<compile_context>
chip_gen: v5e
topology: v5e:2x2
jax: 0.10.0
libtpu: 0.0.40
codegen_flags: <defaults>
</compile_context>

<pallas_src>
import jax
import jax.numpy as jnp
from jax.experimental import pallas as pl
from jax.experimental.pallas import tpu as pltpu

EPS_BN = 1e-5
NEG = -1e30
HEADS = 4

GAT_CFG = [(6, 8), (32, 16), (64, 32), (128, 256)]      # (F_in, out_channels), heads=4
BN_DIMS = [32, 64, 128, 1024, 512, 256]
FC_DIMS = [(1024, 512), (512, 256), (256, 64)]


# ----------------------------------------------------------------------------- specs
def _specs(*arrays):
    """Full-array VMEM block specs for a grid=(1,) call."""
    out = []
    for a in arrays:
        nd = a.ndim
        out.append(pl.BlockSpec(a.shape, lambda i, _nd=nd: (0,) * _nd))
    return out


def _out_spec(shape):
    nd = len(shape)
    return pl.BlockSpec(shape, lambda i, _nd=nd: (0,) * _nd)


# ----------------------------------------------------------------------------- kernel
def _gat_layer(h, w_ref, asrc_ref, adst_ref, scale_ref, shift_ref, mask_bias):
    """Dense GATConv (concat=True) + folded (conv-bias + eval-BN) affine + ReLU.

    h:         [N, Fin]  value
    w_ref:     [H, Fin, C]
    asrc/adst: [H, C]
    scale/shift: [H, C]  (per-channel BN scale, and conv-bias*scale + BN shift)
    mask_bias: [N, N]    additive mask (0 on edges incl. self-loops, -1e30 else)
    """
    heads = w_ref.shape[0]
    outs = []
    for hd in range(heads):                                   # unrolled at trace time
        xh = jnp.dot(h, w_ref[hd], preferred_element_type=jnp.float32)        # [N, C]
        a_s = jnp.sum(xh * asrc_ref[hd:hd + 1, :], axis=-1, keepdims=True)    # [N, 1]
        a_d = jnp.sum(xh * adst_ref[hd:hd + 1, :], axis=-1, keepdims=True)    # [N, 1]
        logits = a_d + jnp.transpose(a_s)                     # [N, N] rows=targets, cols=sources
        logits = jnp.where(logits > 0, logits, 0.2 * logits)  # LeakyReLU(0.2)
        logits = logits + mask_bias                           # additive edge mask
        m = jnp.max(logits, axis=-1, keepdims=True)
        e = jnp.exp(logits - m)                               # masked entries underflow to 0
        attn = e * pl.reciprocal(jnp.sum(e, axis=-1, keepdims=True), approx=True)
        agg = jnp.dot(attn, xh, preferred_element_type=jnp.float32)           # [N, C]
        agg = agg * scale_ref[hd:hd + 1, :] + shift_ref[hd:hd + 1, :]         # folded bias + BN
        outs.append(jnp.maximum(agg, 0.0))                                    # ReLU
    return jnp.concatenate(outs, axis=-1)                     # single lane-dense [N, H*C]


def _fused_kernel(x_ref, maskb_ref, poolb_ref, *refs):
    """Whole GraphNetGAT forward in one kernel (all intermediates stay on-chip)."""
    conv_refs = [refs[5 * i: 5 * (i + 1)] for i in range(4)]
    f1w_ref, f1b_ref, f2w_ref, f2b_ref, f3w_ref, f3b_ref, out_ref = refs[20:]

    mask_bias = maskb_ref[...]                                # [N, N]
    h = x_ref[...]                                            # [N, 8]  (F_IN padded)

    for cr in conv_refs:                                      # 4x GATConv + BN + ReLU
        h = _gat_layer(h, *cr, mask_bias)

    # global_max_pool: per-graph additive -1e30 bias, one sublane max per graph
    num_graphs = poolb_ref.shape[0]
    rows = []
    for b in range(num_graphs):
        rows.append(jnp.max(h + poolb_ref[b], axis=0, keepdims=True))         # [1, 1024]
    pooled = jnp.concatenate(rows, axis=0)                                    # [B, 1024]

    # fc1 / fc2 with folded BN + ReLU (bf16 weights, f32 accumulation on MXU)
    y = jnp.dot(pooled.astype(jnp.bfloat16), f1w_ref[...],
                preferred_element_type=jnp.float32) + f1b_ref[...]
    y = jnp.maximum(y, 0.0)
    y = jnp.dot(y.astype(jnp.bfloat16), f2w_ref[...],
                preferred_element_type=jnp.float32) + f2b_ref[...]
    y = jnp.maximum(y, 0.0)

    # fc3 + L2 normalize (F.normalize(p=2, dim=1))
    y = jnp.dot(y, f3w_ref[...], preferred_element_type=jnp.float32) + f3b_ref[...]
    ssq = jnp.sum(y * y, axis=-1, keepdims=True)
    out_ref[...] = y * jax.lax.rsqrt(jnp.maximum(ssq, 1e-24))


# ----------------------------------------------------------------------------- wrapper
def graphnet_gat_forward(x_pad, mask_bias, pool_bias, kp):
    flat = [x_pad, mask_bias, pool_bias]
    for i in range(1, 5):
        flat += list(kp[f"conv{i}"])
    flat += [kp["fc1w"], kp["fc1b"], kp["fc2w"], kp["fc2b"], kp["fc3w"], kp["fc3b"]]

    num_graphs = pool_bias.shape[0]
    emb = kp["fc3w"].shape[1]
    out_shape = (num_graphs, emb)
    return pl.pallas_call(
        _fused_kernel,
        out_shape=jax.ShapeDtypeStruct(out_shape, jnp.float32),
        grid=(1,),
        in_specs=_specs(*flat),
        out_specs=_out_spec(out_shape),
        compiler_params=pltpu.CompilerParams(dimension_semantics=("arbitrary",)),
    )(*flat)


# ----------------------------------------------------------------------------- params
def init_params(key):
    """Synthetic parameters matching the PyTorch module (eval-mode BN stats)."""
    params = {}

    def nk():
        nonlocal key
        key, sub = jax.random.split(key)
        return sub

    for i, (fin, c) in enumerate(GAT_CFG, start=1):
        params[f"conv{i}"] = dict(
            w=0.2 * jax.random.normal(nk(), (fin, HEADS * c), jnp.float32),    # lin weight
            att_src=0.2 * jax.random.normal(nk(), (HEADS, c), jnp.float32),
            att_dst=0.2 * jax.random.normal(nk(), (HEADS, c), jnp.float32),
            bias=0.1 * jax.random.normal(nk(), (1, HEADS * c), jnp.float32),
        )
    for i, f in enumerate(BN_DIMS, start=1):
        params[f"bn{i}"] = dict(
            gamma=1.0 + 0.1 * jax.random.normal(nk(), (1, f), jnp.float32),
            beta=0.1 * jax.random.normal(nk(), (1, f), jnp.float32),
            mean=0.1 * jax.random.normal(nk(), (1, f), jnp.float32),
            var=0.5 + jax.random.uniform(nk(), (1, f), dtype=jnp.float32),
        )
    for i, (fin, fout) in enumerate(FC_DIMS, start=1):
        params[f"fc{i}"] = dict(
            w=(1.0 / jnp.sqrt(fin)) * jax.random.normal(nk(), (fin, fout), jnp.float32),
            b=0.1 * jax.random.normal(nk(), (1, fout), jnp.float32),
        )
    return params


def fold_params(params):
    """Offline folding: BN -> affine, per-head weight layout, lane padding, bf16 fc weights."""
    kp = {}
    for i, (fin, c) in enumerate(GAT_CFG, start=1):
        cv, bn = params[f"conv{i}"], params[f"bn{i}"]
        s = bn["gamma"] / jnp.sqrt(bn["var"] + EPS_BN)                 # [1, H*C]
        shift = cv["bias"] * s + bn["beta"] - bn["mean"] * s           # conv bias folded into BN shift
        fin_pad = ((fin + 7) // 8) * 8
        w = jnp.pad(cv["w"], ((0, fin_pad - fin), (0, 0)))             # [Fin_pad, H*C]
        w3 = jnp.transpose(w.reshape(fin_pad, HEADS, c), (1, 0, 2))    # [H, Fin_pad, C]
        kp[f"conv{i}"] = (
            w3,
            cv["att_src"],
            cv["att_dst"],
            s.reshape(HEADS, c),
            shift.reshape(HEADS, c),
        )
    for j, bn_idx in ((1, 5), (2, 6)):
        fc, bn = params[f"fc{j}"], params[f"bn{bn_idx}"]
        s = bn["gamma"] / jnp.sqrt(bn["var"] + EPS_BN)
        kp[f"fc{j}w"] = (fc["w"] * s).astype(jnp.bfloat16)             # BN folded into columns
        kp[f"fc{j}b"] = fc["b"] * s + bn["beta"] - bn["mean"] * s
    kp["fc3w"] = params["fc3"]["w"]
    kp["fc3b"] = params["fc3"]["b"]
    return kp


# ----------------------------------------------------------------------------- main
if __name__ == "__main__":
    key = jax.random.PRNGKey(0)
    k_x, k_p = jax.random.split(key)

    NUM_GRAPHS = 2
    NODES_PER_GRAPH = 8
    N = NUM_GRAPHS * NODES_PER_GRAPH          # 16 nodes total
    F_IN = 6
    F_PAD = 8                                 # pad ragged feature dim to sublane grain

    # node features (padded with zero columns; conv1 weight rows padded to match)
    x = jax.random.normal(k_x, (N, F_IN), jnp.float32)
    x_pad = jnp.pad(x, ((0, 0), (0, F_PAD - F_IN)))

    # deterministic edge_index [2, E]: directed ring (both ways) + two chords per graph
    edges = []
    for g in range(NUM_GRAPHS):
        base = g * NODES_PER_GRAPH
        for k in range(NODES_PER_GRAPH):
            a, b = base + k, base + (k + 1) % NODES_PER_GRAPH
            edges.append((a, b))
            edges.append((b, a))
        edges.append((base + 0, base + 4))
        edges.append((base + 2, base + 6))
    edge_index = jnp.array(edges, dtype=jnp.int32).T          # [2, 36]

    # batch assignment vector [N]
    batch = jnp.array([g for g in range(NUM_GRAPHS) for _ in range(NODES_PER_GRAPH)],
                      dtype=jnp.int32)

    # dense adjacency adj[target, source] = 1, plus self loops (GATConv add_self_loops),
    # converted to an additive attention-mask bias.
    src, dst = edge_index[0], edge_index[1]
    adj = jnp.zeros((N, N), jnp.float32).at[dst, src].set(1.0)
    adj = adj.at[jnp.arange(N), jnp.arange(N)].set(1.0)
    mask_bias = jnp.where(adj > 0.5, 0.0, NEG).astype(jnp.float32)       # [N, N]

    # global_max_pool additive bias, pre-shaped [B, N, 1]
    pool_bias = jnp.where(batch[None, :] == jnp.arange(NUM_GRAPHS)[:, None], 0.0, NEG)
    pool_bias = pool_bias[..., None].astype(jnp.float32)                 # [B, N, 1]

    params = init_params(k_p)
    kp = fold_params(params)     # offline: BN folding + layout prep (not in the kernel)

    fwd = jax.jit(graphnet_gat_forward)
    out = jax.block_until_ready(fwd(x_pad, mask_bias, pool_bias, kp))

    assert out.shape == (NUM_GRAPHS, 64), out.shape
    assert bool(jnp.all(jnp.isfinite(out)))
    # rows of the output are unit L2-normalized embeddings
    norms = jnp.linalg.norm(out, axis=1)
    assert bool(jnp.all(jnp.abs(norms - 1.0) < 1e-3)), norms
    print("KERNEL_OK")
</pallas_src>

<mosaic_0001>
module attributes {stable_mosaic.version = 11 : i64} {
  func.func @_fused_kernel(%arg0: i32, %arg1: memref<16x8xf32, #tpu.memory_space<vmem>>, %arg2: memref<16x16xf32, #tpu.memory_space<vmem>>, %arg3: memref<2x16x1xf32, #tpu.memory_space<vmem>>, %arg4: memref<4x8x8xf32, #tpu.memory_space<vmem>>, %arg5: memref<4x8xf32, #tpu.memory_space<vmem>>, %arg6: memref<4x8xf32, #tpu.memory_space<vmem>>, %arg7: memref<4x8xf32, #tpu.memory_space<vmem>>, %arg8: memref<4x8xf32, #tpu.memory_space<vmem>>, %arg9: memref<4x32x16xf32, #tpu.memory_space<vmem>>, %arg10: memref<4x16xf32, #tpu.memory_space<vmem>>, %arg11: memref<4x16xf32, #tpu.memory_space<vmem>>, %arg12: memref<4x16xf32, #tpu.memory_space<vmem>>, %arg13: memref<4x16xf32, #tpu.memory_space<vmem>>, %arg14: memref<4x64x32xf32, #tpu.memory_space<vmem>>, %arg15: memref<4x32xf32, #tpu.memory_space<vmem>>, %arg16: memref<4x32xf32, #tpu.memory_space<vmem>>, %arg17: memref<4x32xf32, #tpu.memory_space<vmem>>, %arg18: memref<4x32xf32, #tpu.memory_space<vmem>>, %arg19: memref<4x128x256xf32, #tpu.memory_space<vmem>>, %arg20: memref<4x256xf32, #tpu.memory_space<vmem>>, %arg21: memref<4x256xf32, #tpu.memory_space<vmem>>, %arg22: memref<4x256xf32, #tpu.memory_space<vmem>>, %arg23: memref<4x256xf32, #tpu.memory_space<vmem>>, %arg24: memref<1024x512xbf16, #tpu.memory_space<vmem>>, %arg25: memref<1x512xf32, #tpu.memory_space<vmem>>, %arg26: memref<512x256xbf16, #tpu.memory_space<vmem>>, %arg27: memref<1x256xf32, #tpu.memory_space<vmem>>, %arg28: memref<256x64xf32, #tpu.memory_space<vmem>>, %arg29: memref<1x64xf32, #tpu.memory_space<vmem>>, %arg30: memref<2x64xf32, #tpu.memory_space<vmem>>) attributes {dimension_semantics = [#tpu.dimension_semantics<arbitrary>], iteration_bounds = array<i64: 1>, scalar_prefetch = 0 : i64, scratch_operands = 0 : i64, tpu.core_type = #tpu.core_type<tc>, window_params = [{pipeline_mode = #tpu.pipeline_mode<synchronous>, transform_indices = @transform_0, window_bounds = array<i64: 16, 8>}, {pipeline_mode = #tpu.pipeline_mode<synchronous>, transform_indices = @transform_1, window_bounds = array<i64: 16, 16>}, {pipeline_mode = #tpu.pipeline_mode<synchronous>, transform_indices = @transform_2, window_bounds = array<i64: 2, 16, 1>}, {pipeline_mode = #tpu.pipeline_mode<synchronous>, transform_indices = @transform_3, window_bounds = array<i64: 4, 8, 8>}, {pipeline_mode = #tpu.pipeline_mode<synchronous>, transform_indices = @transform_4, window_bounds = array<i64: 4, 8>}, {pipeline_mode = #tpu.pipeline_mode<synchronous>, transform_indices = @transform_5, window_bounds = array<i64: 4, 8>}, {pipeline_mode = #tpu.pipeline_mode<synchronous>, transform_indices = @transform_6, window_bounds = array<i64: 4, 8>}, {pipeline_mode = #tpu.pipeline_mode<synchronous>, transform_indices = @transform_7, window_bounds = array<i64: 4, 8>}, {pipeline_mode = #tpu.pipeline_mode<synchronous>, transform_indices = @transform_8, window_bounds = array<i64: 4, 32, 16>}, {pipeline_mode = #tpu.pipeline_mode<synchronous>, transform_indices = @transform_9, window_bounds = array<i64: 4, 16>}, {pipeline_mode = #tpu.pipeline_mode<synchronous>, transform_indices = @transform_10, window_bounds = array<i64: 4, 16>}, {pipeline_mode = #tpu.pipeline_mode<synchronous>, transform_indices = @transform_11, window_bounds = array<i64: 4, 16>}, {pipeline_mode = #tpu.pipeline_mode<synchronous>, transform_indices = @transform_12, window_bounds = array<i64: 4, 16>}, {pipeline_mode = #tpu.pipeline_mode<synchronous>, transform_indices = @transform_13, window_bounds = array<i64: 4, 64, 32>}, {pipeline_mode = #tpu.pipeline_mode<synchronous>, transform_indices = @transform_14, window_bounds = array<i64: 4, 32>}, {pipeline_mode = #tpu.pipeline_mode<synchronous>, transform_indices = @transform_15, window_bounds = array<i64: 4, 32>}, {pipeline_mode = #tpu.pipeline_mode<synchronous>, transform_indices = @transform_16, window_bounds = array<i64: 4, 32>}, {pipeline_mode = #tpu.pipeline_mode<synchronous>, transform_indices = @transform_17, window_bounds = array<i64: 4, 32>}, {pipeline_mode = #tpu.pipeline_mode<synchronous>, transform_indices = @transform_18, window_bounds = array<i64: 4, 128, 256>}, {pipeline_mode = #tpu.pipeline_mode<synchronous>, transform_indices = @transform_19, window_bounds = array<i64: 4, 256>}, {pipeline_mode = #tpu.pipeline_mode<synchronous>, transform_indices = @transform_20, window_bounds = array<i64: 4, 256>}, {pipeline_mode = #tpu.pipeline_mode<synchronous>, transform_indices = @transform_21, window_bounds = array<i64: 4, 256>}, {pipeline_mode = #tpu.pipeline_mode<synchronous>, transform_indices = @transform_22, window_bounds = array<i64: 4, 256>}, {pipeline_mode = #tpu.pipeline_mode<synchronous>, transform_indices = @transform_23, window_bounds = array<i64: 1024, 512>}, {pipeline_mode = #tpu.pipeline_mode<synchronous>, transform_indices = @transform_24, window_bounds = array<i64: 1, 512>}, {pipeline_mode = #tpu.pipeline_mode<synchronous>, transform_indices = @transform_25, window_bounds = array<i64: 512, 256>}, {pipeline_mode = #tpu.pipeline_mode<synchronous>, transform_indices = @transform_26, window_bounds = array<i64: 1, 256>}, {pipeline_mode = #tpu.pipeline_mode<synchronous>, transform_indices = @transform_27, window_bounds = array<i64: 256, 64>}, {pipeline_mode = #tpu.pipeline_mode<synchronous>, transform_indices = @transform_28, window_bounds = array<i64: 1, 64>}, {pipeline_mode = #tpu.pipeline_mode<synchronous>, transform_indices = @transform_29, window_bounds = array<i64: 2, 64>}]} {
    %c0 = arith.constant 0 : index
    %c0_0 = arith.constant 0 : index
    %0 = vector.load %arg2[%c0, %c0_0] : memref<16x16xf32, #tpu.memory_space<vmem>>, vector<16x16xf32>
    %c0_1 = arith.constant 0 : index
    %c0_2 = arith.constant 0 : index
    %1 = vector.load %arg1[%c0_1, %c0_2] : memref<16x8xf32, #tpu.memory_space<vmem>>, vector<16x8xf32>
    %c0_3 = arith.constant 0 : index
    %c0_4 = arith.constant 0 : index
    %c0_5 = arith.constant 0 : index
    %2 = vector.load %arg4[%c0_3, %c0_4, %c0_5] : memref<4x8x8xf32, #tpu.memory_space<vmem>>, vector<1x8x8xf32>
    %3 = vector.shape_cast %2 : vector<1x8x8xf32> to vector<8x8xf32>
    %cst = arith.constant dense<0.000000e+00> : vector<16x8xf32>
    %4 = tpu.matmul %1, %3, %cst {dimension_numbers = #tpu.dot_dimension_numbers<[1], [0], [0], [1], [0, 0, 1, 1], [], []>} : vector<16x8xf32>, vector<8x8xf32>, vector<16x8xf32> -> vector<16x8xf32>
    %c0_6 = arith.constant 0 : index
    %c0_7 = arith.constant 0 : index
    %5 = vector.load %arg5[%c0_6, %c0_7] : memref<4x8xf32, #tpu.memory_space<vmem>>, vector<1x8xf32>
    %6 = vector.broadcast %5 : vector<1x8xf32> to vector<16x8xf32>
    %7 = arith.mulf %4, %6 : vector<16x8xf32>
    %cst_8 = arith.constant dense<0.000000e+00> : vector<16xf32>
    %8 = vector.multi_reduction <add>, %7, %cst_8 [1] : vector<16x8xf32> to vector<16xf32>
    %9 = vector.shape_cast %8 : vector<16xf32> to vector<16x1xf32>
    %c0_9 = arith.constant 0 : index
    %c0_10 = arith.constant 0 : index
    %10 = vector.load %arg6[%c0_9, %c0_10] : memref<4x8xf32, #tpu.memory_space<vmem>>, vector<1x8xf32>
    %11 = vector.broadcast %10 : vector<1x8xf32> to vector<16x8xf32>
    %12 = arith.mulf %4, %11 : vector<16x8xf32>
    %cst_11 = arith.constant dense<0.000000e+00> : vector<16xf32>
    %13 = vector.multi_reduction <add>, %12, %cst_11 [1] : vector<16x8xf32> to vector<16xf32>
    %14 = vector.shape_cast %13 : vector<16xf32> to vector<16x1xf32>
    %15 = tpu.transpose %9, [1, 0] : vector<16x1xf32> -> vector<1x16xf32>
    %16 = vector.broadcast %14 : vector<16x1xf32> to vector<16x16xf32>
    %17 = vector.broadcast %15 : vector<1x16xf32> to vector<16x16xf32>
    %18 = arith.addf %16, %17 : vector<16x16xf32>
    %cst_12 = arith.constant 0.000000e+00 : f32
    %19 = vector.broadcast %cst_12 : f32 to vector<16x16xf32>
    %20 = arith.cmpf ogt, %18, %19 : vector<16x16xf32>
    %cst_13 = arith.constant 2.000000e-01 : f32
    %21 = vector.broadcast %cst_13 : f32 to vector<16x16xf32>
    %22 = arith.mulf %21, %18 : vector<16x16xf32>
    %23 = arith.select %20, %18, %22 : vector<16x16xi1>, vector<16x16xf32>
    %24 = arith.addf %23, %0 : vector<16x16xf32>
    %cst_14 = arith.constant dense<0xFF800000> : vector<16xf32>
    %25 = vector.multi_reduction <maximumf>, %24, %cst_14 [1] : vector<16x16xf32> to vector<16xf32>
    %26 = vector.shape_cast %25 : vector<16xf32> to vector<16x1xf32>
    %27 = vector.broadcast %26 : vector<16x1xf32> to vector<16x16xf32>
    %28 = arith.subf %24, %27 : vector<16x16xf32>
    %29 = math.exp %28 : vector<16x16xf32>
    %cst_15 = arith.constant dense<0.000000e+00> : vector<16xf32>
    %30 = vector.multi_reduction <add>, %29, %cst_15 [1] : vector<16x16xf32> to vector<16xf32>
    %31 = vector.shape_cast %30 : vector<16xf32> to vector<16x1xf32>
    %32 = tpu.reciprocal %31 {approx = true} : vector<16x1xf32> -> vector<16x1xf32>
    %33 = vector.broadcast %32 : vector<16x1xf32> to vector<16x16xf32>
    %34 = arith.mulf %29, %33 : vector<16x16xf32>
    %cst_16 = arith.constant dense<0.000000e+00> : vector<16x8xf32>
    %35 = tpu.matmul %34, %4, %cst_16 {dimension_numbers = #tpu.dot_dimension_numbers<[1], [0], [0], [1], [0, 0, 1, 1], [], []>} : vector<16x16xf32>, vector<16x8xf32>, vector<16x8xf32> -> vector<16x8xf32>
    %c0_17 = arith.constant 0 : index
    %c0_18 = arith.constant 0 : index
    %36 = vector.load %arg7[%c0_17, %c0_18] : memref<4x8xf32, #tpu.memory_space<vmem>>, vector<1x8xf32>
    %37 = vector.broadcast %36 : vector<1x8xf32> to vector<16x8xf32>
    %38 = arith.mulf %35, %37 : vector<16x8xf32>
    %c0_19 = arith.constant 0 : index
    %c0_20 = arith.constant 0 : index
    %39 = vector.load %arg8[%c0_19, %c0_20] : memref<4x8xf32, #tpu.memory_space<vmem>>, vector<1x8xf32>
    %40 = vector.broadcast %39 : vector<1x8xf32> to vector<16x8xf32>
    %41 = arith.addf %38, %40 : vector<16x8xf32>
    %cst_21 = arith.constant 0.000000e+00 : f32
    %42 = vector.broadcast %cst_21 : f32 to vector<16x8xf32>
    %43 = arith.maximumf %41, %42 : vector<16x8xf32>
    %c1 = arith.constant 1 : index
    %c0_22 = arith.constant 0 : index
    %c0_23 = arith.constant 0 : index
    %44 = vector.load %arg4[%c1, %c0_22, %c0_23] : memref<4x8x8xf32, #tpu.memory_space<vmem>>, vector<1x8x8xf32>
    %45 = vector.shape_cast %44 : vector<1x8x8xf32> to vector<8x8xf32>
    %cst_24 = arith.constant dense<0.000000e+00> : vector<16x8xf32>
    %46 = tpu.matmul %1, %45, %cst_24 {dimension_numbers = #tpu.dot_dimension_numbers<[1], [0], [0], [1], [0, 0, 1, 1], [], []>} : vector<16x8xf32>, vector<8x8xf32>, vector<16x8xf32> -> vector<16x8xf32>
    %c1_25 = arith.constant 1 : index
    %c0_26 = arith.constant 0 : index
    %47 = vector.load %arg5[%c1_25, %c0_26] : memref<4x8xf32, #tpu.memory_space<vmem>>, vector<1x8xf32>
    %48 = vector.broadcast %47 : vector<1x8xf32> to vector<16x8xf32>
    %49 = arith.mulf %46, %48 : vector<16x8xf32>
    %cst_27 = arith.constant dense<0.000000e+00> : vector<16xf32>
    %50 = vector.multi_reduction <add>, %49, %cst_27 [1] : vector<16x8xf32> to vector<16xf32>
    %51 = vector.shape_cast %50 : vector<16xf32> to vector<16x1xf32>
    %c1_28 = arith.constant 1 : index
    %c0_29 = arith.constant 0 : index
    %52 = vector.load %arg6[%c1_28, %c0_29] : memref<4x8xf32, #tpu.memory_space<vmem>>, vector<1x8xf32>
    %53 = vector.broadcast %52 : vector<1x8xf32> to vector<16x8xf32>
    %54 = arith.mulf %46, %53 : vector<16x8xf32>
    %cst_30 = arith.constant dense<0.000000e+00> : vector<16xf32>
    %55 = vector.multi_reduction <add>, %54, %cst_30 [1] : vector<16x8xf32> to vector<16xf32>
    %56 = vector.shape_cast %55 : vector<16xf32> to vector<16x1xf32>
    %57 = tpu.transpose %51, [1, 0] : vector<16x1xf32> -> vector<1x16xf32>
    %58 = vector.broadcast %56 : vector<16x1xf32> to vector<16x16xf32>
    %59 = vector.broadcast %57 : vector<1x16xf32> to vector<16x16xf32>
    %60 = arith.addf %58, %59 : vector<16x16xf32>
    %cst_31 = arith.constant 0.000000e+00 : f32
    %61 = vector.broadcast %cst_31 : f32 to vector<16x16xf32>
    %62 = arith.cmpf ogt, %60, %61 : vector<16x16xf32>
    %cst_32 = arith.constant 2.000000e-01 : f32
    %63 = vector.broadcast %cst_32 : f32 to vector<16x16xf32>
    %64 = arith.mulf %63, %60 : vector<16x16xf32>
    %65 = arith.select %62, %60, %64 : vector<16x16xi1>, vector<16x16xf32>
    %66 = arith.addf %65, %0 : vector<16x16xf32>
    %cst_33 = arith.constant dense<0xFF800000> : vector<16xf32>
    %67 = vector.multi_reduction <maximumf>, %66, %cst_33 [1] : vector<16x16xf32> to vector<16xf32>
    %68 = vector.shape_cast %67 : vector<16xf32> to vector<16x1xf32>
    %69 = vector.broadcast %68 : vector<16x1xf32> to vector<16x16xf32>
    %70 = arith.subf %66, %69 : vector<16x16xf32>
    %71 = math.exp %70 : vector<16x16xf32>
    %cst_34 = arith.constant dense<0.000000e+00> : vector<16xf32>
    %72 = vector.multi_reduction <add>, %71, %cst_34 [1] : vector<16x16xf32> to vector<16xf32>
    %73 = vector.shape_cast %72 : vector<16xf32> to vector<16x1xf32>
    %74 = tpu.reciprocal %73 {approx = true} : vector<16x1xf32> -> vector<16x1xf32>
    %75 = vector.broadcast %74 : vector<16x1xf32> to vector<16x16xf32>
    %76 = arith.mulf %71, %75 : vector<16x16xf32>
    %cst_35 = arith.constant dense<0.000000e+00> : vector<16x8xf32>
    %77 = tpu.matmul %76, %46, %cst_35 {dimension_numbers = #tpu.dot_dimension_numbers<[1], [0], [0], [1], [0, 0, 1, 1], [], []>} : vector<16x16xf32>, vector<16x8xf32>, vector<16x8xf32> -> vector<16x8xf32>
    %c1_36 = arith.constant 1 : index
    %c0_37 = arith.constant 0 : index
    %78 = vector.load %arg7[%c1_36, %c0_37] : memref<4x8xf32, #tpu.memory_space<vmem>>, vector<1x8xf32>
    %79 = vector.broadcast %78 : vector<1x8xf32> to vector<16x8xf32>
    %80 = arith.mulf %77, %79 : vector<16x8xf32>
    %c1_38 = arith.constant 1 : index
    %c0_39 = arith.constant 0 : index
    %81 = vector.load %arg8[%c1_38, %c0_39] : memref<4x8xf32, #tpu.memory_space<vmem>>, vector<1x8xf32>
    %82 = vector.broadcast %81 : vector<1x8xf32> to vector<16x8xf32>
    %83 = arith.addf %80, %82 : vector<16x8xf32>
    %cst_40 = arith.constant 0.000000e+00 : f32
    %84 = vector.broadcast %cst_40 : f32 to vector<16x8xf32>
    %85 = arith.maximumf %83, %84 : vector<16x8xf32>
    %c2 = arith.constant 2 : index
    %c0_41 = arith.constant 0 : index
    %c0_42 = arith.constant 0 : index
    %86 = vector.load %arg4[%c2, %c0_41, %c0_42] : memref<4x8x8xf32, #tpu.memory_space<vmem>>, vector<1x8x8xf32>
    %87 = vector.shape_cast %86 : vector<1x8x8xf32> to vector<8x8xf32>
    %cst_43 = arith.constant dense<0.000000e+00> : vector<16x8xf32>
    %88 = tpu.matmul %1, %87, %cst_43 {dimension_numbers = #tpu.dot_dimension_numbers<[1], [0], [0], [1], [0, 0, 1, 1], [], []>} : vector<16x8xf32>, vector<8x8xf32>, vector<16x8xf32> -> vector<16x8xf32>
    %c2_44 = arith.constant 2 : index
    %c0_45 = arith.constant 0 : index
    %89 = vector.load %arg5[%c2_44, %c0_45] : memref<4x8xf32, #tpu.memory_space<vmem>>, vector<1x8xf32>
    %90 = vector.broadcast %89 : vector<1x8xf32> to vector<16x8xf32>
    %91 = arith.mulf %88, %90 : vector<16x8xf32>
    %cst_46 = arith.constant dense<0.000000e+00> : vector<16xf32>
    %92 = vector.multi_reduction <add>, %91, %cst_46 [1] : vector<16x8xf32> to vector<16xf32>
    %93 = vector.shape_cast %92 : vector<16xf32> to vector<16x1xf32>
    %c2_47 = arith.constant 2 : index
    %c0_48 = arith.constant 0 : index
    %94 = vector.load %arg6[%c2_47, %c0_48] : memref<4x8xf32, #tpu.memory_space<vmem>>, vector<1x8xf32>
    %95 = vector.broadcast %94 : vector<1x8xf32> to vector<16x8xf32>
    %96 = arith.mulf %88, %95 : vector<16x8xf32>
    %cst_49 = arith.constant dense<0.000000e+00> : vector<16xf32>
    %97 = vector.multi_reduction <add>, %96, %cst_49 [1] : vector<16x8xf32> to vector<16xf32>
    %98 = vector.shape_cast %97 : vector<16xf32> to vector<16x1xf32>
    %99 = tpu.transpose %93, [1, 0] : vector<16x1xf32> -> vector<1x16xf32>
    %100 = vector.broadcast %98 : vector<16x1xf32> to vector<16x16xf32>
    %101 = vector.broadcast %99 : vector<1x16xf32> to vector<16x16xf32>
    %102 = arith.addf %100, %101 : vector<16x16xf32>
    %cst_50 = arith.constant 0.000000e+00 : f32
    %103 = vector.broadcast %cst_50 : f32 to vector<16x16xf32>
    %104 = arith.cmpf ogt, %102, %103 : vector<16x16xf32>
    %cst_51 = arith.constant 2.000000e-01 : f32
    %105 = vector.broadcast %cst_51 : f32 to vector<16x16xf32>
    %106 = arith.mulf %105, %102 : vector<16x16xf32>
    %107 = arith.select %104, %102, %106 : vector<16x16xi1>, vector<16x16xf32>
    %108 = arith.addf %107, %0 : vector<16x16xf32>
    %cst_52 = arith.constant dense<0xFF800000> : vector<16xf32>
    %109 = vector.multi_reduction <maximumf>, %108, %cst_52 [1] : vector<16x16xf32> to vector<16xf32>
    %110 = vector.shape_cast %109 : vector<16xf32> to vector<16x1xf32>
    %111 = vector.broadcast %110 : vector<16x1xf32> to vector<16x16xf32>
    %112 = arith.subf %108, %111 : vector<16x16xf32>
    %113 = math.exp %112 : vector<16x16xf32>
    %cst_53 = arith.constant dense<0.000000e+00> : vector<16xf32>
    %114 = vector.multi_reduction <add>, %113, %cst_53 [1] : vector<16x16xf32> to vector<16xf32>
    %115 = vector.shape_cast %114 : vector<16xf32> to vector<16x1xf32>
    %116 = tpu.reciprocal %115 {approx = true} : vector<16x1xf32> -> vector<16x1xf32>
    %117 = vector.broadcast %116 : vector<16x1xf32> to vector<16x16xf32>
    %118 = arith.mulf %113, %117 : vector<16x16xf32>
    %cst_54 = arith.constant dense<0.000000e+00> : vector<16x8xf32>
    %119 = tpu.matmul %118, %88, %cst_54 {dimension_numbers = #tpu.dot_dimension_numbers<[1], [0], [0], [1], [0, 0, 1, 1], [], []>} : vector<16x16xf32>, vector<16x8xf32>, vector<16x8xf32> -> vector<16x8xf32>
    %c2_55 = arith.constant 2 : index
    %c0_56 = arith.constant 0 : index
    %120 = vector.load %arg7[%c2_55, %c0_56] : memref<4x8xf32, #tpu.memory_space<vmem>>, vector<1x8xf32>
    %121 = vector.broadcast %120 : vector<1x8xf32> to vector<16x8xf32>
    %122 = arith.mulf %119, %121 : vector<16x8xf32>
    %c2_57 = arith.constant 2 : index
    %c0_58 = arith.constant 0 : index
    %123 = vector.load %arg8[%c2_57, %c0_58] : memref<4x8xf32, #tpu.memory_space<vmem>>, vector<1x8xf32>
    %124 = vector.broadcast %123 : vector<1x8xf32> to vector<16x8xf32>
    %125 = arith.addf %122, %124 : vector<16x8xf32>
    %cst_59 = arith.constant 0.000000e+00 : f32
    %126 = vector.broadcast %cst_59 : f32 to vector<16x8xf32>
    %127 = arith.maximumf %125, %126 : vector<16x8xf32>
    %c3 = arith.constant 3 : index
    %c0_60 = arith.constant 0 : index
    %c0_61 = arith.constant 0 : index
    %128 = vector.load %arg4[%c3, %c0_60, %c0_61] : memref<4x8x8xf32, #tpu.memory_space<vmem>>, vector<1x8x8xf32>
    %129 = vector.shape_cast %128 : vector<1x8x8xf32> to vector<8x8xf32>
    %cst_62 = arith.constant dense<0.000000e+00> : vector<16x8xf32>
    %130 = tpu.matmul %1, %129, %cst_62 {dimension_numbers = #tpu.dot_dimension_numbers<[1], [0], [0], [1], [0, 0, 1, 1], [], []>} : vector<16x8xf32>, vector<8x8xf32>, vector<16x8xf32> -> vector<16x8xf32>
    %c3_63 = arith.constant 3 : index
    %c0_64 = arith.constant 0 : index
    %131 = vector.load %arg5[%c3_63, %c0_64] : memref<4x8xf32, #tpu.memory_space<vmem>>, vector<1x8xf32>
    %132 = vector.broadcast %131 : vector<1x8xf32> to vector<16x8xf32>
    %133 = arith.mulf %130, %132 : vector<16x8xf32>
    %cst_65 = arith.constant dense<0.000000e+00> : vector<16xf32>
    %134 = vector.multi_reduction <add>, %133, %cst_65 [1] : vector<16x8xf32> to vector<16xf32>
    %135 = vector.shape_cast %134 : vector<16xf32> to vector<16x1xf32>
    %c3_66 = arith.constant 3 : index
    %c0_67 = arith.constant 0 : index
    %136 = vector.load %arg6[%c3_66, %c0_67] : memref<4x8xf32, #tpu.memory_space<vmem>>, vector<1x8xf32>
    %137 = vector.broadcast %136 : vector<1x8xf32> to vector<16x8xf32>
    %138 = arith.mulf %130, %137 : vector<16x8xf32>
    %cst_68 = arith.constant dense<0.000000e+00> : vector<16xf32>
    %139 = vector.multi_reduction <add>, %138, %cst_68 [1] : vector<16x8xf32> to vector<16xf32>
    %140 = vector.shape_cast %139 : vector<16xf32> to vector<16x1xf32>
    %141 = tpu.transpose %135, [1, 0] : vector<16x1xf32> -> vector<1x16xf32>
    %142 = vector.broadcast %140 : vector<16x1xf32> to vector<16x16xf32>
    %143 = vector.broadcast %141 : vector<1x16xf32> to vector<16x16xf32>
    %144 = arith.addf %142, %143 : vector<16x16xf32>
    %cst_69 = arith.constant 0.000000e+00 : f32
    %145 = vector.broadcast %cst_69 : f32 to vector<16x16xf32>
    %146 = arith.cmpf ogt, %144, %145 : vector<16x16xf32>
    %cst_70 = arith.constant 2.000000e-01 : f32
    %147 = vector.broadcast %cst_70 : f32 to vector<16x16xf32>
    %148 = arith.mulf %147, %144 : vector<16x16xf32>
    %149 = arith.select %146, %144, %148 : vector<16x16xi1>, vector<16x16xf32>
    %150 = arith.addf %149, %0 : vector<16x16xf32>
    %cst_71 = arith.constant dense<0xFF800000> : vector<16xf32>
    %151 = vector.multi_reduction <maximumf>, %150, %cst_71 [1] : vector<16x16xf32> to vector<16xf32>
    %152 = vector.shape_cast %151 : vector<16xf32> to vector<16x1xf32>
    %153 = vector.broadcast %152 : vector<16x1xf32> to vector<16x16xf32>
    %154 = arith.subf %150, %153 : vector<16x16xf32>
    %155 = math.exp %154 : vector<16x16xf32>
    %cst_72 = arith.constant dense<0.000000e+00> : vector<16xf32>
    %156 = vector.multi_reduction <add>, %155, %cst_72 [1] : vector<16x16xf32> to vector<16xf32>
    %157 = vector.shape_cast %156 : vector<16xf32> to vector<16x1xf32>
    %158 = tpu.reciprocal %157 {approx = true} : vector<16x1xf32> -> vector<16x1xf32>
    %159 = vector.broadcast %158 : vector<16x1xf32> to vector<16x16xf32>
    %160 = arith.mulf %155, %159 : vector<16x16xf32>
    %cst_73 = arith.constant dense<0.000000e+00> : vector<16x8xf32>
    %161 = tpu.matmul %160, %130, %cst_73 {dimension_numbers = #tpu.dot_dimension_numbers<[1], [0], [0], [1], [0, 0, 1, 1], [], []>} : vector<16x16xf32>, vector<16x8xf32>, vector<16x8xf32> -> vector<16x8xf32>
    %c3_74 = arith.constant 3 : index
    %c0_75 = arith.constant 0 : index
    %162 = vector.load %arg7[%c3_74, %c0_75] : memref<4x8xf32, #tpu.memory_space<vmem>>, vector<1x8xf32>
    %163 = vector.broadcast %162 : vector<1x8xf32> to vector<16x8xf32>
    %164 = arith.mulf %161, %163 : vector<16x8xf32>
    %c3_76 = arith.constant 3 : index
    %c0_77 = arith.constant 0 : index
    %165 = vector.load %arg8[%c3_76, %c0_77] : memref<4x8xf32, #tpu.memory_space<vmem>>, vector<1x8xf32>
    %166 = vector.broadcast %165 : vector<1x8xf32> to vector<16x8xf32>
    %167 = arith.addf %164, %166 : vector<16x8xf32>
    %cst_78 = arith.constant 0.000000e+00 : f32
    %168 = vector.broadcast %cst_78 : f32 to vector<16x8xf32>
    %169 = arith.maximumf %167, %168 : vector<16x8xf32>
    %170 = tpu.concatenate %43, %85, %127, %169 in 1 : vector<16x8xf32>, vector<16x8xf32>, vector<16x8xf32>, vector<16x8xf32> -> vector<16x32xf32>
    %c0_79 = arith.constant 0 : index
    %c0_80 = arith.constant 0 : index
    %c0_81 = arith.constant 0 : index
    %171 = vector.load %arg9[%c0_79, %c0_80, %c0_81] : memref<4x32x16xf32, #tpu.memory_space<vmem>>, vector<1x32x16xf32>
    %172 = vector.shape_cast %171 : vector<1x32x16xf32> to vector<32x16xf32>
    %cst_82 = arith.constant dense<0.000000e+00> : vector<16x16xf32>
    %173 = tpu.matmul %170, %172, %cst_82 {dimension_numbers = #tpu.dot_dimension_numbers<[1], [0], [0], [1], [0, 0, 1, 1], [], []>} : vector<16x32xf32>, vector<32x16xf32>, vector<16x16xf32> -> vector<16x16xf32>
    %c0_83 = arith.constant 0 : index
    %c0_84 = arith.constant 0 : index
    %174 = vector.load %arg10[%c0_83, %c0_84] : memref<4x16xf32, #tpu.memory_space<vmem>>, vector<1x16xf32>
    %175 = vector.broadcast %174 : vector<1x16xf32> to vector<16x16xf32>
    %176 = arith.mulf %173, %175 : vector<16x16xf32>
    %cst_85 = arith.constant dense<0.000000e+00> : vector<16xf32>
    %177 = vector.multi_reduction <add>, %176, %cst_85 [1] : vector<16x16xf32> to vector<16xf32>
    %178 = vector.shape_cast %177 : vector<16xf32> to vector<16x1xf32>
    %c0_86 = arith.constant 0 : index
    %c0_87 = arith.constant 0 : index
    %179 = vector.load %arg11[%c0_86, %c0_87] : memref<4x16xf32, #tpu.memory_space<vmem>>, vector<1x16xf32>
    %180 = vector.broadcast %179 : vector<1x16xf32> to vector<16x16xf32>
    %181 = arith.mulf %173, %180 : vector<16x16xf32>
    %cst_88 = arith.constant dense<0.000000e+00> : vector<16xf32>
    %182 = vector.multi_reduction <add>, %181, %cst_88 [1] : vector<16x16xf32> to vector<16xf32>
    %183 = vector.shape_cast %182 : vector<16xf32> to vector<16x1xf32>
    %184 = tpu.transpose %178, [1, 0] : vector<16x1xf32> -> vector<1x16xf32>
    %185 = vector.broadcast %183 : vector<16x1xf32> to vector<16x16xf32>
    %186 = vector.broadcast %184 : vector<1x16xf32> to vector<16x16xf32>
    %187 = arith.addf %185, %186 : vector<16x16xf32>
    %cst_89 = arith.constant 0.000000e+00 : f32
    %188 = vector.broadcast %cst_89 : f32 to vector<16x16xf32>
    %189 = arith.cmpf ogt, %187, %188 : vector<16x16xf32>
    %cst_90 = arith.constant 2.000000e-01 : f32
    %190 = vector.broadcast %cst_90 : f32 to vector<16x16xf32>
    %191 = arith.mulf %190, %187 : vector<16x16xf32>
    %192 = arith.select %189, %187, %191 : vector<16x16xi1>, vector<16x16xf32>
    %193 = arith.addf %192, %0 : vector<16x16xf32>
    %cst_91 = arith.constant dense<0xFF800000> : vector<16xf32>
    %194 = vector.multi_reduction <maximumf>, %193, %cst_91 [1] : vector<16x16xf32> to vector<16xf32>
    %195 = vector.shape_cast %194 : vector<16xf32> to vector<16x1xf32>
    %196 = vector.broadcast %195 : vector<16x1xf32> to vector<16x16xf32>
    %197 = arith.subf %193, %196 : vector<16x16xf32>
    %198 = math.exp %197 : vector<16x16xf32>
    %cst_92 = arith.constant dense<0.000000e+00> : vector<16xf32>
    %199 = vector.multi_reduction <add>, %198, %cst_92 [1] : vector<16x16xf32> to vector<16xf32>
    %200 = vector.shape_cast %199 : vector<16xf32> to vector<16x1xf32>
    %201 = tpu.reciprocal %200 {approx = true} : vector<16x1xf32> -> vector<16x1xf32>
    %202 = vector.broadcast %201 : vector<16x1xf32> to vector<16x16xf32>
    %203 = arith.mulf %198, %202 : vector<16x16xf32>
    %cst_93 = arith.constant dense<0.000000e+00> : vector<16x16xf32>
    %204 = tpu.matmul %203, %173, %cst_93 {dimension_numbers = #tpu.dot_dimension_numbers<[1], [0], [0], [1], [0, 0, 1, 1], [], []>} : vector<16x16xf32>, vector<16x16xf32>, vector<16x16xf32> -> vector<16x16xf32>
    %c0_94 = arith.constant 0 : index
    %c0_95 = arith.constant 0 : index
    %205 = vector.load %arg12[%c0_94, %c0_95] : memref<4x16xf32, #tpu.memory_space<vmem>>, vector<1x16xf32>
    %206 = vector.broadcast %205 : vector<1x16xf32> to vector<16x16xf32>
    %207 = arith.mulf %204, %206 : vector<16x16xf32>
    %c0_96 = arith.constant 0 : index
    %c0_97 = arith.constant 0 : index
    %208 = vector.load %arg13[%c0_96, %c0_97] : memref<4x16xf32, #tpu.memory_space<vmem>>, vector<1x16xf32>
    %209 = vector.broadcast %208 : vector<1x16xf32> to vector<16x16xf32>
    %210 = arith.addf %207, %209 : vector<16x16xf32>
    %cst_98 = arith.constant 0.000000e+00 : f32
    %211 = vector.broadcast %cst_98 : f32 to vector<16x16xf32>
    %212 = arith.maximumf %210, %211 : vector<16x16xf32>
    %c1_99 = arith.constant 1 : index
    %c0_100 = arith.constant 0 : index
    %c0_101 = arith.constant 0 : index
    %213 = vector.load %arg9[%c1_99, %c0_100, %c0_101] : memref<4x32x16xf32, #tpu.memory_space<vmem>>, vector<1x32x16xf32>
    %214 = vector.shape_cast %213 : vector<1x32x16xf32> to vector<32x16xf32>
    %cst_102 = arith.constant dense<0.000000e+00> : vector<16x16xf32>
    %215 = tpu.matmul %170, %214, %cst_102 {dimension_numbers = #tpu.dot_dimension_numbers<[1], [0], [0], [1], [0, 0, 1, 1], [], []>} : vector<16x32xf32>, vector<32x16xf32>, vector<16x16xf32> -> vector<16x16xf32>
    %c1_103 = arith.constant 1 : index
    %c0_104 = arith.constant 0 : index
    %216 = vector.load %arg10[%c1_103, %c0_104] : memref<4x16xf32, #tpu.memory_space<vmem>>, vector<1x16xf32>
    %217 = vector.broadcast %216 : vector<1x16xf32> to vector<16x16xf32>
    %218 = arith.mulf %215, %217 : vector<16x16xf32>
    %cst_105 = arith.constant dense<0.000000e+00> : vector<16xf32>
    %219 = vector.multi_reduction <add>, %218, %cst_105 [1] : vector<16x16xf32> to vector<16xf32>
    %220 = vector.shape_cast %219 : vector<16xf32> to vector<16x1xf32>
    %c1_106 = arith.constant 1 : index
    %c0_107 = arith.constant 0 : index
    %221 = vector.load %arg11[%c1_106, %c0_107] : memref<4x16xf32, #tpu.memory_space<vmem>>, vector<1x16xf32>
    %222 = vector.broadcast %221 : vector<1x16xf32> to vector<16x16xf32>
    %223 = arith.mulf %215, %222 : vector<16x16xf32>
    %cst_108 = arith.constant dense<0.000000e+00> : vector<16xf32>
    %224 = vector.multi_reduction <add>, %223, %cst_108 [1] : vector<16x16xf32> to vector<16xf32>
    %225 = vector.shape_cast %224 : vector<16xf32> to vector<16x1xf32>
    %226 = tpu.transpose %220, [1, 0] : vector<16x1xf32> -> vector<1x16xf32>
    %227 = vector.broadcast %225 : vector<16x1xf32> to vector<16x16xf32>
    %228 = vector.broadcast %226 : vector<1x16xf32> to vector<16x16xf32>
    %229 = arith.addf %227, %228 : vector<16x16xf32>
    %cst_109 = arith.constant 0.000000e+00 : f32
    %230 = vector.broadcast %cst_109 : f32 to vector<16x16xf32>
    %231 = arith.cmpf ogt, %229, %230 : vector<16x16xf32>
    %cst_110 = arith.constant 2.000000e-01 : f32
    %232 = vector.broadcast %cst_110 : f32 to vector<16x16xf32>
    %233 = arith.mulf %232, %229 : vector<16x16xf32>
    %234 = arith.select %231, %229, %233 : vector<16x16xi1>, vector<16x16xf32>
    %235 = arith.addf %234, %0 : vector<16x16xf32>
    %cst_111 = arith.constant dense<0xFF800000> : vector<16xf32>
    %236 = vector.multi_reduction <maximumf>, %235, %cst_111 [1] : vector<16x16xf32> to vector<16xf32>
    %237 = vector.shape_cast %236 : vector<16xf32> to vector<16x1xf32>
    %238 = vector.broadcast %237 : vector<16x1xf32> to vector<16x16xf32>
    %239 = arith.subf %235, %238 : vector<16x16xf32>
    %240 = math.exp %239 : vector<16x16xf32>
    %cst_112 = arith.constant dense<0.000000e+00> : vector<16xf32>
    %241 = vector.multi_reduction <add>, %240, %cst_112 [1] : vector<16x16xf32> to vector<16xf32>
    %242 = vector.shape_cast %241 : vector<16xf32> to vector<16x1xf32>
    %243 = tpu.reciprocal %242 {approx = true} : vector<16x1xf32> -> vector<16x1xf32>
    %244 = vector.broadcast %243 : vector<16x1xf32> to vector<16x16xf32>
    %245 = arith.mulf %240, %244 : vector<16x16xf32>
    %cst_113 = arith.constant dense<0.000000e+00> : vector<16x16xf32>
    %246 = tpu.matmul %245, %215, %cst_113 {dimension_numbers = #tpu.dot_dimension_numbers<[1], [0], [0], [1], [0, 0, 1, 1], [], []>} : vector<16x16xf32>, vector<16x16xf32>, vector<16x16xf32> -> vector<16x16xf32>
    %c1_114 = arith.constant 1 : index
    %c0_115 = arith.constant 0 : index
    %247 = vector.load %arg12[%c1_114, %c0_115] : memref<4x16xf32, #tpu.memory_space<vmem>>, vector<1x16xf32>
    %248 = vector.broadcast %247 : vector<1x16xf32> to vector<16x16xf32>
    %249 = arith.mulf %246, %248 : vector<16x16xf32>
    %c1_116 = arith.constant 1 : index
    %c0_117 = arith.constant 0 : index
    %250 = vector.load %arg13[%c1_116, %c0_117] : memref<4x16xf32, #tpu.memory_space<vmem>>, vector<1x16xf32>
    %251 = vector.broadcast %250 : vector<1x16xf32> to vector<16x16xf32>
    %252 = arith.addf %249, %251 : vector<16x16xf32>
    %cst_118 = arith.constant 0.000000e+00 : f32
    %253 = vector.broadcast %cst_118 : f32 to vector<16x16xf32>
    %254 = arith.maximumf %252, %253 : vector<16x16xf32>
    %c2_119 = arith.constant 2 : index
    %c0_120 = arith.constant 0 : index
    %c0_121 = arith.constant 0 : index
    %255 = vector.load %arg9[%c2_119, %c0_120, %c0_121] : memref<4x32x16xf32, #tpu.memory_space<vmem>>, vector<1x32x16xf32>
    %256 = vector.shape_cast %255 : vector<1x32x16xf32> to vector<32x16xf32>
    %cst_122 = arith.constant dense<0.000000e+00> : vector<16x16xf32>
    %257 = tpu.matmul %170, %256, %cst_122 {dimension_numbers = #tpu.dot_dimension_numbers<[1], [0], [0], [1], [0, 0, 1, 1], [], []>} : vector<16x32xf32>, vector<32x16xf32>, vector<16x16xf32> -> vector<16x16xf32>
    %c2_123 = arith.constant 2 : index
    %c0_124 = arith.constant 0 : index
    %258 = vector.load %arg10[%c2_123, %c0_124] : memref<4x16xf32, #tpu.memory_space<vmem>>, vector<1x16xf32>
    %259 = vector.broadcast %258 : vector<1x16xf32> to vector<16x16xf32>
    %260 = arith.mulf %257, %259 : vector<16x16xf32>
    %cst_125 = arith.constant dense<0.000000e+00> : vector<16xf32>
    %261 = vector.multi_reduction <add>, %260, %cst_125 [1] : vector<16x16xf32> to vector<16xf32>
    %262 = vector.shape_cast %261 : vector<16xf32> to vector<16x1xf32>
    %c2_126 = arith.constant 2 : index
    %c0_127 = arith.constant 0 : index
    %263 = vector.load %arg11[%c2_126, %c0_127] : memref<4x16xf32, #tpu.memory_space<vmem>>, vector<1x16xf32>
    %264 = vector.broadcast %263 : vector<1x16xf32> to vector<16x16xf32>
    %265 = arith.mulf %257, %264 : vector<16x16xf32>
    %cst_128 = arith.constant dense<0.000000e+00> : vector<16xf32>
    %266 = vector.multi_reduction <add>, %265, %cst_128 [1] : vector<16x16xf32> to vector<16xf32>
    %267 = vector.shape_cast %266 : vector<16xf32> to vector<16x1xf32>
    %268 = tpu.transpose %262, [1, 0] : vector<16x1xf32> -> vector<1x16xf32>
    %269 = vector.broadcast %267 : vector<16x1xf32> to vector<16x16xf32>
    %270 = vector.broadcast %268 : vector<1x16xf32> to vector<16x16xf32>
    %271 = arith.addf %269, %270 : vector<16x16xf32>
    %cst_129 = arith.constant 0.000000e+00 : f32
    %272 = vector.broadcast %cst_129 : f32 to vector<16x16xf32>
    %273 = arith.cmpf ogt, %271, %272 : vector<16x16xf32>
    %cst_130 = arith.constant 2.000000e-01 : f32
    %274 = vector.broadcast %cst_130 : f32 to vector<16x16xf32>
    %275 = arith.mulf %274, %271 : vector<16x16xf32>
    %276 = arith.select %273, %271, %275 : vector<16x16xi1>, vector<16x16xf32>
    %277 = arith.addf %276, %0 : vector<16x16xf32>
    %cst_131 = arith.constant dense<0xFF800000> : vector<16xf32>
    %278 = vector.multi_reduction <maximumf>, %277, %cst_131 [1] : vector<16x16xf32> to vector<16xf32>
    %279 = vector.shape_cast %278 : vector<16xf32> to vector<16x1xf32>
    %280 = vector.broadcast %279 : vector<16x1xf32> to vector<16x16xf32>
    %281 = arith.subf %277, %280 : vector<16x16xf32>
    %282 = math.exp %281 : vector<16x16xf32>
    %cst_132 = arith.constant dense<0.000000e+00> : vector<16xf32>
    %283 = vector.multi_reduction <add>, %282, %cst_132 [1] : vector<16x16xf32> to vector<16xf32>
    %284 = vector.shape_cast %283 : vector<16xf32> to vector<16x1xf32>
    %285 = tpu.reciprocal %284 {approx = true} : vector<16x1xf32> -> vector<16x1xf32>
    %286 = vector.broadcast %285 : vector<16x1xf32> to vector<16x16xf32>
    %287 = arith.mulf %282, %286 : vector<16x16xf32>
    %cst_133 = arith.constant dense<0.000000e+00> : vector<16x16xf32>
    %288 = tpu.matmul %287, %257, %cst_133 {dimension_numbers = #tpu.dot_dimension_numbers<[1], [0], [0], [1], [0, 0, 1, 1], [], []>} : vector<16x16xf32>, vector<16x16xf32>, vector<16x16xf32> -> vector<16x16xf32>
    %c2_134 = arith.constant 2 : index
    %c0_135 = arith.constant 0 : index
    %289 = vector.load %arg12[%c2_134, %c0_135] : memref<4x16xf32, #tpu.memory_space<vmem>>, vector<1x16xf32>
    %290 = vector.broadcast %289 : vector<1x16xf32> to vector<16x16xf32>
    %291 = arith.mulf %288, %290 : vector<16x16xf32>
    %c2_136 = arith.constant 2 : index
    %c0_137 = arith.constant 0 : index
    %292 = vector.load %arg13[%c2_136, %c0_137] : memref<4x16xf32, #tpu.memory_space<vmem>>, vector<1x16xf32>
    %293 = vector.broadcast %292 : vector<1x16xf32> to vector<16x16xf32>
    %294 = arith.addf %291, %293 : vector<16x16xf32>
    %cst_138 = arith.constant 0.000000e+00 : f32
    %295 = vector.broadcast %cst_138 : f32 to vector<16x16xf32>
    %296 = arith.maximumf %294, %295 : vector<16x16xf32>
    %c3_139 = arith.constant 3 : index
    %c0_140 = arith.constant 0 : index
    %c0_141 = arith.constant 0 : index
    %297 = vector.load %arg9[%c3_139, %c0_140, %c0_141] : memref<4x32x16xf32, #tpu.memory_space<vmem>>, vector<1x32x16xf32>
    %298 = vector.shape_cast %297 : vector<1x32x16xf32> to vector<32x16xf32>
    %cst_142 = arith.constant dense<0.000000e+00> : vector<16x16xf32>
    %299 = tpu.matmul %170, %298, %cst_142 {dimension_numbers = #tpu.dot_dimension_numbers<[1], [0], [0], [1], [0, 0, 1, 1], [], []>} : vector<16x32xf32>, vector<32x16xf32>, vector<16x16xf32> -> vector<16x16xf32>
    %c3_143 = arith.constant 3 : index
    %c0_144 = arith.constant 0 : index
    %300 = vector.load %arg10[%c3_143, %c0_144] : memref<4x16xf32, #tpu.memory_space<vmem>>, vector<1x16xf32>
    %301 = vector.broadcast %300 : vector<1x16xf32> to vector<16x16xf32>
    %302 = arith.mulf %299, %301 : vector<16x16xf32>
    %cst_145 = arith.constant dense<0.000000e+00> : vector<16xf32>
    %303 = vector.multi_reduction <add>, %302, %cst_145 [1] : vector<16x16xf32> to vector<16xf32>
    %304 = vector.shape_cast %303 : vector<16xf32> to vector<16x1xf32>
    %c3_146 = arith.constant 3 : index
    %c0_147 = arith.constant 0 : index
    %305 = vector.load %arg11[%c3_146, %c0_147] : memref<4x16xf32, #tpu.memory_space<vmem>>, vector<1x16xf32>
    %306 = vector.broadcast %305 : vector<1x16xf32> to vector<16x16xf32>
    %307 = arith.mulf %299, %306 : vector<16x16xf32>
    %cst_148 = arith.constant dense<0.000000e+00> : vector<16xf32>
    %308 = vector.multi_reduction <add>, %307, %cst_148 [1] : vector<16x16xf32> to vector<16xf32>
    %309 = vector.shape_cast %308 : vector<16xf32> to vector<16x1xf32>
    %310 = tpu.transpose %304, [1, 0] : vector<16x1xf32> -> vector<1x16xf32>
    %311 = vector.broadcast %309 : vector<16x1xf32> to vector<16x16xf32>
    %312 = vector.broadcast %310 : vector<1x16xf32> to vector<16x16xf32>
    %313 = arith.addf %311, %312 : vector<16x16xf32>
    %cst_149 = arith.constant 0.000000e+00 : f32
    %314 = vector.broadcast %cst_149 : f32 to vector<16x16xf32>
    %315 = arith.cmpf ogt, %313, %314 : vector<16x16xf32>
    %cst_150 = arith.constant 2.000000e-01 : f32
    %316 = vector.broadcast %cst_150 : f32 to vector<16x16xf32>
    %317 = arith.mulf %316, %313 : vector<16x16xf32>
    %318 = arith.select %315, %313, %317 : vector<16x16xi1>, vector<16x16xf32>
    %319 = arith.addf %318, %0 : vector<16x16xf32>
    %cst_151 = arith.constant dense<0xFF800000> : vector<16xf32>
    %320 = vector.multi_reduction <maximumf>, %319, %cst_151 [1] : vector<16x16xf32> to vector<16xf32>
    %321 = vector.shape_cast %320 : vector<16xf32> to vector<16x1xf32>
    %322 = vector.broadcast %321 : vector<16x1xf32> to vector<16x16xf32>
    %323 = arith.subf %319, %322 : vector<16x16xf32>
    %324 = math.exp %323 : vector<16x16xf32>
    %cst_152 = arith.constant dense<0.000000e+00> : vector<16xf32>
    %325 = vector.multi_reduction <add>, %324, %cst_152 [1] : vector<16x16xf32> to vector<16xf32>
    %326 = vector.shape_cast %325 : vector<16xf32> to vector<16x1xf32>
    %327 = tpu.reciprocal %326 {approx = true} : vector<16x1xf32> -> vector<16x1xf32>
    %328 = vector.broadcast %327 : vector<16x1xf32> to vector<16x16xf32>
    %329 = arith.mulf %324, %328 : vector<16x16xf32>
    %cst_153 = arith.constant dense<0.000000e+00> : vector<16x16xf32>
    %330 = tpu.matmul %329, %299, %cst_153 {dimension_numbers = #tpu.dot_dimension_numbers<[1], [0], [0], [1], [0, 0, 1, 1], [], []>} : vector<16x16xf32>, vector<16x16xf32>, vector<16x16xf32> -> vector<16x16xf32>
    %c3_154 = arith.constant 3 : index
    %c0_155 = arith.constant 0 : index
    %331 = vector.load %arg12[%c3_154, %c0_155] : memref<4x16xf32, #tpu.memory_space<vmem>>, vector<1x16xf32>
    %332 = vector.broadcast %331 : vector<1x16xf32> to vector<16x16xf32>
    %333 = arith.mulf %330, %332 : vector<16x16xf32>
    %c3_156 = arith.constant 3 : index
    %c0_157 = arith.constant 0 : index
    %334 = vector.load %arg13[%c3_156, %c0_157] : memref<4x16xf32, #tpu.memory_space<vmem>>, vector<1x16xf32>
    %335 = vector.broadcast %334 : vector<1x16xf32> to vector<16x16xf32>
    %336 = arith.addf %333, %335 : vector<16x16xf32>
    %cst_158 = arith.constant 0.000000e+00 : f32
    %337 = vector.broadcast %cst_158 : f32 to vector<16x16xf32>
    %338 = arith.maximumf %336, %337 : vector<16x16xf32>
    %339 = tpu.concatenate %212, %254, %296, %338 in 1 : vector<16x16xf32>, vector<16x16xf32>, vector<16x16xf32>, vector<16x16xf32> -> vector<16x64xf32>
    %c0_159 = arith.constant 0 : index
    %c0_160 = arith.constant 0 : index
    %c0_161 = arith.constant 0 : index
    %340 = vector.load %arg14[%c0_159, %c0_160, %c0_161] : memref<4x64x32xf32, #tpu.memory_space<vmem>>, vector<1x64x32xf32>
    %341 = vector.shape_cast %340 : vector<1x64x32xf32> to vector<64x32xf32>
    %cst_162 = arith.constant dense<0.000000e+00> : vector<16x32xf32>
    %342 = tpu.matmul %339, %341, %cst_162 {dimension_numbers = #tpu.dot_dimension_numbers<[1], [0], [0], [1], [0, 0, 1, 1], [], []>} : vector<16x64xf32>, vector<64x32xf32>, vector<16x32xf32> -> vector<16x32xf32>
    %c0_163 = arith.constant 0 : index
    %c0_164 = arith.constant 0 : index
    %343 = vector.load %arg15[%c0_163, %c0_164] : memref<4x32xf32, #tpu.memory_space<vmem>>, vector<1x32xf32>
    %344 = vector.broadcast %343 : vector<1x32xf32> to vector<16x32xf32>
    %345 = arith.mulf %342, %344 : vector<16x32xf32>
    %cst_165 = arith.constant dense<0.000000e+00> : vector<16xf32>
    %346 = vector.multi_reduction <add>, %345, %cst_165 [1] : vector<16x32xf32> to vector<16xf32>
    %347 = vector.shape_cast %346 : vector<16xf32> to vector<16x1xf32>
    %c0_166 = arith.constant 0 : index
    %c0_167 = arith.constant 0 : index
    %348 = vector.load %arg16[%c0_166, %c0_167] : memref<4x32xf32, #tpu.memory_space<vmem>>, vector<1x32xf32>
    %349 = vector.broadcast %348 : vector<1x32xf32> to vector<16x32xf32>
    %350 = arith.mulf %342, %349 : vector<16x32xf32>
    %cst_168 = arith.constant dense<0.000000e+00> : vector<16xf32>
    %351 = vector.multi_reduction <add>, %350, %cst_168 [1] : vector<16x32xf32> to vector<16xf32>
    %352 = vector.shape_cast %351 : vector<16xf32> to vector<16x1xf32>
    %353 = tpu.transpose %347, [1, 0] : vector<16x1xf32> -> vector<1x16xf32>
    %354 = vector.broadcast %352 : vector<16x1xf32> to vector<16x16xf32>
    %355 = vector.broadcast %353 : vector<1x16xf32> to vector<16x16xf32>
    %356 = arith.addf %354, %355 : vector<16x16xf32>
    %cst_169 = arith.constant 0.000000e+00 : f32
    %357 = vector.broadcast %cst_169 : f32 to vector<16x16xf32>
    %358 = arith.cmpf ogt, %356, %357 : vector<16x16xf32>
    %cst_170 = arith.constant 2.000000e-01 : f32
    %359 = vector.broadcast %cst_170 : f32 to vector<16x16xf32>
    %360 = arith.mulf %359, %356 : vector<16x16xf32>
    %361 = arith.select %358, %356, %360 : vector<16x16xi1>, vector<16x16xf32>
    %362 = arith.addf %361, %0 : vector<16x16xf32>
    %cst_171 = arith.constant dense<0xFF800000> : vector<16xf32>
    %363 = vector.multi_reduction <maximumf>, %362, %cst_171 [1] : vector<16x16xf32> to vector<16xf32>
    %364 = vector.shape_cast %363 : vector<16xf32> to vector<16x1xf32>
    %365 = vector.broadcast %364 : vector<16x1xf32> to vector<16x16xf32>
    %366 = arith.subf %362, %365 : vector<16x16xf32>
    %367 = math.exp %366 : vector<16x16xf32>
    %cst_172 = arith.constant dense<0.000000e+00> : vector<16xf32>
    %368 = vector.multi_reduction <add>, %367, %cst_172 [1] : vector<16x16xf32> to vector<16xf32>
    %369 = vector.shape_cast %368 : vector<16xf32> to vector<16x1xf32>
    %370 = tpu.reciprocal %369 {approx = true} : vector<16x1xf32> -> vector<16x1xf32>
    %371 = vector.broadcast %370 : vector<16x1xf32> to vector<16x16xf32>
    %372 = arith.mulf %367, %371 : vector<16x16xf32>
    %cst_173 = arith.constant dense<0.000000e+00> : vector<16x32xf32>
    %373 = tpu.matmul %372, %342, %cst_173 {dimension_numbers = #tpu.dot_dimension_numbers<[1], [0], [0], [1], [0, 0, 1, 1], [], []>} : vector<16x16xf32>, vector<16x32xf32>, vector<16x32xf32> -> vector<16x32xf32>
    %c0_174 = arith.constant 0 : index
    %c0_175 = arith.constant 0 : index
    %374 = vector.load %arg17[%c0_174, %c0_175] : memref<4x32xf32, #tpu.memory_space<vmem>>, vector<1x32xf32>
    %375 = vector.broadcast %374 : vector<1x32xf32> to vector<16x32xf32>
    %376 = arith.mulf %373, %375 : vector<16x32xf32>
    %c0_176 = arith.constant 0 : index
    %c0_177 = arith.constant 0 : index
    %377 = vector.load %arg18[%c0_176, %c0_177] : memref<4x32xf32, #tpu.memory_space<vmem>>, vector<1x32xf32>
    %378 = vector.broadcast %377 : vector<1x32xf32> to vector<16x32xf32>
    %379 = arith.addf %376, %378 : vector<16x32xf32>
    %cst_178 = arith.constant 0.000000e+00 : f32
    %380 = vector.broadcast %cst_178 : f32 to vector<16x32xf32>
    %381 = arith.maximumf %379, %380 : vector<16x32xf32>
    %c1_179 = arith.constant 1 : index
    %c0_180 = arith.constant 0 : index
    %c0_181 = arith.constant 0 : index
    %382 = vector.load %arg14[%c1_179, %c0_180, %c0_181] : memref<4x64x32xf32, #tpu.memory_space<vmem>>, vector<1x64x32xf32>
    %383 = vector.shape_cast %382 : vector<1x64x32xf32> to vector<64x32xf32>
    %cst_182 = arith.constant dense<0.000000e+00> : vector<16x32xf32>
    %384 = tpu.matmul %339, %383, %cst_182 {dimension_numbers = #tpu.dot_dimension_numbers<[1], [0], [0], [1], [0, 0, 1, 1], [], []>} : vector<16x64xf32>, vector<64x32xf32>, vector<16x32xf32> -> vector<16x32xf32>
    %c1_183 = arith.constant 1 : index
    %c0_184 = arith.constant 0 : index
    %385 = vector.load %arg15[%c1_183, %c0_184] : memref<4x32xf32, #tpu.memory_space<vmem>>, vector<1x32xf32>
    %386 = vector.broadcast %385 : vector<1x32xf32> to vector<16x32xf32>
    %387 = arith.mulf %384, %386 : vector<16x32xf32>
    %cst_185 = arith.constant dense<0.000000e+00> : vector<16xf32>
    %388 = vector.multi_reduction <add>, %387, %cst_185 [1] : vector<16x32xf32> to vector<16xf32>
    %389 = vector.shape_cast %388 : vector<16xf32> to vector<16x1xf32>
    %c1_186 = arith.constant 1 : index
    %c0_187 = arith.constant 0 : index
    %390 = vector.load %arg16[%c1_186, %c0_187] : memref<4x32xf32, #tpu.memory_space<vmem>>, vector<1x32xf32>
    %391 = vector.broadcast %390 : vector<1x32xf32> to vector<16x32xf32>
    %392 = arith.mulf %384, %391 : vector<16x32xf32>
    %cst_188 = arith.constant dense<0.000000e+00> : vector<16xf32>
    %393 = vector.multi_reduction <add>, %392, %cst_188 [1] : vector<16x32xf32> to vector<16xf32>
    %394 = vector.shape_cast %393 : vector<16xf32> to vector<16x1xf32>
    %395 = tpu.transpose %389, [1, 0] : vector<16x1xf32> -> vector<1x16xf32>
    %396 = vector.broadcast %394 : vector<16x1xf32> to vector<16x16xf32>
    %397 = vector.broadcast %395 : vector<1x16xf32> to vector<16x16xf32>
    %398 = arith.addf %396, %397 : vector<16x16xf32>
    %cst_189 = arith.constant 0.000000e+00 : f32
    %399 = vector.broadcast %cst_189 : f32 to vector<16x16xf32>
    %400 = arith.cmpf ogt, %398, %399 : vector<16x16xf32>
    %cst_190 = arith.constant 2.000000e-01 : f32
    %401 = vector.broadcast %cst_190 : f32 to vector<16x16xf32>
    %402 = arith.mulf %401, %398 : vector<16x16xf32>
    %403 = arith.select %400, %398, %402 : vector<16x16xi1>, vector<16x16xf32>
    %404 = arith.addf %403, %0 : vector<16x16xf32>
    %cst_191 = arith.constant dense<0xFF800000> : vector<16xf32>
    %405 = vector.multi_reduction <maximumf>, %404, %cst_191 [1] : vector<16x16xf32> to vector<16xf32>
    %406 = vector.shape_cast %405 : vector<16xf32> to vector<16x1xf32>
    %407 = vector.broadcast %406 : vector<16x1xf32> to vector<16x16xf32>
    %408 = arith.subf %404, %407 : vector<16x16xf32>
    %409 = math.exp %408 : vector<16x16xf32>
    %cst_192 = arith.constant dense<0.000000e+00> : vector<16xf32>
    %410 = vector.multi_reduction <add>, %409, %cst_192 [1] : vector<16x16xf32> to vector<16xf32>
    %411 = vector.shape_cast %410 : vector<16xf32> to vector<16x1xf32>
    %412 = tpu.reciprocal %411 {approx = true} : vector<16x1xf32> -> vector<16x1xf32>
    %413 = vector.broadcast %412 : vector<16x1xf32> to vector<16x16xf32>
    %414 = arith.mulf %409, %413 : vector<16x16xf32>
    %cst_193 = arith.constant dense<0.000000e+00> : vector<16x32xf32>
    %415 = tpu.matmul %414, %384, %cst_193 {dimension_numbers = #tpu.dot_dimension_numbers<[1], [0], [0], [1], [0, 0, 1, 1], [], []>} : vector<16x16xf32>, vector<16x32xf32>, vector<16x32xf32> -> vector<16x32xf32>
    %c1_194 = arith.constant 1 : index
    %c0_195 = arith.constant 0 : index
    %416 = vector.load %arg17[%c1_194, %c0_195] : memref<4x32xf32, #tpu.memory_space<vmem>>, vector<1x32xf32>
    %417 = vector.broadcast %416 : vector<1x32xf32> to vector<16x32xf32>
    %418 = arith.mulf %415, %417 : vector<16x32xf32>
    %c1_196 = arith.constant 1 : index
    %c0_197 = arith.constant 0 : index
    %419 = vector.load %arg18[%c1_196, %c0_197] : memref<4x32xf32, #tpu.memory_space<vmem>>, vector<1x32xf32>
    %420 = vector.broadcast %419 : vector<1x32xf32> to vector<16x32xf32>
    %421 = arith.addf %418, %420 : vector<16x32xf32>
    %cst_198 = arith.constant 0.000000e+00 : f32
    %422 = vector.broadcast %cst_198 : f32 to vector<16x32xf32>
    %423 = arith.maximumf %421, %422 : vector<16x32xf32>
    %c2_199 = arith.constant 2 : index
    %c0_200 = arith.constant 0 : index
    %c0_201 = arith.constant 0 : index
    %424 = vector.load %arg14[%c2_199, %c0_200, %c0_201] : memref<4x64x32xf32, #tpu.memory_space<vmem>>, vector<1x64x32xf32>
    %425 = vector.shape_cast %424 : vector<1x64x32xf32> to vector<64x32xf32>
    %cst_202 = arith.constant dense<0.000000e+00> : vector<16x32xf32>
    %426 = tpu.matmul %339, %425, %cst_202 {dimension_numbers = #tpu.dot_dimension_numbers<[1], [0], [0], [1], [0, 0, 1, 1], [], []>} : vector<16x64xf32>, vector<64x32xf32>, vector<16x32xf32> -> vector<16x32xf32>
    %c2_203 = arith.constant 2 : index
    %c0_204 = arith.constant 0 : index
    %427 = vector.load %arg15[%c2_203, %c0_204] : memref<4x32xf32, #tpu.memory_space<vmem>>, vector<1x32xf32>
    %428 = vector.broadcast %427 : vector<1x32xf32> to vector<16x32xf32>
    %429 = arith.mulf %426, %428 : vector<16x32xf32>
    %cst_205 = arith.constant dense<0.000000e+00> : vector<16xf32>
    %430 = vector.multi_reduction <add>, %429, %cst_205 [1] : vector<16x32xf32> to vector<16xf32>
    %431 = vector.shape_cast %430 : vector<16xf32> to vector<16x1xf32>
    %c2_206 = arith.constant 2 : index
    %c0_207 = arith.constant 0 : index
    %432 = vector.load %arg16[%c2_206, %c0_207] : memref<4x32xf32, #tpu.memory_space<vmem>>, vector<1x32xf32>
    %433 = vector.broadcast %432 : vector<1x32xf32> to vector<16x32xf32>
    %434 = arith.mulf %426, %433 : vector<16x32xf32>
    %cst_208 = arith.constant dense<0.000000e+00> : vector<16xf32>
    %435 = vector.multi_reduction <add>, %434, %cst_208 [1] : vector<16x32xf32> to vector<16xf32>
    %436 = vector.shape_cast %435 : vector<16xf32> to vector<16x1xf32>
    %437 = tpu.transpose %431, [1, 0] : vector<16x1xf32> -> vector<1x16xf32>
    %438 = vector.broadcast %436 : vector<16x1xf32> to vector<16x16xf32>
    %439 = vector.broadcast %437 : vector<1x16xf32> to vector<16x16xf32>
    %440 = arith.addf %438, %439 : vector<16x16xf32>
    %cst_209 = arith.constant 0.000000e+00 : f32
    %441 = vector.broadcast %cst_209 : f32 to vector<16x16xf32>
    %442 = arith.cmpf ogt, %440, %441 : vector<16x16xf32>
    %cst_210 = arith.constant 2.000000e-01 : f32
    %443 = vector.broadcast %cst_210 : f32 to vector<16x16xf32>
    %444 = arith.mulf %443, %440 : vector<16x16xf32>
    %445 = arith.select %442, %440, %444 : vector<16x16xi1>, vector<16x16xf32>
    %446 = arith.addf %445, %0 : vector<16x16xf32>
    %cst_211 = arith.constant dense<0xFF800000> : vector<16xf32>
    %447 = vector.multi_reduction <maximumf>, %446, %cst_211 [1] : vector<16x16xf32> to vector<16xf32>
    %448 = vector.shape_cast %447 : vector<16xf32> to vector<16x1xf32>
    %449 = vector.broadcast %448 : vector<16x1xf32> to vector<16x16xf32>
    %450 = arith.subf %446, %449 : vector<16x16xf32>
    %451 = math.exp %450 : vector<16x16xf32>
    %cst_212 = arith.constant dense<0.000000e+00> : vector<16xf32>
    %452 = vector.multi_reduction <add>, %451, %cst_212 [1] : vector<16x16xf32> to vector<16xf32>
    %453 = vector.shape_cast %452 : vector<16xf32> to vector<16x1xf32>
    %454 = tpu.reciprocal %453 {approx = true} : vector<16x1xf32> -> vector<16x1xf32>
    %455 = vector.broadcast %454 : vector<16x1xf32> to vector<16x16xf32>
    %456 = arith.mulf %451, %455 : vector<16x16xf32>
    %cst_213 = arith.constant dense<0.000000e+00> : vector<16x32xf32>
    %457 = tpu.matmul %456, %426, %cst_213 {dimension_numbers = #tpu.dot_dimension_numbers<[1], [0], [0], [1], [0, 0, 1, 1], [], []>} : vector<16x16xf32>, vector<16x32xf32>, vector<16x32xf32> -> vector<16x32xf32>
    %c2_214 = arith.constant 2 : index
    %c0_215 = arith.constant 0 : index
    %458 = vector.load %arg17[%c2_214, %c0_215] : memref<4x32xf32, #tpu.memory_space<vmem>>, vector<1x32xf32>
    %459 = vector.broadcast %458 : vector<1x32xf32> to vector<16x32xf32>
    %460 = arith.mulf %457, %459 : vector<16x32xf32>
    %c2_216 = arith.constant 2 : index
    %c0_217 = arith.constant 0 : index
    %461 = vector.load %arg18[%c2_216, %c0_217] : memref<4x32xf32, #tpu.memory_space<vmem>>, vector<1x32xf32>
    %462 = vector.broadcast %461 : vector<1x32xf32> to vector<16x32xf32>
    %463 = arith.addf %460, %462 : vector<16x32xf32>
    %cst_218 = arith.constant 0.000000e+00 : f32
    %464 = vector.broadcast %cst_218 : f32 to vector<16x32xf32>
    %465 = arith.maximumf %463, %464 : vector<16x32xf32>
    %c3_219 = arith.constant 3 : index
    %c0_220 = arith.constant 0 : index
    %c0_221 = arith.constant 0 : index
    %466 = vector.load %arg14[%c3_219, %c0_220, %c0_221] : memref<4x64x32xf32, #tpu.memory_space<vmem>>, vector<1x64x32xf32>
    %467 = vector.shape_cast %466 : vector<1x64x32xf32> to vector<64x32xf32>
    %cst_222 = arith.constant dense<0.000000e+00> : vector<16x32xf32>
    %468 = tpu.matmul %339, %467, %cst_222 {dimension_numbers = #tpu.dot_dimension_numbers<[1], [0], [0], [1], [0, 0, 1, 1], [], []>} : vector<16x64xf32>, vector<64x32xf32>, vector<16x32xf32> -> vector<16x32xf32>
    %c3_223 = arith.constant 3 : index
    %c0_224 = arith.constant 0 : index
    %469 = vector.load %arg15[%c3_223, %c0_224] : memref<4x32xf32, #tpu.memory_space<vmem>>, vector<1x32xf32>
    %470 = vector.broadcast %469 : vector<1x32xf32> to vector<16x32xf32>
    %471 = arith.mulf %468, %470 : vector<16x32xf32>
    %cst_225 = arith.constant dense<0.000000e+00> : vector<16xf32>
    %472 = vector.multi_reduction <add>, %471, %cst_225 [1] : vector<16x32xf32> to vector<16xf32>
    %473 = vector.shape_cast %472 : vector<16xf32> to vector<16x1xf32>
    %c3_226 = arith.constant 3 : index
    %c0_227 = arith.constant 0 : index
    %474 = vector.load %arg16[%c3_226, %c0_227] : memref<4x32xf32, #tpu.memory_space<vmem>>, vector<1x32xf32>
    %475 = vector.broadcast %474 : vector<1x32xf32> to vector<16x32xf32>
    %476 = arith.mulf %468, %475 : vector<16x32xf32>
    %cst_228 = arith.constant dense<0.000000e+00> : vector<16xf32>
    %477 = vector.multi_reduction <add>, %476, %cst_228 [1] : vector<16x32xf32> to vector<16xf32>
    %478 = vector.shape_cast %477 : vector<16xf32> to vector<16x1xf32>
    %479 = tpu.transpose %473, [1, 0] : vector<16x1xf32> -> vector<1x16xf32>
    %480 = vector.broadcast %478 : vector<16x1xf32> to vector<16x16xf32>
    %481 = vector.broadcast %479 : vector<1x16xf32> to vector<16x16xf32>
    %482 = arith.addf %480, %481 : vector<16x16xf32>
    %cst_229 = arith.constant 0.000000e+00 : f32
    %483 = vector.broadcast %cst_229 : f32 to vector<16x16xf32>
    %484 = arith.cmpf ogt, %482, %483 : vector<16x16xf32>
    %cst_230 = arith.constant 2.000000e-01 : f32
    %485 = vector.broadcast %cst_230 : f32 to vector<16x16xf32>
    %486 = arith.mulf %485, %482 : vector<16x16xf32>
    %487 = arith.select %484, %482, %486 : vector<16x16xi1>, vector<16x16xf32>
    %488 = arith.addf %487, %0 : vector<16x16xf32>
    %cst_231 = arith.constant dense<0xFF800000> : vector<16xf32>
    %489 = vector.multi_reduction <maximumf>, %488, %cst_231 [1] : vector<16x16xf32> to vector<16xf32>
    %490 = vector.shape_cast %489 : vector<16xf32> to vector<16x1xf32>
    %491 = vector.broadcast %490 : vector<16x1xf32> to vector<16x16xf32>
    %492 = arith.subf %488, %491 : vector<16x16xf32>
    %493 = math.exp %492 : vector<16x16xf32>
    %cst_232 = arith.constant dense<0.000000e+00> : vector<16xf32>
    %494 = vector.multi_reduction <add>, %493, %cst_232 [1] : vector<16x16xf32> to vector<16xf32>
    %495 = vector.shape_cast %494 : vector<16xf32> to vector<16x1xf32>
    %496 = tpu.reciprocal %495 {approx = true} : vector<16x1xf32> -> vector<16x1xf32>
    %497 = vector.broadcast %496 : vector<16x1xf32> to vector<16x16xf32>
    %498 = arith.mulf %493, %497 : vector<16x16xf32>
    %cst_233 = arith.constant dense<0.000000e+00> : vector<16x32xf32>
    %499 = tpu.matmul %498, %468, %cst_233 {dimension_numbers = #tpu.dot_dimension_numbers<[1], [0], [0], [1], [0, 0, 1, 1], [], []>} : vector<16x16xf32>, vector<16x32xf32>, vector<16x32xf32> -> vector<16x32xf32>
    %c3_234 = arith.constant 3 : index
    %c0_235 = arith.constant 0 : index
    %500 = vector.load %arg17[%c3_234, %c0_235] : memref<4x32xf32, #tpu.memory_space<vmem>>, vector<1x32xf32>
    %501 = vector.broadcast %500 : vector<1x32xf32> to vector<16x32xf32>
    %502 = arith.mulf %499, %501 : vector<16x32xf32>
    %c3_236 = arith.constant 3 : index
    %c0_237 = arith.constant 0 : index
    %503 = vector.load %arg18[%c3_236, %c0_237] : memref<4x32xf32, #tpu.memory_space<vmem>>, vector<1x32xf32>
    %504 = vector.broadcast %503 : vector<1x32xf32> to vector<16x32xf32>
    %505 = arith.addf %502, %504 : vector<16x32xf32>
    %cst_238 = arith.constant 0.000000e+00 : f32
    %506 = vector.broadcast %cst_238 : f32 to vector<16x32xf32>
    %507 = arith.maximumf %505, %506 : vector<16x32xf32>
    %508 = tpu.concatenate %381, %423, %465, %507 in 1 : vector<16x32xf32>, vector<16x32xf32>, vector<16x32xf32>, vector<16x32xf32> -> vector<16x128xf32>
    %c0_239 = arith.constant 0 : index
    %c0_240 = arith.constant 0 : index
    %c0_241 = arith.constant 0 : index
    %509 = vector.load %arg19[%c0_239, %c0_240, %c0_241] : memref<4x128x256xf32, #tpu.memory_space<vmem>>, vector<1x128x256xf32>
    %510 = vector.shape_cast %509 : vector<1x128x256xf32> to vector<128x256xf32>
    %cst_242 = arith.constant dense<0.000000e+00> : vector<16x256xf32>
    %511 = tpu.matmul %508, %510, %cst_242 {dimension_numbers = #tpu.dot_dimension_numbers<[1], [0], [0], [1], [0, 0, 1, 1], [], []>} : vector<16x128xf32>, vector<128x256xf32>, vector<16x256xf32> -> vector<16x256xf32>
    %c0_243 = arith.constant 0 : index
    %c0_244 = arith.constant 0 : index
    %512 = vector.load %arg20[%c0_243, %c0_244] : memref<4x256xf32, #tpu.memory_space<vmem>>, vector<1x256xf32>
    %513 = vector.broadcast %512 : vector<1x256xf32> to vector<16x256xf32>
    %514 = arith.mulf %511, %513 : vector<16x256xf32>
    %cst_245 = arith.constant dense<0.000000e+00> : vector<16xf32>
    %515 = vector.multi_reduction <add>, %514, %cst_245 [1] : vector<16x256xf32> to vector<16xf32>
    %516 = vector.shape_cast %515 : vector<16xf32> to vector<16x1xf32>
    %c0_246 = arith.constant 0 : index
    %c0_247 = arith.constant 0 : index
    %517 = vector.load %arg21[%c0_246, %c0_247] : memref<4x256xf32, #tpu.memory_space<vmem>>, vector<1x256xf32>
    %518 = vector.broadcast %517 : vector<1x256xf32> to vector<16x256xf32>
    %519 = arith.mulf %511, %518 : vector<16x256xf32>
    %cst_248 = arith.constant dense<0.000000e+00> : vector<16xf32>
    %520 = vector.multi_reduction <add>, %519, %cst_248 [1] : vector<16x256xf32> to vector<16xf32>
    %521 = vector.shape_cast %520 : vector<16xf32> to vector<16x1xf32>
    %522 = tpu.transpose %516, [1, 0] : vector<16x1xf32> -> vector<1x16xf32>
    %523 = vector.broadcast %521 : vector<16x1xf32> to vector<16x16xf32>
    %524 = vector.broadcast %522 : vector<1x16xf32> to vector<16x16xf32>
    %525 = arith.addf %523, %524 : vector<16x16xf32>
    %cst_249 = arith.constant 0.000000e+00 : f32
    %526 = vector.broadcast %cst_249 : f32 to vector<16x16xf32>
    %527 = arith.cmpf ogt, %525, %526 : vector<16x16xf32>
    %cst_250 = arith.constant 2.000000e-01 : f32
    %528 = vector.broadcast %cst_250 : f32 to vector<16x16xf32>
    %529 = arith.mulf %528, %525 : vector<16x16xf32>
    %530 = arith.select %527, %525, %529 : vector<16x16xi1>, vector<16x16xf32>
    %531 = arith.addf %530, %0 : vector<16x16xf32>
    %cst_251 = arith.constant dense<0xFF800000> : vector<16xf32>
    %532 = vector.multi_reduction <maximumf>, %531, %cst_251 [1] : vector<16x16xf32> to vector<16xf32>
    %533 = vector.shape_cast %532 : vector<16xf32> to vector<16x1xf32>
    %534 = vector.broadcast %533 : vector<16x1xf32> to vector<16x16xf32>
    %535 = arith.subf %531, %534 : vector<16x16xf32>
    %536 = math.exp %535 : vector<16x16xf32>
    %cst_252 = arith.constant dense<0.000000e+00> : vector<16xf32>
    %537 = vector.multi_reduction <add>, %536, %cst_252 [1] : vector<16x16xf32> to vector<16xf32>
    %538 = vector.shape_cast %537 : vector<16xf32> to vector<16x1xf32>
    %539 = tpu.reciprocal %538 {approx = true} : vector<16x1xf32> -> vector<16x1xf32>
    %540 = vector.broadcast %539 : vector<16x1xf32> to vector<16x16xf32>
    %541 = arith.mulf %536, %540 : vector<16x16xf32>
    %cst_253 = arith.constant dense<0.000000e+00> : vector<16x256xf32>
    %542 = tpu.matmul %541, %511, %cst_253 {dimension_numbers = #tpu.dot_dimension_numbers<[1], [0], [0], [1], [0, 0, 1, 1], [], []>} : vector<16x16xf32>, vector<16x256xf32>, vector<16x256xf32> -> vector<16x256xf32>
    %c0_254 = arith.constant 0 : index
    %c0_255 = arith.constant 0 : index
    %543 = vector.load %arg22[%c0_254, %c0_255] : memref<4x256xf32, #tpu.memory_space<vmem>>, vector<1x256xf32>
    %544 = vector.broadcast %543 : vector<1x256xf32> to vector<16x256xf32>
    %545 = arith.mulf %542, %544 : vector<16x256xf32>
    %c0_256 = arith.constant 0 : index
    %c0_257 = arith.constant 0 : index
    %546 = vector.load %arg23[%c0_256, %c0_257] : memref<4x256xf32, #tpu.memory_space<vmem>>, vector<1x256xf32>
    %547 = vector.broadcast %546 : vector<1x256xf32> to vector<16x256xf32>
    %548 = arith.addf %545, %547 : vector<16x256xf32>
    %cst_258 = arith.constant 0.000000e+00 : f32
    %549 = vector.broadcast %cst_258 : f32 to vector<16x256xf32>
    %550 = arith.maximumf %548, %549 : vector<16x256xf32>
    %c1_259 = arith.constant 1 : index
    %c0_260 = arith.constant 0 : index
    %c0_261 = arith.constant 0 : index
    %551 = vector.load %arg19[%c1_259, %c0_260, %c0_261] : memref<4x128x256xf32, #tpu.memory_space<vmem>>, vector<1x128x256xf32>
    %552 = vector.shape_cast %551 : vector<1x128x256xf32> to vector<128x256xf32>
    %cst_262 = arith.constant dense<0.000000e+00> : vector<16x256xf32>
    %553 = tpu.matmul %508, %552, %cst_262 {dimension_numbers = #tpu.dot_dimension_numbers<[1], [0], [0], [1], [0, 0, 1, 1], [], []>} : vector<16x128xf32>, vector<128x256xf32>, vector<16x256xf32> -> vector<16x256xf32>
    %c1_263 = arith.constant 1 : index
    %c0_264 = arith.constant 0 : index
    %554 = vector.load %arg20[%c1_263, %c0_264] : memref<4x256xf32, #tpu.memory_space<vmem>>, vector<1x256xf32>
    %555 = vector.broadcast %554 : vector<1x256xf32> to vector<16x256xf32>
    %556 = arith.mulf %553, %555 : vector<16x256xf32>
    %cst_265 = arith.constant dense<0.000000e+00> : vector<16xf32>
    %557 = vector.multi_reduction <add>, %556, %cst_265 [1] : vector<16x256xf32> to vector<16xf32>
    %558 = vector.shape_cast %557 : vector<16xf32> to vector<16x1xf32>
    %c1_266 = arith.constant 1 : index
    %c0_267 = arith.constant 0 : index
    %559 = vector.load %arg21[%c1_266, %c0_267] : memref<4x256xf32, #tpu.memory_space<vmem>>, vector<1x256xf32>
    %560 = vector.broadcast %559 : vector<1x256xf32> to vector<16x256xf32>
    %561 = arith.mulf %553, %560 : vector<16x256xf32>
    %cst_268 = arith.constant dense<0.000000e+00> : vector<16xf32>
    %562 = vector.multi_reduction <add>, %561, %cst_268 [1] : vector<16x256xf32> to vector<16xf32>
    %563 = vector.shape_cast %562 : vector<16xf32> to vector<16x1xf32>
    %564 = tpu.transpose %558, [1, 0] : vector<16x1xf32> -> vector<1x16xf32>
    %565 = vector.broadcast %563 : vector<16x1xf32> to vector<16x16xf32>
    %566 = vector.broadcast %564 : vector<1x16xf32> to vector<16x16xf32>
    %567 = arith.addf %565, %566 : vector<16x16xf32>
    %cst_269 = arith.constant 0.000000e+00 : f32
    %568 = vector.broadcast %cst_269 : f32 to vector<16x16xf32>
    %569 = arith.cmpf ogt, %567, %568 : vector<16x16xf32>
    %cst_270 = arith.constant 2.000000e-01 : f32
    %570 = vector.broadcast %cst_270 : f32 to vector<16x16xf32>
    %571 = arith.mulf %570, %567 : vector<16x16xf32>
    %572 = arith.select %569, %567, %571 : vector<16x16xi1>, vector<16x16xf32>
    %573 = arith.addf %572, %0 : vector<16x16xf32>
    %cst_271 = arith.constant dense<0xFF800000> : vector<16xf32>
    %574 = vector.multi_reduction <maximumf>, %573, %cst_271 [1] : vector<16x16xf32> to vector<16xf32>
    %575 = vector.shape_cast %574 : vector<16xf32> to vector<16x1xf32>
    %576 = vector.broadcast %575 : vector<16x1xf32> to vector<16x16xf32>
    %577 = arith.subf %573, %576 : vector<16x16xf32>
    %578 = math.exp %577 : vector<16x16xf32>
    %cst_272 = arith.constant dense<0.000000e+00> : vector<16xf32>
    %579 = vector.multi_reduction <add>, %578, %cst_272 [1] : vector<16x16xf32> to vector<16xf32>
    %580 = vector.shape_cast %579 : vector<16xf32> to vector<16x1xf32>
    %581 = tpu.reciprocal %580 {approx = true} : vector<16x1xf32> -> vector<16x1xf32>
    %582 = vector.broadcast %581 : vector<16x1xf32> to vector<16x16xf32>
    %583 = arith.mulf %578, %582 : vector<16x16xf32>
    %cst_273 = arith.constant dense<0.000000e+00> : vector<16x256xf32>
    %584 = tpu.matmul %583, %553, %cst_273 {dimension_numbers = #tpu.dot_dimension_numbers<[1], [0], [0], [1], [0, 0, 1, 1], [], []>} : vector<16x16xf32>, vector<16x256xf32>, vector<16x256xf32> -> vector<16x256xf32>
    %c1_274 = arith.constant 1 : index
    %c0_275 = arith.constant 0 : index
    %585 = vector.load %arg22[%c1_274, %c0_275] : memref<4x256xf32, #tpu.memory_space<vmem>>, vector<1x256xf32>
    %586 = vector.broadcast %585 : vector<1x256xf32> to vector<16x256xf32>
    %587 = arith.mulf %584, %586 : vector<16x256xf32>
    %c1_276 = arith.constant 1 : index
    %c0_277 = arith.constant 0 : index
    %588 = vector.load %arg23[%c1_276, %c0_277] : memref<4x256xf32, #tpu.memory_space<vmem>>, vector<1x256xf32>
    %589 = vector.broadcast %588 : vector<1x256xf32> to vector<16x256xf32>
    %590 = arith.addf %587, %589 : vector<16x256xf32>
    %cst_278 = arith.constant 0.000000e+00 : f32
    %591 = vector.broadcast %cst_278 : f32 to vector<16x256xf32>
    %592 = arith.maximumf %590, %591 : vector<16x256xf32>
    %c2_279 = arith.constant 2 : index
    %c0_280 = arith.constant 0 : index
    %c0_281 = arith.constant 0 : index
    %593 = vector.load %arg19[%c2_279, %c0_280, %c0_281] : memref<4x128x256xf32, #tpu.memory_space<vmem>>, vector<1x128x256xf32>
    %594 = vector.shape_cast %593 : vector<1x128x256xf32> to vector<128x256xf32>
    %cst_282 = arith.constant dense<0.000000e+00> : vector<16x256xf32>
    %595 = tpu.matmul %508, %594, %cst_282 {dimension_numbers = #tpu.dot_dimension_numbers<[1], [0], [0], [1], [0, 0, 1, 1], [], []>} : vector<16x128xf32>, vector<128x256xf32>, vector<16x256xf32> -> vector<16x256xf32>
    %c2_283 = arith.constant 2 : index
    %c0_284 = arith.constant 0 : index
    %596 = vector.load %arg20[%c2_283, %c0_284] : memref<4x256xf32, #tpu.memory_space<vmem>>, vector<1x256xf32>
    %597 = vector.broadcast %596 : vector<1x256xf32> to vector<16x256xf32>
    %598 = arith.mulf %595, %597 : vector<16x256xf32>
    %cst_285 = arith.constant dense<0.000000e+00> : vector<16xf32>
    %599 = vector.multi_reduction <add>, %598, %cst_285 [1] : vector<16x256xf32> to vector<16xf32>
    %600 = vector.shape_cast %599 : vector<16xf32> to vector<16x1xf32>
    %c2_286 = arith.constant 2 : index
    %c0_287 = arith.constant 0 : index
    %601 = vector.load %arg21[%c2_286, %c0_287] : memref<4x256xf32, #tpu.memory_space<vmem>>, vector<1x256xf32>
    %602 = vector.broadcast %601 : vector<1x256xf32> to vector<16x256xf32>
    %603 = arith.mulf %595, %602 : vector<16x256xf32>
    %cst_288 = arith.constant dense<0.000000e+00> : vector<16xf32>
    %604 = vector.multi_reduction <add>, %603, %cst_288 [1] : vector<16x256xf32> to vector<16xf32>
    %605 = vector.shape_cast %604 : vector<16xf32> to vector<16x1xf32>
    %606 = tpu.transpose %600, [1, 0] : vector<16x1xf32> -> vector<1x16xf32>
    %607 = vector.broadcast %605 : vector<16x1xf32> to vector<16x16xf32>
    %608 = vector.broadcast %606 : vector<1x16xf32> to vector<16x16xf32>
    %609 = arith.addf %607, %608 : vector<16x16xf32>
    %cst_289 = arith.constant 0.000000e+00 : f32
    %610 = vector.broadcast %cst_289 : f32 to vector<16x16xf32>
    %611 = arith.cmpf ogt, %609, %610 : vector<16x16xf32>
    %cst_290 = arith.constant 2.000000e-01 : f32
    %612 = vector.broadcast %cst_290 : f32 to vector<16x16xf32>
    %613 = arith.mulf %612, %609 : vector<16x16xf32>
    %614 = arith.select %611, %609, %613 : vector<16x16xi1>, vector<16x16xf32>
    %615 = arith.addf %614, %0 : vector<16x16xf32>
    %cst_291 = arith.constant dense<0xFF800000> : vector<16xf32>
    %616 = vector.multi_reduction <maximumf>, %615, %cst_291 [1] : vector<16x16xf32> to vector<16xf32>
    %617 = vector.shape_cast %616 : vector<16xf32> to vector<16x1xf32>
    %618 = vector.broadcast %617 : vector<16x1xf32> to vector<16x16xf32>
    %619 = arith.subf %615, %618 : vector<16x16xf32>
    %620 = math.exp %619 : vector<16x16xf32>
    %cst_292 = arith.constant dense<0.000000e+00> : vector<16xf32>
    %621 = vector.multi_reduction <add>, %620, %cst_292 [1] : vector<16x16xf32> to vector<16xf32>
    %622 = vector.shape_cast %621 : vector<16xf32> to vector<16x1xf32>
    %623 = tpu.reciprocal %622 {approx = true} : vector<16x1xf32> -> vector<16x1xf32>
    %624 = vector.broadcast %623 : vector<16x1xf32> to vector<16x16xf32>
    %625 = arith.mulf %620, %624 : vector<16x16xf32>
    %cst_293 = arith.constant dense<0.000000e+00> : vector<16x256xf32>
    %626 = tpu.matmul %625, %595, %cst_293 {dimension_numbers = #tpu.dot_dimension_numbers<[1], [0], [0], [1], [0, 0, 1, 1], [], []>} : vector<16x16xf32>, vector<16x256xf32>, vector<16x256xf32> -> vector<16x256xf32>
    %c2_294 = arith.constant 2 : index
    %c0_295 = arith.constant 0 : index
    %627 = vector.load %arg22[%c2_294, %c0_295] : memref<4x256xf32, #tpu.memory_space<vmem>>, vector<1x256xf32>
    %628 = vector.broadcast %627 : vector<1x256xf32> to vector<16x256xf32>
    %629 = arith.mulf %626, %628 : vector<16x256xf32>
    %c2_296 = arith.constant 2 : index
    %c0_297 = arith.constant 0 : index
    %630 = vector.load %arg23[%c2_296, %c0_297] : memref<4x256xf32, #tpu.memory_space<vmem>>, vector<1x256xf32>
    %631 = vector.broadcast %630 : vector<1x256xf32> to vector<16x256xf32>
    %632 = arith.addf %629, %631 : vector<16x256xf32>
    %cst_298 = arith.constant 0.000000e+00 : f32
    %633 = vector.broadcast %cst_298 : f32 to vector<16x256xf32>
    %634 = arith.maximumf %632, %633 : vector<16x256xf32>
    %c3_299 = arith.constant 3 : index
    %c0_300 = arith.constant 0 : index
    %c0_301 = arith.constant 0 : index
    %635 = vector.load %arg19[%c3_299, %c0_300, %c0_301] : memref<4x128x256xf32, #tpu.memory_space<vmem>>, vector<1x128x256xf32>
    %636 = vector.shape_cast %635 : vector<1x128x256xf32> to vector<128x256xf32>
    %cst_302 = arith.constant dense<0.000000e+00> : vector<16x256xf32>
    %637 = tpu.matmul %508, %636, %cst_302 {dimension_numbers = #tpu.dot_dimension_numbers<[1], [0], [0], [1], [0, 0, 1, 1], [], []>} : vector<16x128xf32>, vector<128x256xf32>, vector<16x256xf32> -> vector<16x256xf32>
    %c3_303 = arith.constant 3 : index
    %c0_304 = arith.constant 0 : index
    %638 = vector.load %arg20[%c3_303, %c0_304] : memref<4x256xf32, #tpu.memory_space<vmem>>, vector<1x256xf32>
    %639 = vector.broadcast %638 : vector<1x256xf32> to vector<16x256xf32>
    %640 = arith.mulf %637, %639 : vector<16x256xf32>
    %cst_305 = arith.constant dense<0.000000e+00> : vector<16xf32>
    %641 = vector.multi_reduction <add>, %640, %cst_305 [1] : vector<16x256xf32> to vector<16xf32>
    %642 = vector.shape_cast %641 : vector<16xf32> to vector<16x1xf32>
    %c3_306 = arith.constant 3 : index
    %c0_307 = arith.constant 0 : index
    %643 = vector.load %arg21[%c3_306, %c0_307] : memref<4x256xf32, #tpu.memory_space<vmem>>, vector<1x256xf32>
    %644 = vector.broadcast %643 : vector<1x256xf32> to vector<16x256xf32>
    %645 = arith.mulf %637, %644 : vector<16x256xf32>
    %cst_308 = arith.constant dense<0.000000e+00> : vector<16xf32>
    %646 = vector.multi_reduction <add>, %645, %cst_308 [1] : vector<16x256xf32> to vector<16xf32>
    %647 = vector.shape_cast %646 : vector<16xf32> to vector<16x1xf32>
    %648 = tpu.transpose %642, [1, 0] : vector<16x1xf32> -> vector<1x16xf32>
    %649 = vector.broadcast %647 : vector<16x1xf32> to vector<16x16xf32>
    %650 = vector.broadcast %648 : vector<1x16xf32> to vector<16x16xf32>
    %651 = arith.addf %649, %650 : vector<16x16xf32>
    %cst_309 = arith.constant 0.000000e+00 : f32
    %652 = vector.broadcast %cst_309 : f32 to vector<16x16xf32>
    %653 = arith.cmpf ogt, %651, %652 : vector<16x16xf32>
    %cst_310 = arith.constant 2.000000e-01 : f32
    %654 = vector.broadcast %cst_310 : f32 to vector<16x16xf32>
    %655 = arith.mulf %654, %651 : vector<16x16xf32>
    %656 = arith.select %653, %651, %655 : vector<16x16xi1>, vector<16x16xf32>
    %657 = arith.addf %656, %0 : vector<16x16xf32>
    %cst_311 = arith.constant dense<0xFF800000> : vector<16xf32>
    %658 = vector.multi_reduction <maximumf>, %657, %cst_311 [1] : vector<16x16xf32> to vector<16xf32>
    %659 = vector.shape_cast %658 : vector<16xf32> to vector<16x1xf32>
    %660 = vector.broadcast %659 : vector<16x1xf32> to vector<16x16xf32>
    %661 = arith.subf %657, %660 : vector<16x16xf32>
    %662 = math.exp %661 : vector<16x16xf32>
    %cst_312 = arith.constant dense<0.000000e+00> : vector<16xf32>
    %663 = vector.multi_reduction <add>, %662, %cst_312 [1] : vector<16x16xf32> to vector<16xf32>
    %664 = vector.shape_cast %663 : vector<16xf32> to vector<16x1xf32>
    %665 = tpu.reciprocal %664 {approx = true} : vector<16x1xf32> -> vector<16x1xf32>
    %666 = vector.broadcast %665 : vector<16x1xf32> to vector<16x16xf32>
    %667 = arith.mulf %662, %666 : vector<16x16xf32>
    %cst_313 = arith.constant dense<0.000000e+00> : vector<16x256xf32>
    %668 = tpu.matmul %667, %637, %cst_313 {dimension_numbers = #tpu.dot_dimension_numbers<[1], [0], [0], [1], [0, 0, 1, 1], [], []>} : vector<16x16xf32>, vector<16x256xf32>, vector<16x256xf32> -> vector<16x256xf32>
    %c3_314 = arith.constant 3 : index
    %c0_315 = arith.constant 0 : index
    %669 = vector.load %arg22[%c3_314, %c0_315] : memref<4x256xf32, #tpu.memory_space<vmem>>, vector<1x256xf32>
    %670 = vector.broadcast %669 : vector<1x256xf32> to vector<16x256xf32>
    %671 = arith.mulf %668, %670 : vector<16x256xf32>
    %c3_316 = arith.constant 3 : index
    %c0_317 = arith.constant 0 : index
    %672 = vector.load %arg23[%c3_316, %c0_317] : memref<4x256xf32, #tpu.memory_space<vmem>>, vector<1x256xf32>
    %673 = vector.broadcast %672 : vector<1x256xf32> to vector<16x256xf32>
    %674 = arith.addf %671, %673 : vector<16x256xf32>
    %cst_318 = arith.constant 0.000000e+00 : f32
    %675 = vector.broadcast %cst_318 : f32 to vector<16x256xf32>
    %676 = arith.maximumf %674, %675 : vector<16x256xf32>
    %677 = tpu.concatenate %550, %592, %634, %676 in 1 : vector<16x256xf32>, vector<16x256xf32>, vector<16x256xf32>, vector<16x256xf32> -> vector<16x1024xf32>
    %c0_319 = arith.constant 0 : index
    %c0_320 = arith.constant 0 : index
    %c0_321 = arith.constant 0 : index
    %678 = vector.load %arg3[%c0_319, %c0_320, %c0_321] : memref<2x16x1xf32, #tpu.memory_space<vmem>>, vector<1x16x1xf32>
    %679 = vector.shape_cast %678 : vector<1x16x1xf32> to vector<16x1xf32>
    %680 = vector.broadcast %679 : vector<16x1xf32> to vector<16x1024xf32>
    %681 = arith.addf %677, %680 : vector<16x1024xf32>
    %cst_322 = arith.constant dense<0xFF800000> : vector<1024xf32>
    %682 = vector.multi_reduction <maximumf>, %681, %cst_322 [0] : vector<16x1024xf32> to vector<1024xf32>
    %683 = vector.shape_cast %682 : vector<1024xf32> to vector<1x1024xf32>
    %c1_323 = arith.constant 1 : index
    %c0_324 = arith.constant 0 : index
    %c0_325 = arith.constant 0 : index
    %684 = vector.load %arg3[%c1_323, %c0_324, %c0_325] : memref<2x16x1xf32, #tpu.memory_space<vmem>>, vector<1x16x1xf32>
    %685 = vector.shape_cast %684 : vector<1x16x1xf32> to vector<16x1xf32>
    %686 = vector.broadcast %685 : vector<16x1xf32> to vector<16x1024xf32>
    %687 = arith.addf %677, %686 : vector<16x1024xf32>
    %cst_326 = arith.constant dense<0xFF800000> : vector<1024xf32>
    %688 = vector.multi_reduction <maximumf>, %687, %cst_326 [0] : vector<16x1024xf32> to vector<1024xf32>
    %689 = vector.shape_cast %688 : vector<1024xf32> to vector<1x1024xf32>
    %690 = tpu.concatenate %683, %689 in 0 : vector<1x1024xf32>, vector<1x1024xf32> -> vector<2x1024xf32>
    %691 = arith.truncf %690 : vector<2x1024xf32> to vector<2x1024xbf16>
    %c0_327 = arith.constant 0 : index
    %c0_328 = arith.constant 0 : index
    %692 = vector.load %arg24[%c0_327, %c0_328] : memref<1024x512xbf16, #tpu.memory_space<vmem>>, vector<1024x512xbf16>
    %cst_329 = arith.constant dense<0.000000e+00> : vector<2x512xf32>
    %693 = tpu.matmul %691, %692, %cst_329 {dimension_numbers = #tpu.dot_dimension_numbers<[1], [0], [0], [1], [0, 0, 1, 1], [], []>} : vector<2x1024xbf16>, vector<1024x512xbf16>, vector<2x512xf32> -> vector<2x512xf32>
    %c0_330 = arith.constant 0 : index
    %c0_331 = arith.constant 0 : index
    %694 = vector.load %arg25[%c0_330, %c0_331] : memref<1x512xf32, #tpu.memory_space<vmem>>, vector<1x512xf32>
    %695 = vector.broadcast %694 : vector<1x512xf32> to vector<2x512xf32>
    %696 = arith.addf %693, %695 : vector<2x512xf32>
    %cst_332 = arith.constant 0.000000e+00 : f32
    %697 = vector.broadcast %cst_332 : f32 to vector<2x512xf32>
    %698 = arith.maximumf %696, %697 : vector<2x512xf32>
    %699 = arith.truncf %698 : vector<2x512xf32> to vector<2x512xbf16>
    %c0_333 = arith.constant 0 : index
    %c0_334 = arith.constant 0 : index
    %700 = vector.load %arg26[%c0_333, %c0_334] : memref<512x256xbf16, #tpu.memory_space<vmem>>, vector<512x256xbf16>
    %cst_335 = arith.constant dense<0.000000e+00> : vector<2x256xf32>
    %701 = tpu.matmul %699, %700, %cst_335 {dimension_numbers = #tpu.dot_dimension_numbers<[1], [0], [0], [1], [0, 0, 1, 1], [], []>} : vector<2x512xbf16>, vector<512x256xbf16>, vector<2x256xf32> -> vector<2x256xf32>
    %c0_336 = arith.constant 0 : index
    %c0_337 = arith.constant 0 : index
    %702 = vector.load %arg27[%c0_336, %c0_337] : memref<1x256xf32, #tpu.memory_space<vmem>>, vector<1x256xf32>
    %703 = vector.broadcast %702 : vector<1x256xf32> to vector<2x256xf32>
    %704 = arith.addf %701, %703 : vector<2x256xf32>
    %cst_338 = arith.constant 0.000000e+00 : f32
    %705 = vector.broadcast %cst_338 : f32 to vector<2x256xf32>
    %706 = arith.maximumf %704, %705 : vector<2x256xf32>
    %c0_339 = arith.constant 0 : index
    %c0_340 = arith.constant 0 : index
    %707 = vector.load %arg28[%c0_339, %c0_340] : memref<256x64xf32, #tpu.memory_space<vmem>>, vector<256x64xf32>
    %cst_341 = arith.constant dense<0.000000e+00> : vector<2x64xf32>
    %708 = tpu.matmul %706, %707, %cst_341 {dimension_numbers = #tpu.dot_dimension_numbers<[1], [0], [0], [1], [0, 0, 1, 1], [], []>} : vector<2x256xf32>, vector<256x64xf32>, vector<2x64xf32> -> vector<2x64xf32>
    %c0_342 = arith.constant 0 : index
    %c0_343 = arith.constant 0 : index
    %709 = vector.load %arg29[%c0_342, %c0_343] : memref<1x64xf32, #tpu.memory_space<vmem>>, vector<1x64xf32>
    %710 = vector.broadcast %709 : vector<1x64xf32> to vector<2x64xf32>
    %711 = arith.addf %708, %710 : vector<2x64xf32>
    %712 = arith.mulf %711, %711 : vector<2x64xf32>
    %cst_344 = arith.constant dense<0.000000e+00> : vector<2xf32>
    %713 = vector.multi_reduction <add>, %712, %cst_344 [1] : vector<2x64xf32> to vector<2xf32>
    %714 = vector.shape_cast %713 : vector<2xf32> to vector<2x1xf32>
    %cst_345 = arith.constant 1.000000e-24 : f32
    %715 = vector.broadcast %cst_345 : f32 to vector<2x1xf32>
    %716 = arith.maximumf %714, %715 : vector<2x1xf32>
    %717 = math.rsqrt %716 : vector<2x1xf32>
    %718 = vector.broadcast %717 : vector<2x1xf32> to vector<2x64xf32>
    %719 = arith.mulf %711, %718 : vector<2x64xf32>
    %c0_346 = arith.constant 0 : index
    %c0_347 = arith.constant 0 : index
    %720 = vector.load %arg30[%c0_346, %c0_347] : memref<2x64xf32, #tpu.memory_space<vmem>>, vector<2x64xf32>
    tpu.vector_store %arg30[%c0_346, %c0_347], %719 {strides = array<i32>} : memref<2x64xf32, #tpu.memory_space<vmem>>, vector<2x64xf32>,
    return
  }
  func.func @transform_0(%arg0: i32) -> (i32, i32) {
    %c0_i32 = arith.constant 0 : i32
    %c0_i32_0 = arith.constant 0 : i32
    %c0_i32_1 = arith.constant 0 : i32
    return %c0_i32, %c0_i32_0 : i32, i32
  }
  func.func @transform_1(%arg0: i32) -> (i32, i32) {
    %c0_i32 = arith.constant 0 : i32
    %c0_i32_0 = arith.constant 0 : i32
    %c0_i32_1 = arith.constant 0 : i32
    return %c0_i32, %c0_i32_0 : i32, i32
  }
  func.func @transform_2(%arg0: i32) -> (i32, i32, i32) {
    %c0_i32 = arith.constant 0 : i32
    %c0_i32_0 = arith.constant 0 : i32
    %c0_i32_1 = arith.constant 0 : i32
    %c0_i32_2 = arith.constant 0 : i32
    return %c0_i32, %c0_i32_0, %c0_i32_1 : i32, i32, i32
  }
  func.func @transform_3(%arg0: i32) -> (i32, i32, i32) {
    %c0_i32 = arith.constant 0 : i32
    %c0_i32_0 = arith.constant 0 : i32
    %c0_i32_1 = arith.constant 0 : i32
    %c0_i32_2 = arith.constant 0 : i32
    return %c0_i32, %c0_i32_0, %c0_i32_1 : i32, i32, i32
  }
  func.func @transform_4(%arg0: i32) -> (i32, i32) {
    %c0_i32 = arith.constant 0 : i32
    %c0_i32_0 = arith.constant 0 : i32
    %c0_i32_1 = arith.constant 0 : i32
    return %c0_i32, %c0_i32_0 : i32, i32
  }
  func.func @transform_5(%arg0: i32) -> (i32, i32) {
    %c0_i32 = arith.constant 0 : i32
    %c0_i32_0 = arith.constant 0 : i32
    %c0_i32_1 = arith.constant 0 : i32
    return %c0_i32, %c0_i32_0 : i32, i32
  }
  func.func @transform_6(%arg0: i32) -> (i32, i32) {
    %c0_i32 = arith.constant 0 : i32
    %c0_i32_0 = arith.constant 0 : i32
    %c0_i32_1 = arith.constant 0 : i32
    return %c0_i32, %c0_i32_0 : i32, i32
  }
  func.func @transform_7(%arg0: i32) -> (i32, i32) {
    %c0_i32 = arith.constant 0 : i32
    %c0_i32_0 = arith.constant 0 : i32
    %c0_i32_1 = arith.constant 0 : i32
    return %c0_i32, %c0_i32_0 : i32, i32
  }
  func.func @transform_8(%arg0: i32) -> (i32, i32, i32) {
    %c0_i32 = arith.constant 0 : i32
    %c0_i32_0 = arith.constant 0 : i32
    %c0_i32_1 = arith.constant 0 : i32
    %c0_i32_2 = arith.constant 0 : i32
    return %c0_i32, %c0_i32_0, %c0_i32_1 : i32, i32, i32
  }
  func.func @transform_9(%arg0: i32) -> (i32, i32) {
    %c0_i32 = arith.constant 0 : i32
    %c0_i32_0 = arith.constant 0 : i32
    %c0_i32_1 = arith.constant 0 : i32
    return %c0_i32, %c0_i32_0 : i32, i32
  }
  func.func @transform_10(%arg0: i32) -> (i32, i32) {
    %c0_i32 = arith.constant 0 : i32
    %c0_i32_0 = arith.constant 0 : i32
    %c0_i32_1 = arith.constant 0 : i32
    return %c0_i32, %c0_i32_0 : i32, i32
  }
  func.func @transform_11(%arg0: i32) -> (i32, i32) {
    %c0_i32 = arith.constant 0 : i32
    %c0_i32_0 = arith.constant 0 : i32
    %c0_i32_1 = arith.constant 0 : i32
    return %c0_i32, %c0_i32_0 : i32, i32
  }
  func.func @transform_12(%arg0: i32) -> (i32, i32) {
    %c0_i32 = arith.constant 0 : i32
    %c0_i32_0 = arith.constant 0 : i32
    %c0_i32_1 = arith.constant 0 : i32
    return %c0_i32, %c0_i32_0 : i32, i32
  }
  func.func @transform_13(%arg0: i32) -> (i32, i32, i32) {
    %c0_i32 = arith.constant 0 : i32
    %c0_i32_0 = arith.constant 0 : i32
    %c0_i32_1 = arith.constant 0 : i32
    %c0_i32_2 = arith.constant 0 : i32
    return %c0_i32, %c0_i32_0, %c0_i32_1 : i32, i32, i32
  }
  func.func @transform_14(%arg0: i32) -> (i32, i32) {
    %c0_i32 = arith.constant 0 : i32
    %c0_i32_0 = arith.constant 0 : i32
    %c0_i32_1 = arith.constant 0 : i32
    return %c0_i32, %c0_i32_0 : i32, i32
  }
  func.func @transform_15(%arg0: i32) -> (i32, i32) {
    %c0_i32 = arith.constant 0 : i32
    %c0_i32_0 = arith.constant 0 : i32
    %c0_i32_1 = arith.constant 0 : i32
    return %c0_i32, %c0_i32_0 : i32, i32
  }
  func.func @transform_16(%arg0: i32) -> (i32, i32) {
    %c0_i32 = arith.constant 0 : i32
    %c0_i32_0 = arith.constant 0 : i32
    %c0_i32_1 = arith.constant 0 : i32
    return %c0_i32, %c0_i32_0 : i32, i32
  }
  func.func @transform_17(%arg0: i32) -> (i32, i32) {
    %c0_i32 = arith.constant 0 : i32
    %c0_i32_0 = arith.constant 0 : i32
    %c0_i32_1 = arith.constant 0 : i32
    return %c0_i32, %c0_i32_0 : i32, i32
  }
  func.func @transform_18(%arg0: i32) -> (i32, i32, i32) {
    %c0_i32 = arith.constant 0 : i32
    %c0_i32_0 = arith.constant 0 : i32
    %c0_i32_1 = arith.constant 0 : i32
    %c0_i32_2 = arith.constant 0 : i32
    return %c0_i32, %c0_i32_0, %c0_i32_1 : i32, i32, i32
  }
  func.func @transform_19(%arg0: i32) -> (i32, i32) {
    %c0_i32 = arith.constant 0 : i32
    %c0_i32_0 = arith.constant 0 : i32
    %c0_i32_1 = arith.constant 0 : i32
    return %c0_i32, %c0_i32_0 : i32, i32
  }
  func.func @transform_20(%arg0: i32) -> (i32, i32) {
    %c0_i32 = arith.constant 0 : i32
    %c0_i32_0 = arith.constant 0 : i32
    %c0_i32_1 = arith.constant 0 : i32
    return %c0_i32, %c0_i32_0 : i32, i32
  }
  func.func @transform_21(%arg0: i32) -> (i32, i32) {
    %c0_i32 = arith.constant 0 : i32
    %c0_i32_0 = arith.constant 0 : i32
    %c0_i32_1 = arith.constant 0 : i32
    return %c0_i32, %c0_i32_0 : i32, i32
  }
  func.func @transform_22(%arg0: i32) -> (i32, i32) {
    %c0_i32 = arith.constant 0 : i32
    %c0_i32_0 = arith.constant 0 : i32
    %c0_i32_1 = arith.constant 0 : i32
    return %c0_i32, %c0_i32_0 : i32, i32
  }
  func.func @transform_23(%arg0: i32) -> (i32, i32) {
    %c0_i32 = arith.constant 0 : i32
    %c0_i32_0 = arith.constant 0 : i32
    %c0_i32_1 = arith.constant 0 : i32
    return %c0_i32, %c0_i32_0 : i32, i32
  }
  func.func @transform_24(%arg0: i32) -> (i32, i32) {
    %c0_i32 = arith.constant 0 : i32
    %c0_i32_0 = arith.constant 0 : i32
    %c0_i32_1 = arith.constant 0 : i32
    return %c0_i32, %c0_i32_0 : i32, i32
  }
  func.func @transform_25(%arg0: i32) -> (i32, i32) {
    %c0_i32 = arith.constant 0 : i32
    %c0_i32_0 = arith.constant 0 : i32
    %c0_i32_1 = arith.constant 0 : i32
    return %c0_i32, %c0_i32_0 : i32, i32
  }
  func.func @transform_26(%arg0: i32) -> (i32, i32) {
    %c0_i32 = arith.constant 0 : i32
    %c0_i32_0 = arith.constant 0 : i32
    %c0_i32_1 = arith.constant 0 : i32
    return %c0_i32, %c0_i32_0 : i32, i32
  }
  func.func @transform_27(%arg0: i32) -> (i32, i32) {
    %c0_i32 = arith.constant 0 : i32
    %c0_i32_0 = arith.constant 0 : i32
    %c0_i32_1 = arith.constant 0 : i32
    return %c0_i32, %c0_i32_0 : i32, i32
  }
  func.func @transform_28(%arg0: i32) -> (i32, i32) {
    %c0_i32 = arith.constant 0 : i32
    %c0_i32_0 = arith.constant 0 : i32
    %c0_i32_1 = arith.constant 0 : i32
    return %c0_i32, %c0_i32_0 : i32, i32
  }
  func.func @transform_29(%arg0: i32) -> (i32, i32) {
    %c0_i32 = arith.constant 0 : i32
    %c0_i32_0 = arith.constant 0 : i32
    %c0_i32_1 = arith.constant 0 : i32
    return %c0_i32, %c0_i32_0 : i32, i32
  }
}

</mosaic_0001>

<bundles_post_ra>
// kernel: graphnet_gat_forward.1
= control target key start
LH: loop header
LB: loop body
LE: loop exit
PB: predicated region body
PF: predicated region fallthrough
CT: control target
= control target key end

     0   :  { %s7935_s6 = smov 1   ;;  %s7936_s10 = smov 2   ;;  %s9078_s0 = inlined_call_operand.smem [shape: u32[30], index: -1, kind: input, shape index: {}] }
   0x1   :  { %s7984_s5 = sld [smem:[%s9078_s0]]   ;;  %s7937_s14 = smov 3  }
   0x2   :  { %s7989_s9 = sld [smem:[%s9078_s0 + %s7935_s6]]   ;;  %s7938_s18 = smov 4  }
   0x3   :  { %s7994_s13 = sld [smem:[%s9078_s0 + %s7936_s10]]   ;;  %s7939_s22 = smov 5  }
   0x4   :  { %s7999_s17 = sld [smem:[%s9078_s0 + %s7937_s14]]   ;;  %s7940_s26 = smov 6  }
   0x5   :  { %s8004_s21 = sld [smem:[%s9078_s0 + %s7938_s18]]   ;;  %s7941_s30 = smov 7  }
   0x6   :  { %s8009_s25 = sld [smem:[%s9078_s0 + %s7939_s22]]   ;;  %s7942_s4 = smov 8  }
   0x7   :  { %s8014_s29 = sld [smem:[%s9078_s0 + %s7940_s26]]   ;;  %s7943_s10 = smov 9  }
   0x8   :  { %s8019_s3 = sld [smem:[%s9078_s0 + %s7941_s30]]   ;;  %s7944_s15 = smov 10  }
   0x9   :  { %9091 = sst [smem:[#allocation11_spill]] %s7994_s13  ;;  %s7945_s20 = smov 11  }
   0xa   :  { %s8024_s8 = sld [smem:[%s9078_s0 + %s7942_s4]]   ;;  %s7946_s26 = smov 12  }
   0xb   :  { %s8029_s14 = sld [smem:[%s9078_s0 + %s7943_s10]]   ;;  %s7947_s1 = smov 13  }
   0xc   :  { %s8034_s19 = sld [smem:[%s9078_s0 + %s7944_s15]]   ;;  %s7948_s7 = smov 14  }
   0xd   :  { %s8039_s24 = sld [smem:[%s9078_s0 + %s7945_s20]]   ;;  %s7949_s15 = smov 15  }
   0xe   :  { %s8044_s30 = sld [smem:[%s9078_s0 + %s7946_s26]]   ;;  %s7950_s22 = smov 16  }
   0xf   :  { %s8049_s6 = sld [smem:[%s9078_s0 + %s7947_s1]]   ;;  %s7951_s28 = smov 17  }
  0x10   :  { %s8054_s12 = sld [smem:[%s9078_s0 + %s7948_s7]]   ;;  %s7952_s7 = smov 18  }
  0x11   :  { %s8059_s20 = sld [smem:[%s9078_s0 + %s7949_s15]]   ;;  %s7953_s15 = smov 19  }
  0x12   :  { %s8064_s27 = sld [smem:[%s9078_s0 + %s7950_s22]]   ;;  %s7954_s22 = smov 20  }
  0x13   :  { %s8069_s4 = sld [smem:[%s9078_s0 + %s7951_s28]]   ;;  %s7955_s28 = smov 21  }
  0x14   :  { %s8074_s13 = sld [smem:[%s9078_s0 + %s7952_s7]]   ;;  %s7956_s7 = smov 22  }
  0x15   :  { %9092 = sst [smem:[#allocation12_spill]] %s8049_s6 }
  0x16   :  { %9093 = sst [smem:[#allocation13_spill]] %s8054_s12 }
  0x17   :  { %9094 = sst [smem:[#allocation14_spill]] %s8059_s20 }
  0x18   :  { %9095 = sst [smem:[#allocation15_spill]] %s8064_s27 }
  0x19   :  { %9096 = sst [smem:[#allocation16_spill]] %s8069_s4 }
  0x1a   :  { %s8079_s20 = sld [smem:[%s9078_s0 + %s7953_s15]]   ;;  %s7957_s15 = smov 23  }
  0x1b   :  { %s8084_s27 = sld [smem:[%s9078_s0 + %s7954_s22]]   ;;  %s7958_s22 = smov 24  }
  0x1c   :  { %s8089_s4 = sld [smem:[%s9078_s0 + %s7955_s28]]   ;;  %s7959_s28 = smov 25  }
  0x1d   :  { %s8094_s12 = sld [smem:[%s9078_s0 + %s7956_s7]]   ;;  %s7960_s7 = smov 26  }
  0x20   :  { %9097 = sst [smem:[#allocation17_spill]] %s8079_s20 }
  0x21   :  { %9098 = sst [smem:[#allocation18_spill]] %s8084_s27 }
  0x22   :  { %9099 = sst [smem:[#allocation19_spill]] %s8089_s4 }
  0x23   :  { %9100 = sst [smem:[#allocation20_spill]] %s8094_s12 }
  0x24   :  { %s8099_s20 = sld [smem:[%s9078_s0 + %s7957_s15]]   ;;  %s7961_s15 = smov 27  }
  0x25   :  { %s8104_s27 = sld [smem:[%s9078_s0 + %s7958_s22]]   ;;  %s7962_s22 = smov 28  }
  0x26   :  { %s8109_s4 = sld [smem:[%s9078_s0 + %s7959_s28]]   ;;  %s7963_s28 = smov 29  }
  0x27   :  { %s8114_s12 = sld [smem:[%s9078_s0 + %s7960_s7]]  }
  0x28   :  { %s8119_s6 = sld [smem:[%s9078_s0 + %s7961_s15]]  }
  0x2b   :  { %9101 = sst [smem:[#allocation21_spill]] %s8104_s27 }
  0x2c   :  { %9102 = sst [smem:[#allocation22_spill]] %s8109_s4 }
  0x2d   :  { %s8124_s27 = sld [smem:[%s9078_s0 + %s7962_s22]]  }
  0x2e   :  { %s8129_s4 = sld [smem:[%s9078_s0 + %s7963_s28]]  }
  0x2f   :  { %64 = vsyncpa [#allocation3], 0 }
  0x30   :  { %65 = vsyncpa [#allocation6], 0 }
  0x31   :  { %66 = vsyncpa [#allocation4], 0  ;;  %s107_s7 = sshll.u32 %s8074_s13, 4  ;;  %s7964_s10 = smov [#allocation2]   ;;  %s108_s7 = int_to_ptr.hbm [resolvable:$true] %s107_s7 }
  0x32   :  { %s109_s11 = sshll.u32 %s7964_s10, 4  ;;  %s128_s15 = sshll.u32 %s8099_s20, 4  ;;  %s110_s11 = int_to_ptr.vmem [resolvable:$true] %s109_s11  ;;  %s129_s15 = int_to_ptr.hbm [resolvable:$true] %s128_s15 }
  0x33   :  { %s7857_s16 = sshra.s32 %s108_s7, 4  ;;  %s7861_s22 = scalar_lea.hbm %s8074_s13, 1024  ;;  %s7858_s16 = int_to_ptr.hbm [resolvable:$true] %s7857_s16 }
  0x34   :  { %s7859_s18 = scalar_lea.hbm %s7858_s16, 1024  ;;  %p7862_p1 = scmp.lt.s32.totalorder %s7858_s16, %s8074_s13 }
  0x35   :  { %p7860_p0 = scmp.ne.s32.totalorder %s7858_s16, %s7859_s18  ;;  %p7863_p2 = scmp.lt.s32.totalorder %s7861_s22, %s7859_s18 }
  0x37   :  { %p7864_p3 = por %p7863_p2, %p7862_p1 }
  0x39   :  { %p7865_p4 = pnand %p7864_p3, %p7860_p0 }
  0x3b   :  { %7868 = shalt.err (!%p7865_p4)
}
  0x3c   :  { %s7965_s0 = smov 256   ;;  %s7966_s23 = smov 16  }
  0x3d   :  { %115 = dma.hbm_to_vmem [thread:$0]  %s108_s7, 16384, %s110_s11, [#allocation3], %s7965_s0, %s7965_s0, %s7966_s23  }
  0x3e   :  { %s7967_s26 = smov [#allocation5]   ;;  %s7881_s1 = sshra.s32 %s129_s15, 4  ;;  %s7882_s1 = int_to_ptr.hbm [resolvable:$true] %s7881_s1 }
  0x3f   :  { %s130_s28 = sshll.u32 %s7967_s26, 4  ;;  %s7883_s2 = scalar_lea.hbm %s7882_s1, 2048  ;;  %s131_s28 = int_to_ptr.vmem [resolvable:$true] %s130_s28 }
  0x40   :  { %p7884_p5 = scmp.ne.s32.totalorder %s7882_s1, %s7883_s2  ;;  %s7885_s10 = scalar_lea.hbm %s8099_s20, 2048 }
  0x41   :  { %p7886_p6 = scmp.lt.s32.totalorder %s7882_s1, %s8099_s20  ;;  %p7887_p7 = scmp.lt.s32.totalorder %s7885_s10, %s7883_s2 }
  0x43   :  { %p7888_p8 = por %p7887_p7, %p7886_p6 }
  0x45   :  { %p7889_p9 = pnand %p7888_p8, %p7884_p5 }
  0x47   :  { %7892 = shalt.err (!%p7889_p9)
}
  0x48   :  { %136 = dma.hbm_to_vmem [thread:$0]  %s129_s15, 32768, %s131_s28, [#allocation6], %s7965_s0, %s7965_s0, %s7966_s23  }
  0x49   :  { %7929 = dma.done.wait [#allocation3], 16384  }
  0x4a   :  { %7930 = vsyncadd [#allocation3], 4294950912 }
  0x4b   :  { %7931 = dma.done.wait [#allocation6], 32768  }
  0x4c   :  { %7932 = vsyncadd [#allocation6], 4294934528  ;;  %vm160_vm0 = vcmask 64512   ;;  %v159_v0 = vld [vmem:[%s7999_s17] sm:$0xff]  ;;  %v8146_v2 = vld [vmem:[%s7984_s5 + $0x8] sm:$0xff]  ;;  %vm253_vm3 = vcmask 130048  }
  0x4d   :  { %v8141_v1 = vld [vmem:[%s7984_s5] sm:$0xff]  ;;  %182 = vmatpush.msra.mxu1 %v159_v0  ;;  %v5915_v17 = vld [vmem:[%s7999_s17 + $0x8] sm:$0xff]  ;;  %v5920_v18 = vld [vmem:[%s7999_s17 + $0x10] sm:$0xff]  ;;  %s7968_s5 = smov 8   ;;  %s7969_s13 = smov 24   ;;  %vm790_vm10 = vcmask 195584  }
  0x4e   :  { %5911 = vmatmul.msk.f32.vlgmr.msra.gmra.mxu1 %vm160_vm0, %v8141_v1  ;;  %v7673_v3 = vld [vmem:[%s8009_s25] ss:$0 sm:$0xff]  ;;  %332 = vmatpush.msra.mxu3 %v5915_v17  ;;  %v8167_v25 = vld [vmem:[%s7989_s9 + $0x8] sm:$0xff]  ;;  %v7675_v35 = vld [vmem:[%s8004_s21 + $0x1] ss:$0 sm:$0xff]  ;;  %vm797_vm11 = vcmask 261120  }
  0x4f   :  { %v7674_v4 = vld [vmem:[%s8004_s21] ss:$0 sm:$0xff]  ;;  %5916 = vmatmul.msk.f32.vlgmr.msra.gmra.mxu3 %vm160_vm0, %v8141_v1  ;;  %481 = vmatpush.msra.mxu0 %v5920_v18  ;;  %v7676_v41 = vld [vmem:[%s8004_s21 + $0x2] ss:$0 sm:$0xff]  ;;  %v7677_v46 = vld [vmem:[%s8009_s25 + $0x1] ss:$0 sm:$0xff] }
  0x50   :  { %5921 = vmatmul.msk.f32.vlgmr.msra.gmra.mxu0 %vm160_vm0, %v8141_v1  ;;  %v8170_v26 = vld [vmem:[%s7989_s9] sm:$0xff]  ;;  %s9109_s20 = sld [smem:[#allocation17_spill]]  ;;  %s7921_s0 = scalar_lea.hbm %s8129_s4, 2 }
  0x51   :  { %v7678_v56 = vld [vmem:[%s8009_s25 + $0x2] ss:$0 sm:$0xff]  ;;  %s9110_s7 = sld [smem:[#allocation11_spill]] }
  0x52   :  { %s9112_s11 = sld [smem:[#allocation20_spill]] }
  0x53   :  { %s9113_s15 = sld [smem:[#allocation21_spill]] }
  0x54   :  { %s9114_s16 = sld [smem:[#allocation22_spill]] }
  0x56   :  { %5912 = vmatmul.msk.f32.gmra.mxu1 %vm160_vm0, %v8146_v2 }
  0x57   :  { %5917 = vmatmul.msk.f32.gmra.mxu3 %vm160_vm0, %v8146_v2 }
  0x58   :  { %5922 = vmatmul.msk.f32.gmra.mxu0 %vm160_vm0, %v8146_v2 }
  0xcb   :  { %v184_v5 = vpop.f32.mrf.mxu1 }
  0xcc   :  { %v202_v6 = vmul.f32 %v7673_v3, %v184_v5  ;;  %v192_v7 = vmul.f32 %v7674_v4, %v184_v5 }
  0xcd   :  { %v483_v40 = vpop.f32.mrf.mxu0 }
  0xce   :  { %v204_v8 = vsel %vm160_vm0, %v202_v6, 0.0  ;;  %v194_v9 = vsel %vm160_vm0, %v192_v7, 0.0  ;;  %v491_v42 = vmul.f32 %v7676_v41, %v483_v40  ;;  %v501_v58 = vmul.f32 %v7678_v56, %v483_v40 }
  0xcf   :  { %205 = vadd.xlane.f32.xlu1 %v204_v8  ;;  %195 = vadd.xlane.f32.xlu0 %v194_v9 }
  0xd0   :  { %v493_v43 = vsel %vm160_vm0, %v491_v42, 0.0  ;;  %v503_v63 = vsel %vm160_vm0, %v501_v58, 0.0 }
  0xd2   :  { %v334_v36 = vpop.f32.mrf.mxu3 }
  0xd3   :  { %v187_v10 = vpop.f32.mrf.mxu1  ;;  %v342_v37 = vmul.f32 %v7675_v35, %v334_v36  ;;  %v352_v54 = vmul.f32 %v7677_v46, %v334_v36 }
  0xd4   :  { %296 = vmatpush.msrb.mxu1 %v187_v10  ;;  %v203_v11 = vmul.f32 %v7673_v3, %v187_v10  ;;  %v193_v12 = vmul.f32 %v7674_v4, %v187_v10  ;;  %v5925_v4 = vld [vmem:[%s7999_s17 + $0x18] sm:$0xff]  ;;  %s9103_s17 = sld [smem:[#allocation12_spill]] }
  0xd5   :  { %v344_v38 = vsel %vm160_vm0, %v342_v37, 0.0  ;;  %v486_v44 = vpop.f32.mrf.mxu0  ;;  %v354_v55 = vsel %vm160_vm0, %v352_v54, 0.0 }
  0xd6   :  { %297 = vmatpush.msrb.mxu1 %v184_v5  ;;  %v207_v13 = vsel %vm160_vm0, %v203_v11, 0.0  ;;  %v197_v14 = vsel %vm160_vm0, %v193_v12, 0.0  ;;  %v492_v45 = vmul.f32 %v7676_v41, %v486_v44  ;;  %594 = vmatpush.msra.mxu2 %v486_v44 }
  0xd7   :  { %208 = vadd.xlane.f32.xlu1 %v207_v13  ;;  %198 = vadd.xlane.f32.xlu0 %v197_v14  ;;  %v502_v14 = vmul.f32 %v7678_v56, %v486_v44 }
  0xd8   :  { %v496_v49 = vsel %vm160_vm0, %v492_v45, 0.0  ;;  %595 = vmatpush.msra.mxu2 %v483_v40  ;;  %630 = vmatpush.msra.mxu1 %v5925_v4 }
  0xda   :  { %v337_v39 = vpop.f32.mrf.mxu3 }
  0xdb   :  { %445 = vmatpush.msrb.mxu3 %v337_v39  ;;  %v343_v62 = vmul.f32 %v7675_v35, %v337_v39  ;;  %v353_v7 = vmul.f32 %v7677_v46, %v337_v39 }
  0xdd   :  { %446 = vmatpush.msrb.mxu3 %v334_v36  ;;  %v347_v0 = vsel %vm160_vm0, %v343_v62, 0.0  ;;  %v357_v8 = vsel %vm160_vm0, %v353_v7, 0.0 }
 0x142   :  { %v196_v15 = vpop.xlane.xlu0 %195  ;;  %v206_v19 = vpop.xlane.xlu1 %205 }
 0x143   :  { %210 = vxpose.xlu2.b32.start [1/2] (short) (narrow) %v196_v15, 8  ;;  %v506_v15 = vsel %vm160_vm0, %v502_v14, 0.0 }
 0x14a   :  { %v199_v16 = vpop.xlane.xlu0 %198  ;;  %v209_v22 = vpop.xlane.xlu1 %208 }
 0x14b   :  { %211 = vxpose.xlu2.b32.end [2/2] (short) (narrow) %v199_v16, 8 }
 0x1dc   :  { %v226_v20 = vpop.trf.xlu2 }
 0x1dd   :  { %v242_v21 = vperm.slane %v226_v20, 0 }
 0x1df   :  { %v243_v23 = vadd.f32 %v242_v21, %v206_v19  ;;  %v244_v24 = vadd.f32 %v242_v21, %v209_v22  ;;  %v7681_v21 = vld [vmem:[%s8004_s21 + $0x3] ss:$0 sm:$0xff]  ;;  %s7970_s21 = smov 32  }
 0x1e1   :  { %v247_v27 = vmul.f32 0.2, %v243_v23  ;;  %v248_v28 = vmul.f32 0.2, %v244_v24  ;;  %vm246_vm1 = vcmp.gt.f32.partialorder %v244_v24, 0.0  ;;  %vm245_vm2 = vcmp.gt.f32.partialorder %v243_v23, 0.0 }
 0x1e3   :  { %v250_v29 = vsel %vm246_vm1, %v244_v24, %v248_v28  ;;  %v249_v30 = vsel %vm245_vm2, %v243_v23, %v247_v27  ;;  %v7682_v27 = vld [vmem:[%s8009_s25 + $0x3] ss:$0 sm:$0xff]  ;;  %s7971_s25 = smov 48  }
 0x1e4   :  { %v252_v31 = vadd.f32 %v250_v29, %v8167_v25  ;;  %v251_v32 = vadd.f32 %v249_v30, %v8170_v26 }
 0x1e6   :  { %v257_v33 = vsel %vm253_vm3, %v252_v31, -inf  ;;  %v254_v34 = vsel %vm253_vm3, %v251_v32, -inf }
 0x1e7   :  { %258 = vmax.xlane.f32.xlu1 %v257_v33  ;;  %255 = vmax.xlane.f32.xlu0 %v254_v34 }
 0x1ef   :  { %345 = vadd.xlane.f32.xlu1 %v344_v38 }
 0x1f7   :  { %494 = vadd.xlane.f32.xlu1 %v493_v43 }
 0x1ff   :  { %497 = vadd.xlane.f32.xlu1 %v496_v49 }
 0x207   :  { %355 = vadd.xlane.f32.xlu1 %v354_v55 }
 0x20f   :  { %504 = vadd.xlane.f32.xlu1 %v503_v63 }
 0x25a   :  { %v259_v47 = vpop.xlane.xlu1 %258  ;;  %v256_v48 = vpop.xlane.xlu0 %255 }
 0x25b   :  { %v261_v50 = vsub.f32 %v252_v31, %v259_v47  ;;  %v260_v51 = vsub.f32 %v251_v32, %v256_v48 }
 0x25d   :  { %v264_v52 = vmul.f32 1.442695, %v261_v50  ;;  %v262_v53 = vmul.f32 1.442695, %v260_v51 }
 0x25f   :  { %7722 = vpow2.f32 %v264_v52 }
 0x260   :  { %7724 = vpow2.f32 %v262_v53 }
 0x262   :  { %v346_v3 = vpop.xlane.xlu1 %345 }
 0x263   :  { %360 = vxpose.xlu1.b32.start [1/2] (short) (narrow) %v346_v3, 8 }
 0x265   :  { %v7723_v57 = vpop.eup %7722 }
 0x266   :  { %v7725_v59 = vpop.eup %7724  ;;  %v269_v60 = vsel %vm253_vm3, %v7723_v57, 0.0 }
 0x267   :  { %270 = vadd.xlane.f32.xlu0 %v269_v60  ;;  %v266_v61 = vsel %vm253_vm3, %v7725_v59, 0.0 }
 0x268   :  { %267 = vadd.xlane.f32.xlu2 %v266_v61 }
 0x26a   :  { %v495_v16 = vpop.xlane.xlu1 %494 }
 0x26f   :  { %348 = vadd.xlane.f32.xlu0 %v347_v0 }
 0x272   :  { %v498_v17 = vpop.xlane.xlu1 %497 }
 0x277   :  { %358 = vadd.xlane.f32.xlu0 %v357_v8 }
 0x27a   :  { %v356_v20 = vpop.xlane.xlu1 %355 }
 0x27f   :  { %507 = vadd.xlane.f32.xlu0 %v506_v15 }
 0x2da   :  { %v271_v5 = vpop.xlane.xlu0 %270 }
 0x2db   :  { %v268_v6 = vpop.xlane.xlu2 %267 }
 0x2dc   :  { %7726 = vrcp.f32 %v268_v6 }
 0x2dd   :  { %7728 = vrcp.f32 %v271_v5 }
 0x2e2   :  { %v7727_v9 = vpop.eup %7726  ;;  %v349_v10 = vpop.xlane.xlu0 %348 }
 0x2e3   :  { %361 = vxpose.xlu1.b32.end [2/2] (short) (narrow) %v349_v10, 8  ;;  %v274_v11 = vmul.f32 %v7727_v9, %v7725_v59  ;;  %v7729_v12 = vpop.eup %7728 }
 0x2e4   :  { %v275_v13 = vmul.f32 %v7729_v12, %v7723_v57 }
 0x2e5   :  { %5913 = vmatmul.msk.f32.vlgmr.msrb.gmra.mxu1 %vm253_vm3, %v274_v11 }
 0x2ea   :  { %v359_v41 = vpop.xlane.xlu0 %358 }
 0x2ed   :  { %5914 = vmatmul.msk.f32.gmra.mxu1 %vm253_vm3, %v275_v13 }
 0x2f2   :  { %v508_v42 = vpop.xlane.xlu0 %507 }
 0x2f5   :  { %5926 = vmatmul.msk.f32.vlgmr.msra.gmra.mxu1 %vm160_vm0, %v8141_v1  ;;  %v505_v1 = vpop.xlane.xlu1 %504 }
 0x2fd   :  { %5927 = vmatmul.msk.f32.gmra.mxu1 %vm160_vm0, %v8146_v2 }
 0x362   :  { %v8197_v18 = vpop.f32.mrf.mxu1 }
 0x36a   :  { %v8199_v19 = vpop.f32.mrf.mxu1 }
 0x372   :  { %v632_v22 = vpop.f32.mrf.mxu1 }
 0x373   :  { %v640_v23 = vmul.f32 %v7681_v21, %v632_v22  ;;  %v650_v2 = vmul.f32 %v7682_v27, %v632_v22 }
 0x375   :  { %v642_v24 = vsel %vm160_vm0, %v640_v23, 0.0  ;;  %v652_v29 = vsel %vm160_vm0, %v650_v2, 0.0 }
 0x376   :  { %643 = vadd.xlane.f32.xlu0 %v642_v24 }
 0x37a   :  { %v635_v28 = vpop.f32.mrf.mxu1 }
 0x37b   :  { %743 = vmatpush.msra.mxu3 %v635_v28  ;;  %v641_v31 = vmul.f32 %v7681_v21, %v635_v28  ;;  %v651_v39 = vmul.f32 %v7682_v27, %v635_v28 }
 0x37d   :  { %744 = vmatpush.msra.mxu3 %v632_v22  ;;  %v645_v34 = vsel %vm160_vm0, %v641_v31, 0.0  ;;  %v655_v40 = vsel %vm160_vm0, %v651_v39, 0.0 }
 0x37e   :  { %653 = vadd.xlane.f32.xlu0 %v652_v29 }
 0x37f   :  { %v376_v30 = vpop.trf.xlu1 }
 0x380   :  { %v392_v32 = vperm.slane %v376_v30, 0 }
 0x382   :  { %v393_v33 = vadd.f32 %v392_v32, %v356_v20  ;;  %v394_v46 = vadd.f32 %v392_v32, %v359_v41 }
 0x384   :  { %vm395_vm4 = vcmp.gt.f32.partialorder %v393_v33, 0.0  ;;  %v397_v35 = vmul.f32 0.2, %v393_v33  ;;  %v398_v48 = vmul.f32 0.2, %v394_v46  ;;  %vm396_vm5 = vcmp.gt.f32.partialorder %v394_v46, 0.0 }
 0x386   :  { %646 = vadd.xlane.f32.xlu0 %v645_v34  ;;  %v399_v36 = vsel %vm395_vm4, %v393_v33, %v397_v35  ;;  %v400_v50 = vsel %vm396_vm5, %v394_v46, %v398_v48  ;;  %vm1435_vm5 = vcmask 392192  }
 0x387   :  { %v401_v37 = vadd.f32 %v399_v36, %v8170_v26  ;;  %v402_v52 = vadd.f32 %v400_v50, %v8167_v25 }
 0x389   :  { %v403_v38 = vsel %vm253_vm3, %v401_v37, -inf  ;;  %v406_v53 = vsel %vm253_vm3, %v402_v52, -inf }
 0x38a   :  { %404 = vmax.xlane.f32.xlu1 %v403_v38 }
 0x38e   :  { %656 = vadd.xlane.f32.xlu0 %v655_v40 }
 0x3b7   :  { %509 = vxpose.xlu0.b32.start [1/2] (short) (narrow) %v495_v16, 8 }
 0x3bf   :  { %510 = vxpose.xlu0.b32.end [2/2] (short) (narrow) %v498_v17, 8 }
 0x3e9   :  { %v644_v43 = vpop.xlane.xlu0 %643 }
 0x3ea   :  { %658 = vxpose.xlu2.b32.start [1/2] (short) (narrow) %v644_v43, 8 }
 0x3f1   :  { %v654_v44 = vpop.xlane.xlu0 %653 }
 0x3f9   :  { %v647_v45 = vpop.xlane.xlu0 %646 }
 0x3fa   :  { %659 = vxpose.xlu2.b32.end [2/2] (short) (narrow) %v647_v45, 8 }
 0x3fd   :  { %v405_v47 = vpop.xlane.xlu1 %404 }
 0x3fe   :  { %v409_v49 = vsub.f32 %v401_v37, %v405_v47 }
 0x400   :  { %v411_v51 = vmul.f32 1.442695, %v409_v49 }
 0x401   :  { %v657_v56 = vpop.xlane.xlu0 %656 }
 0x402   :  { %7730 = vpow2.f32 %v411_v51 }
 0x408   :  { %v7731_v54 = vpop.eup %7730 }
 0x409   :  { %v415_v55 = vsel %vm253_vm3, %v7731_v54, 0.0 }
 0x430   :  { %407 = vmax.xlane.f32.xlu0 %v406_v53  ;;  %v7684_v53 = vld [vmem:[%s8019_s3 + $0x1] ss:$0 sm:$0xff] }
 0x438   :  { %416 = vadd.xlane.f32.xlu0 %v415_v55 }
 0x45b   :  { %v525_v57 = vpop.trf.xlu0 }
 0x45c   :  { %v541_v58 = vperm.slane %v525_v57, 0 }
 0x45e   :  { %v542_v59 = vadd.f32 %v541_v58, %v505_v1  ;;  %v543_v60 = vadd.f32 %v541_v58, %v508_v42 }
 0x460   :  { %vm545_vm6 = vcmp.gt.f32.partialorder %v543_v60, 0.0  ;;  %v547_v61 = vmul.f32 0.2, %v543_v60  ;;  %vm544_vm7 = vcmp.gt.f32.partialorder %v542_v59, 0.0  ;;  %v546_v62 = vmul.f32 0.2, %v542_v59 }
 0x462   :  { %v549_v63 = vsel %vm545_vm6, %v543_v60, %v547_v61  ;;  %v548_v3 = vsel %vm544_vm7, %v542_v59, %v546_v62  ;;  %vm1446_vm6 = vcmask 523264  }
 0x463   :  { %v551_v0 = vadd.f32 %v549_v63, %v8167_v25  ;;  %v550_v5 = vadd.f32 %v548_v3, %v8170_v26 }
 0x465   :  { %v555_v4 = vsel %vm253_vm3, %v551_v0, -inf  ;;  %v552_v6 = vsel %vm253_vm3, %v550_v5, -inf }
 0x466   :  { %556 = vmax.xlane.f32.xlu1 %v555_v4 }
 0x46b   :  { %553 = vmax.xlane.f32.xlu2 %v552_v6 }
 0x48b   :  { %v674_v7 = vpop.trf.xlu2 }
 0x48c   :  { %v690_v8 = vperm.slane %v674_v7, 0 }
 0x48e   :  { %v691_v9 = vadd.f32 %v690_v8, %v654_v44  ;;  %v692_v10 = vadd.f32 %v690_v8, %v657_v56 }
 0x490   :  { %v695_v11 = vmul.f32 0.2, %v691_v9  ;;  %vm693_vm8 = vcmp.gt.f32.partialorder %v691_v9, 0.0  ;;  %v696_v12 = vmul.f32 0.2, %v692_v10  ;;  %vm694_vm9 = vcmp.gt.f32.partialorder %v692_v10, 0.0 }
 0x492   :  { %v697_v13 = vsel %vm693_vm8, %v691_v9, %v695_v11  ;;  %v698_v16 = vsel %vm694_vm9, %v692_v10, %v696_v12  ;;  %v7685_v12 = vld [vmem:[%s8014_s29 + $0x2] ss:$0 sm:$0xff] }
 0x493   :  { %v699_v14 = vadd.f32 %v697_v13, %v8170_v26  ;;  %v700_v17 = vadd.f32 %v698_v16, %v8167_v25  ;;  %v7686_v13 = vld [vmem:[%s8019_s3 + $0x2] ss:$0 sm:$0xff] }
 0x495   :  { %v701_v15 = vsel %vm253_vm3, %v699_v14, -inf  ;;  %v704_v20 = vsel %vm253_vm3, %v700_v17, -inf }
 0x496   :  { %702 = vmax.xlane.f32.xlu1 %v701_v15 }
 0x49e   :  { %705 = vmax.xlane.f32.xlu1 %v704_v20 }
 0x4a3   :  { %v408_v21 = vpop.xlane.xlu0 %407 }
 0x4a4   :  { %v410_v22 = vsub.f32 %v402_v52, %v408_v21  ;;  %v7683_v52 = vld [vmem:[%s8014_s29 + $0x1] ss:$0 sm:$0xff] }
 0x4a6   :  { %v413_v23 = vmul.f32 1.442695, %v410_v22 }
 0x4a8   :  { %7732 = vpow2.f32 %v413_v23 }
 0x4ab   :  { %v417_v24 = vpop.xlane.xlu0 %416 }
 0x4ac   :  { %7734 = vrcp.f32 %v417_v24  ;;  %v7687_v24 = vld [vmem:[%s8014_s29 + $0x3] ss:$0 sm:$0xff] }
 0x4ae   :  { %v7733_v1 = vpop.eup %7732 }
 0x4af   :  { %v418_v27 = vsel %vm253_vm3, %v7733_v1, 0.0 }
 0x4b0   :  { %419 = vadd.xlane.f32.xlu1 %v418_v27 }
 0x4b2   :  { %v7735_v2 = vpop.eup %7734 }
 0x4b3   :  { %v423_v28 = vmul.f32 %v7735_v2, %v7731_v54 }
 0x4b5   :  { %5918 = vmatmul.msk.f32.vlgmr.msrb.gmra.mxu3 %vm253_vm3, %v423_v28 }
 0x4d9   :  { %v557_v29 = vpop.xlane.xlu1 %556 }
 0x4da   :  { %v559_v32 = vsub.f32 %v551_v0, %v557_v29 }
 0x4dc   :  { %v562_v34 = vmul.f32 1.442695, %v559_v32 }
 0x4de   :  { %v554_v30 = vpop.xlane.xlu2 %553 }
 0x4df   :  { %v558_v31 = vsub.f32 %v550_v5, %v554_v30 }
 0x4e1   :  { %v560_v33 = vmul.f32 1.442695, %v558_v31 }
 0x4e3   :  { %7736 = vpow2.f32 %v560_v33 }
 0x4e4   :  { %7738 = vpow2.f32 %v562_v34  ;;  %v796_v34 = vld [vmem:[%s8024_s8 + $0x18] sm:$0xff] }
 0x4e5   :  { %816 = vmatpush.msrb.mxu0 %v796_v34 }
 0x4e9   :  { %v7737_v35 = vpop.eup %7736 }
 0x4ea   :  { %v564_v36 = vsel %vm253_vm3, %v7737_v35, 0.0  ;;  %v7739_v37 = vpop.eup %7738 }
 0x4eb   :  { %565 = vadd.xlane.f32.xlu0 %v564_v36  ;;  %v567_v38 = vsel %vm253_vm3, %v7739_v37, 0.0  ;;  %v795_v36 = vld [vmem:[%s8024_s8 + $0x10] sm:$0xff] }
 0x4ec   :  { %817 = vmatpush.msrb.mxu0 %v795_v36 }
 0x4f3   :  { %568 = vadd.xlane.f32.xlu0 %v567_v38  ;;  %v794_v38 = vld [vmem:[%s8024_s8 + $0x8] sm:$0xff] }
 0x4f4   :  { %818 = vmatpush.msrb.mxu0 %v794_v38 }
 0x509   :  { %v703_v39 = vpop.xlane.xlu1 %702 }
 0x50a   :  { %v707_v40 = vsub.f32 %v699_v14, %v703_v39  ;;  %v5935_v39 = vld [vmem:[%s8024_s8 + $0x28] sm:$0xff] }
 0x50c   :  { %v709_v41 = vmul.f32 1.442695, %v707_v40  ;;  %v793_v40 = vld [vmem:[%s8024_s8] sm:$0xff] }
 0x50d   :  { %819 = vmatpush.msrb.mxu0 %v793_v40 }
 0x50e   :  { %7740 = vpow2.f32 %v709_v41  ;;  %v5934_v41 = vld [vmem:[%s8024_s8 + $0x20] sm:$0xff] }
 0x511   :  { %v706_v42 = vpop.xlane.xlu1 %705 }
 0x512   :  { %v708_v43 = vsub.f32 %v700_v17, %v706_v42  ;;  %v7679_v42 = vld [vmem:[%s8014_s29] ss:$0 sm:$0xff]  ;;  %s9104_s29 = sld [smem:[#allocation13_spill]] }
 0x514   :  { %v7741_v44 = vpop.eup %7740  ;;  %v711_v45 = vmul.f32 1.442695, %v708_v43  ;;  %v307_v43 = vmul.f32 %v7679_v42, %v8197_v18 }
 0x515   :  { %v713_v46 = vsel %vm253_vm3, %v7741_v44, 0.0 }
 0x516   :  { %7742 = vpow2.f32 %v711_v45  ;;  %714 = vadd.xlane.f32.xlu1 %v713_v46 }
 0x51c   :  { %v7743_v47 = vpop.eup %7742 }
 0x51d   :  { %v716_v48 = vsel %vm253_vm3, %v7743_v47, 0.0 }
 0x51e   :  { %717 = vadd.xlane.f32.xlu1 %v716_v48 }
 0x523   :  { %v420_v49 = vpop.xlane.xlu1 %419 }
 0x524   :  { %7744 = vrcp.f32 %v420_v49 }
 0x52a   :  { %v7745_v50 = vpop.eup %7744 }
 0x52b   :  { %v424_v51 = vmul.f32 %v7745_v50, %v7733_v1  ;;  %v7688_v1 = vld [vmem:[%s8019_s3 + $0x3] ss:$0 sm:$0xff] }
 0x52d   :  { %5919 = vmatmul.msk.f32.gmra.mxu3 %vm253_vm3, %v424_v51 }
 0x538   :  { %v448_v54 = vpop.f32.mrf.mxu3 }
 0x539   :  { %v456_v55 = vmul.f32 %v7683_v52, %v448_v54  ;;  %v5944_v54 = vld [vmem:[%s8024_s8 + $0x50] sm:$0xff] }
 0x53b   :  { %v460_v56 = vadd.f32 %v7684_v53, %v456_v55  ;;  %v5952_v55 = vld [vmem:[%s8024_s8 + $0x70] sm:$0xff] }
 0x53d   :  { %v462_v57 = vmax.f32 %v460_v56, 0.0  ;;  %v5943_v56 = vld [vmem:[%s8024_s8 + $0x48] sm:$0xff] }
 0x53f   :  { %764 = vrot.lane.b32.xlu0 %v462_v57, %s7968_s5  ;;  %v5951_v57 = vld [vmem:[%s8024_s8 + $0x68] sm:$0xff] }
 0x55e   :  { %v566_v58 = vpop.xlane.xlu0 %565 }
 0x55f   :  { %7746 = vrcp.f32 %v566_v58  ;;  %v5942_v58 = vld [vmem:[%s8024_s8 + $0x40] sm:$0xff] }
 0x565   :  { %v7747_v59 = vpop.eup %7746 }
 0x566   :  { %v569_v60 = vpop.xlane.xlu0 %568  ;;  %v572_v61 = vmul.f32 %v7747_v59, %v7737_v35  ;;  %v5937_v35 = vld [vmem:[%s8024_s8 + $0x38] sm:$0xff]  ;;  %v5950_v59 = vld [vmem:[%s8024_s8 + $0x60] sm:$0xff] }
 0x567   :  { %7748 = vrcp.f32 %v569_v60  ;;  %968 = vmatpush.msrb.mxu1 %v5937_v35  ;;  %v308_v60 = vmul.f32 %v7679_v42, %v8199_v19  ;;  %v7689_v19 = vld [vmem:[%s8029_s14 + $0x1] ss:$0 sm:$0xff] }
 0x568   :  { %5923 = vmatmul.msk.f32.vlgmr.msra.gmra.mxu2 %vm253_vm3, %v572_v61 }
 0x56d   :  { %v7749_v62 = vpop.eup %7748 }
 0x56e   :  { %v573_v63 = vmul.f32 %v7749_v62, %v7739_v37  ;;  %v5936_v37 = vld [vmem:[%s8024_s8 + $0x30] sm:$0xff] }
 0x56f   :  { %969 = vmatpush.msrb.mxu1 %v5936_v37 }
 0x570   :  { %5924 = vmatmul.msk.f32.gmra.mxu2 %vm253_vm3, %v573_v63 }
 0x571   :  { %970 = vmatpush.msrb.mxu1 %v5935_v39  ;;  %v7695_v39 = vld [vmem:[%s8034_s19 + $0x3] ss:$0 sm:$0xff] }
 0x573   :  { %971 = vmatpush.msrb.mxu1 %v5934_v41  ;;  %v7696_v41 = vld [vmem:[%s8029_s14 + $0x3] ss:$0 sm:$0xff] }
 0x589   :  { %v715_v0 = vpop.xlane.xlu1 %714 }
 0x58a   :  { %7750 = vrcp.f32 %v715_v0 }
 0x590   :  { %v7751_v3 = vpop.eup %7750 }
 0x591   :  { %v721_v4 = vmul.f32 %v7751_v3, %v7741_v44  ;;  %v718_v5 = vpop.xlane.xlu1 %717  ;;  %v7680_v44 = vld [vmem:[%s8019_s3] ss:$0 sm:$0xff]  ;;  %s9105_s3 = sld [smem:[#allocation14_spill]] }
 0x592   :  { %7752 = vrcp.f32 %v718_v5  ;;  %v311_v45 = vadd.f32 %v7680_v44, %v307_v43  ;;  %v312_v62 = vadd.f32 %v7680_v44, %v308_v60 }
 0x593   :  { %5928 = vmatmul.msk.f32.vlgmr.msra.gmra.mxu3 %vm253_vm3, %v721_v4 }
 0x594   :  { %v314_v63 = vmax.f32 %v312_v62, 0.0 }
 0x598   :  { %v7753_v6 = vpop.eup %7752 }
 0x599   :  { %v722_v7 = vmul.f32 %v7753_v6, %v7743_v47  ;;  %v313_v47 = vmax.f32 %v311_v45, 0.0 }
 0x59b   :  { %5929 = vmatmul.msk.f32.gmra.mxu3 %vm253_vm3, %v722_v7  ;;  %v7690_v7 = vld [vmem:[%s8034_s19] ss:$0 sm:$0xff] }
 0x5b0   :  { %v451_v8 = vpop.f32.mrf.mxu3 }
 0x5b1   :  { %v457_v9 = vmul.f32 %v7683_v52, %v451_v8  ;;  %v765_v46 = vpop.permute.xlu0 %764  ;;  %v5945_v52 = vld [vmem:[%s8024_s8 + $0x58] sm:$0xff]  ;;  %v7691_v8 = vld [vmem:[%s8029_s14] ss:$0 sm:$0xff] }
 0x5b2   :  { %v786_v49 = vsel %vm160_vm0, %v313_v47, %v765_v46  ;;  %1120 = vmatpush.msra.mxu0 %v5945_v52 }
 0x5b3   :  { %v461_v10 = vadd.f32 %v7684_v53, %v457_v9  ;;  %v5953_v53 = vld [vmem:[%s8024_s8 + $0x78] sm:$0xff]  ;;  %s9106_s8 = sld [smem:[#allocation15_spill]] }
 0x5b4   :  { %1272 = vmatpush.msra.mxu1 %v5953_v53  ;;  %1121 = vmatpush.msra.mxu0 %v5944_v54 }
 0x5b5   :  { %v463_v11 = vmax.f32 %v461_v10, 0.0 }
 0x5b6   :  { %1273 = vmatpush.msra.mxu1 %v5952_v55  ;;  %1122 = vmatpush.msra.mxu0 %v5943_v56 }
 0x5b7   :  { %766 = vrot.lane.b32.xlu0 %v463_v11, %s7968_s5 }
 0x5b8   :  { %1274 = vmatpush.msra.mxu1 %v5951_v57  ;;  %1123 = vmatpush.msra.mxu0 %v5942_v58 }
 0x5ba   :  { %1275 = vmatpush.msra.mxu1 %v5950_v59 }
 0x5eb   :  { %v597_v14 = vpop.f32.mrf.mxu2 }
 0x5ec   :  { %v605_v15 = vmul.f32 %v7685_v12, %v597_v14 }
 0x5ee   :  { %v609_v16 = vadd.f32 %v7686_v13, %v605_v15 }
 0x5f0   :  { %v611_v17 = vmax.f32 %v609_v16, 0.0 }
 0x5f2   :  { %772 = vrot.lane.b32.xlu1 %v611_v17, %s7966_s23  ;;  %v7692_v17 = vld [vmem:[%s8034_s19 + $0x1] ss:$0 sm:$0xff] }
 0x5f3   :  { %v600_v20 = vpop.f32.mrf.mxu2 }
 0x5f4   :  { %v606_v21 = vmul.f32 %v7685_v12, %v600_v20 }
 0x5f6   :  { %v610_v22 = vadd.f32 %v7686_v13, %v606_v21 }
 0x5f8   :  { %v612_v23 = vmax.f32 %v610_v22, 0.0 }
 0x5fa   :  { %774 = vrot.lane.b32.xlu1 %v612_v23, %s7966_s23 }
 0x616   :  { %v746_v27 = vpop.f32.mrf.mxu3 }
 0x617   :  { %v754_v2 = vmul.f32 %v7687_v24, %v746_v27 }
 0x619   :  { %v758_v28 = vadd.f32 %v7688_v1, %v754_v2 }
 0x61b   :  { %v760_v29 = vmax.f32 %v758_v28, 0.0 }
 0x61d   :  { %780 = vrot.lane.b32.xlu2 %v760_v29, %s7969_s13 }
 0x61e   :  { %v749_v30 = vpop.f32.mrf.mxu3 }
 0x61f   :  { %v755_v31 = vmul.f32 %v7687_v24, %v749_v30  ;;  %v7693_v30 = vld [vmem:[%s8034_s19 + $0x2] ss:$0 sm:$0xff]  ;;  %s7972_s19 = smov 64  }
 0x621   :  { %v759_v32 = vadd.f32 %v7688_v1, %v755_v31  ;;  %v7694_v31 = vld [vmem:[%s8029_s14 + $0x2] ss:$0 sm:$0xff]  ;;  %s9107_s14 = sld [smem:[#allocation16_spill]] }
 0x623   :  { %v761_v33 = vmax.f32 %v759_v32, 0.0 }
 0x625   :  { %782 = vrot.lane.b32.xlu0 %v761_v33, %s7969_s13 }
 0x629   :  { %v767_v61 = vpop.permute.xlu0 %766 }
 0x62a   :  { %v787_v3 = vsel %vm160_vm0, %v314_v63, %v767_v61 }
 0x664   :  { %v773_v48 = vpop.permute.xlu1 %772 }
 0x665   :  { %v788_v50 = vsel %vm253_vm3, %v786_v49, %v773_v48 }
 0x66c   :  { %v775_v0 = vpop.permute.xlu1 %774 }
 0x66d   :  { %v789_v4 = vsel %vm253_vm3, %v787_v3, %v775_v0 }
 0x677   :  { %v781_v51 = vpop.permute.xlu2 %780 }
 0x678   :  { %v791_v18 = vsel %vm790_vm10, %v788_v50, %v781_v51 }
 0x679   :  { %5930 = vmatmul.msk.f32.vlgmr.msrb.gmra.mxu0 %vm797_vm11, %v791_v18  ;;  %5938 = vmatmul.msk.f32.vlgmr.msrb.gmra.mxu1 %vm797_vm11, %v791_v18 }
 0x697   :  { %v783_v5 = vpop.permute.xlu0 %782 }
 0x698   :  { %v792_v6 = vsel %vm790_vm10, %v789_v4, %v783_v5 }
 0x699   :  { %5931 = vmatmul.msk.f32.gmra.mxu0 %vm797_vm11, %v792_v6  ;;  %5939 = vmatmul.msk.f32.gmra.mxu1 %vm797_vm11, %v792_v6 }
 0x6a1   :  { %5946 = vmatmul.msk.f32.vlgmr.msra.gmra.mxu0 %vm797_vm11, %v791_v18  ;;  %5954 = vmatmul.msk.f32.vlgmr.msra.gmra.mxu1 %vm797_vm11, %v791_v18 }
 0x6a9   :  { %5947 = vmatmul.msk.f32.gmra.mxu0 %vm797_vm11, %v792_v6  ;;  %5955 = vmatmul.msk.f32.gmra.mxu1 %vm797_vm11, %v792_v6 }
 0x6f6   :  { %v821_v9 = vpop.f32.mrf.mxu0  ;;  %v973_v10 = vpop.f32.mrf.mxu1 }
 0x6f7   :  { %v981_v11 = vmul.f32 %v7689_v19, %v973_v10  ;;  %v839_v12 = vmul.f32 %v7690_v7, %v821_v9  ;;  %v829_v13 = vmul.f32 %v7691_v8, %v821_v9  ;;  %v991_v20 = vmul.f32 %v7692_v17, %v973_v10 }
 0x6f9   :  { %v983_v14 = vsel %vm253_vm3, %v981_v11, 0.0  ;;  %v841_v15 = vsel %vm253_vm3, %v839_v12, 0.0  ;;  %v831_v16 = vsel %vm253_vm3, %v829_v13, 0.0  ;;  %v993_v21 = vsel %vm253_vm3, %v991_v20, 0.0 }
 0x6fa   :  { %984 = vadd.xlane.f32.xlu0 %v983_v14  ;;  %842 = vadd.xlane.f32.xlu2 %v841_v15 }
 0x6fb   :  { %832 = vadd.xlane.f32.xlu1 %v831_v16 }
 0x703   :  { %994 = vadd.xlane.f32.xlu1 %v993_v21 }
 0x716   :  { %v824_v22 = vpop.f32.mrf.mxu0  ;;  %v976_v23 = vpop.f32.mrf.mxu1 }
 0x717   :  { %932 = vmatpush.msrb.mxu2 %v824_v22  ;;  %1084 = vmatpush.msrb.mxu3 %v976_v23  ;;  %v982_v24 = vmul.f32 %v7689_v19, %v976_v23  ;;  %v840_v1 = vmul.f32 %v7690_v7, %v824_v22  ;;  %v830_v27 = vmul.f32 %v7691_v8, %v824_v22 }
 0x718   :  { %v992_v34 = vmul.f32 %v7692_v17, %v976_v23 }
 0x719   :  { %933 = vmatpush.msrb.mxu2 %v821_v9  ;;  %1085 = vmatpush.msrb.mxu3 %v973_v10  ;;  %v986_v2 = vsel %vm253_vm3, %v982_v24, 0.0  ;;  %v844_v28 = vsel %vm253_vm3, %v840_v1, 0.0  ;;  %v834_v29 = vsel %vm253_vm3, %v830_v27, 0.0 }
 0x71a   :  { %987 = vadd.xlane.f32.xlu1 %v986_v2  ;;  %845 = vadd.xlane.f32.xlu0 %v844_v28  ;;  %v996_v40 = vsel %vm253_vm3, %v992_v34, 0.0 }
 0x71b   :  { %835 = vadd.xlane.f32.xlu2 %v834_v29 }
 0x71e   :  { %v1125_v32 = vpop.f32.mrf.mxu0  ;;  %v1277_v33 = vpop.f32.mrf.mxu1 }
 0x71f   :  { %v1143_v35 = vmul.f32 %v7693_v30, %v1125_v32  ;;  %v1133_v36 = vmul.f32 %v7694_v31, %v1125_v32  ;;  %v1295_v42 = vmul.f32 %v7695_v39, %v1277_v33  ;;  %v1285_v45 = vmul.f32 %v7696_v41, %v1277_v33 }
 0x721   :  { %v1145_v37 = vsel %vm253_vm3, %v1143_v35, 0.0  ;;  %v1135_v38 = vsel %vm253_vm3, %v1133_v36, 0.0  ;;  %v1297_v48 = vsel %vm253_vm3, %v1295_v42, 0.0  ;;  %v1287_v49 = vsel %vm253_vm3, %v1285_v45, 0.0 }
 0x722   :  { %1146 = vadd.xlane.f32.xlu1 %v1145_v37  ;;  %1136 = vadd.xlane.f32.xlu0 %v1135_v38 }
 0x723   :  { %997 = vadd.xlane.f32.xlu2 %v996_v40 }
 0x726   :  { %v1128_v43 = vpop.f32.mrf.mxu0  ;;  %v1280_v44 = vpop.f32.mrf.mxu1 }
 0x727   :  { %1236 = vmatpush.msra.mxu2 %v1128_v43  ;;  %1388 = vmatpush.msra.mxu3 %v1280_v44  ;;  %v1134_v46 = vmul.f32 %v7694_v31, %v1128_v43  ;;  %v1286_v50 = vmul.f32 %v7696_v41, %v1280_v44  ;;  %v1144_v18 = vmul.f32 %v7693_v30, %v1128_v43 }
 0x728   :  { %v1296_v53 = vmul.f32 %v7695_v39, %v1280_v44 }
 0x729   :  { %1237 = vmatpush.msra.mxu2 %v1125_v32  ;;  %1389 = vmatpush.msra.mxu3 %v1277_v33  ;;  %v1138_v47 = vsel %vm253_vm3, %v1134_v46, 0.0  ;;  %v1290_v51 = vsel %vm253_vm3, %v1286_v50, 0.0  ;;  %v1148_v52 = vsel %vm253_vm3, %v1144_v18, 0.0 }
 0x72a   :  { %1139 = vadd.xlane.f32.xlu1 %v1138_v47  ;;  %1298 = vadd.xlane.f32.xlu0 %v1297_v48  ;;  %v1300_v54 = vsel %vm253_vm3, %v1296_v53, 0.0 }
 0x72b   :  { %1288 = vadd.xlane.f32.xlu2 %v1287_v49 }
 0x732   :  { %1291 = vadd.xlane.f32.xlu0 %v1290_v51 }
 0x73a   :  { %1149 = vadd.xlane.f32.xlu0 %v1148_v52 }
 0x742   :  { %1301 = vadd.xlane.f32.xlu0 %v1300_v54 }
 0x76d   :  { %v985_v55 = vpop.xlane.xlu0 %984  ;;  %v843_v58 = vpop.xlane.xlu2 %842 }
 0x76e   :  { %v833_v56 = vpop.xlane.xlu1 %832  ;;  %999 = vxpose.xlu1.b32.start [1/2] (short) (narrow) %v985_v55, 8 }
 0x76f   :  { %847 = vxpose.xlu2.b32.start [1/2] (short) (narrow) %v833_v56, 8 }
 0x776   :  { %v995_v57 = vpop.xlane.xlu1 %994 }
 0x78d   :  { %v988_v59 = vpop.xlane.xlu1 %987  ;;  %v846_v60 = vpop.xlane.xlu0 %845 }
 0x78e   :  { %v836_v61 = vpop.xlane.xlu2 %835  ;;  %1000 = vxpose.xlu1.b32.end [2/2] (short) (narrow) %v988_v59, 8 }
 0x78f   :  { %848 = vxpose.xlu2.b32.end [2/2] (short) (narrow) %v836_v61, 8 }
 0x795   :  { %v1147_v62 = vpop.xlane.xlu1 %1146  ;;  %v1137_v63 = vpop.xlane.xlu0 %1136 }
 0x796   :  { %v998_v0 = vpop.xlane.xlu2 %997  ;;  %1151 = vxpose.xlu0.b32.start [1/2] (short) (narrow) %v1137_v63, 8 }
 0x79d   :  { %v1140_v3 = vpop.xlane.xlu1 %1139  ;;  %v1299_v4 = vpop.xlane.xlu0 %1298 }
 0x79e   :  { %v1289_v5 = vpop.xlane.xlu2 %1288  ;;  %1152 = vxpose.xlu0.b32.end [2/2] (short) (narrow) %v1140_v3, 8 }
 0x79f   :  { %1303 = vxpose.xlu2.b32.start [1/2] (short) (narrow) %v1289_v5, 8 }
 0x7a5   :  { %v1292_v6 = vpop.xlane.xlu0 %1291 }
 0x7a7   :  { %1304 = vxpose.xlu2.b32.end [2/2] (short) (narrow) %v1292_v6, 8 }
 0x7ad   :  { %v1150_v14 = vpop.xlane.xlu0 %1149 }
 0x7b5   :  { %v1302_v28 = vpop.xlane.xlu0 %1301 }
 0x820   :  { %v863_v19 = vpop.trf.xlu2 }
 0x821   :  { %v879_v7 = vperm.slane %v863_v19, 0 }
 0x823   :  { %v880_v8 = vadd.f32 %v879_v7, %v843_v58  ;;  %v881_v9 = vadd.f32 %v879_v7, %v846_v60 }
 0x825   :  { %v884_v10 = vmul.f32 0.2, %v880_v8  ;;  %v885_v11 = vmul.f32 0.2, %v881_v9  ;;  %vm883_vm12 = vcmp.gt.f32.partialorder %v881_v9, 0.0  ;;  %vm882_vm13 = vcmp.gt.f32.partialorder %v880_v8, 0.0 }
 0x827   :  { %v887_v12 = vsel %vm883_vm12, %v881_v9, %v885_v11  ;;  %v886_v13 = vsel %vm882_vm13, %v880_v8, %v884_v10 }
 0x828   :  { %v889_v15 = vadd.f32 %v887_v12, %v8167_v25  ;;  %v888_v16 = vadd.f32 %v886_v13, %v8170_v26 }
 0x82a   :  { %v1015_v17 = vpop.trf.xlu1  ;;  %v893_v20 = vsel %vm253_vm3, %v889_v15, -inf  ;;  %v890_v21 = vsel %vm253_vm3, %v888_v16, -inf }
 0x82b   :  { %v1031_v22 = vperm.slane %v1015_v17, 0  ;;  %894 = vmax.xlane.f32.xlu0 %v893_v20  ;;  %891 = vmax.xlane.f32.xlu2 %v890_v21 }
 0x82d   :  { %v1032_v23 = vadd.f32 %v1031_v22, %v995_v57  ;;  %v1033_v24 = vadd.f32 %v1031_v22, %v998_v0 }
 0x82f   :  { %v1036_v1 = vmul.f32 0.2, %v1032_v23  ;;  %vm1034_vm14 = vcmp.gt.f32.partialorder %v1032_v23, 0.0  ;;  %v1037_v27 = vmul.f32 0.2, %v1033_v24  ;;  %vm1035_vm15 = vcmp.gt.f32.partialorder %v1033_v24, 0.0 }
 0x831   :  { %v1038_v2 = vsel %vm1034_vm14, %v1032_v23, %v1036_v1  ;;  %v1039_v31 = vsel %vm1035_vm15, %v1033_v24, %v1037_v27 }
 0x832   :  { %v1040_v29 = vadd.f32 %v1038_v2, %v8170_v26  ;;  %v1041_v33 = vadd.f32 %v1039_v31, %v8167_v25 }
 0x834   :  { %v1042_v30 = vsel %vm253_vm3, %v1040_v29, -inf  ;;  %v1045_v39 = vsel %vm253_vm3, %v1041_v33, -inf }
 0x835   :  { %1043 = vmax.xlane.f32.xlu1 %v1042_v30 }
 0x838   :  { %v1319_v32 = vpop.trf.xlu2 }
 0x839   :  { %v1335_v34 = vperm.slane %v1319_v32, 0 }
 0x83a   :  { %v1167_v35 = vpop.trf.xlu0 }
 0x83b   :  { %v1336_v36 = vadd.f32 %v1335_v34, %v1299_v4  ;;  %v1337_v37 = vadd.f32 %v1335_v34, %v1302_v28  ;;  %v1183_v38 = vperm.slane %v1167_v35, 0 }
 0x83d   :  { %v1340_v40 = vmul.f32 0.2, %v1336_v36  ;;  %v1341_v41 = vmul.f32 0.2, %v1337_v37  ;;  %v1184_v42 = vadd.f32 %v1183_v38, %v1147_v62  ;;  %v1185_v43 = vadd.f32 %v1183_v38, %v1150_v14  ;;  %1046 = vmax.xlane.f32.xlu1 %v1045_v39 }
 0x83e   :  { %vm1338_vm0 = vcmp.gt.f32.partialorder %v1336_v36, 0.0  ;;  %vm1339_vm1 = vcmp.gt.f32.partialorder %v1337_v37, 0.0 }
 0x83f   :  { %v1188_v44 = vmul.f32 0.2, %v1184_v42  ;;  %v1342_v45 = vsel %vm1338_vm0, %v1336_v36, %v1340_v40  ;;  %v1343_v46 = vsel %vm1339_vm1, %v1337_v37, %v1341_v41  ;;  %vm1186_vm2 = vcmp.gt.f32.partialorder %v1184_v42, 0.0 }
 0x840   :  { %v1344_v47 = vadd.f32 %v1342_v45, %v8170_v26  ;;  %v1345_v48 = vadd.f32 %v1343_v46, %v8167_v25  ;;  %v1189_v49 = vmul.f32 0.2, %v1185_v43  ;;  %vm1187_vm4 = vcmp.gt.f32.partialorder %v1185_v43, 0.0 }
 0x841   :  { %v1190_v50 = vsel %vm1186_vm2, %v1184_v42, %v1188_v44  ;;  %vm2096_vm0 = vcmask 785408  }
 0x842   :  { %v1346_v51 = vsel %vm253_vm3, %v1344_v47, -inf  ;;  %v1349_v18 = vsel %vm253_vm3, %v1345_v48, -inf  ;;  %v1192_v52 = vadd.f32 %v1190_v50, %v8170_v26  ;;  %v1191_v54 = vsel %vm1187_vm4, %v1185_v43, %v1189_v49 }
 0x843   :  { %1347 = vmax.xlane.f32.xlu2 %v1346_v51  ;;  %1350 = vmax.xlane.f32.xlu0 %v1349_v18  ;;  %v1193_v55 = vadd.f32 %v1191_v54, %v8167_v25 }
 0x844   :  { %v1194_v53 = vsel %vm253_vm3, %v1192_v52, -inf }
 0x845   :  { %1195 = vmax.xlane.f32.xlu1 %v1194_v53  ;;  %v1197_v56 = vsel %vm253_vm3, %v1193_v55, -inf }
 0x84d   :  { %1198 = vmax.xlane.f32.xlu1 %v1197_v56 }
 0x89e   :  { %v892_v57 = vpop.xlane.xlu2 %891  ;;  %v895_v58 = vpop.xlane.xlu0 %894 }
 0x89f   :  { %v896_v59 = vsub.f32 %v888_v16, %v892_v57  ;;  %v897_v60 = vsub.f32 %v889_v15, %v895_v58  ;;  %v7699_v57 = vld [vmem:[%s8039_s24 + $0x1] ss:$0 sm:$0xff] }
 0x8a1   :  { %v898_v61 = vmul.f32 1.442695, %v896_v59  ;;  %v900_v62 = vmul.f32 1.442695, %v897_v60  ;;  %v7700_v59 = vld [vmem:[%s8044_s30 + $0x1] ss:$0 sm:$0xff] }
 0x8a3   :  { %7754 = vpow2.f32 %v898_v61 }
 0x8a4   :  { %7756 = vpow2.f32 %v900_v62 }
 0x8a8   :  { %v1044_v26 = vpop.xlane.xlu1 %1043 }
 0x8a9   :  { %v7755_v63 = vpop.eup %7754  ;;  %v1048_v0 = vsub.f32 %v1040_v29, %v1044_v26 }
 0x8aa   :  { %v7757_v3 = vpop.eup %7756  ;;  %v902_v4 = vsel %vm253_vm3, %v7755_v63, 0.0 }
 0x8ab   :  { %v1050_v5 = vmul.f32 1.442695, %v1048_v0  ;;  %903 = vadd.xlane.f32.xlu2 %v902_v4  ;;  %v905_v25 = vsel %vm253_vm3, %v7757_v3, 0.0 }
 0x8ac   :  { %906 = vadd.xlane.f32.xlu0 %v905_v25  ;;  %v7701_v25 = vld [vmem:[%s8039_s24 + $0x2] ss:$0 sm:$0xff] }
 0x8ad   :  { %7758 = vpow2.f32 %v1050_v5 }
 0x8b0   :  { %v1047_v6 = vpop.xlane.xlu1 %1046 }
 0x8b1   :  { %v1049_v19 = vsub.f32 %v1041_v33, %v1047_v6  ;;  %v7703_v6 = vld [vmem:[%s8039_s24 + $0x3] ss:$0 sm:$0xff] }
 0x8b3   :  { %v7759_v7 = vpop.eup %7758  ;;  %v1052_v8 = vmul.f32 1.442695, %v1049_v19  ;;  %v7702_v19 = vld [vmem:[%s8044_s30 + $0x2] ss:$0 sm:$0xff] }
 0x8b4   :  { %v1054_v9 = vsel %vm253_vm3, %v7759_v7, 0.0 }
 0x8b5   :  { %7760 = vpow2.f32 %v1052_v8  ;;  %1055 = vadd.xlane.f32.xlu1 %v1054_v9 }
 0x8b6   :  { %v1348_v10 = vpop.xlane.xlu2 %1347  ;;  %v1351_v12 = vpop.xlane.xlu0 %1350 }
 0x8b7   :  { %v1352_v11 = vsub.f32 %v1344_v47, %v1348_v10  ;;  %v1353_v17 = vsub.f32 %v1345_v48, %v1351_v12 }
 0x8b8   :  { %v1196_v13 = vpop.xlane.xlu1 %1195 }
 0x8b9   :  { %v1354_v14 = vmul.f32 1.442695, %v1352_v11  ;;  %v1200_v15 = vsub.f32 %v1192_v52, %v1196_v13  ;;  %v1356_v22 = vmul.f32 1.442695, %v1353_v17 }
 0x8bb   :  { %v7761_v16 = vpop.eup %7760  ;;  %7762 = vpow2.f32 %v1354_v14  ;;  %v1202_v20 = vmul.f32 1.442695, %v1200_v15 }
 0x8bc   :  { %v1057_v21 = vsel %vm253_vm3, %v7761_v16, 0.0 }
 0x8bd   :  { %7764 = vpow2.f32 %v1202_v20  ;;  %1058 = vadd.xlane.f32.xlu2 %v1057_v21 }
 0x8be   :  { %7766 = vpow2.f32 %v1356_v22 }
 0x8c0   :  { %v1199_v23 = vpop.xlane.xlu1 %1198 }
 0x8c1   :  { %v7763_v24 = vpop.eup %7762  ;;  %v1201_v1 = vsub.f32 %v1193_v55, %v1199_v23 }
 0x8c2   :  { %v1358_v27 = vsel %vm253_vm3, %v7763_v24, 0.0 }
 0x8c3   :  { %v7765_v2 = vpop.eup %7764  ;;  %v1204_v28 = vmul.f32 1.442695, %v1201_v1  ;;  %1359 = vadd.xlane.f32.xlu0 %v1358_v27  ;;  %v1445_v27 = vld [vmem:[%s9103_s17 + $0x38] sm:$0xff] }
 0x8c4   :  { %v1206_v29 = vsel %vm253_vm3, %v7765_v2, 0.0  ;;  %v7767_v30 = vpop.eup %7766  ;;  %1461 = vmatpush.msrb.mxu0 %v1445_v27 }
 0x8c5   :  { %7768 = vpow2.f32 %v1204_v28  ;;  %1207 = vadd.xlane.f32.xlu1 %v1206_v29  ;;  %v1361_v33 = vsel %vm253_vm3, %v7767_v30, 0.0  ;;  %v1444_v28 = vld [vmem:[%s9103_s17 + $0x30] sm:$0xff] }
 0x8c6   :  { %v5968_v29 = vld [vmem:[%s9103_s17 + $0x70] sm:$0xff]  ;;  %1462 = vmatpush.msrb.mxu0 %v1444_v28 }
 0x8cb   :  { %v7769_v31 = vpop.eup %7768 }
 0x8cc   :  { %v1209_v32 = vsel %vm253_vm3, %v7769_v31, 0.0 }
 0x8cd   :  { %1210 = vadd.xlane.f32.xlu2 %v1209_v32  ;;  %1362 = vadd.xlane.f32.xlu1 %v1361_v33  ;;  %v1442_v32 = vld [vmem:[%s9103_s17 + $0x20] sm:$0xff] }
 0x8ce   :  { %v5966_v33 = vld [vmem:[%s9103_s17 + $0x60] sm:$0xff] }
 0x91e   :  { %v904_v34 = vpop.xlane.xlu2 %903 }
 0x91f   :  { %7770 = vrcp.f32 %v904_v34  ;;  %v907_v35 = vpop.xlane.xlu0 %906  ;;  %v1441_v34 = vld [vmem:[%s9103_s17 + $0x18] sm:$0xff] }
 0x920   :  { %7772 = vrcp.f32 %v907_v35  ;;  %v5965_v35 = vld [vmem:[%s9103_s17 + $0x58] sm:$0xff] }
 0x925   :  { %v7771_v36 = vpop.eup %7770 }
 0x926   :  { %v910_v37 = vmul.f32 %v7771_v36, %v7755_v63  ;;  %v7773_v39 = vpop.eup %7772  ;;  %v1440_v36 = vld [vmem:[%s9103_s17 + $0x10] sm:$0xff] }
 0x927   :  { %v911_v40 = vmul.f32 %v7773_v39, %v7757_v3  ;;  %v5963_v39 = vld [vmem:[%s9103_s17 + $0x48] sm:$0xff] }
 0x928   :  { %5932 = vmatmul.msk.f32.vlgmr.msrb.gmra.mxu2 %vm253_vm3, %v910_v37  ;;  %v1056_v38 = vpop.xlane.xlu1 %1055  ;;  %v5964_v37 = vld [vmem:[%s9103_s17 + $0x50] sm:$0xff] }
 0x929   :  { %7774 = vrcp.f32 %v1056_v38  ;;  %v1439_v38 = vld [vmem:[%s9103_s17 + $0x8] sm:$0xff] }
 0x92f   :  { %v7775_v41 = vpop.eup %7774 }
 0x930   :  { %v1062_v42 = vmul.f32 %v7775_v41, %v7759_v7  ;;  %5933 = vmatmul.msk.f32.gmra.mxu2 %vm253_vm3, %v911_v40  ;;  %v1059_v43 = vpop.xlane.xlu2 %1058  ;;  %v7704_v7 = vld [vmem:[%s8044_s30 + $0x3] ss:$0 sm:$0xff] }
 0x931   :  { %7776 = vrcp.f32 %v1059_v43  ;;  %v1438_v40 = vld [vmem:[%s9103_s17] sm:$0xff]  ;;  %v5993_v43 = vld [vmem:[%s9103_s17 + $0xf8] sm:$0xff] }
 0x932   :  { %5940 = vmatmul.msk.f32.vlgmr.msrb.gmra.mxu3 %vm253_vm3, %v1062_v42  ;;  %v5962_v41 = vld [vmem:[%s9103_s17 + $0x40] sm:$0xff]  ;;  %v5981_v42 = vld [vmem:[%s9103_s17 + $0xb8] sm:$0xff] }
 0x936   :  { %v1360_v44 = vpop.xlane.xlu0 %1359 }
 0x937   :  { %v7777_v45 = vpop.eup %7776  ;;  %7778 = vrcp.f32 %v1360_v44  ;;  %v5980_v44 = vld [vmem:[%s9103_s17 + $0xb0] sm:$0xff] }
 0x938   :  { %v1208_v46 = vpop.xlane.xlu1 %1207  ;;  %v1063_v47 = vmul.f32 %v7777_v45, %v7761_v16  ;;  %v5992_v45 = vld [vmem:[%s9103_s17 + $0xf0] sm:$0xff] }
 0x939   :  { %7780 = vrcp.f32 %v1208_v46  ;;  %v5979_v46 = vld [vmem:[%s9103_s17 + $0xa8] sm:$0xff] }
 0x93a   :  { %5941 = vmatmul.msk.f32.gmra.mxu3 %vm253_vm3, %v1063_v47  ;;  %v5991_v47 = vld [vmem:[%s9103_s17 + $0xe8] sm:$0xff] }
 0x93d   :  { %v7779_v48 = vpop.eup %7778 }
 0x93e   :  { %v1366_v50 = vmul.f32 %v7779_v48, %v7763_v24  ;;  %v5978_v48 = vld [vmem:[%s9103_s17 + $0xa0] sm:$0xff] }
 0x93f   :  { %v7781_v49 = vpop.eup %7780 }
 0x940   :  { %v1214_v51 = vmul.f32 %v7781_v49, %v7765_v2  ;;  %v1211_v18 = vpop.xlane.xlu2 %1210  ;;  %v1363_v52 = vpop.xlane.xlu1 %1362  ;;  %v5969_v2 = vld [vmem:[%s9103_s17 + $0x78] sm:$0xff]  ;;  %v5990_v49 = vld [vmem:[%s9103_s17 + $0xe0] sm:$0xff] }
 0x941   :  { %7782 = vrcp.f32 %v1211_v18  ;;  %1617 = vmatpush.msrb.mxu1 %v5969_v2  ;;  %v5976_v18 = vld [vmem:[%s9103_s17 + $0x90] sm:$0xff] }
 0x942   :  { %7784 = vrcp.f32 %v1363_v52  ;;  %5948 = vmatmul.msk.f32.vlgmr.msra.gmra.mxu2 %vm253_vm3, %v1214_v51  ;;  %5956 = vmatmul.msk.f32.vlgmr.msra.gmra.mxu3 %vm253_vm3, %v1366_v50  ;;  %v5977_v50 = vld [vmem:[%s9103_s17 + $0x98] sm:$0xff]  ;;  %v5988_v52 = vld [vmem:[%s9103_s17 + $0xd0] sm:$0xff] }
 0x943   :  { %1618 = vmatpush.msrb.mxu1 %v5968_v29  ;;  %v5989_v51 = vld [vmem:[%s9103_s17 + $0xd8] sm:$0xff] }
 0x947   :  { %v7783_v53 = vpop.eup %7782 }
 0x948   :  { %v7785_v54 = vpop.eup %7784  ;;  %v1215_v55 = vmul.f32 %v7783_v53, %v7769_v31  ;;  %v5967_v31 = vld [vmem:[%s9103_s17 + $0x68] sm:$0xff] }
 0x949   :  { %v1367_v56 = vmul.f32 %v7785_v54, %v7767_v30  ;;  %v1443_v30 = vld [vmem:[%s9103_s17 + $0x28] sm:$0xff]  ;;  %1619 = vmatpush.msrb.mxu1 %v5967_v31 }
 0x94a   :  { %5949 = vmatmul.msk.f32.gmra.mxu2 %vm253_vm3, %v1215_v55  ;;  %1463 = vmatpush.msrb.mxu0 %v1443_v30  ;;  %v5975_v53 = vld [vmem:[%s9103_s17 + $0x88] sm:$0xff]  ;;  %v7697_v55 = vld [vmem:[%s8039_s24] ss:$0 sm:$0xff]  ;;  %s7973_s24 = smov 96  }
 0x94b   :  { %5957 = vmatmul.msk.f32.gmra.mxu3 %vm253_vm3, %v1367_v56  ;;  %1620 = vmatpush.msrb.mxu1 %v5966_v33  ;;  %v5987_v54 = vld [vmem:[%s9103_s17 + $0xc8] sm:$0xff]  ;;  %v5974_v56 = vld [vmem:[%s9103_s17 + $0x80] sm:$0xff] }
 0x94c   :  { %1464 = vmatpush.msrb.mxu0 %v1442_v32 }
 0x94d   :  { %1621 = vmatpush.msrb.mxu1 %v5965_v35 }
 0x94e   :  { %1465 = vmatpush.msrb.mxu0 %v1441_v34 }
 0x94f   :  { %1622 = vmatpush.msrb.mxu1 %v5964_v37 }
 0x950   :  { %1466 = vmatpush.msrb.mxu0 %v1440_v36 }
 0x951   :  { %1623 = vmatpush.msrb.mxu1 %v5963_v39  ;;  %v7709_v39 = vld [vmem:[%s9104_s29 + $0x3] ss:$0 sm:$0xff] }
 0x952   :  { %1467 = vmatpush.msrb.mxu0 %v1439_v38 }
 0x953   :  { %1624 = vmatpush.msrb.mxu1 %v5962_v41 }
 0x954   :  { %1468 = vmatpush.msrb.mxu0 %v1438_v40  ;;  %v7710_v40 = vld [vmem:[%s9105_s3 + $0x2] ss:$0 sm:$0xff] }
 0x955   :  { %1929 = vmatpush.msra.mxu1 %v5993_v43 }
 0x956   :  { %1773 = vmatpush.msra.mxu0 %v5981_v42  ;;  %v7711_v42 = vld [vmem:[%s9104_s29 + $0x2] ss:$0 sm:$0xff] }
 0x957   :  { %1930 = vmatpush.msra.mxu1 %v5992_v45 }
 0x958   :  { %1774 = vmatpush.msra.mxu0 %v5980_v44 }
 0x959   :  { %1931 = vmatpush.msra.mxu1 %v5991_v47 }
 0x95a   :  { %1775 = vmatpush.msra.mxu0 %v5979_v46 }
 0x95b   :  { %1932 = vmatpush.msra.mxu1 %v5990_v49 }
 0x95c   :  { %1776 = vmatpush.msra.mxu0 %v5978_v48 }
 0x95d   :  { %1933 = vmatpush.msra.mxu1 %v5989_v51  ;;  %v7712_v51 = vld [vmem:[%s9105_s3 + $0x3] ss:$0 sm:$0xff] }
 0x95e   :  { %1777 = vmatpush.msra.mxu0 %v5977_v50 }
 0x95f   :  { %1934 = vmatpush.msra.mxu1 %v5988_v52 }
 0x960   :  { %1778 = vmatpush.msra.mxu0 %v5976_v18 }
 0x961   :  { %1935 = vmatpush.msra.mxu1 %v5987_v54 }
 0x962   :  { %1779 = vmatpush.msra.mxu0 %v5975_v53 }
 0x964   :  { %1780 = vmatpush.msra.mxu0 %v5974_v56 }
 0x9ab   :  { %v8330_v58 = vpop.f32.mrf.mxu2 }
 0x9b3   :  { %v8334_v63 = vpop.f32.mrf.mxu2 }
 0x9b5   :  { %v1087_v60 = vpop.f32.mrf.mxu3 }
 0x9b6   :  { %v1095_v61 = vmul.f32 %v7699_v57, %v1087_v60  ;;  %v7698_v60 = vld [vmem:[%s8044_s30] ss:$0 sm:$0xff]  ;;  %s9108_s30 = sld [smem:[#allocation18_spill]] }
 0x9b8   :  { %v1099_v62 = vadd.f32 %v7700_v59, %v1095_v61 }
 0x9ba   :  { %v1101_v26 = vmax.f32 %v1099_v62, 0.0 }
 0x9bc   :  { %1409 = vrot.lane.b32.xlu0 %v1101_v26, %s7966_s23 }
 0x9bd   :  { %v1090_v0 = vpop.f32.mrf.mxu3 }
 0x9be   :  { %v1096_v3 = vmul.f32 %v7699_v57, %v1090_v0  ;;  %v5986_v57 = vld [vmem:[%s9103_s17 + $0xc0] sm:$0xff] }
 0x9bf   :  { %1936 = vmatpush.msra.mxu1 %v5986_v57 }
 0x9c0   :  { %v1100_v4 = vadd.f32 %v7700_v59, %v1096_v3  ;;  %v943_v59 = vmul.f32 %v7697_v55, %v8330_v58  ;;  %v944_v3 = vmul.f32 %v7697_v55, %v8334_v63 }
 0x9c2   :  { %v1102_v5 = vmax.f32 %v1100_v4, 0.0  ;;  %v947_v62 = vadd.f32 %v7698_v60, %v943_v59 }
 0x9c4   :  { %1411 = vrot.lane.b32.xlu0 %v1102_v5, %s7966_s23  ;;  %v949_v26 = vmax.f32 %v947_v62, 0.0 }
 0x9c5   :  { %v1239_v8 = vpop.f32.mrf.mxu2  ;;  %v1391_v9 = vpop.f32.mrf.mxu3 }
 0x9c6   :  { %v1247_v10 = vmul.f32 %v7701_v25, %v1239_v8  ;;  %v1399_v11 = vmul.f32 %v7703_v6, %v1391_v9 }
 0x9c8   :  { %v1251_v12 = vadd.f32 %v7702_v19, %v1247_v10  ;;  %v1403_v13 = vadd.f32 %v7704_v7, %v1399_v11 }
 0x9ca   :  { %v1253_v14 = vmax.f32 %v1251_v12, 0.0  ;;  %v1405_v15 = vmax.f32 %v1403_v13, 0.0  ;;  %v7705_v12 = vld [vmem:[%s9104_s29 + $0x1] ss:$0 sm:$0xff]  ;;  %v7706_v13 = vld [vmem:[%s9104_s29] ss:$0 sm:$0xff] }
 0x9cc   :  { %1417 = vrot.lane.b32.xlu2 %v1253_v14, %s7970_s21  ;;  %1425 = vrot.lane.b32.xlu1 %v1405_v15, %s7971_s25 }
 0x9cd   :  { %v1242_v16 = vpop.f32.mrf.mxu2 }
 0x9ce   :  { %v1248_v17 = vmul.f32 %v7701_v25, %v1242_v16  ;;  %v1394_v20 = vpop.f32.mrf.mxu3 }
 0x9cf   :  { %v1400_v21 = vmul.f32 %v7703_v6, %v1394_v20 }
 0x9d0   :  { %v1252_v22 = vadd.f32 %v7702_v19, %v1248_v17 }
 0x9d1   :  { %v1404_v23 = vadd.f32 %v7704_v7, %v1400_v21  ;;  %v948_v7 = vadd.f32 %v7698_v60, %v944_v3 }
 0x9d2   :  { %v1254_v24 = vmax.f32 %v1252_v22, 0.0  ;;  %v7707_v22 = vld [vmem:[%s9105_s3] ss:$0 sm:$0xff] }
 0x9d3   :  { %v1406_v1 = vmax.f32 %v1404_v23, 0.0  ;;  %v950_v58 = vmax.f32 %v948_v7, 0.0  ;;  %v7708_v23 = vld [vmem:[%s9105_s3 + $0x1] ss:$0 sm:$0xff] }
 0x9d4   :  { %1419 = vrot.lane.b32.xlu0 %v1254_v24, %s7970_s21 }
 0x9d5   :  { %1427 = vrot.lane.b32.xlu2 %v1406_v1, %s7971_s25 }
 0xa26   :  { %v1418_v4 = vpop.permute.xlu2 %1417 }
 0xa2e   :  { %v1410_v61 = vpop.permute.xlu0 %1409 }
 0xa2f   :  { %v1431_v0 = vsel %vm253_vm3, %v949_v26, %v1410_v61  ;;  %v1428_v63 = vpop.permute.xlu2 %1427 }
 0xa30   :  { %v1433_v6 = vsel %vm797_vm11, %v1431_v0, %v1418_v4 }
 0xa36   :  { %v1412_v5 = vpop.permute.xlu0 %1411 }
 0xa37   :  { %v1432_v8 = vsel %vm253_vm3, %v950_v58, %v1412_v5 }
 0xa3e   :  { %v1426_v25 = vpop.permute.xlu1 %1425 }
 0xa3f   :  { %v1436_v19 = vsel %vm1435_vm5, %v1433_v6, %v1426_v25 }
 0xa40   :  { %5958 = vmatmul.msk.f32.vlgmr.msrb.gmra.mxu0 %vm1446_vm6, %v1436_v19  ;;  %5970 = vmatmul.msk.f32.vlgmr.msrb.gmra.mxu1 %vm1446_vm6, %v1436_v19 }
 0xa46   :  { %v1420_v9 = vpop.permute.xlu0 %1419 }
 0xa47   :  { %v1434_v10 = vsel %vm797_vm11, %v1432_v8, %v1420_v9 }
 0xa48   :  { %v1437_v11 = vsel %vm1435_vm5, %v1434_v10, %v1428_v63 }
 0xa49   :  { %5959 = vmatmul.msk.f32.gmra.mxu0 %vm1446_vm6, %v1437_v11  ;;  %5971 = vmatmul.msk.f32.gmra.mxu1 %vm1446_vm6, %v1437_v11 }
 0xa51   :  { %5982 = vmatmul.msk.f32.vlgmr.msra.gmra.mxu0 %vm1446_vm6, %v1436_v19  ;;  %5994 = vmatmul.msk.f32.vlgmr.msra.gmra.mxu1 %vm1446_vm6, %v1436_v19 }
 0xa59   :  { %5983 = vmatmul.msk.f32.gmra.mxu0 %vm1446_vm6, %v1437_v11  ;;  %5995 = vmatmul.msk.f32.gmra.mxu1 %vm1446_vm6, %v1437_v11 }
 0xabd   :  { %v1470_v14 = vpop.f32.mrf.mxu0  ;;  %v1626_v15 = vpop.f32.mrf.mxu1 }
 0xabe   :  { %v1634_v16 = vmul.f32 %v7705_v12, %v1626_v15  ;;  %v1478_v17 = vmul.f32 %v7706_v13, %v1470_v14  ;;  %v1488_v24 = vmul.f32 %v7707_v22, %v1470_v14  ;;  %v1644_v1 = vmul.f32 %v7708_v23, %v1626_v15 }
 0xac0   :  { %v1636_v20 = vsel %vm797_vm11, %v1634_v16, 0.0  ;;  %v1480_v21 = vsel %vm797_vm11, %v1478_v17, 0.0  ;;  %v1490_v29 = vsel %vm797_vm11, %v1488_v24, 0.0  ;;  %v1646_v30 = vsel %vm797_vm11, %v1644_v1, 0.0  ;;  %v8416_v24 = vld [vmem:[%s7989_s9 + $0x8] sm:$0xff] }
 0xac1   :  { %1637 = vadd.xlane.f32.xlu0 %v1636_v20  ;;  %1481 = vadd.xlane.f32.xlu1 %v1480_v21 }
 0xac6   :  { %v1473_v27 = vpop.f32.mrf.mxu0  ;;  %v1629_v2 = vpop.f32.mrf.mxu1 }
 0xac7   :  { %1581 = vmatpush.msrb.mxu2 %v1473_v27  ;;  %1737 = vmatpush.msrb.mxu3 %v1629_v2  ;;  %v1479_v28 = vmul.f32 %v7706_v13, %v1473_v27  ;;  %v1645_v32 = vmul.f32 %v7708_v23, %v1629_v2  ;;  %v1635_v33 = vmul.f32 %v7705_v12, %v1629_v2 }
 0xac8   :  { %v1489_v36 = vmul.f32 %v7707_v22, %v1473_v27  ;;  %v8420_v27 = vld [vmem:[%s7989_s9] sm:$0xff] }
 0xac9   :  { %1491 = vadd.xlane.f32.xlu0 %v1490_v29  ;;  %1647 = vadd.xlane.f32.xlu1 %v1646_v30  ;;  %v1483_v31 = vsel %vm797_vm11, %v1479_v28, 0.0  ;;  %v1649_v37 = vsel %vm797_vm11, %v1645_v32, 0.0  ;;  %v1639_v38 = vsel %vm797_vm11, %v1635_v33, 0.0 }
 0xaca   :  { %1582 = vmatpush.msrb.mxu2 %v1470_v14  ;;  %1738 = vmatpush.msrb.mxu3 %v1626_v15  ;;  %v1493_v41 = vsel %vm797_vm11, %v1489_v36, 0.0 }
 0xacb   :  { %1484 = vadd.xlane.f32.xlu2 %v1483_v31 }
 0xace   :  { %v1782_v34 = vpop.f32.mrf.mxu0  ;;  %v1938_v35 = vpop.f32.mrf.mxu1 }
 0xacf   :  { %v1946_v43 = vmul.f32 %v7709_v39, %v1938_v35  ;;  %v1800_v44 = vmul.f32 %v7710_v40, %v1782_v34  ;;  %v1790_v47 = vmul.f32 %v7711_v42, %v1782_v34  ;;  %v1956_v52 = vmul.f32 %v7712_v51, %v1938_v35 }
 0xad1   :  { %1650 = vadd.xlane.f32.xlu0 %v1649_v37  ;;  %1640 = vadd.xlane.f32.xlu1 %v1639_v38  ;;  %v1948_v48 = vsel %vm797_vm11, %v1946_v43, 0.0  ;;  %v1802_v49 = vsel %vm797_vm11, %v1800_v44, 0.0  ;;  %v1792_v50 = vsel %vm797_vm11, %v1790_v47, 0.0  ;;  %v1958_v54 = vsel %vm797_vm11, %v1956_v52, 0.0 }
 0xad3   :  { %1494 = vadd.xlane.f32.xlu2 %v1493_v41 }
 0xad6   :  { %v1785_v45 = vpop.f32.mrf.mxu0  ;;  %v1941_v46 = vpop.f32.mrf.mxu1 }
 0xad7   :  { %1893 = vmatpush.msra.mxu2 %v1785_v45  ;;  %2049 = vmatpush.msra.mxu3 %v1941_v46  ;;  %v1791_v18 = vmul.f32 %v7711_v42, %v1785_v45  ;;  %v1947_v55 = vmul.f32 %v7709_v39, %v1941_v46  ;;  %v1801_v57 = vmul.f32 %v7710_v40, %v1785_v45 }
 0xad8   :  { %v1957_v60 = vmul.f32 %v7712_v51, %v1941_v46 }
 0xad9   :  { %2050 = vmatpush.msra.mxu3 %v1938_v35  ;;  %1949 = vadd.xlane.f32.xlu0 %v1948_v48  ;;  %v1795_v53 = vsel %vm797_vm11, %v1791_v18, 0.0  ;;  %v1951_v56 = vsel %vm797_vm11, %v1947_v55, 0.0  ;;  %v1805_v59 = vsel %vm797_vm11, %v1801_v57, 0.0 }
 0xada   :  { %1803 = vadd.xlane.f32.xlu1 %v1802_v49  ;;  %1894 = vmatpush.msra.mxu2 %v1782_v34  ;;  %v1961_v61 = vsel %vm797_vm11, %v1957_v60, 0.0 }
 0xadb   :  { %1793 = vadd.xlane.f32.xlu2 %v1792_v50 }
 0xae2   :  { %1796 = vadd.xlane.f32.xlu1 %v1795_v53 }
 0xae3   :  { %1959 = vadd.xlane.f32.xlu2 %v1958_v54 }
 0xaeb   :  { %1952 = vadd.xlane.f32.xlu2 %v1951_v56 }
 0xaf3   :  { %1806 = vadd.xlane.f32.xlu2 %v1805_v59 }
 0xafb   :  { %1962 = vadd.xlane.f32.xlu2 %v1961_v61 }
 0xb34   :  { %v1482_v62 = vpop.xlane.xlu1 %1481  ;;  %v1638_v26 = vpop.xlane.xlu0 %1637 }
 0xb35   :  { %1496 = vxpose.xlu0.b32.start [1/2] (short) (narrow) %v1482_v62, 8  ;;  %1652 = vxpose.xlu1.b32.start [1/2] (short) (narrow) %v1638_v26, 8 }
 0xb3c   :  { %v1648_v0 = vpop.xlane.xlu1 %1647  ;;  %v1492_v3 = vpop.xlane.xlu0 %1491 }
 0xb3e   :  { %v1485_v4 = vpop.xlane.xlu2 %1484 }
 0xb3f   :  { %1497 = vxpose.xlu0.b32.end [2/2] (short) (narrow) %v1485_v4, 8 }
 0xb44   :  { %v1641_v5 = vpop.xlane.xlu1 %1640  ;;  %v1651_v25 = vpop.xlane.xlu0 %1650 }
 0xb45   :  { %1653 = vxpose.xlu1.b32.end [2/2] (short) (narrow) %v1641_v5, 8 }
 0xb46   :  { %v1495_v6 = vpop.xlane.xlu2 %1494 }
 0xb4c   :  { %v1950_v19 = vpop.xlane.xlu0 %1949 }
 0xb4d   :  { %v1804_v7 = vpop.xlane.xlu1 %1803  ;;  %1964 = vxpose.xlu0.b32.start [1/2] (short) (narrow) %v1950_v19, 8 }
 0xb4e   :  { %v1794_v58 = vpop.xlane.xlu2 %1793 }
 0xb4f   :  { %1808 = vxpose.xlu2.b32.start [1/2] (short) (narrow) %v1794_v58, 8 }
 0xb55   :  { %v1797_v8 = vpop.xlane.xlu1 %1796 }
 0xb56   :  { %v1960_v9 = vpop.xlane.xlu2 %1959 }
 0xb57   :  { %1809 = vxpose.xlu2.b32.end [2/2] (short) (narrow) %v1797_v8, 8 }
 0xb5e   :  { %v1953_v63 = vpop.xlane.xlu2 %1952 }
 0xb5f   :  { %1965 = vxpose.xlu0.b32.end [2/2] (short) (narrow) %v1953_v63, 8 }
 0xb66   :  { %v1807_v10 = vpop.xlane.xlu2 %1806 }
 0xb6e   :  { %v1963_v15 = vpop.xlane.xlu2 %1962 }
 0xbdb   :  { %v1512_v11 = vpop.trf.xlu0 }
 0xbdc   :  { %v1528_v12 = vperm.slane %v1512_v11, 0 }
 0xbde   :  { %v1529_v13 = vadd.f32 %v1528_v12, %v1492_v3  ;;  %v1530_v14 = vadd.f32 %v1528_v12, %v1495_v6 }
 0xbe0   :  { %v1533_v16 = vmul.f32 0.2, %v1529_v13  ;;  %v1534_v17 = vmul.f32 0.2, %v1530_v14  ;;  %vm1532_vm7 = vcmp.gt.f32.partialorder %v1530_v14, 0.0  ;;  %vm1531_vm8 = vcmp.gt.f32.partialorder %v1529_v13, 0.0 }
 0xbe1   :  { %v1668_v20 = vpop.trf.xlu1 }
 0xbe2   :  { %v1684_v21 = vperm.slane %v1668_v20, 0  ;;  %v1536_v22 = vsel %vm1532_vm7, %v1530_v14, %v1534_v17  ;;  %v1535_v23 = vsel %vm1531_vm8, %v1529_v13, %v1533_v16 }
 0xbe3   :  { %v1538_v1 = vadd.f32 %v8416_v24, %v1536_v22  ;;  %v1537_v2 = vadd.f32 %v8420_v27, %v1535_v23 }
 0xbe4   :  { %v1685_v28 = vadd.f32 %v1684_v21, %v1648_v0  ;;  %v1686_v29 = vadd.f32 %v1684_v21, %v1651_v25 }
 0xbe5   :  { %v1542_v30 = vsel %vm253_vm3, %v1538_v1, -inf  ;;  %v1539_v31 = vsel %vm253_vm3, %v1537_v2, -inf }
 0xbe6   :  { %v1689_v32 = vmul.f32 0.2, %v1685_v28  ;;  %1543 = vmax.xlane.f32.xlu2 %v1542_v30  ;;  %1540 = vmax.xlane.f32.xlu0 %v1539_v31  ;;  %vm1687_vm9 = vcmp.gt.f32.partialorder %v1685_v28, 0.0  ;;  %v1690_v33 = vmul.f32 0.2, %v1686_v29  ;;  %vm1688_vm10 = vcmp.gt.f32.partialorder %v1686_v29, 0.0 }
 0xbe8   :  { %v1824_v34 = vpop.trf.xlu2  ;;  %v1691_v35 = vsel %vm1687_vm9, %v1685_v28, %v1689_v32  ;;  %v1692_v40 = vsel %vm1688_vm10, %v1686_v29, %v1690_v33  ;;  %vm5847_vm9 = vcmask 517120  }
 0xbe9   :  { %v1840_v36 = vperm.slane %v1824_v34, 0  ;;  %v1693_v37 = vadd.f32 %v8420_v27, %v1691_v35  ;;  %v1694_v41 = vadd.f32 %v8416_v24, %v1692_v40 }
 0xbeb   :  { %v1695_v38 = vsel %vm253_vm3, %v1693_v37, -inf  ;;  %v1841_v39 = vadd.f32 %v1840_v36, %v1804_v7  ;;  %v1698_v43 = vsel %vm253_vm3, %v1694_v41, -inf  ;;  %v1842_v44 = vadd.f32 %v1840_v36, %v1807_v10 }
 0xbec   :  { %1696 = vmax.xlane.f32.xlu1 %v1695_v38 }
 0xbed   :  { %v1845_v42 = vmul.f32 0.2, %v1841_v39  ;;  %vm1843_vm12 = vcmp.gt.f32.partialorder %v1841_v39, 0.0  ;;  %v1846_v47 = vmul.f32 0.2, %v1842_v44  ;;  %vm1844_vm13 = vcmp.gt.f32.partialorder %v1842_v44, 0.0 }
 0xbef   :  { %v1847_v45 = vsel %vm1843_vm12, %v1841_v39, %v1845_v42  ;;  %v1848_v51 = vsel %vm1844_vm13, %v1842_v44, %v1846_v47 }
 0xbf0   :  { %v1849_v46 = vadd.f32 %v8420_v27, %v1847_v45  ;;  %v1850_v53 = vadd.f32 %v8416_v24, %v1848_v51 }
 0xbf2   :  { %v1851_v49 = vsel %vm253_vm3, %v1849_v46, -inf  ;;  %v1854_v59 = vsel %vm253_vm3, %v1850_v53, -inf }
 0xbf4   :  { %1699 = vmax.xlane.f32.xlu1 %v1698_v43 }
 0xbfb   :  { %v1980_v48 = vpop.trf.xlu0 }
 0xbfc   :  { %v1996_v50 = vperm.slane %v1980_v48, 0  ;;  %1852 = vmax.xlane.f32.xlu1 %v1851_v49 }
 0xbfe   :  { %v1997_v18 = vadd.f32 %v1996_v50, %v1960_v9  ;;  %v1998_v52 = vadd.f32 %v1996_v50, %v1963_v15 }
 0xc00   :  { %v2001_v54 = vmul.f32 0.2, %v1997_v18  ;;  %v2002_v55 = vmul.f32 0.2, %v1998_v52  ;;  %vm2000_vm14 = vcmp.gt.f32.partialorder %v1998_v52, 0.0  ;;  %vm1999_vm15 = vcmp.gt.f32.partialorder %v1997_v18, 0.0 }
 0xc02   :  { %v2004_v56 = vsel %vm2000_vm14, %v1998_v52, %v2002_v55  ;;  %v2003_v57 = vsel %vm1999_vm15, %v1997_v18, %v2001_v54 }
 0xc03   :  { %v2006_v60 = vadd.f32 %v8416_v24, %v2004_v56  ;;  %v2005_v61 = vadd.f32 %v8420_v27, %v2003_v57 }
 0xc04   :  { %1855 = vmax.xlane.f32.xlu1 %v1854_v59 }
 0xc05   :  { %v2010_v62 = vsel %vm253_vm3, %v2006_v60, -inf  ;;  %v2007_v26 = vsel %vm253_vm3, %v2005_v61, -inf }
 0xc06   :  { %2011 = vmax.xlane.f32.xlu2 %v2010_v62  ;;  %2008 = vmax.xlane.f32.xlu0 %v2007_v26 }
 0xc59   :  { %v1544_v0 = vpop.xlane.xlu2 %1543  ;;  %v1541_v3 = vpop.xlane.xlu0 %1540 }
 0xc5a   :  { %v1546_v4 = vsub.f32 %v1538_v1, %v1544_v0  ;;  %v1545_v5 = vsub.f32 %v1537_v2, %v1541_v3 }
 0xc5c   :  { %v1549_v25 = vmul.f32 1.442695, %v1546_v4  ;;  %v1547_v6 = vmul.f32 1.442695, %v1545_v5  ;;  %v7715_v4 = vld [vmem:[%s9106_s8 + $0x1] ss:$0 sm:$0xff] }
 0xc5e   :  { %7786 = vpow2.f32 %v1549_v25  ;;  %v7716_v25 = vld [vmem:[%s9107_s14 + $0x1] ss:$0 sm:$0xff] }
 0xc5f   :  { %7788 = vpow2.f32 %v1547_v6  ;;  %v1697_v19 = vpop.xlane.xlu1 %1696 }
 0xc60   :  { %v1701_v7 = vsub.f32 %v1693_v37, %v1697_v19 }
 0xc62   :  { %v1703_v58 = vmul.f32 1.442695, %v1701_v7 }
 0xc64   :  { %v7787_v8 = vpop.eup %7786  ;;  %7790 = vpow2.f32 %v1703_v58 }
 0xc65   :  { %v7789_v9 = vpop.eup %7788  ;;  %v1554_v63 = vsel %vm253_vm3, %v7787_v8, 0.0 }
 0xc66   :  { %1555 = vadd.xlane.f32.xlu2 %v1554_v63  ;;  %v1551_v10 = vsel %vm253_vm3, %v7789_v9, 0.0  ;;  %v7718_v63 = vld [vmem:[%s9107_s14 + $0x2] ss:$0 sm:$0xff] }
 0xc67   :  { %1552 = vadd.xlane.f32.xlu0 %v1551_v10  ;;  %v1700_v11 = vpop.xlane.xlu1 %1699 }
 0xc68   :  { %v1702_v12 = vsub.f32 %v1694_v41, %v1700_v11 }
 0xc6a   :  { %v7791_v13 = vpop.eup %7790  ;;  %v1705_v14 = vmul.f32 1.442695, %v1702_v12 }
 0xc6b   :  { %v1707_v15 = vsel %vm253_vm3, %v7791_v13, 0.0 }
 0xc6c   :  { %7792 = vpow2.f32 %v1705_v14  ;;  %1708 = vadd.xlane.f32.xlu1 %v1707_v15 }
 0xc6f   :  { %v1853_v16 = vpop.xlane.xlu1 %1852 }
 0xc70   :  { %v1857_v17 = vsub.f32 %v1849_v46, %v1853_v16 }
 0xc72   :  { %v7793_v20 = vpop.eup %7792  ;;  %v1859_v21 = vmul.f32 1.442695, %v1857_v17  ;;  %v7719_v17 = vld [vmem:[%s9106_s8 + $0x3] ss:$0 sm:$0xff] }
 0xc73   :  { %v1710_v22 = vsel %vm253_vm3, %v7793_v20, 0.0 }
 0xc74   :  { %7794 = vpow2.f32 %v1859_v21  ;;  %1711 = vadd.xlane.f32.xlu0 %v1710_v22  ;;  %v7720_v22 = vld [vmem:[%s9107_s14 + $0x3] ss:$0 sm:$0xff] }
 0xc77   :  { %v1856_v23 = vpop.xlane.xlu1 %1855 }
 0xc78   :  { %v1858_v1 = vsub.f32 %v1850_v53, %v1856_v23 }
 0xc79   :  { %v2012_v2 = vpop.xlane.xlu2 %2011  ;;  %v2009_v28 = vpop.xlane.xlu0 %2008 }
 0xc7a   :  { %v7795_v29 = vpop.eup %7794  ;;  %v1861_v30 = vmul.f32 1.442695, %v1858_v1  ;;  %v2014_v31 = vsub.f32 %v2006_v60, %v2012_v2  ;;  %v2013_v32 = vsub.f32 %v2005_v61, %v2009_v28 }
 0xc7b   :  { %v1863_v33 = vsel %vm253_vm3, %v7795_v29, 0.0 }
 0xc7c   :  { %7796 = vpow2.f32 %v1861_v30  ;;  %v2017_v34 = vmul.f32 1.442695, %v2014_v31  ;;  %v2015_v35 = vmul.f32 1.442695, %v2013_v32  ;;  %1864 = vadd.xlane.f32.xlu1 %v1863_v33 }
 0xc7e   :  { %7798 = vpow2.f32 %v2017_v34 }
 0xc7f   :  { %7800 = vpow2.f32 %v2015_v35 }
 0xc82   :  { %v7797_v36 = vpop.eup %7796 }
 0xc83   :  { %v1866_v37 = vsel %vm253_vm3, %v7797_v36, 0.0 }
 0xc84   :  { %v7799_v38 = vpop.eup %7798  ;;  %1867 = vadd.xlane.f32.xlu0 %v1866_v37  ;;  %v2130_v37 = vld [vmem:[#allocation2 + $0xf8] sm:$0xff] }
 0xc85   :  { %v7801_v39 = vpop.eup %7800  ;;  %v2022_v40 = vsel %vm253_vm3, %v7799_v38, 0.0 }
 0xc86   :  { %2023 = vadd.xlane.f32.xlu1 %v2022_v40  ;;  %v2019_v41 = vsel %vm253_vm3, %v7801_v39, 0.0  ;;  %v2125_v40 = vld [vmem:[#allocation2 + $0xd0] sm:$0xff] }
 0xc87   :  { %2020 = vadd.xlane.f32.xlu2 %v2019_v41  ;;  %v2126_v41 = vld [vmem:[#allocation2 + $0xd8] sm:$0xff] }
 0xcd9   :  { %v1556_v43 = vpop.xlane.xlu2 %1555 }
 0xcda   :  { %v1553_v42 = vpop.xlane.xlu0 %1552 }
 0xcdb   :  { %7802 = vrcp.f32 %v1553_v42  ;;  %v2123_v42 = vld [vmem:[#allocation2 + $0xc0] sm:$0xff] }
 0xcdf   :  { %v1709_v44 = vpop.xlane.xlu1 %1708 }
 0xce0   :  { %7804 = vrcp.f32 %v1709_v44  ;;  %v2121_v44 = vld [vmem:[#allocation2 + $0xb0] sm:$0xff] }
 0xce1   :  { %v7803_v45 = vpop.eup %7802  ;;  %7806 = vrcp.f32 %v1556_v43  ;;  %v2124_v43 = vld [vmem:[#allocation2 + $0xc8] sm:$0xff] }
 0xce2   :  { %v1559_v46 = vmul.f32 %v7803_v45, %v7789_v9  ;;  %v7717_v9 = vld [vmem:[%s9106_s8 + $0x2] ss:$0 sm:$0xff]  ;;  %v2122_v45 = vld [vmem:[#allocation2 + $0xb8] sm:$0xff] }
 0xce4   :  { %5960 = vmatmul.msk.f32.vlgmr.msrb.gmra.mxu2 %vm253_vm3, %v1559_v46  ;;  %v2119_v46 = vld [vmem:[#allocation2 + $0xa0] sm:$0xff] }
 0xce5   :  { %2154 = vmatpush.msrb.mxu2 %v2130_v37 }
 0xce6   :  { %v7805_v47 = vpop.eup %7804 }
 0xce7   :  { %v7807_v48 = vpop.eup %7806  ;;  %v1715_v49 = vmul.f32 %v7805_v47, %v7791_v13  ;;  %v1712_v50 = vpop.xlane.xlu0 %1711  ;;  %v2120_v47 = vld [vmem:[#allocation2 + $0xa8] sm:$0xff] }
 0xce8   :  { %7808 = vrcp.f32 %v1712_v50  ;;  %v1560_v51 = vmul.f32 %v7807_v48, %v7787_v8  ;;  %v2117_v48 = vld [vmem:[#allocation2 + $0x90] sm:$0xff]  ;;  %v2115_v50 = vld [vmem:[#allocation2 + $0x80] sm:$0xff] }
 0xce9   :  { %5972 = vmatmul.msk.f32.vlgmr.msrb.gmra.mxu3 %vm253_vm3, %v1715_v49  ;;  %v2118_v49 = vld [vmem:[#allocation2 + $0x98] sm:$0xff] }
 0xcec   :  { %5961 = vmatmul.msk.f32.gmra.mxu2 %vm253_vm3, %v1560_v51  ;;  %v2116_v51 = vld [vmem:[#allocation2 + $0x88] sm:$0xff] }
 0xcee   :  { %v7809_v18 = vpop.eup %7808 }
 0xcef   :  { %v1865_v52 = vpop.xlane.xlu1 %1864  ;;  %v1716_v53 = vmul.f32 %v7809_v18, %v7793_v20  ;;  %v2113_v18 = vld [vmem:[#allocation2 + $0x70] sm:$0xff] }
 0xcf0   :  { %7810 = vrcp.f32 %v1865_v52  ;;  %v2114_v52 = vld [vmem:[#allocation2 + $0x78] sm:$0xff] }
 0xcf1   :  { %5973 = vmatmul.msk.f32.gmra.mxu3 %vm253_vm3, %v1716_v53  ;;  %v2111_v53 = vld [vmem:[#allocation2 + $0x60] sm:$0xff] }
 0xcf6   :  { %v7811_v54 = vpop.eup %7810 }
 0xcf7   :  { %v1871_v55 = vmul.f32 %v7811_v54, %v7795_v29  ;;  %v1868_v56 = vpop.xlane.xlu0 %1867  ;;  %v2112_v54 = vld [vmem:[#allocation2 + $0x68] sm:$0xff] }
 0xcf8   :  { %7812 = vrcp.f32 %v1868_v56  ;;  %v2110_v56 = vld [vmem:[#allocation2 + $0x58] sm:$0xff] }
 0xcf9   :  { %5984 = vmatmul.msk.f32.vlgmr.msra.gmra.mxu2 %vm253_vm3, %v1871_v55  ;;  %v2024_v60 = vpop.xlane.xlu1 %2023  ;;  %v2109_v55 = vld [vmem:[#allocation2 + $0x50] sm:$0xff] }
 0xcfa   :  { %v2021_v57 = vpop.xlane.xlu2 %2020 }
 0xcfb   :  { %7814 = vrcp.f32 %v2021_v57  ;;  %v2107_v57 = vld [vmem:[#allocation2 + $0x40] sm:$0xff] }
 0xcfc   :  { %7816 = vrcp.f32 %v2024_v60  ;;  %v2105_v60 = vld [vmem:[#allocation2 + $0x30] sm:$0xff] }
 0xcfe   :  { %v7813_v59 = vpop.eup %7812 }
 0xcff   :  { %v1872_v61 = vmul.f32 %v7813_v59, %v7797_v36  ;;  %v2129_v36 = vld [vmem:[#allocation2 + $0xf0] sm:$0xff]  ;;  %v2108_v59 = vld [vmem:[#allocation2 + $0x48] sm:$0xff] }
 0xd00   :  { %2131 = vmatpush.msrb.mxu0 %v2129_v36 }
 0xd01   :  { %v7815_v62 = vpop.eup %7814  ;;  %5985 = vmatmul.msk.f32.gmra.mxu2 %vm253_vm3, %v1872_v61  ;;  %v2106_v61 = vld [vmem:[#allocation2 + $0x38] sm:$0xff] }
 0xd02   :  { %v2027_v26 = vmul.f32 %v7815_v62, %v7801_v39  ;;  %v7817_v0 = vpop.eup %7816  ;;  %v2128_v39 = vld [vmem:[#allocation2 + $0xe8] sm:$0xff]  ;;  %v2103_v62 = vld [vmem:[#allocation2 + $0x20] sm:$0xff] }
 0xd03   :  { %v2028_v3 = vmul.f32 %v7817_v0, %v7799_v38  ;;  %v2127_v38 = vld [vmem:[#allocation2 + $0xe0] sm:$0xff]  ;;  %2155 = vmatpush.msrb.mxu2 %v2128_v39  ;;  %v2101_v0 = vld [vmem:[#allocation2 + $0x10] sm:$0xff] }
 0xd04   :  { %5996 = vmatmul.msk.f32.vlgmr.msra.gmra.mxu3 %vm253_vm3, %v2027_v26  ;;  %2132 = vmatpush.msrb.mxu0 %v2127_v38  ;;  %v2104_v26 = vld [vmem:[#allocation2 + $0x28] sm:$0xff] }
 0xd05   :  { %2156 = vmatpush.msrb.mxu2 %v2126_v41 }
 0xd06   :  { %2133 = vmatpush.msrb.mxu0 %v2125_v40 }
 0xd07   :  { %2157 = vmatpush.msrb.mxu2 %v2124_v43 }
 0xd08   :  { %2134 = vmatpush.msrb.mxu0 %v2123_v42 }
 0xd09   :  { %2158 = vmatpush.msrb.mxu2 %v2122_v45 }
 0xd0a   :  { %2135 = vmatpush.msrb.mxu0 %v2121_v44 }
 0xd0b   :  { %2159 = vmatpush.msrb.mxu2 %v2120_v47 }
 0xd0c   :  { %5997 = vmatmul.msk.f32.gmra.mxu3 %vm253_vm3, %v2028_v3  ;;  %2136 = vmatpush.msrb.mxu0 %v2119_v46  ;;  %v2102_v3 = vld [vmem:[#allocation2 + $0x18] sm:$0xff] }
 0xd0d   :  { %2160 = vmatpush.msrb.mxu2 %v2118_v49 }
 0xd0e   :  { %2137 = vmatpush.msrb.mxu0 %v2117_v48 }
 0xd0f   :  { %2161 = vmatpush.msrb.mxu2 %v2116_v51 }
 0xd10   :  { %2138 = vmatpush.msrb.mxu0 %v2115_v50 }
 0xd11   :  { %2162 = vmatpush.msrb.mxu2 %v2114_v52 }
 0xd12   :  { %2139 = vmatpush.msrb.mxu0 %v2113_v18 }
 0xd13   :  { %2163 = vmatpush.msrb.mxu2 %v2112_v54 }
 0xd14   :  { %2140 = vmatpush.msrb.mxu0 %v2111_v53 }
 0xd15   :  { %2164 = vmatpush.msrb.mxu2 %v2110_v56 }
 0xd16   :  { %2141 = vmatpush.msrb.mxu0 %v2109_v55 }
 0xd17   :  { %2165 = vmatpush.msrb.mxu2 %v2108_v59 }
 0xd18   :  { %2142 = vmatpush.msrb.mxu0 %v2107_v57 }
 0xd19   :  { %2166 = vmatpush.msrb.mxu2 %v2106_v61 }
 0xd1a   :  { %2143 = vmatpush.msrb.mxu0 %v2105_v60 }
 0xd1b   :  { %2167 = vmatpush.msrb.mxu2 %v2104_v26 }
 0xd1c   :  { %2144 = vmatpush.msrb.mxu0 %v2103_v62 }
 0xd1d   :  { %2168 = vmatpush.msrb.mxu2 %v2102_v3  ;;  %v2382_v3 = vld [vmem:[#allocation2 + $0x1f8] sm:$0xff] }
 0xd1e   :  { %2145 = vmatpush.msrb.mxu0 %v2101_v0  ;;  %v2381_v0 = vld [vmem:[#allocation2 + $0x1f0] sm:$0xff] }
 0xd67   :  { %v8454_v5 = vpop.f32.mrf.mxu2 }
 0xd6c   :  { %v1740_v6 = vpop.f32.mrf.mxu3 }
 0xd6d   :  { %v1748_v19 = vmul.f32 %v7715_v4, %v1740_v6  ;;  %v7713_v6 = vld [vmem:[%s9106_s8] ss:$0 sm:$0xff] }
 0xd6f   :  { %v1752_v7 = vadd.f32 %v7716_v25, %v1748_v19  ;;  %v8458_v8 = vpop.f32.mrf.mxu2  ;;  %v1592_v19 = vmul.f32 %v7713_v6, %v8454_v5 }
 0xd71   :  { %v1754_v58 = vmax.f32 %v1752_v7, 0.0  ;;  %v7714_v7 = vld [vmem:[%s9107_s14] ss:$0 sm:$0xff] }
 0xd73   :  { %2070 = vrot.lane.b32.xlu2 %v1754_v58, %s7970_s21 }
 0xd74   :  { %v1743_v12 = vpop.f32.mrf.mxu3 }
 0xd75   :  { %v1749_v14 = vmul.f32 %v7715_v4, %v1743_v12  ;;  %v2099_v4 = vld [vmem:[#allocation2] sm:$0xff] }
 0xd76   :  { %2146 = vmatpush.msrb.mxu0 %v2099_v4  ;;  %v2379_v4 = vld [vmem:[#allocation2 + $0x1e0] sm:$0xff] }
 0xd77   :  { %v1753_v20 = vadd.f32 %v7716_v25, %v1749_v14  ;;  %v2100_v25 = vld [vmem:[#allocation2 + $0x8] sm:$0xff] }
 0xd78   :  { %2169 = vmatpush.msrb.mxu2 %v2100_v25  ;;  %v2380_v25 = vld [vmem:[#allocation2 + $0x1e8] sm:$0xff] }
 0xd79   :  { %v1755_v28 = vmax.f32 %v1753_v20, 0.0 }
 0xd7c   :  { %v1896_v10 = vpop.f32.mrf.mxu2 }
 0xd7d   :  { %v1904_v11 = vmul.f32 %v7717_v9, %v1896_v10 }
 0xd7f   :  { %v1908_v13 = vadd.f32 %v7718_v63, %v1904_v11 }
 0xd81   :  { %v1910_v15 = vmax.f32 %v1908_v13, 0.0 }
 0xd83   :  { %2078 = vrot.lane.b32.xlu0 %v1910_v15, %s7972_s19 }
 0xd84   :  { %v1899_v16 = vpop.f32.mrf.mxu2 }
 0xd85   :  { %v1905_v21 = vmul.f32 %v7717_v9, %v1899_v16  ;;  %v1596_v9 = vadd.f32 %v7714_v7, %v1592_v19  ;;  %v2378_v19 = vld [vmem:[#allocation2 + $0x1d8] sm:$0xff] }
 0xd87   :  { %v1909_v23 = vadd.f32 %v7718_v63, %v1905_v21  ;;  %v2052_v1 = vpop.f32.mrf.mxu3  ;;  %v1593_v63 = vmul.f32 %v7713_v6, %v8458_v8  ;;  %v1598_v11 = vmax.f32 %v1596_v9, 0.0  ;;  %v2377_v6 = vld [vmem:[#allocation2 + $0x1d0] sm:$0xff] }
 0xd88   :  { %v2060_v2 = vmul.f32 %v7719_v17, %v2052_v1 }
 0xd89   :  { %v1911_v29 = vmax.f32 %v1909_v23, 0.0  ;;  %v1597_v12 = vadd.f32 %v7714_v7, %v1593_v63 }
 0xd8a   :  { %v2064_v30 = vadd.f32 %v7720_v22, %v2060_v2  ;;  %v2193_v2 = vld [vmem:[%s9108_s30] ss:$4 sm:$0x3] }
 0xd8b   :  { %2072 = vrot.lane.b32.xlu0 %v1755_v28, %s7970_s21  ;;  %2080 = vrot.lane.b32.xlu2 %v1911_v29, %s7972_s19  ;;  %v1599_v5 = vmax.f32 %v1597_v12, 0.0  ;;  %v2177_v28 = vld [vmem:[%s9109_s20] ss:$4 sm:$0x3]  ;;  %v2195_v29 = vperm.slane %v2193_v2, 0 }
 0xd8c   :  { %v2066_v31 = vmax.f32 %v2064_v30, 0.0  ;;  %v2196_v30 = vperm.slane %v2193_v2, 1  ;;  %v2370_v2 = vld [vmem:[#allocation2 + $0x198] sm:$0xff] }
 0xd8e   :  { %2086 = vrot.lane.b32.xlu1 %v2066_v31, %s7973_s24  ;;  %v2179_v31 = vperm.slane %v2177_v28, 0 }
 0xd8f   :  { %v2055_v32 = vpop.f32.mrf.mxu3 }
 0xd90   :  { %v2061_v33 = vmul.f32 %v7719_v17, %v2055_v32  ;;  %v2180_v32 = vperm.slane %v2177_v28, 1  ;;  %v2367_v28 = vld [vmem:[#allocation2 + $0x180] sm:$0xff] }
 0xd92   :  { %v2065_v34 = vadd.f32 %v7720_v22, %v2061_v33 }
 0xd94   :  { %v2067_v35 = vmax.f32 %v2065_v34, 0.0 }
 0xd96   :  { %2088 = vrot.lane.b32.xlu1 %v2067_v35, %s7973_s24 }
 0xdcd   :  { %v2071_v10 = vpop.permute.xlu2 %2070 }
 0xdce   :  { %v2092_v13 = vsel %vm797_vm11, %v1598_v11, %v2071_v10 }
 0xde5   :  { %v2081_v20 = vpop.permute.xlu2 %2080 }
 0xdf5   :  { %v2079_v58 = vpop.permute.xlu0 %2078 }
 0xdf6   :  { %v2094_v14 = vsel %vm1446_vm6, %v2092_v13, %v2079_v58 }
 0xdfd   :  { %v2073_v17 = vpop.permute.xlu0 %2072 }
 0xdfe   :  { %v2093_v8 = vsel %vm797_vm11, %v1599_v5, %v2073_v17  ;;  %v2375_v17 = vld [vmem:[#allocation2 + $0x1c0] sm:$0xff]  ;;  %v2376_v5 = vld [vmem:[#allocation2 + $0x1c8] sm:$0xff] }
 0xdff   :  { %v2095_v22 = vsel %vm1446_vm6, %v2093_v8, %v2081_v20  ;;  %v2373_v8 = vld [vmem:[#allocation2 + $0x1b0] sm:$0xff]  ;;  %v2374_v20 = vld [vmem:[#allocation2 + $0x1b8] sm:$0xff] }
 0xe00   :  { %v2087_v15 = vpop.permute.xlu1 %2086 }
 0xe01   :  { %v8471_v16 = vsel %vm2096_vm0, %v2094_v14, %v2087_v15 }
 0xe02   :  { %2147 = vmatmul.f32.vlgmr.msrb.gmra.mxu0 %v8471_v16  ;;  %2170 = vmatmul.f32.vlgmr.msrb.gmra.mxu2 %v8471_v16 }
 0xe08   :  { %v2089_v21 = vpop.permute.xlu1 %2088 }
 0xe09   :  { %v8477_v23 = vsel %vm2096_vm0, %v2095_v22, %v2089_v21  ;;  %v2371_v21 = vld [vmem:[#allocation2 + $0x1a0] sm:$0xff]  ;;  %v2372_v22 = vld [vmem:[#allocation2 + $0x1a8] sm:$0xff] }
 0xe0a   :  { %2150 = vmatmul.f32.gmra.mxu0 %v8477_v23  ;;  %2173 = vmatmul.f32.gmra.mxu2 %v8477_v23 }
 0xe7f   :  { %v2148_v1 = vpop.f32.mrf.mxu0 }
 0xe80   :  { %v2199_v34 = vmul.f32 %v2195_v29, %v2148_v1  ;;  %v2183_v36 = vmul.f32 %v2179_v31, %v2148_v1 }
 0xe85   :  { %v2171_v33 = vpop.f32.mrf.mxu2 }
 0xe86   :  { %v2200_v35 = vmul.f32 %v2196_v30, %v2171_v33  ;;  %v2184_v37 = vmul.f32 %v2180_v32, %v2171_v33 }
 0xe87   :  { %v2151_v38 = vpop.f32.mrf.mxu0 }
 0xe88   :  { %2294 = vmatpush.msrb.mxu1 %v2151_v38  ;;  %v2203_v39 = vadd.f32 %v2200_v35, %v2199_v34  ;;  %v2187_v40 = vadd.f32 %v2184_v37, %v2183_v36  ;;  %v2201_v42 = vmul.f32 %v2195_v29, %v2151_v38  ;;  %v2185_v44 = vmul.f32 %v2179_v31, %v2151_v38  ;;  %v2368_v29 = vld [vmem:[#allocation2 + $0x188] sm:$0xff]  ;;  %v2366_v31 = vld [vmem:[#allocation2 + $0x178] sm:$0xff]  ;;  %v2361_v34 = vld [vmem:[#allocation2 + $0x150] sm:$0xff] }
 0xe89   :  { %v2362_v35 = vld [vmem:[#allocation2 + $0x158] sm:$0xff]  ;;  %v2359_v36 = vld [vmem:[#allocation2 + $0x140] sm:$0xff]  ;;  %v2360_v37 = vld [vmem:[#allocation2 + $0x148] sm:$0xff] }
 0xe8a   :  { %2204 = vadd.xlane.f32.xlu1 %v2203_v39  ;;  %2188 = vadd.xlane.f32.xlu0 %v2187_v40  ;;  %v2357_v38 = vld [vmem:[#allocation2 + $0x130] sm:$0xff]  ;;  %v2358_v39 = vld [vmem:[#allocation2 + $0x138] sm:$0xff]  ;;  %v2355_v40 = vld [vmem:[#allocation2 + $0x120] sm:$0xff] }
 0xe8b   :  { %2295 = vmatpush.msrb.mxu1 %v2148_v1  ;;  %v2369_v1 = vld [vmem:[#allocation2 + $0x190] sm:$0xff] }
 0xe8d   :  { %v2174_v41 = vpop.f32.mrf.mxu2  ;;  %2383 = vmatpush.msra.mxu1 %v2381_v0 }
 0xe8e   :  { %2317 = vmatpush.msrb.mxu3 %v2174_v41  ;;  %v2202_v43 = vmul.f32 %v2196_v30, %v2174_v41  ;;  %v2186_v45 = vmul.f32 %v2180_v32, %v2174_v41  ;;  %v2365_v30 = vld [vmem:[#allocation2 + $0x170] sm:$0xff]  ;;  %v2363_v32 = vld [vmem:[#allocation2 + $0x160] sm:$0xff]  ;;  %v2356_v41 = vld [vmem:[#allocation2 + $0x128] sm:$0xff] }
 0xe8f   :  { %2384 = vmatpush.msra.mxu1 %v2379_v4 }
 0xe90   :  { %2318 = vmatpush.msrb.mxu3 %v2171_v33  ;;  %v2206_v46 = vadd.f32 %v2202_v43, %v2201_v42  ;;  %v2190_v47 = vadd.f32 %v2186_v45, %v2185_v44  ;;  %v2364_v33 = vld [vmem:[#allocation2 + $0x168] sm:$0xff]  ;;  %v2353_v42 = vld [vmem:[#allocation2 + $0x110] sm:$0xff]  ;;  %v2354_v43 = vld [vmem:[#allocation2 + $0x118] sm:$0xff] }
 0xe91   :  { %2385 = vmatpush.msra.mxu1 %v2377_v6  ;;  %v2351_v44 = vld [vmem:[#allocation2 + $0x100] sm:$0xff]  ;;  %v2352_v45 = vld [vmem:[#allocation2 + $0x108] sm:$0xff] }
 0xe92   :  { %2207 = vadd.xlane.f32.xlu0 %v2206_v46  ;;  %2191 = vadd.xlane.f32.xlu2 %v2190_v47 }
 0xe93   :  { %2406 = vmatpush.msra.mxu3 %v2382_v3  ;;  %2386 = vmatpush.msra.mxu1 %v2375_v17 }
 0xe95   :  { %2407 = vmatpush.msra.mxu3 %v2380_v25  ;;  %2387 = vmatpush.msra.mxu1 %v2373_v8 }
 0xe97   :  { %2408 = vmatpush.msra.mxu3 %v2378_v19  ;;  %2388 = vmatpush.msra.mxu1 %v2371_v21 }
 0xe99   :  { %2409 = vmatpush.msra.mxu3 %v2376_v5  ;;  %2389 = vmatpush.msra.mxu1 %v2369_v1 }
 0xe9b   :  { %2410 = vmatpush.msra.mxu3 %v2374_v20  ;;  %2390 = vmatpush.msra.mxu1 %v2367_v28 }
 0xe9d   :  { %2411 = vmatpush.msra.mxu3 %v2372_v22  ;;  %2391 = vmatpush.msra.mxu1 %v2365_v30 }
 0xe9f   :  { %2412 = vmatpush.msra.mxu3 %v2370_v2  ;;  %2392 = vmatpush.msra.mxu1 %v2363_v32 }
 0xea1   :  { %2413 = vmatpush.msra.mxu3 %v2368_v29  ;;  %2393 = vmatpush.msra.mxu1 %v2361_v34  ;;  %v2637_v34 = vld [vmem:[#allocation2 + $0x2f0] sm:$0xff] }
 0xea3   :  { %2414 = vmatpush.msra.mxu3 %v2366_v31  ;;  %2394 = vmatpush.msra.mxu1 %v2359_v36  ;;  %v2635_v36 = vld [vmem:[#allocation2 + $0x2e0] sm:$0xff] }
 0xea5   :  { %2415 = vmatpush.msra.mxu3 %v2364_v33  ;;  %2395 = vmatpush.msra.mxu1 %v2357_v38  ;;  %v2633_v38 = vld [vmem:[#allocation2 + $0x2d0] sm:$0xff] }
 0xea7   :  { %2416 = vmatpush.msra.mxu3 %v2362_v35  ;;  %2396 = vmatpush.msra.mxu1 %v2355_v40  ;;  %v2638_v35 = vld [vmem:[#allocation2 + $0x2f8] sm:$0xff] }
 0xea9   :  { %2417 = vmatpush.msra.mxu3 %v2360_v37  ;;  %2397 = vmatpush.msra.mxu1 %v2353_v42  ;;  %v2636_v37 = vld [vmem:[#allocation2 + $0x2e8] sm:$0xff] }
 0xeab   :  { %2418 = vmatpush.msra.mxu3 %v2358_v39  ;;  %2398 = vmatpush.msra.mxu1 %v2351_v44  ;;  %v2634_v39 = vld [vmem:[#allocation2 + $0x2d8] sm:$0xff] }
 0xead   :  { %2419 = vmatpush.msra.mxu3 %v2356_v41 }
 0xeaf   :  { %2420 = vmatpush.msra.mxu3 %v2354_v43 }
 0xeb1   :  { %2421 = vmatpush.msra.mxu3 %v2352_v45 }
 0xefd   :  { %v2189_v48 = vpop.xlane.xlu0 %2188  ;;  %v2205_v18 = vpop.xlane.xlu1 %2204 }
 0xefe   :  { %2209 = vxpose.xlu2.b32.start [1/2] (short) (narrow) %v2189_v48, 8 }
 0xf05   :  { %v2192_v49 = vpop.xlane.xlu2 %2191  ;;  %v2208_v52 = vpop.xlane.xlu0 %2207 }
 0xf06   :  { %2210 = vxpose.xlu2.b32.end [2/2] (short) (narrow) %v2192_v49, 8 }
 0xf97   :  { %v2225_v50 = vpop.trf.xlu2 }
 0xf98   :  { %v2241_v51 = vperm.slane %v2225_v50, 0 }
 0xf9a   :  { %v2242_v53 = vadd.f32 %v2241_v51, %v2205_v18  ;;  %v2243_v54 = vadd.f32 %v2241_v51, %v2208_v52 }
 0xf9c   :  { %v2246_v55 = vmul.f32 0.2, %v2242_v53  ;;  %v2247_v56 = vmul.f32 0.2, %v2243_v54  ;;  %vm2244_vm11 = vcmp.gt.f32.partialorder %v2242_v53, 0.0  ;;  %vm2245_vm1 = vcmp.gt.f32.partialorder %v2243_v54, 0.0 }
 0xf9e   :  { %v2248_v57 = vsel %vm2244_vm11, %v2242_v53, %v2246_v55  ;;  %v2249_v59 = vsel %vm2245_vm1, %v2243_v54, %v2247_v56  ;;  %v6002_v56 = vld [vmem:[%s9109_s20 + $0x1] ss:$4 sm:$0x3] }
 0xf9f   :  { %v2250_v60 = vadd.f32 %v8420_v27, %v2248_v57  ;;  %v2251_v61 = vadd.f32 %v8416_v24, %v2249_v59  ;;  %v2432_v57 = vperm.slane %v6002_v56, 0  ;;  %v2433_v59 = vperm.slane %v6002_v56, 1  ;;  %v2628_v56 = vld [vmem:[#allocation2 + $0x2a8] sm:$0xff] }
 0xfa1   :  { %v2252_v62 = vsel %vm253_vm3, %v2250_v60, -inf  ;;  %v2255_v26 = vsel %vm253_vm3, %v2251_v61, -inf }
 0xfa2   :  { %2253 = vmax.xlane.f32.xlu1 %v2252_v62  ;;  %2256 = vmax.xlane.f32.xlu0 %v2255_v26  ;;  %v6003_v26 = vld [vmem:[%s9108_s30 + $0x1] ss:$4 sm:$0x3] }
 0xfa3   :  { %v2450_v3 = vperm.slane %v6003_v26, 1  ;;  %v2449_v25 = vperm.slane %v6003_v26, 0  ;;  %v2622_v26 = vld [vmem:[#allocation2 + $0x278] sm:$0xff] }
0x1015   :  { %v2254_v7 = vpop.xlane.xlu1 %2253  ;;  %v2257_v58 = vpop.xlane.xlu0 %2256 }
0x1016   :  { %v2258_v9 = vsub.f32 %v2250_v60, %v2254_v7  ;;  %v2259_v63 = vsub.f32 %v2251_v61, %v2257_v58 }
0x1018   :  { %v2260_v10 = vmul.f32 1.442695, %v2258_v9  ;;  %v2262_v11 = vmul.f32 1.442695, %v2259_v63 }
0x101a   :  { %7818 = vpow2.f32 %v2260_v10 }
0x101b   :  { %7820 = vpow2.f32 %v2262_v11 }
0x1020   :  { %v8487_v12 = vpop.eup %7818 }
0x1021   :  { %v8489_v13 = vpop.eup %7820  ;;  %v2264_v14 = vsel %vm253_vm3, %v8487_v12, 0.0 }
0x1022   :  { %2265 = vadd.xlane.f32.xlu1 %v2264_v14  ;;  %v2267_v15 = vsel %vm253_vm3, %v8489_v13, 0.0 }
0x1023   :  { %2268 = vadd.xlane.f32.xlu0 %v2267_v15 }
0x1095   :  { %v2266_v46 = vpop.xlane.xlu1 %2265 }
0x1096   :  { %7822 = vrcp.f32 %v2266_v46  ;;  %v2269_v47 = vpop.xlane.xlu0 %2268 }
0x1097   :  { %7824 = vrcp.f32 %v2269_v47 }
0x109c   :  { %v7823_v48 = vpop.eup %7822 }
0x109d   :  { %v2272_v49 = vmul.f32 %v7823_v48, %v8487_v12  ;;  %v7825_v50 = vpop.eup %7824  ;;  %v2631_v48 = vld [vmem:[#allocation2 + $0x2c0] sm:$0xff] }
0x109e   :  { %v2273_v51 = vmul.f32 %v7825_v50, %v8489_v13  ;;  %v2629_v50 = vld [vmem:[#allocation2 + $0x2b0] sm:$0xff] }
0x109f   :  { %5998 = vmatmul.msk.f32.vlgmr.msrb.gmra.mxu1 %vm253_vm3, %v2272_v49  ;;  %6000 = vmatmul.msk.f32.vlgmr.msrb.gmra.mxu3 %vm253_vm3, %v2272_v49  ;;  %v2632_v49 = vld [vmem:[#allocation2 + $0x2c8] sm:$0xff] }
0x10a7   :  { %5999 = vmatmul.msk.f32.gmra.mxu1 %vm253_vm3, %v2273_v51  ;;  %6001 = vmatmul.msk.f32.gmra.mxu3 %vm253_vm3, %v2273_v51  ;;  %v2630_v51 = vld [vmem:[#allocation2 + $0x2b8] sm:$0xff] }
0x10af   :  { %2399 = vmatmul.f32.vlgmr.msra.gmra.mxu1 %v8471_v16  ;;  %2422 = vmatmul.f32.vlgmr.msra.gmra.mxu3 %v8471_v16 }
0x10b7   :  { %2402 = vmatmul.f32.gmra.mxu1 %v8477_v23  ;;  %2425 = vmatmul.f32.gmra.mxu3 %v8477_v23 }
0x111c   :  { %v8505_v18 = vpop.f32.mrf.mxu1 }
0x1122   :  { %v8507_v52 = vpop.f32.mrf.mxu3 }
0x1124   :  { %v8509_v53 = vpop.f32.mrf.mxu1 }
0x112a   :  { %v8511_v54 = vpop.f32.mrf.mxu3 }
0x112c   :  { %v2400_v55 = vpop.f32.mrf.mxu1 }
0x112d   :  { %v2436_v61 = vmul.f32 %v2432_v57, %v2400_v55  ;;  %v2453_v7 = vmul.f32 %v2449_v25, %v2400_v55 }
0x1132   :  { %v2423_v60 = vpop.f32.mrf.mxu3 }
0x1133   :  { %v2437_v62 = vmul.f32 %v2433_v59, %v2423_v60  ;;  %v2454_v6 = vmul.f32 %v2450_v3, %v2423_v60 }
0x1134   :  { %v2403_v0 = vpop.f32.mrf.mxu1 }
0x1135   :  { %2548 = vmatpush.msra.mxu0 %v2403_v0  ;;  %v2440_v4 = vadd.f32 %v2437_v62, %v2436_v61  ;;  %v2438_v58 = vmul.f32 %v2432_v57, %v2403_v0  ;;  %v2457_v63 = vadd.f32 %v2454_v6, %v2453_v7  ;;  %v2455_v12 = vmul.f32 %v2449_v25, %v2403_v0  ;;  %v2625_v57 = vld [vmem:[#allocation2 + $0x290] sm:$0xff]  ;;  %v2624_v61 = vld [vmem:[#allocation2 + $0x288] sm:$0xff]  ;;  %v2619_v0 = vld [vmem:[#allocation2 + $0x260] sm:$0xff] }
0x1136   :  { %v2621_v62 = vld [vmem:[#allocation2 + $0x270] sm:$0xff]  ;;  %v2618_v25 = vld [vmem:[#allocation2 + $0x258] sm:$0xff]  ;;  %v2615_v6 = vld [vmem:[#allocation2 + $0x240] sm:$0xff] }
0x1137   :  { %2441 = vadd.xlane.f32.xlu1 %v2440_v4  ;;  %2549 = vmatpush.msra.mxu0 %v2400_v55  ;;  %v2627_v55 = vld [vmem:[#allocation2 + $0x2a0] sm:$0xff]  ;;  %v2617_v4 = vld [vmem:[#allocation2 + $0x250] sm:$0xff] }
0x1138   :  { %v2613_v7 = vld [vmem:[#allocation2 + $0x230] sm:$0xff] }
0x1139   :  { %2639 = vmatpush.msrb.mxu0 %v2637_v34 }
0x113a   :  { %v2426_v19 = vpop.f32.mrf.mxu3 }
0x113b   :  { %v2439_v9 = vmul.f32 %v2433_v59, %v2426_v19  ;;  %2571 = vmatpush.msra.mxu2 %v2426_v19  ;;  %v2456_v11 = vmul.f32 %v2450_v3, %v2426_v19  ;;  %2640 = vmatpush.msrb.mxu0 %v2635_v36  ;;  %v2626_v59 = vld [vmem:[#allocation2 + $0x298] sm:$0xff]  ;;  %v2620_v3 = vld [vmem:[#allocation2 + $0x268] sm:$0xff]  ;;  %v6011_v36 = vld [vmem:[%s9108_s30 + $0x2] ss:$4 sm:$0x3] }
0x113c   :  { %v2616_v19 = vld [vmem:[#allocation2 + $0x248] sm:$0xff] }
0x113d   :  { %2572 = vmatpush.msra.mxu2 %v2423_v60  ;;  %v2443_v10 = vadd.f32 %v2439_v9, %v2438_v58  ;;  %v2460_v13 = vadd.f32 %v2456_v11, %v2455_v12  ;;  %2641 = vmatpush.msrb.mxu0 %v2633_v38  ;;  %v2623_v60 = vld [vmem:[#allocation2 + $0x280] sm:$0xff]  ;;  %v2614_v58 = vld [vmem:[#allocation2 + $0x238] sm:$0xff]  ;;  %v2706_v38 = vperm.slane %v6011_v36, 1 }
0x113e   :  { %v2611_v9 = vld [vmem:[#allocation2 + $0x220] sm:$0xff]  ;;  %v2610_v11 = vld [vmem:[#allocation2 + $0x218] sm:$0xff] }
0x113f   :  { %2458 = vadd.xlane.f32.xlu1 %v2457_v63  ;;  %2444 = vadd.xlane.f32.xlu0 %v2443_v10  ;;  %v2612_v63 = vld [vmem:[#allocation2 + $0x228] sm:$0xff]  ;;  %v2609_v10 = vld [vmem:[#allocation2 + $0x210] sm:$0xff]  ;;  %v2607_v12 = vld [vmem:[#allocation2 + $0x200] sm:$0xff] }
0x1140   :  { %2662 = vmatpush.msrb.mxu2 %v2638_v35  ;;  %2642 = vmatpush.msrb.mxu0 %v2631_v48 }
0x1142   :  { %2663 = vmatpush.msrb.mxu2 %v2636_v37  ;;  %2643 = vmatpush.msrb.mxu0 %v2629_v50 }
0x1144   :  { %2664 = vmatpush.msrb.mxu2 %v2634_v39  ;;  %2644 = vmatpush.msrb.mxu0 %v2627_v55  ;;  %v2705_v39 = vperm.slane %v6011_v36, 0  ;;  %v2883_v36 = vld [vmem:[#allocation2 + $0x3a0] sm:$0xff] }
0x1146   :  { %2665 = vmatpush.msrb.mxu2 %v2632_v49  ;;  %2645 = vmatpush.msrb.mxu0 %v2625_v57 }
0x1147   :  { %2461 = vadd.xlane.f32.xlu0 %v2460_v13  ;;  %v2608_v13 = vld [vmem:[#allocation2 + $0x208] sm:$0xff] }
0x1148   :  { %2666 = vmatpush.msrb.mxu2 %v2630_v51  ;;  %2646 = vmatpush.msrb.mxu0 %v2623_v60  ;;  %v7974_v51 = vmov 0  }
0x114a   :  { %2667 = vmatpush.msrb.mxu2 %v2628_v56  ;;  %2647 = vmatpush.msrb.mxu0 %v2621_v62 }
0x114c   :  { %2668 = vmatpush.msrb.mxu2 %v2626_v59  ;;  %2648 = vmatpush.msrb.mxu0 %v2619_v0 }
0x114e   :  { %2669 = vmatpush.msrb.mxu2 %v2624_v61  ;;  %2649 = vmatpush.msrb.mxu0 %v2617_v4 }
0x1150   :  { %2670 = vmatpush.msrb.mxu2 %v2622_v26  ;;  %2650 = vmatpush.msrb.mxu0 %v2615_v6 }
0x1152   :  { %2671 = vmatpush.msrb.mxu2 %v2620_v3  ;;  %2651 = vmatpush.msrb.mxu0 %v2613_v7  ;;  %v8550_v3 = vld [vmem:[%s7989_s9 + $0x8] sm:$0xff] }
0x1154   :  { %2672 = vmatpush.msrb.mxu2 %v2618_v25  ;;  %2652 = vmatpush.msrb.mxu0 %v2611_v9  ;;  %v8554_v25 = vld [vmem:[%s7989_s9] sm:$0xff]  ;;  %v2893_v9 = vld [vmem:[#allocation2 + $0x3f0] sm:$0xff]  ;;  %s9111_s9 = sld [smem:[#allocation19_spill]] }
0x1156   :  { %2673 = vmatpush.msrb.mxu2 %v2616_v19  ;;  %2653 = vmatpush.msrb.mxu0 %v2609_v10  ;;  %v2891_v10 = vld [vmem:[#allocation2 + $0x3e0] sm:$0xff] }
0x1158   :  { %2674 = vmatpush.msrb.mxu2 %v2614_v58  ;;  %2654 = vmatpush.msrb.mxu0 %v2607_v12  ;;  %v6026_v58 = vld [vmem:[%s9110_s7 + $0x10] sm:$0xff] }
0x1159   :  { %v2889_v12 = vld [vmem:[#allocation2 + $0x3d0] sm:$0xff] }
0x115a   :  { %2675 = vmatpush.msrb.mxu2 %v2612_v63  ;;  %v2894_v63 = vld [vmem:[#allocation2 + $0x3f8] sm:$0xff] }
0x115c   :  { %2676 = vmatpush.msrb.mxu2 %v2610_v11  ;;  %v2892_v11 = vld [vmem:[#allocation2 + $0x3e8] sm:$0xff] }
0x115e   :  { %2677 = vmatpush.msrb.mxu2 %v2608_v13  ;;  %v2890_v13 = vld [vmem:[#allocation2 + $0x3d8] sm:$0xff] }
0x11aa   :  { %v2442_v14 = vpop.xlane.xlu1 %2441 }
0x11ab   :  { %2463 = vxpose.xlu1.b32.start [1/2] (short) (narrow) %v2442_v14, 8 }
0x11b2   :  { %v2445_v15 = vpop.xlane.xlu0 %2444  ;;  %v2459_v17 = vpop.xlane.xlu1 %2458 }
0x11b3   :  { %2464 = vxpose.xlu1.b32.end [2/2] (short) (narrow) %v2445_v15, 8 }
0x11ba   :  { %v2462_v20 = vpop.xlane.xlu0 %2461 }
0x1206   :  { %7670 = vset.pattern.permute.xlu1 %v7974_v51 }
0x124f   :  { %v2479_v5 = vpop.trf.xlu1 }
0x1250   :  { %v2495_v8 = vperm.slane %v2479_v5, 0 }
0x1252   :  { %v2496_v21 = vadd.f32 %v2495_v8, %v2459_v17  ;;  %v2497_v22 = vadd.f32 %v2495_v8, %v2462_v20 }
0x1254   :  { %v2500_v1 = vmul.f32 0.2, %v2496_v21  ;;  %vm2498_vm2 = vcmp.gt.f32.partialorder %v2496_v21, 0.0  ;;  %v2501_v2 = vmul.f32 0.2, %v2497_v22  ;;  %vm2499_vm4 = vcmp.gt.f32.partialorder %v2497_v22, 0.0 }
0x1256   :  { %v2502_v28 = vsel %vm2498_vm2, %v2496_v21, %v2500_v1  ;;  %v2503_v31 = vsel %vm2499_vm4, %v2497_v22, %v2501_v2 }
0x1257   :  { %v2504_v29 = vadd.f32 %v8420_v27, %v2502_v28  ;;  %v2505_v32 = vadd.f32 %v8416_v24, %v2503_v31 }
0x1259   :  { %v2506_v30 = vsel %vm253_vm3, %v2504_v29, -inf  ;;  %v2509_v33 = vsel %vm253_vm3, %v2505_v32, -inf }
0x125a   :  { %2507 = vmax.xlane.f32.xlu0 %v2506_v30 }
0x1262   :  { %2510 = vmax.xlane.f32.xlu0 %v2509_v33 }
0x12cd   :  { %v2508_v27 = vpop.xlane.xlu0 %2507 }
0x12ce   :  { %v2512_v40 = vsub.f32 %v2504_v29, %v2508_v27  ;;  %v6010_v29 = vld [vmem:[%s9109_s20 + $0x2] ss:$4 sm:$0x3] }
0x12cf   :  { %v2689_v30 = vperm.slane %v6010_v29, 1  ;;  %v2688_v31 = vperm.slane %v6010_v29, 0 }
0x12d0   :  { %v2514_v41 = vmul.f32 1.442695, %v2512_v40 }
0x12d2   :  { %7826 = vpow2.f32 %v2514_v41 }
0x12d5   :  { %v2511_v24 = vpop.xlane.xlu0 %2510 }
0x12d6   :  { %v2513_v42 = vsub.f32 %v2505_v32, %v2511_v24 }
0x12d8   :  { %v8519_v43 = vpop.eup %7826  ;;  %v2516_v44 = vmul.f32 1.442695, %v2513_v42 }
0x12d9   :  { %v2518_v45 = vsel %vm253_vm3, %v8519_v43, 0.0 }
0x12da   :  { %7828 = vpow2.f32 %v2516_v44  ;;  %2519 = vadd.xlane.f32.xlu2 %v2518_v45 }
0x12e0   :  { %v8523_v46 = vpop.eup %7828 }
0x12e1   :  { %v2521_v47 = vsel %vm253_vm3, %v8523_v46, 0.0 }
0x12e2   :  { %2522 = vadd.xlane.f32.xlu0 %v2521_v47 }
0x134d   :  { %v2520_v14 = vpop.xlane.xlu2 %2519 }
0x134e   :  { %7830 = vrcp.f32 %v2520_v14 }
0x1354   :  { %v7831_v15 = vpop.eup %7830 }
0x1355   :  { %v2526_v17 = vmul.f32 %v7831_v15, %v8519_v43  ;;  %v2523_v5 = vpop.xlane.xlu0 %2522 }
0x1356   :  { %7832 = vrcp.f32 %v2523_v5 }
0x1357   :  { %6004 = vmatmul.msk.f32.vlgmr.msra.gmra.mxu0 %vm253_vm3, %v2526_v17  ;;  %6006 = vmatmul.msk.f32.vlgmr.msra.gmra.mxu2 %vm253_vm3, %v2526_v17 }
0x135c   :  { %v7833_v8 = vpop.eup %7832 }
0x135d   :  { %v2527_v20 = vmul.f32 %v7833_v8, %v8523_v46 }
0x135f   :  { %6005 = vmatmul.msk.f32.gmra.mxu0 %vm253_vm3, %v2527_v20  ;;  %6007 = vmatmul.msk.f32.gmra.mxu2 %vm253_vm3, %v2527_v20 }
0x1367   :  { %2655 = vmatmul.f32.vlgmr.msrb.gmra.mxu0 %v8471_v16  ;;  %2678 = vmatmul.f32.vlgmr.msrb.gmra.mxu2 %v8471_v16 }
0x136f   :  { %2658 = vmatmul.f32.gmra.mxu0 %v8477_v23  ;;  %2681 = vmatmul.f32.gmra.mxu2 %v8477_v23 }
0x13d4   :  { %v8537_v21 = vpop.f32.mrf.mxu0 }
0x13da   :  { %v8539_v22 = vpop.f32.mrf.mxu2 }
0x13dc   :  { %v8541_v1 = vpop.f32.mrf.mxu0 }
0x13e2   :  { %v8543_v2 = vpop.f32.mrf.mxu2 }
0x13e4   :  { %v2656_v28 = vpop.f32.mrf.mxu0 }
0x13e5   :  { %v2692_v34 = vmul.f32 %v2688_v31, %v2656_v28  ;;  %v2709_v41 = vmul.f32 %v2705_v39, %v2656_v28 }
0x13ea   :  { %v2679_v32 = vpop.f32.mrf.mxu2 }
0x13eb   :  { %v2693_v33 = vmul.f32 %v2689_v30, %v2679_v32  ;;  %v2710_v27 = vmul.f32 %v2706_v38, %v2679_v32 }
0x13ec   :  { %v2659_v35 = vpop.f32.mrf.mxu0 }
0x13ed   :  { %2804 = vmatpush.msrb.mxu1 %v2659_v35  ;;  %v2696_v37 = vadd.f32 %v2693_v33, %v2692_v34  ;;  %v2713_v24 = vadd.f32 %v2710_v27, %v2709_v41  ;;  %v2694_v43 = vmul.f32 %v2688_v31, %v2659_v35  ;;  %v2711_v46 = vmul.f32 %v2705_v39, %v2659_v35  ;;  %v2888_v33 = vld [vmem:[#allocation2 + $0x3c8] sm:$0xff]  ;;  %v2885_v34 = vld [vmem:[#allocation2 + $0x3b0] sm:$0xff]  ;;  %v2886_v35 = vld [vmem:[#allocation2 + $0x3b8] sm:$0xff] }
0x13ee   :  { %v2882_v39 = vld [vmem:[#allocation2 + $0x398] sm:$0xff]  ;;  %v2879_v27 = vld [vmem:[#allocation2 + $0x380] sm:$0xff]  ;;  %v2877_v41 = vld [vmem:[#allocation2 + $0x370] sm:$0xff] }
0x13ef   :  { %2697 = vadd.xlane.f32.xlu0 %v2696_v37  ;;  %2805 = vmatpush.msrb.mxu1 %v2656_v28  ;;  %v2884_v37 = vld [vmem:[#allocation2 + $0x3a8] sm:$0xff] }
0x13f1   :  { %2895 = vmatpush.msra.mxu1 %v2893_v9 }
0x13f2   :  { %v2682_v40 = vpop.f32.mrf.mxu2 }
0x13f3   :  { %2827 = vmatpush.msrb.mxu3 %v2682_v40  ;;  %v2695_v42 = vmul.f32 %v2689_v30, %v2682_v40  ;;  %v2712_v45 = vmul.f32 %v2706_v38, %v2682_v40  ;;  %2896 = vmatpush.msra.mxu1 %v2891_v10  ;;  %v2881_v38 = vld [vmem:[#allocation2 + $0x390] sm:$0xff]  ;;  %v2880_v40 = vld [vmem:[#allocation2 + $0x388] sm:$0xff]  ;;  %v6018_v10 = vld [vmem:[%s9109_s20 + $0x3] ss:$4 sm:$0x3] }
0x13f5   :  { %2828 = vmatpush.msrb.mxu3 %v2679_v32  ;;  %v2699_v44 = vadd.f32 %v2695_v42, %v2694_v43  ;;  %v2716_v47 = vadd.f32 %v2712_v45, %v2711_v46  ;;  %2897 = vmatpush.msra.mxu1 %v2889_v12  ;;  %v2887_v32 = vld [vmem:[#allocation2 + $0x3c0] sm:$0xff]  ;;  %v2876_v43 = vld [vmem:[#allocation2 + $0x368] sm:$0xff]  ;;  %v2874_v45 = vld [vmem:[#allocation2 + $0x358] sm:$0xff]  ;;  %v2945_v12 = vperm.slane %v6018_v10, 1 }
0x13f6   :  { %v2875_v42 = vld [vmem:[#allocation2 + $0x360] sm:$0xff] }
0x13f7   :  { %2714 = vadd.xlane.f32.xlu0 %v2713_v24  ;;  %2918 = vmatpush.msra.mxu3 %v2894_v63  ;;  %v2878_v24 = vld [vmem:[#allocation2 + $0x378] sm:$0xff]  ;;  %v2871_v46 = vld [vmem:[#allocation2 + $0x340] sm:$0xff] }
0x13f8   :  { %2898 = vmatpush.msra.mxu1 %v2887_v32 }
0x13f9   :  { %2919 = vmatpush.msra.mxu3 %v2892_v11  ;;  %v2944_v11 = vperm.slane %v6018_v10, 0  ;;  %v6270_v10 = vld [vmem:[#allocation5 + $0x1e0] sm:$0xf] }
0x13fa   :  { %2899 = vmatpush.msra.mxu1 %v2885_v34 }
0x13fb   :  { %2920 = vmatpush.msra.mxu3 %v2890_v13 }
0x13fc   :  { %2900 = vmatpush.msra.mxu1 %v2883_v36 }
0x13fd   :  { %2921 = vmatpush.msra.mxu3 %v2888_v33 }
0x13fe   :  { %2901 = vmatpush.msra.mxu1 %v2881_v38 }
0x13ff   :  { %2700 = vadd.xlane.f32.xlu0 %v2699_v44  ;;  %2922 = vmatpush.msra.mxu3 %v2886_v35  ;;  %v2873_v44 = vld [vmem:[#allocation2 + $0x350] sm:$0xff] }
0x1400   :  { %2902 = vmatpush.msra.mxu1 %v2879_v27  ;;  %v3119_v27 = vld [vmem:[%s9110_s7 + $0x8] sm:$0xff] }
0x1401   :  { %2923 = vmatpush.msra.mxu3 %v2884_v37 }
0x1402   :  { %2903 = vmatpush.msra.mxu1 %v2877_v41 }
0x1403   :  { %2924 = vmatpush.msra.mxu3 %v2882_v39 }
0x1404   :  { %2904 = vmatpush.msra.mxu1 %v2875_v42 }
0x1405   :  { %2925 = vmatpush.msra.mxu3 %v2880_v40 }
0x1406   :  { %2905 = vmatpush.msra.mxu1 %v2873_v44 }
0x1407   :  { %2717 = vadd.xlane.f32.xlu0 %v2716_v47  ;;  %2926 = vmatpush.msra.mxu3 %v2878_v24  ;;  %v2872_v47 = vld [vmem:[#allocation2 + $0x348] sm:$0xff] }
0x1408   :  { %2906 = vmatpush.msra.mxu1 %v2871_v46 }
0x1409   :  { %2927 = vmatpush.msra.mxu3 %v2876_v43 }
0x140b   :  { %2928 = vmatpush.msra.mxu3 %v2874_v45 }
0x140d   :  { %2929 = vmatpush.msra.mxu3 %v2872_v47 }
0x1462   :  { %v2698_v48 = vpop.xlane.xlu0 %2697 }
0x1463   :  { %2719 = vxpose.xlu0.b32.start [1/2] (short) (narrow) %v2698_v48, 8  ;;  %v2869_v48 = vld [vmem:[#allocation2 + $0x330] sm:$0xff] }
0x1464   :  { %2907 = vmatpush.msra.mxu1 %v2869_v48 }
0x146a   :  { %v2715_v49 = vpop.xlane.xlu0 %2714 }
0x1472   :  { %v2701_v50 = vpop.xlane.xlu0 %2700 }
0x1473   :  { %2720 = vxpose.xlu0.b32.end [2/2] (short) (narrow) %v2701_v50, 8  ;;  %v2867_v50 = vld [vmem:[#allocation2 + $0x320] sm:$0xff] }
0x1474   :  { %2908 = vmatpush.msra.mxu1 %v2867_v50 }
0x147a   :  { %v2718_v55 = vpop.xlane.xlu0 %2717 }
0x14da   :  { %7672 = vset.pattern.permute.xlu0 %v7974_v51 }
0x150f   :  { %v2735_v56 = vpop.trf.xlu0 }
0x1510   :  { %v2751_v57 = vperm.slane %v2735_v56, 0  ;;  %v2865_v56 = vld [vmem:[#allocation2 + $0x310] sm:$0xff] }
0x1511   :  { %2909 = vmatpush.msra.mxu1 %v2865_v56 }
0x1512   :  { %v2752_v59 = vadd.f32 %v2751_v57, %v2715_v49  ;;  %v2753_v60 = vadd.f32 %v2751_v57, %v2718_v55  ;;  %v2870_v49 = vld [vmem:[#allocation2 + $0x338] sm:$0xff]  ;;  %v2868_v55 = vld [vmem:[#allocation2 + $0x328] sm:$0xff] }
0x1513   :  { %2930 = vmatpush.msra.mxu3 %v2870_v49  ;;  %v2866_v57 = vld [vmem:[#allocation2 + $0x318] sm:$0xff] }
0x1514   :  { %v2756_v61 = vmul.f32 0.2, %v2752_v59  ;;  %v2757_v62 = vmul.f32 0.2, %v2753_v60  ;;  %vm2755_vm5 = vcmp.gt.f32.partialorder %v2753_v60, 0.0  ;;  %vm2754_vm6 = vcmp.gt.f32.partialorder %v2752_v59, 0.0 }
0x1515   :  { %2931 = vmatpush.msra.mxu3 %v2868_v55 }
0x1516   :  { %v2759_v26 = vsel %vm2755_vm5, %v2753_v60, %v2757_v62  ;;  %v2758_v0 = vsel %vm2754_vm6, %v2752_v59, %v2756_v61  ;;  %v2863_v59 = vld [vmem:[#allocation2 + $0x300] sm:$0xff]  ;;  %v2864_v60 = vld [vmem:[#allocation2 + $0x308] sm:$0xff] }
0x1517   :  { %v2761_v4 = vadd.f32 %v8550_v3, %v2759_v26  ;;  %v2760_v6 = vadd.f32 %v8554_v25, %v2758_v0  ;;  %2932 = vmatpush.msra.mxu3 %v2866_v57  ;;  %2910 = vmatpush.msra.mxu1 %v2863_v59 }
0x1519   :  { %v2765_v19 = vsel %vm253_vm3, %v2761_v4, -inf  ;;  %v2762_v7 = vsel %vm253_vm3, %v2760_v6, -inf  ;;  %2933 = vmatpush.msra.mxu3 %v2864_v60 }
0x151a   :  { %2766 = vmax.xlane.f32.xlu0 %v2765_v19  ;;  %2763 = vmax.xlane.f32.xlu1 %v2762_v7 }
0x152e   :  { %3207 = vperm.xlu0 %7672, %v6026_v58  }
0x158d   :  { %v2764_v14 = vpop.xlane.xlu1 %2763  ;;  %v2767_v15 = vpop.xlane.xlu0 %2766 }
0x158e   :  { %v2768_v17 = vsub.f32 %v2760_v6, %v2764_v14  ;;  %v2769_v8 = vsub.f32 %v2761_v4, %v2767_v15 }
0x1590   :  { %v2770_v5 = vmul.f32 1.442695, %v2768_v17  ;;  %v2772_v20 = vmul.f32 1.442695, %v2769_v8 }
0x1591   :  { %v6019_v17 = vld [vmem:[%s9108_s30 + $0x3] ss:$4 sm:$0x3] }
0x1592   :  { %7834 = vpow2.f32 %v2770_v5  ;;  %v2961_v8 = vperm.slane %v6019_v17, 0 }
0x1593   :  { %7836 = vpow2.f32 %v2772_v20 }
0x1598   :  { %v7835_v28 = vpop.eup %7834 }
0x1599   :  { %v2774_v29 = vsel %vm253_vm3, %v7835_v28, 0.0  ;;  %v8561_v30 = vpop.eup %7836 }
0x159a   :  { %2775 = vadd.xlane.f32.xlu2 %v2774_v29  ;;  %v2777_v31 = vsel %vm253_vm3, %v8561_v30, 0.0 }
0x15a2   :  { %2778 = vadd.xlane.f32.xlu2 %v2777_v31 }
0x160d   :  { %v2776_v61 = vpop.xlane.xlu2 %2775 }
0x160e   :  { %7838 = vrcp.f32 %v2776_v61 }
0x1614   :  { %v7839_v62 = vpop.eup %7838 }
0x1615   :  { %v2782_v26 = vmul.f32 %v7839_v62, %v7835_v28  ;;  %v2779_v0 = vpop.xlane.xlu2 %2778 }
0x1616   :  { %7840 = vrcp.f32 %v2779_v0  ;;  %v3118_v0 = vld [vmem:[%s9110_s7] sm:$0xff] }
0x1617   :  { %6012 = vmatmul.msk.f32.vlgmr.msrb.gmra.mxu1 %vm253_vm3, %v2782_v26  ;;  %6014 = vmatmul.msk.f32.vlgmr.msrb.gmra.mxu3 %vm253_vm3, %v2782_v26 }
0x161c   :  { %v7841_v4 = vpop.eup %7840 }
0x161d   :  { %v2783_v6 = vmul.f32 %v7841_v4, %v8561_v30  ;;  %v6027_v4 = vld [vmem:[%s9110_s7 + $0x18] sm:$0xff] }
0x161f   :  { %6013 = vmatmul.msk.f32.gmra.mxu1 %vm253_vm3, %v2783_v6  ;;  %6015 = vmatmul.msk.f32.gmra.mxu3 %vm253_vm3, %v2783_v6  ;;  %v6142_v6 = vld [vmem:[#allocation5 + $0xe0] sm:$0xf] }
0x1627   :  { %2911 = vmatmul.f32.vlgmr.msra.gmra.mxu1 %v8471_v16  ;;  %2934 = vmatmul.f32.vlgmr.msra.gmra.mxu3 %v8471_v16 }
0x162f   :  { %2914 = vmatmul.f32.gmra.mxu1 %v8477_v23  ;;  %2937 = vmatmul.f32.gmra.mxu3 %v8477_v23  ;;  %v2962_v23 = vperm.slane %v6019_v17, 1 }
0x1694   :  { %v8574_v19 = vpop.f32.mrf.mxu1 }
0x169a   :  { %v8576_v7 = vpop.f32.mrf.mxu3 }
0x169c   :  { %v8578_v58 = vpop.f32.mrf.mxu1 }
0x16a2   :  { %v8580_v9 = vpop.f32.mrf.mxu3 }
0x16a4   :  { %v2912_v63 = vpop.f32.mrf.mxu1 }
0x16a5   :  { %v2948_v14 = vmul.f32 %v2944_v11, %v2912_v63  ;;  %v2965_v31 = vmul.f32 %v2961_v8, %v2912_v63 }
0x16aa   :  { %v2935_v13 = vpop.f32.mrf.mxu3 }
0x16ab   :  { %v2949_v15 = vmul.f32 %v2945_v12, %v2935_v13  ;;  %v2966_v20 = vmul.f32 %v2962_v23, %v2935_v13 }
0x16ac   :  { %v2915_v16 = vpop.f32.mrf.mxu1 }
0x16ad   :  { %3060 = vmatpush.msra.mxu0 %v2915_v16  ;;  %v2952_v5 = vadd.f32 %v2949_v15, %v2948_v14  ;;  %v2967_v29 = vmul.f32 %v2961_v8, %v2915_v16  ;;  %v2969_v32 = vadd.f32 %v2966_v20, %v2965_v31  ;;  %v2950_v35 = vmul.f32 %v2944_v11, %v2915_v16  ;;  %v6126_v14 = vld [vmem:[#allocation5 + $0xc0] sm:$0xf]  ;;  %v7334_v15 = vld [vmem:[#allocation5 + $0xcc] sm:$0xf0] }
0x16ae   :  { %v6254_v16 = vld [vmem:[#allocation5 + $0x1c0] sm:$0xf]  ;;  %v6127_v17 = vor.u32 %v7334_v15, %v6126_v14  ;;  %v7330_v20 = vld [vmem:[#allocation5 + $0xac] sm:$0xf0] }
0x16af   :  { %2953 = vadd.xlane.f32.xlu2 %v2952_v5  ;;  %3061 = vmatpush.msra.mxu0 %v2912_v63  ;;  %v7338_v63 = vld [vmem:[#allocation5 + $0xec] sm:$0xf0]  ;;  %v6110_v8 = vld [vmem:[#allocation5 + $0xa0] sm:$0xf] }
0x16b0   :  { %v6143_v11 = vor.u32 %v7338_v63, %v6142_v6  ;;  %v7366_v5 = vld [vmem:[#allocation5 + $0x1cc] sm:$0xf0]  ;;  %v6158_v6 = vld [vmem:[#allocation5 + $0x100] sm:$0xf] }
0x16b1   :  { %v7342_v63 = vld [vmem:[#allocation5 + $0x10c] sm:$0xf0]  ;;  %v8605_v14 = vld [vmem:[%s9112_s11] ss:$4 sm:$0x3] }
0x16b2   :  { %v2938_v28 = vpop.f32.mrf.mxu3  ;;  %4850 = vmatpush.bf16.msrb.mxu0 %v6143_v11  ;;  %v6382_v15 = vld [vmem:[#allocation5 + $0x2c0] sm:$0xf] }
0x16b3   :  { %v2968_v30 = vmul.f32 %v2962_v23, %v2938_v28  ;;  %3083 = vmatpush.msra.mxu2 %v2938_v28  ;;  %v2951_v34 = vmul.f32 %v2945_v12, %v2938_v28  ;;  %v7370_v12 = vld [vmem:[#allocation5 + $0x1ec] sm:$0xf0]  ;;  %v6255_v23 = vor.u32 %v7366_v5, %v6254_v16  ;;  %v6238_v28 = vld [vmem:[#allocation5 + $0x1a0] sm:$0xf] }
0x16b4   :  { %v7398_v16 = vld [vmem:[#allocation5 + $0x2cc] sm:$0xf0] }
0x16b5   :  { %3084 = vmatpush.msra.mxu2 %v2935_v13  ;;  %v2972_v33 = vadd.f32 %v2968_v30, %v2967_v29  ;;  %v2955_v36 = vadd.f32 %v2951_v34, %v2950_v35  ;;  %v6271_v13 = vor.u32 %v7370_v12, %v6270_v10  ;;  %v6111_v29 = vor.u32 %v7330_v20, %v6110_v8  ;;  %v7362_v30 = vld [vmem:[#allocation5 + $0x1ac] sm:$0xf0]  ;;  %v6222_v34 = vld [vmem:[#allocation5 + $0x180] sm:$0xf] }
0x16b6   :  { %4851 = vmatpush.bf16.msrb.mxu0 %v6127_v17  ;;  %v6239_v31 = vor.u32 %v7362_v30, %v6238_v28  ;;  %v8601_v10 = vld [vmem:[%s9111_s9] ss:$4 sm:$0x3]  ;;  %v6159_v12 = vor.u32 %v7342_v63, %v6158_v6  ;;  %v7430_v8 = vld [vmem:[#allocation5 + $0x3cc] sm:$0xf0] }
0x16b7   :  { %2970 = vadd.xlane.f32.xlu2 %v2969_v32  ;;  %2973 = vadd.xlane.f32.xlu1 %v2972_v33  ;;  %v6094_v32 = vld [vmem:[#allocation5 + $0x80] sm:$0xf]  ;;  %v7326_v33 = vld [vmem:[#allocation5 + $0x8c] sm:$0xf0] }
0x16b8   :  { %4863 = vmatpush.bf16.msrb.mxu2 %v6271_v13  ;;  %v6095_v35 = vor.u32 %v7326_v33, %v6094_v32  ;;  %v2328_v13 = vperm.slane %v8601_v10, 0  ;;  %v6510_v17 = vld [vmem:[#allocation5 + $0x3c0] sm:$0xf]  ;;  %v7418_v63 = vld [vmem:[#allocation5 + $0x36c] sm:$0xf0] }
0x16b9   :  { %v6511_v20 = vor.u32 %v7430_v8, %v6510_v17  ;;  %v6366_v30 = vld [vmem:[#allocation5 + $0x2a0] sm:$0xf] }
0x16ba   :  { %4852 = vmatpush.bf16.msrb.mxu0 %v6111_v29  ;;  %v2332_v28 = vmul.f32 %v2328_v13, %v8505_v18  ;;  %v2338_v29 = vperm.slane %v8605_v14, 0  ;;  %v6654_v32 = vld [vmem:[#allocation5 + $0x4e0] sm:$0xf]  ;;  %v7462_v18 = vld [vmem:[#allocation5 + $0x4cc] sm:$0xf0] }
0x16bb   :  { %v6462_v6 = vld [vmem:[#allocation5 + $0x360] sm:$0xf] }
0x16bc   :  { %4864 = vmatpush.bf16.msrb.mxu2 %v6255_v23  ;;  %v6383_v23 = vor.u32 %v7398_v16, %v6382_v15  ;;  %v7490_v15 = vld [vmem:[#allocation5 + $0x5ac] sm:$0xf0]  ;;  %v6463_v17 = vor.u32 %v7418_v63, %v6462_v6  ;;  %v6318_v8 = vld [vmem:[#allocation5 + $0x240] sm:$0xf] }
0x16bd   :  { %v7374_v63 = vld [vmem:[#allocation5 + $0x20c] sm:$0xf0] }
0x16be   :  { %4853 = vmatpush.bf16.msrb.mxu0 %v6095_v35  ;;  %v7426_v35 = vld [vmem:[#allocation5 + $0x3ac] sm:$0xf0] }
0x16bf   :  { %2956 = vadd.xlane.f32.xlu2 %v2955_v36  ;;  %v7358_v36 = vld [vmem:[#allocation5 + $0x18c] sm:$0xf0] }
0x16c0   :  { %4865 = vmatpush.bf16.msrb.mxu2 %v6239_v31  ;;  %v7394_v31 = vld [vmem:[#allocation5 + $0x2ac] sm:$0xf0] }
0x16c1   :  { %v6367_v33 = vor.u32 %v7394_v31, %v6366_v30  ;;  %v2334_v30 = vmul.f32 %v2328_v13, %v8509_v53 }
0x1722   :  { %v2954_v37 = vpop.xlane.xlu2 %2953 }
0x1723   :  { %2975 = vxpose.xlu2.b32.start [1/2] (short) (narrow) %v2954_v37, 8  ;;  %v6223_v37 = vor.u32 %v7358_v36, %v6222_v34  ;;  %v6494_v34 = vld [vmem:[#allocation5 + $0x3a0] sm:$0xf]  ;;  %v7466_v36 = vld [vmem:[#allocation5 + $0x4ec] sm:$0xf0] }
0x1725   :  { %4866 = vmatpush.bf16.msrb.mxu2 %v6223_v37  ;;  %v6782_v37 = vld [vmem:[#allocation5 + $0x5e0] sm:$0xf] }
0x172a   :  { %v2971_v38 = vpop.xlane.xlu2 %2970  ;;  %v2974_v24 = vpop.xlane.xlu1 %2973 }
0x1732   :  { %v2957_v39 = vpop.xlane.xlu2 %2956 }
0x1733   :  { %2976 = vxpose.xlu2.b32.end [2/2] (short) (narrow) %v2957_v39, 8  ;;  %v7322_v39 = vld [vmem:[#allocation5 + $0x6c] sm:$0xf0] }
0x1795   :  { %7671 = vset.pattern.permute.xlu2 %v7974_v51 }
0x179c   :  { %3127 = vperm.xlu2 %7671, %v3119_v27   ;;  %v6206_v27 = vld [vmem:[#allocation5 + $0x160] sm:$0xf] }
0x17c4   :  { %v2991_v40 = vpop.trf.xlu2 }
0x17c5   :  { %v3007_v41 = vperm.slane %v2991_v40, 0 }
0x17c7   :  { %v3008_v42 = vadd.f32 %v3007_v41, %v2971_v38  ;;  %v3009_v43 = vadd.f32 %v3007_v41, %v2974_v24  ;;  %v6078_v38 = vld [vmem:[#allocation5 + $0x60] sm:$0xf]  ;;  %v7354_v41 = vld [vmem:[#allocation5 + $0x16c] sm:$0xf0] }
0x17c8   :  { %v6079_v40 = vor.u32 %v7322_v39, %v6078_v38  ;;  %v6207_v24 = vor.u32 %v7354_v41, %v6206_v27  ;;  %v7498_v38 = vld [vmem:[#allocation5 + $0x5ec] sm:$0xf0]  ;;  %v6495_v39 = vor.u32 %v7426_v35, %v6494_v34  ;;  %v8613_v27 = vadd.f32 %v2338_v29, %v2332_v28  ;;  %v6446_v28 = vld [vmem:[#allocation5 + $0x340] sm:$0xf] }
0x17c9   :  { %v3012_v44 = vmul.f32 0.2, %v3008_v42  ;;  %vm3010_vm7 = vcmp.gt.f32.partialorder %v3008_v42, 0.0  ;;  %v3013_v45 = vmul.f32 0.2, %v3009_v43  ;;  %vm3011_vm8 = vcmp.gt.f32.partialorder %v3009_v43, 0.0 }
0x17ca   :  { %4854 = vmatpush.bf16.msrb.mxu0 %v6079_v40  ;;  %4867 = vmatpush.bf16.msrb.mxu2 %v6207_v24  ;;  %v6638_v40 = vld [vmem:[#allocation5 + $0x4c0] sm:$0xf]  ;;  %v6655_v24 = vor.u32 %v7466_v36, %v6654_v32  ;;  %v7414_v34 = vld [vmem:[#allocation5 + $0x34c] sm:$0xf0] }
0x17cb   :  { %v3014_v46 = vsel %vm3010_vm7, %v3008_v42, %v3012_v44  ;;  %v3015_v49 = vsel %vm3011_vm8, %v3009_v43, %v3013_v45  ;;  %v6062_v42 = vld [vmem:[#allocation5 + $0x40] sm:$0xf]  ;;  %v7318_v43 = vld [vmem:[#allocation5 + $0x4c] sm:$0xf0] }
0x17cc   :  { %v3016_v47 = vadd.f32 %v8554_v25, %v3014_v46  ;;  %v3017_v51 = vadd.f32 %v8550_v3, %v3015_v49  ;;  %v6190_v44 = vld [vmem:[#allocation5 + $0x140] sm:$0xf]  ;;  %v6063_v45 = vor.u32 %v7318_v43, %v6062_v42  ;;  %v7350_v46 = vld [vmem:[#allocation5 + $0x14c] sm:$0xf0]  ;;  %v6783_v42 = vor.u32 %v7498_v38, %v6782_v37 }
0x17cd   :  { %v6191_v49 = vor.u32 %v7350_v46, %v6190_v44  ;;  %v6350_v43 = vld [vmem:[#allocation5 + $0x280] sm:$0xf]  ;;  %v7390_v44 = vld [vmem:[#allocation5 + $0x28c] sm:$0xf0] }
0x17ce   :  { %v3018_v48 = vsel %vm253_vm3, %v3016_v47, -inf  ;;  %v3021_v50 = vsel %vm253_vm3, %v3017_v51, -inf  ;;  %4855 = vmatpush.bf16.msrb.mxu0 %v6063_v45  ;;  %v6478_v45 = vld [vmem:[#allocation5 + $0x380] sm:$0xf] }
0x17cf   :  { %3019 = vmax.xlane.f32.xlu1 %v3018_v48  ;;  %v7314_v48 = vld [vmem:[#allocation5 + $0x2c] sm:$0xf0]  ;;  %4868 = vmatpush.bf16.msrb.mxu2 %v6191_v49 }
0x17d0   :  { %v7494_v49 = vld [vmem:[#allocation5 + $0x5cc] sm:$0xf0] }
0x17d7   :  { %3022 = vmax.xlane.f32.xlu1 %v3021_v50  ;;  %v7346_v50 = vld [vmem:[#allocation5 + $0x12c] sm:$0xf0] }
0x1842   :  { %v3020_v55 = vpop.xlane.xlu1 %3019 }
0x1843   :  { %v3024_v56 = vsub.f32 %v3016_v47, %v3020_v55  ;;  %v6046_v47 = vld [vmem:[#allocation5 + $0x20] sm:$0xf] }
0x1844   :  { %v6398_v55 = vld [vmem:[#allocation5 + $0x2e0] sm:$0xf] }
0x1845   :  { %v3026_v57 = vmul.f32 1.442695, %v3024_v56  ;;  %v7402_v56 = vld [vmem:[#allocation5 + $0x2ec] sm:$0xf0] }
0x1847   :  { %7842 = vpow2.f32 %v3026_v57  ;;  %v6526_v57 = vld [vmem:[#allocation5 + $0x3e0] sm:$0xf] }
0x184a   :  { %v3023_v59 = vpop.xlane.xlu1 %3022 }
0x184b   :  { %v3025_v60 = vsub.f32 %v3017_v51, %v3023_v59  ;;  %v6174_v51 = vld [vmem:[#allocation5 + $0x120] sm:$0xf]  ;;  %v7434_v59 = vld [vmem:[#allocation5 + $0x3ec] sm:$0xf0] }
0x184d   :  { %v8590_v61 = vpop.eup %7842  ;;  %v3028_v25 = vmul.f32 1.442695, %v3025_v60  ;;  %v6399_v60 = vor.u32 %v7402_v56, %v6398_v55  ;;  %v2329_v55 = vperm.slane %v8601_v10, 1  ;;  %v8618_v56 = vld [vmem:[%s9111_s9 + $0x1] ss:$4 sm:$0x3] }
0x184e   :  { %v3030_v62 = vsel %vm253_vm3, %v8590_v61, 0.0  ;;  %v2583_v32 = vperm.slane %v8618_v56, 0  ;;  %v2584_v36 = vperm.slane %v8618_v56, 1  ;;  %v6734_v10 = vld [vmem:[#allocation5 + $0x580] sm:$0xf] }
0x184f   :  { %7844 = vpow2.f32 %v3028_v25  ;;  %3031 = vadd.xlane.f32.xlu1 %v3030_v62  ;;  %v6527_v25 = vor.u32 %v7434_v59, %v6526_v57  ;;  %v6047_v62 = vor.u32 %v7314_v48, %v6046_v47  ;;  %4876 = vmatpush.bf16.msrb.mxu1 %v6399_v60  ;;  %v6766_v48 = vld [vmem:[#allocation5 + $0x5c0] sm:$0xf]  ;;  %v2346_v59 = vmax.f32 %v8613_v27, 0.0 }
0x1850   :  { %v2339_v60 = vperm.slane %v8605_v14, 1  ;;  %v2335_v31 = vmul.f32 %v2329_v55, %v8511_v54  ;;  %v7486_v54 = vld [vmem:[#allocation5 + $0x58c] sm:$0xf0] }
0x1851   :  { %4889 = vmatpush.bf16.msrb.mxu3 %v6527_v25  ;;  %4856 = vmatpush.bf16.msrb.mxu0 %v6047_v62  ;;  %v8623_v25 = vld [vmem:[%s9111_s9 + $0x2] ss:$4 sm:$0x3]  ;;  %v7386_v62 = vld [vmem:[#allocation5 + $0x26c] sm:$0xf0] }
0x1852   :  { %v8659_v56 = vadd.f32 %v2339_v60, %v2335_v31  ;;  %v7406_v14 = vld [vmem:[#allocation5 + $0x30c] sm:$0xf0] }
0x1853   :  { %4877 = vmatpush.bf16.msrb.mxu1 %v6383_v23  ;;  %v8629_v23 = vld [vmem:[%s9112_s11 + $0x1] ss:$4 sm:$0x3] }
0x1855   :  { %v8594_v3 = vpop.eup %7844  ;;  %4890 = vmatpush.bf16.msrb.mxu3 %v6511_v20  ;;  %v7382_v20 = vld [vmem:[#allocation5 + $0x24c] sm:$0xf0] }
0x1856   :  { %v3033_v26 = vsel %vm253_vm3, %v8594_v3, 0.0  ;;  %v6319_v13 = vor.u32 %v7382_v20, %v6318_v8  ;;  %v7478_v8 = vld [vmem:[#allocation5 + $0x54c] sm:$0xf0] }
0x1857   :  { %3034 = vadd.xlane.f32.xlu1 %v3033_v26  ;;  %v6175_v26 = vor.u32 %v7346_v50, %v6174_v51  ;;  %4878 = vmatpush.bf16.msrb.mxu1 %v6367_v33  ;;  %v6351_v51 = vor.u32 %v7390_v44, %v6350_v43  ;;  %v7422_v50 = vld [vmem:[#allocation5 + $0x38c] sm:$0xf0]  ;;  %v8637_v33 = vld [vmem:[%s9112_s11 + $0x2] ss:$4 sm:$0x3] }
0x1858   :  { %v6479_v57 = vor.u32 %v7422_v50, %v6478_v45  ;;  %v6430_v43 = vld [vmem:[#allocation5 + $0x320] sm:$0xf]  ;;  %v7410_v44 = vld [vmem:[#allocation5 + $0x32c] sm:$0xf0]  ;;  %v8648_v45 = vadd.f32 %v2338_v29, %v2334_v30  ;;  %v6735_v50 = vor.u32 %v7486_v54, %v6734_v10 }
0x1859   :  { %4869 = vmatpush.bf16.msrb.mxu2 %v6175_v26  ;;  %4891 = vmatpush.bf16.msrb.mxu3 %v6495_v39  ;;  %v6639_v26 = vor.u32 %v7462_v18, %v6638_v40  ;;  %v6606_v39 = vld [vmem:[#allocation5 + $0x480] sm:$0xf]  ;;  %v7454_v40 = vld [vmem:[#allocation5 + $0x48c] sm:$0xf0]  ;;  %v6447_v18 = vor.u32 %v7414_v34, %v6446_v28 }
0x185a   :  { %v6590_v29 = vld [vmem:[#allocation5 + $0x460] sm:$0xf]  ;;  %v2348_v31 = vmax.f32 %v8648_v45, 0.0  ;;  %v7474_v10 = vld [vmem:[#allocation5 + $0x52c] sm:$0xf0] }
0x185b   :  { %4879 = vmatpush.bf16.msrb.mxu1 %v6351_v51  ;;  %v6607_v51 = vor.u32 %v7454_v40, %v6606_v39  ;;  %v6558_v39 = vld [vmem:[#allocation5 + $0x420] sm:$0xf]  ;;  %v7442_v40 = vld [vmem:[#allocation5 + $0x42c] sm:$0xf0] }
0x185d   :  { %4870 = vmatpush.bf16.msrb.mxu2 %v6159_v12  ;;  %v6750_v12 = vld [vmem:[#allocation5 + $0x5a0] sm:$0xf]  ;;  %4892 = vmatpush.bf16.msrb.mxu3 %v6479_v57 }
0x185e   :  { %v6751_v38 = vor.u32 %v7490_v15, %v6750_v12  ;;  %v6718_v57 = vld [vmem:[#allocation5 + $0x560] sm:$0xf]  ;;  %v2851_v12 = vperm.slane %v8637_v33, 1 }
0x1861   :  { %4893 = vmatpush.bf16.msrb.mxu3 %v6463_v17 }
0x1865   :  { %4894 = vmatpush.bf16.msrb.mxu3 %v6447_v18 }
0x1870   :  { %3122 = vperm.xlu1 %7670, %v3118_v0   ;;  %v6030_v0 = vld [vmem:[#allocation5] sm:$0xf] }
0x1878   :  { %3212 = vperm.xlu1 %7670, %v6027_v4   ;;  %v7310_v4 = vld [vmem:[#allocation5 + $0xc] sm:$0xf0] }
0x1879   :  { %v6031_v11 = vor.u32 %v7310_v4, %v6030_v0  ;;  %v6767_v0 = vor.u32 %v7494_v49, %v6766_v48  ;;  %v6622_v4 = vld [vmem:[#allocation5 + $0x4a0] sm:$0xf]  ;;  %v2587_v48 = vmul.f32 %v2583_v32, %v8537_v21  ;;  %v2850_v49 = vperm.slane %v8637_v33, 0 }
0x187a   :  { %v2588_v21 = vmul.f32 %v2584_v36, %v8539_v22 }
0x187b   :  { %4857 = vmatpush.bf16.msrb.mxu0 %v6031_v11  ;;  %v7458_v11 = vld [vmem:[#allocation5 + $0x4ac] sm:$0xf0] }
0x187c   :  { %v6623_v37 = vor.u32 %v7458_v11, %v6622_v4  ;;  %v2590_v4 = vmul.f32 %v2584_v36, %v8543_v2  ;;  %v6414_v11 = vld [vmem:[#allocation5 + $0x300] sm:$0xf] }
0x187d   :  { %v6415_v20 = vor.u32 %v7406_v14, %v6414_v11 }
0x18c2   :  { %v3032_v5 = vpop.xlane.xlu1 %3031 }
0x18c3   :  { %7846 = vrcp.f32 %v3032_v5  ;;  %v2333_v5 = vmul.f32 %v2329_v55, %v8507_v52  ;;  %v2839_v52 = vperm.slane %v8623_v25, 0  ;;  %v7450_v55 = vld [vmem:[#allocation5 + $0x46c] sm:$0xf0] }
0x18c5   :  { %v2843_v6 = vmul.f32 %v2839_v52, %v8574_v19  ;;  %v2845_v15 = vmul.f32 %v2839_v52, %v8578_v58  ;;  %v6574_v19 = vld [vmem:[#allocation5 + $0x440] sm:$0xf]  ;;  %v8689_v52 = vpop.permute.xlu2 %3127 }
0x18c7   :  { %v8678_v30 = vadd.f32 %v2850_v49, %v2843_v6  ;;  %v8683_v33 = vadd.f32 %v2850_v49, %v2845_v15 }
0x18c9   :  { %v7847_v41 = vpop.eup %7846 }
0x18ca   :  { %v3038_v46 = vmul.f32 %v7847_v41, %v8590_v61  ;;  %v3035_v47 = vpop.xlane.xlu1 %3034  ;;  %v6334_v61 = vld [vmem:[#allocation5 + $0x260] sm:$0xf] }
0x18cb   :  { %7848 = vrcp.f32 %v3035_v47  ;;  %v6335_v16 = vor.u32 %v7386_v62, %v6334_v61  ;;  %v6302_v41 = vld [vmem:[#allocation5 + $0x220] sm:$0xf]  ;;  %v2840_v47 = vperm.slane %v8623_v25, 1  ;;  %v7482_v25 = vld [vmem:[#allocation5 + $0x56c] sm:$0xf0]  ;;  %v6431_v62 = vor.u32 %v7410_v44, %v6430_v43 }
0x18cc   :  { %6020 = vmatmul.msk.f32.vlgmr.msra.gmra.mxu0 %vm253_vm3, %v3038_v46  ;;  %6022 = vmatmul.msk.f32.vlgmr.msra.gmra.mxu2 %vm253_vm3, %v3038_v46  ;;  %v2595_v46 = vperm.slane %v8629_v23, 1  ;;  %v6719_v2 = vor.u32 %v7482_v25, %v6718_v57  ;;  %v2860_v43 = vmax.f32 %v8683_v33, 0.0 }
0x18cd   :  { %4902 = vmatpush.bf16.msra.mxu0 %v6655_v24  ;;  %4915 = vmatpush.bf16.msra.mxu2 %v6783_v42  ;;  %v8644_v24 = vadd.f32 %v2339_v60, %v2333_v5  ;;  %v7378_v42 = vld [vmem:[#allocation5 + $0x22c] sm:$0xf0]  ;;  %v2844_v60 = vmul.f32 %v2840_v47, %v8576_v7 }
0x18ce   :  { %4880 = vmatpush.bf16.msrb.mxu1 %v6335_v16  ;;  %v6303_v61 = vor.u32 %v7378_v42, %v6302_v41  ;;  %v2846_v16 = vmul.f32 %v2840_v47, %v8580_v9  ;;  %v7446_v5 = vld [vmem:[#allocation5 + $0x44c] sm:$0xf0]  ;;  %4895 = vmatpush.bf16.msrb.mxu3 %v6431_v62  ;;  %v8672_v28 = vadd.f32 %v2595_v46, %v2588_v21  ;;  %v2858_v41 = vmax.f32 %v8678_v30, 0.0 }
0x18cf   :  { %v2347_v17 = vmax.f32 %v8644_v24, 0.0  ;;  %v8676_v9 = vadd.f32 %v2595_v46, %v2590_v4  ;;  %v6542_v46 = vld [vmem:[#allocation5 + $0x400] sm:$0xf]  ;;  %v3142_v25 = vadd.f32 %v8689_v52, %v2860_v43  ;;  %v8746_v24 = vld [vmem:[#allocation5 + $0x1f0] sm:$0xf0] }
0x18d0   :  { %v8685_v34 = vadd.f32 %v2851_v12, %v2846_v16  ;;  %v2603_v54 = vmax.f32 %v8672_v28, 0.0  ;;  %v8740_v28 = vld [vmem:[#allocation5 + $0xf0] sm:$0xf0] }
0x18d1   :  { %v7849_v35 = vpop.eup %7848  ;;  %4903 = vmatpush.bf16.msra.mxu0 %v6639_v26  ;;  %4916 = vmatpush.bf16.msra.mxu2 %v6767_v0  ;;  %v6286_v26 = vld [vmem:[#allocation5 + $0x200] sm:$0xf]  ;;  %v2589_v0 = vmul.f32 %v2583_v32, %v8541_v1  ;;  %v6591_v1 = vor.u32 %v7450_v55, %v6590_v29  ;;  %v8681_v32 = vadd.f32 %v2851_v12, %v2844_v60  ;;  %v2605_v18 = vmax.f32 %v8676_v9, 0.0  ;;  %v7470_v29 = vld [vmem:[#allocation5 + $0x50c] sm:$0xf0] }
0x18d2   :  { %v3039_v53 = vmul.f32 %v7849_v35, %v8594_v3  ;;  %v2594_v3 = vperm.slane %v8629_v23, 0  ;;  %4881 = vmatpush.bf16.msrb.mxu1 %v6319_v13  ;;  %v6702_v23 = vld [vmem:[#allocation5 + $0x540] sm:$0xf]  ;;  %v6287_v7 = vor.u32 %v7374_v63, %v6286_v26  ;;  %v2349_v35 = vmax.f32 %v8659_v56, 0.0  ;;  %4896 = vmatpush.bf16.msrb.mxu3 %v6415_v20  ;;  %v8718_v26 = vpop.permute.xlu0 %3207 }
0x18d3   :  { %v2859_v42 = vmax.f32 %v8681_v32, 0.0  ;;  %v2861_v44 = vmax.f32 %v8685_v34, 0.0  ;;  %v3141_v57 = vadd.f32 %v8689_v52, %v2605_v18  ;;  %v3218_v27 = vadd.f32 %v8718_v26, %v2603_v54 }
0x18d4   :  { %6021 = vmatmul.msk.f32.gmra.mxu0 %vm253_vm3, %v3039_v53  ;;  %6023 = vmatmul.msk.f32.gmra.mxu2 %vm253_vm3, %v3039_v53  ;;  %v8670_v22 = vadd.f32 %v2594_v3, %v2587_v48  ;;  %v8674_v58 = vadd.f32 %v2594_v3, %v2589_v0  ;;  %v6686_v53 = vld [vmem:[#allocation5 + $0x520] sm:$0xf]  ;;  %v3138_v3 = vadd.f32 %v8689_v52, %v2348_v31  ;;  %vm3287_vm3 = vcmask 1040384  }
0x18d5   :  { %4904 = vmatpush.bf16.msra.mxu0 %v6623_v37  ;;  %4917 = vmatpush.bf16.msra.mxu2 %v6751_v38  ;;  %v6575_v37 = vor.u32 %v7446_v5, %v6574_v19  ;;  %v6703_v38 = vor.u32 %v7478_v8, %v6702_v23  ;;  %v3139_v47 = vadd.f32 %v8689_v52, %v2349_v35 }
0x18d6   :  { %4882 = vmatpush.bf16.msrb.mxu1 %v6303_v61  ;;  %v2602_v36 = vmax.f32 %v8670_v22, 0.0  ;;  %v2604_v13 = vmax.f32 %v8674_v58, 0.0  ;;  %v6559_v48 = vor.u32 %v7442_v40, %v6558_v39  ;;  %v6687_v49 = vor.u32 %v7474_v10, %v6686_v53  ;;  %v8744_v40 = vld [vmem:[#allocation5 + $0x1e4] sm:$0xf] }
0x18d7   :  { %v3143_v61 = vadd.f32 %v8689_v52, %v2861_v44  ;;  %v3215_v22 = vadd.f32 %v8718_v26, %v2346_v59  ;;  %v3216_v23 = vadd.f32 %v8718_v26, %v2347_v17  ;;  %v3220_v53 = vadd.f32 %v8718_v26, %v2859_v42 }
0x18d8   :  { %v3140_v55 = vadd.f32 %v8689_v52, %v2604_v13  ;;  %v3217_v30 = vadd.f32 %v8718_v26, %v2602_v36 }
0x18d9   :  { %4905 = vmatpush.bf16.msra.mxu0 %v6607_v51  ;;  %4918 = vmatpush.bf16.msra.mxu2 %v6735_v50  ;;  %v7438_v51 = vld [vmem:[#allocation5 + $0x40c] sm:$0xf0]  ;;  %v6670_v50 = vld [vmem:[#allocation5 + $0x500] sm:$0xf] }
0x18da   :  { %4883 = vmatpush.bf16.msrb.mxu1 %v6287_v7  ;;  %v6543_v14 = vor.u32 %v7438_v51, %v6542_v46  ;;  %v6671_v60 = vor.u32 %v7470_v29, %v6670_v50 }
0x18dd   :  { %4906 = vmatpush.bf16.msra.mxu0 %v6591_v1  ;;  %4919 = vmatpush.bf16.msra.mxu2 %v6719_v2  ;;  %v8733_v2 = vld [vmem:[#allocation5 + $0xe4] sm:$0xf] }
0x18e1   :  { %4907 = vmatpush.bf16.msra.mxu0 %v6575_v37  ;;  %4920 = vmatpush.bf16.msra.mxu2 %v6703_v38 }
0x18e2   :  { %v8716_v62 = vpop.permute.xlu1 %3122 }
0x18e3   :  { %v3130_v21 = vadd.f32 %v8716_v62, %v2346_v59  ;;  %v3131_v0 = vadd.f32 %v8716_v62, %v2347_v17  ;;  %v3132_v4 = vadd.f32 %v8716_v62, %v2602_v36  ;;  %v3133_v6 = vadd.f32 %v8716_v62, %v2603_v54 }
0x18e4   :  { %v3134_v63 = vadd.f32 %v8716_v62, %v2858_v41  ;;  %v3135_v11 = vadd.f32 %v8716_v62, %v2859_v42  ;;  %v3219_v17 = vadd.f32 %v8718_v26, %v2858_v41  ;;  %v6147_v54 = vor.u32 %v8733_v2, %v8740_v28 }
0x18e5   :  { %4908 = vmatpush.bf16.msra.mxu0 %v6559_v48  ;;  %4921 = vmatpush.bf16.msra.mxu2 %v6687_v49  ;;  %v3146_v12 = vmax.f32 %v3130_v21, %v3138_v3  ;;  %v3153_v15 = vmax.f32 %v3131_v0, %v3139_v47  ;;  %v3160_v16 = vmax.f32 %v3132_v4, %v3140_v55 }
0x18e6   :  { %v3167_v1 = vmax.f32 %v3133_v6, %v3141_v57  ;;  %v3174_v19 = vmax.f32 %v3134_v63, %v3142_v25  ;;  %v8735_v5 = vmax.f32 %v3135_v11, %v3143_v61  ;;  %v6275_v49 = vor.u32 %v8744_v40, %v8746_v24  ;;  %v6096_v40 = vld [vmem:[#allocation5 + $0x90] sm:$0xf0]  ;;  %v7356_v24 = vld [vmem:[#allocation5 + $0x184] sm:$0xf] }
0x18e7   :  { %v3147_v8 = vrot.slane %v3146_v12, 4  ;;  %v3154_v7 = vrot.slane %v3153_v15, 4  ;;  %v3161_v20 = vrot.slane %v3160_v16, 4 }
0x18e8   :  { %v3168_v59 = vrot.slane %v3167_v1, 4  ;;  %v3175_v32 = vrot.slane %v3174_v19, 4 }
0x18e9   :  { %4909 = vmatpush.bf16.msra.mxu0 %v6543_v14  ;;  %4922 = vmatpush.bf16.msra.mxu2 %v6671_v60  ;;  %v3148_v37 = vmax.f32 %v3146_v12, %v3147_v8  ;;  %v3155_v38 = vmax.f32 %v3153_v15, %v3154_v7  ;;  %v3162_v39 = vmax.f32 %v3160_v16, %v3161_v20  ;;  %v3182_v15 = vrot.slane %v8735_v5, 4 }
0x18ea   :  { %v8750_v10 = vpop.permute.xlu1 %3212  ;;  %v3169_v36 = vmax.f32 %v3167_v1, %v3168_v59  ;;  %v3176_v45 = vmax.f32 %v3174_v19, %v3175_v32 }
0x18eb   :  { %v3223_v3 = vadd.f32 %v8750_v10, %v2348_v31  ;;  %v3224_v46 = vadd.f32 %v8750_v10, %v2349_v35  ;;  %v3225_v41 = vadd.f32 %v8750_v10, %v2604_v13  ;;  %v3226_v42 = vadd.f32 %v8750_v10, %v2605_v18 }
0x18ec   :  { %v3149_v47 = vrot.slane %v3148_v37, 2  ;;  %v3156_v48 = vrot.slane %v3155_v38, 2  ;;  %v3163_v50 = vrot.slane %v3162_v39, 2  ;;  %v3170_v55 = vrot.slane %v3169_v36, 2 }
0x18ed   :  { %v3231_v51 = vmax.f32 %v3215_v22, %v3223_v3  ;;  %v3238_v31 = vmax.f32 %v3216_v23, %v3224_v46  ;;  %v3245_v56 = vmax.f32 %v3217_v30, %v3225_v41  ;;  %v3252_v58 = vmax.f32 %v3218_v27, %v3226_v42 }
0x18ee   :  { %v3150_v29 = vmax.f32 %v3148_v37, %v3149_v47  ;;  %v3157_v35 = vmax.f32 %v3155_v38, %v3156_v48  ;;  %v3164_v25 = vmax.f32 %v3162_v39, %v3163_v50  ;;  %v3171_v21 = vmax.f32 %v3169_v36, %v3170_v55 }
0x18ef   :  { %v3232_v57 = vrot.slane %v3231_v51, 4  ;;  %v3239_v13 = vrot.slane %v3238_v31, 4  ;;  %v3246_v9 = vrot.slane %v3245_v56, 4  ;;  %v3253_v0 = vrot.slane %v3252_v58, 4 }
0x18f0   :  { %v3151_v61 = vrot.slane %v3150_v29, 1  ;;  %v3158_v18 = vrot.slane %v3157_v35, 1  ;;  %v3227_v4 = vadd.f32 %v8750_v10, %v2860_v43  ;;  %v3228_v14 = vadd.f32 %v8750_v10, %v2861_v44 }
0x18f1   :  { %v3233_v6 = vmax.f32 %v3231_v51, %v3232_v57  ;;  %v3240_v63 = vmax.f32 %v3238_v31, %v3239_v13  ;;  %v3247_v11 = vmax.f32 %v3245_v56, %v3246_v9  ;;  %v3165_v60 = vrot.slane %v3164_v25, 1  ;;  %v6128_v9 = vld [vmem:[#allocation5 + $0xd0] sm:$0xf0] }
0x18f2   :  { %v3254_v12 = vmax.f32 %v3252_v58, %v3253_v0  ;;  %v3152_v16 = vmax.f32 %v3150_v29, %v3151_v61  ;;  %v3159_v23 = vmax.f32 %v3157_v35, %v3158_v18  ;;  %v3172_v8 = vrot.slane %v3171_v21, 1  ;;  %v7364_v18 = vld [vmem:[#allocation5 + $0x1c4] sm:$0xf] }
0x18f3   :  { %v3234_v22 = vrot.slane %v3233_v6, 2  ;;  %v3241_v1 = vrot.slane %v3240_v63, 2  ;;  %v3248_v19 = vrot.slane %v3247_v11, 2  ;;  %v3177_v7 = vrot.slane %v3176_v45, 2 }
0x18f4   :  { %v3255_v33 = vrot.slane %v3254_v12, 2  ;;  %v3259_v27 = vmax.f32 %v3219_v17, %v3227_v4  ;;  %v3166_v59 = vmax.f32 %v3164_v25, %v3165_v60  ;;  %v3183_v44 = vmax.f32 %v8735_v5, %v3182_v15  ;;  %v7332_v25 = vld [vmem:[#allocation5 + $0xc4] sm:$0xf] }
0x18f5   :  { %v3235_v43 = vmax.f32 %v3233_v6, %v3234_v22  ;;  %v3242_v20 = vmax.f32 %v3240_v63, %v3241_v1  ;;  %v3249_v30 = vmax.f32 %v3247_v11, %v3248_v19  ;;  %v3266_v32 = vmax.f32 %v3220_v53, %v3228_v14  ;;  %v7328_v15 = vld [vmem:[#allocation5 + $0xa4] sm:$0xf]  ;;  %v6240_v1 = vld [vmem:[#allocation5 + $0x1b0] sm:$0xf0] }
0x18f6   :  { %v3256_v34 = vmax.f32 %v3254_v12, %v3255_v33  ;;  %v3260_v36 = vrot.slane %v3259_v27, 4  ;;  %v3178_v46 = vmax.f32 %v3176_v45, %v3177_v7  ;;  %v3184_v41 = vrot.slane %v3183_v44, 2  ;;  %v7360_v22 = vld [vmem:[#allocation5 + $0x1a4] sm:$0xf] }
0x18f7   :  { %v3236_v37 = vrot.slane %v3235_v43, 1  ;;  %v3243_v38 = vrot.slane %v3242_v20, 1  ;;  %v3250_v39 = vrot.slane %v3249_v30, 1  ;;  %v3267_v42 = vrot.slane %v3266_v32, 4 }
0x18f8   :  { %v3257_v3 = vrot.slane %v3256_v34, 1  ;;  %v3261_v31 = vmax.f32 %v3259_v27, %v3260_v36  ;;  %v3173_v50 = vmax.f32 %v3171_v21, %v3172_v8  ;;  %v3185_v17 = vmax.f32 %v3183_v44, %v3184_v41  ;;  %v6256_v21 = vld [vmem:[#allocation5 + $0x1d0] sm:$0xf0]  ;;  %v7352_v44 = vld [vmem:[#allocation5 + $0x164] sm:$0xf] }
0x18f9   :  { %v3237_v47 = vmax.f32 %v3235_v43, %v3236_v37  ;;  %v3244_v48 = vmax.f32 %v3242_v20, %v3243_v38  ;;  %v3251_v51 = vmax.f32 %v3249_v30, %v3250_v39  ;;  %v3268_v29 = vmax.f32 %v3266_v32, %v3267_v42  ;;  %v6208_v32 = vld [vmem:[#allocation5 + $0x170] sm:$0xf0]  ;;  %v7348_v41 = vld [vmem:[#allocation5 + $0x144] sm:$0xf] }
0x18fa   :  { %v3258_v56 = vmax.f32 %v3256_v34, %v3257_v3  ;;  %v3262_v55 = vrot.slane %v3261_v31, 2  ;;  %v3179_v0 = vrot.slane %v3178_v46, 1  ;;  %v3186_v11 = vrot.slane %v3185_v17, 1  ;;  %v6080_v34 = vld [vmem:[#allocation5 + $0x70] sm:$0xf0] }
0x18fb   :  { %v3288_v35 = vsel %vm3287_vm3, %v3152_v16, %v3237_v47  ;;  %v3289_v5 = vsel %vm3287_vm3, %v3159_v23, %v3244_v48  ;;  %v3290_v53 = vsel %vm3287_vm3, %v3166_v59, %v3251_v51  ;;  %v3269_v6 = vrot.slane %v3268_v29, 2  ;;  %v6112_v16 = vld [vmem:[#allocation5 + $0xb0] sm:$0xf0]  ;;  %v7320_v59 = vld [vmem:[#allocation5 + $0x64] sm:$0xf] }
0x18fc   :  { %v8779_v58 = vpack.c.bf16 %v3288_v35, %v3288_v35  ;;  %v8781_v45 = vpack.c.bf16 %v3289_v5, %v3289_v5  ;;  %v8783_v57 = vpack.c.bf16 %v3290_v53, %v3290_v53  ;;  %v3291_v13 = vsel %vm3287_vm3, %v3173_v50, %v3258_v56  ;;  %v7316_v3 = vld [vmem:[#allocation5 + $0x44] sm:$0xf]  ;;  %v6192_v42 = vld [vmem:[#allocation5 + $0x150] sm:$0xf0] }
0x18fd   :  { %v8786_v61 = vpack.c.bf16 %v3291_v13, %v3291_v13  ;;  %v3263_v4 = vmax.f32 %v3261_v31, %v3262_v55  ;;  %v3270_v14 = vmax.f32 %v3268_v29, %v3269_v6  ;;  %v6131_v60 = vor.u32 %v7332_v25, %v6128_v9  ;;  %v7312_v51 = vld [vmem:[#allocation5 + $0x24] sm:$0xf]  ;;  %v6048_v31 = vld [vmem:[#allocation5 + $0x30] sm:$0xf0]  ;;  %v7530_v29 = vld [vmem:[#allocation5 + $0x6ec] sm:$0xf0] }
0x18fe   :  { %4858 = vmatmul.bf16.vlgmr.msrb.gmra.mxu0 %v8779_v58  ;;  %4871 = vmatmul.bf16.vlgmr.msrb.gmra.mxu2 %v8781_v45  ;;  %v6259_v12 = vor.u32 %v7364_v18, %v6256_v21  ;;  %v3180_v19 = vmax.f32 %v3178_v46, %v3179_v0  ;;  %v3187_v7 = vmax.f32 %v3185_v17, %v3186_v11  ;;  %v6064_v46 = vld [vmem:[#allocation5 + $0x50] sm:$0xf0]  ;;  %v7344_v50 = vld [vmem:[#allocation5 + $0x124] sm:$0xf]  ;;  %v6910_v17 = vld [vmem:[#allocation5 + $0x6e0] sm:$0xf] }
0x18ff   :  { %4884 = vmatmul.bf16.vlgmr.msrb.gmra.mxu1 %v8783_v57  ;;  %4897 = vmatmul.bf16.vlgmr.msrb.gmra.mxu3 %v8786_v61  ;;  %v3264_v63 = vrot.slane %v3263_v4, 1  ;;  %v3271_v8 = vrot.slane %v3270_v14, 1  ;;  %v6115_v2 = vor.u32 %v7328_v15, %v6112_v16  ;;  %v6243_v28 = vor.u32 %v7360_v22, %v6240_v1  ;;  %v6176_v56 = vld [vmem:[#allocation5 + $0x130] sm:$0xf0]  ;;  %v7308_v35 = vld [vmem:[#allocation5 + $0x4] sm:$0xf] }
0x1900   :  { %4954 = vmatpush.bf16.msrb.mxu0 %v6147_v54  ;;  %4967 = vmatpush.bf16.msrb.mxu2 %v6275_v49  ;;  %v7324_v54 = vld [vmem:[#allocation5 + $0x84] sm:$0xf]  ;;  %v6224_v49 = vld [vmem:[#allocation5 + $0x190] sm:$0xf0]  ;;  %v6083_v37 = vor.u32 %v7320_v59, %v6080_v34  ;;  %v6211_v36 = vor.u32 %v7352_v44, %v6208_v32  ;;  %v6067_v47 = vor.u32 %v7316_v3, %v6064_v46  ;;  %v6894_v6 = vld [vmem:[#allocation5 + $0x6c0] sm:$0xf] }
0x1901   :  { %v3265_v23 = vmax.f32 %v3263_v4, %v3264_v63  ;;  %v3272_v43 = vmax.f32 %v3270_v14, %v3271_v8  ;;  %v6099_v30 = vor.u32 %v7324_v54, %v6096_v40  ;;  %v6227_v27 = vor.u32 %v7356_v24, %v6224_v49  ;;  %v6032_v5 = vld [vmem:[#allocation5 + $0x10] sm:$0xf0]  ;;  %v7340_v53 = vld [vmem:[#allocation5 + $0x104] sm:$0xf]  ;;  %v7526_v63 = vld [vmem:[#allocation5 + $0x6cc] sm:$0xf0] }
0x1902   :  { %v6195_v48 = vor.u32 %v7348_v41, %v6192_v42  ;;  %v6911_v55 = vor.u32 %v7530_v29, %v6910_v17  ;;  %v6051_v13 = vor.u32 %v7312_v51, %v6048_v31  ;;  %v6179_v25 = vor.u32 %v7344_v50, %v6176_v56  ;;  %v6160_v9 = vld [vmem:[#allocation5 + $0x110] sm:$0xf0]  ;;  %v7464_v18 = vld [vmem:[#allocation5 + $0x4e4] sm:$0xf]  ;;  %v7038_v11 = vld [vmem:[#allocation5 + $0x7e0] sm:$0xf] }
0x1903   :  { %v3292_v33 = vsel %vm3287_vm3, %v3180_v19, %v3265_v23  ;;  %v3293_v20 = vsel %vm3287_vm3, %v3187_v7, %v3272_v43  ;;  %v6656_v21 = vld [vmem:[#allocation5 + $0x4f0] sm:$0xf0]  ;;  %v7496_v0 = vld [vmem:[#allocation5 + $0x5e4] sm:$0xf]  ;;  %v7562_v14 = vld [vmem:[#allocation5 + $0x7ec] sm:$0xf0]  ;;  %v6035_v15 = vor.u32 %v7308_v35, %v6032_v5  ;;  %v6163_v16 = vor.u32 %v7340_v53, %v6160_v9 }
0x1904   :  { %4955 = vmatpush.bf16.msrb.mxu0 %v6131_v60  ;;  %4968 = vmatpush.bf16.msrb.mxu2 %v6259_v12  ;;  %v8800_v38 = vpack.c.bf16 %v3292_v33, %v3292_v33  ;;  %v8802_v39 = vpack.c.bf16 %v3293_v20, %v3293_v20  ;;  %v6784_v4 = vld [vmem:[#allocation5 + $0x5f0] sm:$0xf0]  ;;  %v6895_v60 = vor.u32 %v7526_v63, %v6894_v6  ;;  %v7460_v19 = vld [vmem:[#allocation5 + $0x4c4] sm:$0xf]  ;;  %v6878_v7 = vld [vmem:[#allocation5 + $0x6a0] sm:$0xf] }
0x1905   :  { %4928 = vmatpush.bf16.msra.mxu1 %v6911_v55  ;;  %v7039_v12 = vor.u32 %v7562_v14, %v7038_v11  ;;  %v6659_v22 = vor.u32 %v7464_v18, %v6656_v21  ;;  %v6787_v1 = vor.u32 %v7496_v0, %v6784_v4  ;;  %v6640_v23 = vld [vmem:[#allocation5 + $0x4d0] sm:$0xf0]  ;;  %v7492_v8 = vld [vmem:[#allocation5 + $0x5c4] sm:$0xf]  ;;  %v7522_v43 = vld [vmem:[#allocation5 + $0x6ac] sm:$0xf0] }
0x1906   :  { %v6768_v33 = vld [vmem:[#allocation5 + $0x5d0] sm:$0xf0]  ;;  %v7558_v54 = vld [vmem:[#allocation5 + $0x7cc] sm:$0xf0]  ;;  %v6643_v40 = vor.u32 %v7460_v19, %v6640_v23  ;;  %v7456_v49 = vld [vmem:[#allocation5 + $0x4a4] sm:$0xf] }
0x1907   :  { %4941 = vmatpush.bf16.msra.mxu3 %v7039_v12  ;;  %v6771_v24 = vor.u32 %v7492_v8, %v6768_v33  ;;  %v6624_v20 = vld [vmem:[#allocation5 + $0x4b0] sm:$0xf0]  ;;  %v6862_v34 = vld [vmem:[#allocation5 + $0x680] sm:$0xf]  ;;  %v7518_v44 = vld [vmem:[#allocation5 + $0x68c] sm:$0xf0] }
0x1908   :  { %4956 = vmatpush.bf16.msrb.mxu0 %v6115_v2  ;;  %4969 = vmatpush.bf16.msrb.mxu2 %v6243_v28  ;;  %v6879_v2 = vor.u32 %v7522_v43, %v6878_v7  ;;  %v7022_v28 = vld [vmem:[#allocation5 + $0x7c0] sm:$0xf]  ;;  %v6752_v59 = vld [vmem:[#allocation5 + $0x5b0] sm:$0xf0]  ;;  %v6627_v46 = vor.u32 %v7456_v49, %v6624_v20  ;;  %v7452_v42 = vld [vmem:[#allocation5 + $0x484] sm:$0xf] }
0x1909   :  { %4929 = vmatpush.bf16.msra.mxu1 %v6895_v60  ;;  %v7006_v32 = vld [vmem:[#allocation5 + $0x7a0] sm:$0xf]  ;;  %v6736_v51 = vld [vmem:[#allocation5 + $0x590] sm:$0xf0]  ;;  %v7514_v50 = vld [vmem:[#allocation5 + $0x66c] sm:$0xf0] }
0x190a   :  { %v6846_v31 = vld [vmem:[#allocation5 + $0x660] sm:$0xf]  ;;  %v7550_v17 = vld [vmem:[#allocation5 + $0x78c] sm:$0xf0]  ;;  %v7448_v55 = vld [vmem:[#allocation5 + $0x464] sm:$0xf] }
0x190b   :  { %v6990_v56 = vld [vmem:[#allocation5 + $0x780] sm:$0xf]  ;;  %v6847_v29 = vor.u32 %v7514_v50, %v6846_v31  ;;  %v6720_v9 = vld [vmem:[#allocation5 + $0x570] sm:$0xf0]  ;;  %v7510_v21 = vld [vmem:[#allocation5 + $0x64c] sm:$0xf0] }
0x190c   :  { %4957 = vmatpush.bf16.msrb.mxu0 %v6099_v30  ;;  %4970 = vmatpush.bf16.msrb.mxu2 %v6227_v27  ;;  %v7023_v30 = vor.u32 %v7558_v54, %v7022_v28  ;;  %v7488_v27 = vld [vmem:[#allocation5 + $0x5a4] sm:$0xf]  ;;  %v6991_v35 = vor.u32 %v7550_v17, %v6990_v56  ;;  %v6830_v18 = vld [vmem:[#allocation5 + $0x640] sm:$0xf]  ;;  %v7546_v4 = vld [vmem:[#allocation5 + $0x76c] sm:$0xf0] }
0x190d   :  { %4930 = vmatpush.bf16.msra.mxu1 %v6879_v2  ;;  %v6755_v41 = vor.u32 %v7488_v27, %v6752_v59  ;;  %v6974_v0 = vld [vmem:[#allocation5 + $0x760] sm:$0xf]  ;;  %v6831_v6 = vor.u32 %v7510_v21, %v6830_v18  ;;  %v7444_v60 = vld [vmem:[#allocation5 + $0x444] sm:$0xf]  ;;  %v6576_v12 = vld [vmem:[#allocation5 + $0x450] sm:$0xf0] }
0x190e   :  { %4910 = vmatmul.bf16.vlgmr.msra.gmra.mxu0 %v8800_v38  ;;  %4923 = vmatmul.bf16.vlgmr.msra.gmra.mxu2 %v8802_v39  ;;  %v6975_v63 = vor.u32 %v7546_v4, %v6974_v0  ;;  %v7440_v19 = vld [vmem:[#allocation5 + $0x424] sm:$0xf]  ;;  %v6560_v23 = vld [vmem:[#allocation5 + $0x430] sm:$0xf0]  ;;  %v6814_v54 = vld [vmem:[#allocation5 + $0x620] sm:$0xf] }
0x190f   :  { %4942 = vmatpush.bf16.msra.mxu3 %v7023_v30  ;;  %v7472_v8 = vld [vmem:[#allocation5 + $0x524] sm:$0xf]  ;;  %v6688_v33 = vld [vmem:[#allocation5 + $0x530] sm:$0xf0]  ;;  %v6563_v49 = vor.u32 %v7440_v19, %v6560_v23  ;;  %v6150_v30 = vld [vmem:[#allocation5 + $0xe8] sm:$0xf] }
0x1910   :  { %4958 = vmatpush.bf16.msrb.mxu0 %v6083_v37  ;;  %4971 = vmatpush.bf16.msrb.mxu2 %v6211_v36  ;;  %v7554_v37 = vld [vmem:[#allocation5 + $0x7ac] sm:$0xf0]  ;;  %v6863_v36 = vor.u32 %v7518_v44, %v6862_v34  ;;  %v7436_v7 = vld [vmem:[#allocation5 + $0x404] sm:$0xf]  ;;  %v6544_v43 = vld [vmem:[#allocation5 + $0x410] sm:$0xf0]  ;;  %v6691_v20 = vor.u32 %v7472_v8, %v6688_v33 }
0x1911   :  { %v7007_v3 = vor.u32 %v7554_v37, %v7006_v32  ;;  %v7468_v2 = vld [vmem:[#allocation5 + $0x504] sm:$0xf]  ;;  %v6672_v28 = vld [vmem:[#allocation5 + $0x510] sm:$0xf0]  ;;  %v7339_v27 = vld [vmem:[#allocation5 + $0xf4] sm:$0xf0] }
0x1912   :  { %4931 = vmatpush.bf16.msra.mxu1 %v6863_v36  ;;  %v7542_v34 = vld [vmem:[#allocation5 + $0x74c] sm:$0xf0]  ;;  %v6278_v44 = vld [vmem:[#allocation5 + $0x1e8] sm:$0xf]  ;;  %v7371_v32 = vld [vmem:[#allocation5 + $0x1f4] sm:$0xf0]  ;;  %v6151_v31 = vor.u32 %v7339_v27, %v6150_v30 }
0x1913   :  { %4943 = vmatpush.bf16.msra.mxu3 %v7007_v3  ;;  %v6798_v36 = vld [vmem:[#allocation5 + $0x600] sm:$0xf]  ;;  %v7502_v3 = vld [vmem:[#allocation5 + $0x60c] sm:$0xf0]  ;;  %v6279_v50 = vor.u32 %v7371_v32, %v6278_v44  ;;  %v6134_v56 = vld [vmem:[#allocation5 + $0xc8] sm:$0xf] }
0x1914   :  { %4959 = vmatpush.bf16.msrb.mxu0 %v6067_v47  ;;  %4972 = vmatpush.bf16.msrb.mxu2 %v6195_v48  ;;  %v6608_v47 = vld [vmem:[#allocation5 + $0x490] sm:$0xf0]  ;;  %v7484_v48 = vld [vmem:[#allocation5 + $0x584] sm:$0xf]  ;;  %v6942_v17 = vld [vmem:[#allocation5 + $0x720] sm:$0xf] }
0x1915   :  { %v6611_v5 = vor.u32 %v7452_v42, %v6608_v47  ;;  %v6739_v53 = vor.u32 %v7484_v48, %v6736_v51  ;;  %v6799_v42 = vor.u32 %v7502_v3, %v6798_v36  ;;  %v6547_v48 = vor.u32 %v7436_v7, %v6544_v43  ;;  %v7331_v18 = vld [vmem:[#allocation5 + $0xb4] sm:$0xf0]  ;;  %v6246_v21 = vld [vmem:[#allocation5 + $0x1a8] sm:$0xf]  ;;  %v7432_v23 = vld [vmem:[#allocation5 + $0x3e4] sm:$0xf] }
0x1916   :  { %4932 = vmatpush.bf16.msra.mxu1 %v6847_v29  ;;  %v6675_v51 = vor.u32 %v7468_v2, %v6672_v28  ;;  %v7538_v29 = vld [vmem:[#allocation5 + $0x72c] sm:$0xf0]  ;;  %v7363_v0 = vld [vmem:[#allocation5 + $0x1b4] sm:$0xf0]  ;;  %v6102_v4 = vld [vmem:[#allocation5 + $0x88] sm:$0xf] }
0x1917   :  { %4944 = vmatpush.bf16.msra.mxu3 %v6991_v35  ;;  %v7335_v35 = vld [vmem:[#allocation5 + $0xd4] sm:$0xf0]  ;;  %v6528_v8 = vld [vmem:[#allocation5 + $0x3f0] sm:$0xf0]  ;;  %v6086_v7 = vld [vmem:[#allocation5 + $0x68] sm:$0xf] }
0x1918   :  { %4960 = vmatpush.bf16.msrb.mxu0 %v6051_v13  ;;  %4973 = vmatpush.bf16.msrb.mxu2 %v6179_v25  ;;  %v6592_v13 = vld [vmem:[#allocation5 + $0x470] sm:$0xf0]  ;;  %v7480_v25 = vld [vmem:[#allocation5 + $0x564] sm:$0xf]  ;;  %v6531_v33 = vor.u32 %v7432_v23, %v6528_v8  ;;  %v7323_v43 = vld [vmem:[#allocation5 + $0x74] sm:$0xf0] }
0x1919   :  { %v6595_v11 = vor.u32 %v7448_v55, %v6592_v13  ;;  %v6723_v14 = vor.u32 %v7480_v25, %v6720_v9  ;;  %v6943_v55 = vor.u32 %v7538_v29, %v6942_v17  ;;  %v6135_v13 = vor.u32 %v7335_v35, %v6134_v56  ;;  %v6118_v9 = vld [vmem:[#allocation5 + $0xa8] sm:$0xf]  ;;  %v8811_v2 = vld [vmem:[%s9111_s9 + $0x3] ss:$4 sm:$0x3] }
0x191a   :  { %4933 = vmatpush.bf16.msra.mxu1 %v6831_v6  ;;  %v7327_v6 = vld [vmem:[#allocation5 + $0x94] sm:$0xf0]  ;;  %v7428_v27 = vld [vmem:[#allocation5 + $0x3c4] sm:$0xf]  ;;  %v3095_v32 = vperm.slane %v8811_v2, 0  ;;  %v6087_v3 = vor.u32 %v7323_v43, %v6086_v7 }
0x191b   :  { %4945 = vmatpush.bf16.msra.mxu3 %v6975_v63  ;;  %v7396_v63 = vld [vmem:[#allocation5 + $0x2c4] sm:$0xf]  ;;  %v6103_v28 = vor.u32 %v7327_v6, %v6102_v4  ;;  %v6352_v36 = vld [vmem:[#allocation5 + $0x290] sm:$0xf0] }
0x191c   :  { %4961 = vmatpush.bf16.msrb.mxu0 %v6035_v15  ;;  %4974 = vmatpush.bf16.msrb.mxu2 %v6163_v16  ;;  %v7476_v15 = vld [vmem:[#allocation5 + $0x544] sm:$0xf]  ;;  %v6704_v16 = vld [vmem:[#allocation5 + $0x550] sm:$0xf0] }
0x191d   :  { %v7384_v35 = vld [vmem:[#allocation5 + $0x264] sm:$0xf]  ;;  %v6480_v6 = vld [vmem:[#allocation5 + $0x390] sm:$0xf0] }
0x191e   :  { %v7420_v4 = vld [vmem:[#allocation5 + $0x384] sm:$0xf] }
0x191f   :  { %4962 = vmatmul.bf16.vlgmr.msrb.gmra.mxu0 %v8779_v58  ;;  %4975 = vmatmul.bf16.vlgmr.msrb.gmra.mxu2 %v8781_v45  ;;  %v7416_v8 = vld [vmem:[#allocation5 + $0x364] sm:$0xf] }
0x1920   :  { %5006 = vmatpush.bf16.msra.mxu0 %v6659_v22  ;;  %5019 = vmatpush.bf16.msra.mxu2 %v6787_v1  ;;  %v6579_v22 = vor.u32 %v7444_v60, %v6576_v12  ;;  %v6707_v1 = vor.u32 %v7476_v15, %v6704_v16  ;;  %v6247_v60 = vor.u32 %v7363_v0, %v6246_v21  ;;  %v6230_v12 = vld [vmem:[#allocation5 + $0x188] sm:$0xf]  ;;  %v6926_v16 = vld [vmem:[#allocation5 + $0x700] sm:$0xf]  ;;  %v7347_v0 = vld [vmem:[#allocation5 + $0x134] sm:$0xf0] }
0x1924   :  { %5007 = vmatpush.bf16.msra.mxu0 %v6643_v40  ;;  %5020 = vmatpush.bf16.msra.mxu2 %v6771_v24  ;;  %v7506_v40 = vld [vmem:[#allocation5 + $0x62c] sm:$0xf0]  ;;  %v6958_v24 = vld [vmem:[#allocation5 + $0x740] sm:$0xf] }
0x1925   :  { %v6815_v59 = vor.u32 %v7506_v40, %v6814_v54  ;;  %v6959_v37 = vor.u32 %v7542_v34, %v6958_v24  ;;  %v6214_v40 = vld [vmem:[#allocation5 + $0x168] sm:$0xf]  ;;  %v7392_v24 = vld [vmem:[#allocation5 + $0x2a4] sm:$0xf] }
0x1926   :  { %v8814_v34 = vld [vmem:[%s9112_s11 + $0x3] ss:$4 sm:$0x3] }
0x1927   :  { %4934 = vmatpush.bf16.msra.mxu1 %v6815_v59  ;;  %4946 = vmatpush.bf16.msra.mxu3 %v6959_v37  ;;  %v6512_v59 = vld [vmem:[#allocation5 + $0x3d0] sm:$0xf0]  ;;  %v7388_v37 = vld [vmem:[#allocation5 + $0x284] sm:$0xf]  ;;  %v3106_v29 = vperm.slane %v8814_v34, 0 }
0x1928   :  { %5008 = vmatpush.bf16.msra.mxu0 %v6627_v46  ;;  %5021 = vmatpush.bf16.msra.mxu2 %v6755_v41  ;;  %v7400_v46 = vld [vmem:[#allocation5 + $0x2e4] sm:$0xf]  ;;  %v6400_v41 = vld [vmem:[#allocation5 + $0x2f0] sm:$0xf0]  ;;  %v6515_v44 = vor.u32 %v7428_v27, %v6512_v59  ;;  %v3107_v59 = vperm.slane %v8814_v34, 1 }
0x1929   :  { %v6403_v47 = vor.u32 %v7400_v46, %v6400_v41  ;;  %v6070_v41 = vld [vmem:[#allocation5 + $0x48] sm:$0xf] }
0x192b   :  { %4935 = vmatpush.bf16.msra.mxu1 %v6799_v42  ;;  %4947 = vmatpush.bf16.msra.mxu3 %v6943_v55  ;;  %v7319_v42 = vld [vmem:[#allocation5 + $0x54] sm:$0xf0] }
0x192c   :  { %5009 = vmatpush.bf16.msra.mxu0 %v6611_v5  ;;  %5022 = vmatpush.bf16.msra.mxu2 %v6739_v53  ;;  %v6262_v5 = vld [vmem:[#allocation5 + $0x1c8] sm:$0xf]  ;;  %v7367_v53 = vld [vmem:[#allocation5 + $0x1d4] sm:$0xf0] }
0x192d   :  { %v6263_v25 = vor.u32 %v7367_v53, %v6262_v5  ;;  %v6336_v5 = vld [vmem:[#allocation5 + $0x270] sm:$0xf0]  ;;  %v6071_v53 = vor.u32 %v7319_v42, %v6070_v41 }
0x192f   :  { %4980 = vmatpush.bf16.msrb.mxu1 %v6403_v47  ;;  %v6198_v47 = vld [vmem:[#allocation5 + $0x148] sm:$0xf] }
0x1930   :  { %5010 = vmatpush.bf16.msra.mxu0 %v6595_v11  ;;  %5023 = vmatpush.bf16.msra.mxu2 %v6723_v14  ;;  %v6384_v11 = vld [vmem:[#allocation5 + $0x2d0] sm:$0xf0]  ;;  %v6119_v14 = vor.u32 %v7331_v18, %v6118_v9  ;;  %v6182_v9 = vld [vmem:[#allocation5 + $0x128] sm:$0xf]  ;;  %v6339_v18 = vor.u32 %v7384_v35, %v6336_v5 }
0x1931   :  { %v6387_v15 = vor.u32 %v7396_v63, %v6384_v11  ;;  %v3096_v63 = vperm.slane %v8811_v2, 1  ;;  %v6483_v11 = vor.u32 %v7420_v4, %v6480_v6  ;;  %v6774_v5 = vld [vmem:[#allocation5 + $0x5c8] sm:$0xf] }
0x1932   :  { %v6630_v6 = vld [vmem:[#allocation5 + $0x4a8] sm:$0xf] }
0x1933   :  { %4981 = vmatpush.bf16.msrb.mxu1 %v6387_v15  ;;  %v7380_v15 = vld [vmem:[#allocation5 + $0x244] sm:$0xf] }
0x1934   :  { %5011 = vmatpush.bf16.msra.mxu0 %v6579_v22  ;;  %5024 = vmatpush.bf16.msra.mxu2 %v6707_v1  ;;  %v7534_v22 = vld [vmem:[#allocation5 + $0x70c] sm:$0xf0]  ;;  %v7359_v1 = vld [vmem:[#allocation5 + $0x194] sm:$0xf0] }
0x1935   :  { %v6927_v19 = vor.u32 %v7534_v22, %v6926_v16  ;;  %v6231_v54 = vor.u32 %v7359_v1, %v6230_v12  ;;  %v6166_v12 = vld [vmem:[#allocation5 + $0x108] sm:$0xf]  ;;  %v6320_v16 = vld [vmem:[#allocation5 + $0x250] sm:$0xf0]  ;;  %v6183_v1 = vor.u32 %v7347_v0, %v6182_v9 }
0x1936   :  { %v6323_v23 = vor.u32 %v7380_v15, %v6320_v16  ;;  %v6758_v15 = vld [vmem:[#allocation5 + $0x5a8] sm:$0xf]  ;;  %v7491_v16 = vld [vmem:[#allocation5 + $0x5b4] sm:$0xf0] }
0x1937   :  { %4948 = vmatpush.bf16.msra.mxu3 %v6927_v19  ;;  %v7343_v19 = vld [vmem:[#allocation5 + $0x114] sm:$0xf0] }
0x1938   :  { %5012 = vmatpush.bf16.msra.mxu0 %v6563_v49  ;;  %5025 = vmatpush.bf16.msra.mxu2 %v6691_v20  ;;  %v6368_v49 = vld [vmem:[#allocation5 + $0x2b0] sm:$0xf0]  ;;  %v7355_v20 = vld [vmem:[#allocation5 + $0x174] sm:$0xf0]  ;;  %v6167_v42 = vor.u32 %v7343_v19, %v6166_v12  ;;  %v7404_v19 = vld [vmem:[#allocation5 + $0x304] sm:$0xf] }
0x1939   :  { %v6371_v30 = vor.u32 %v7392_v24, %v6368_v49  ;;  %v6215_v46 = vor.u32 %v7355_v20, %v6214_v40  ;;  %v6790_v40 = vld [vmem:[#allocation5 + $0x5e8] sm:$0xf]  ;;  %v7499_v49 = vld [vmem:[#allocation5 + $0x5f4] sm:$0xf0]  ;;  %v7376_v20 = vld [vmem:[#allocation5 + $0x224] sm:$0xf] }
0x193a   :  { %v7459_v12 = vld [vmem:[#allocation5 + $0x4b4] sm:$0xf0] }
0x193b   :  { %4993 = vmatpush.bf16.msrb.mxu3 %v6531_v33  ;;  %4982 = vmatpush.bf16.msrb.mxu1 %v6371_v30  ;;  %v6464_v33 = vld [vmem:[#allocation5 + $0x370] sm:$0xf0]  ;;  %v6631_v2 = vor.u32 %v7459_v12, %v6630_v6  ;;  %v7528_v6 = vld [vmem:[#allocation5 + $0x6e4] sm:$0xf]  ;;  %v6566_v12 = vld [vmem:[#allocation5 + $0x428] sm:$0xf] }
0x193c   :  { %5013 = vmatpush.bf16.msra.mxu0 %v6547_v48  ;;  %5026 = vmatpush.bf16.msra.mxu2 %v6675_v51  ;;  %v6355_v48 = vor.u32 %v7388_v37, %v6352_v36  ;;  %v7351_v51 = vld [vmem:[#allocation5 + $0x154] sm:$0xf0]  ;;  %v6467_v24 = vor.u32 %v7416_v8, %v6464_v33  ;;  %v6304_v30 = vld [vmem:[#allocation5 + $0x230] sm:$0xf0]  ;;  %v7412_v36 = vld [vmem:[#allocation5 + $0x344] sm:$0xf] }
0x193d   :  { %v6199_v55 = vor.u32 %v7351_v51, %v6198_v47  ;;  %v6307_v37 = vor.u32 %v7376_v20, %v6304_v30  ;;  %v6646_v47 = vld [vmem:[#allocation5 + $0x4c8] sm:$0xf]  ;;  %v7487_v20 = vld [vmem:[#allocation5 + $0x594] sm:$0xf0] }
0x193f   :  { %5014 = vmatmul.bf16.vlgmr.msra.gmra.mxu0 %v8800_v38  ;;  %5027 = vmatmul.bf16.vlgmr.msra.gmra.mxu2 %v8802_v39 }
0x1940   :  { %5058 = vmatpush.bf16.msrb.mxu0 %v6151_v31  ;;  %5071 = vmatpush.bf16.msrb.mxu2 %v6279_v50  ;;  %v7424_v31 = vld [vmem:[#allocation5 + $0x3a4] sm:$0xf]  ;;  %v6496_v50 = vld [vmem:[#allocation5 + $0x3b0] sm:$0xf0] }
0x1941   :  { %4994 = vmatpush.bf16.msrb.mxu3 %v6515_v44  ;;  %v6499_v56 = vor.u32 %v7424_v31, %v6496_v50  ;;  %4983 = vmatpush.bf16.msrb.mxu1 %v6355_v48  ;;  %v7463_v48 = vld [vmem:[#allocation5 + $0x4d4] sm:$0xf0]  ;;  %v6791_v50 = vor.u32 %v7499_v49, %v6790_v40 }
0x1944   :  { %5059 = vmatpush.bf16.msrb.mxu0 %v6135_v13  ;;  %5072 = vmatpush.bf16.msrb.mxu2 %v6263_v25  ;;  %v6054_v13 = vld [vmem:[#allocation5 + $0x28] sm:$0xf]  ;;  %v7315_v25 = vld [vmem:[#allocation5 + $0x34] sm:$0xf0] }
0x1945   :  { %4995 = vmatpush.bf16.msrb.mxu3 %v6499_v56  ;;  %4984 = vmatpush.bf16.msrb.mxu1 %v6339_v18  ;;  %v6055_v22 = vor.u32 %v7315_v25, %v6054_v13  ;;  %v7372_v56 = vld [vmem:[#allocation5 + $0x204] sm:$0xf]  ;;  %v6647_v18 = vor.u32 %v7463_v48, %v6646_v47  ;;  %v7451_v47 = vld [vmem:[#allocation5 + $0x474] sm:$0xf0] }
0x1946   :  { %v7408_v25 = vld [vmem:[#allocation5 + $0x324] sm:$0xf] }
0x1948   :  { %5060 = vmatpush.bf16.msrb.mxu0 %v6119_v14  ;;  %5073 = vmatpush.bf16.msrb.mxu2 %v6247_v60  ;;  %v6038_v14 = vld [vmem:[#allocation5 + $0x8] sm:$0xf]  ;;  %v7311_v60 = vld [vmem:[#allocation5 + $0x14] sm:$0xf0] }
0x1949   :  { %v3063_v17 = vpop.f32.mrf.mxu0  ;;  %4996 = vmatpush.bf16.msrb.mxu3 %v6483_v11  ;;  %4985 = vmatpush.bf16.msrb.mxu1 %v6323_v23  ;;  %v6039_v41 = vor.u32 %v7311_v60, %v6038_v14  ;;  %v6416_v23 = vld [vmem:[#allocation5 + $0x310] sm:$0xf0] }
0x194a   :  { %v3099_v21 = vmul.f32 %v3095_v32, %v3063_v17  ;;  %v6288_v17 = vld [vmem:[#allocation5 + $0x210] sm:$0xf0]  ;;  %v6419_v30 = vor.u32 %v7404_v19, %v6416_v23  ;;  %v6694_v19 = vld [vmem:[#allocation5 + $0x528] sm:$0xf]  ;;  %v7475_v23 = vld [vmem:[#allocation5 + $0x534] sm:$0xf0] }
0x194c   :  { %5061 = vmatpush.bf16.msrb.mxu0 %v6103_v28  ;;  %5074 = vmatpush.bf16.msrb.mxu2 %v6231_v54  ;;  %v3110_v7 = vadd.f32 %v3106_v29, %v3099_v21  ;;  %v6662_v28 = vld [vmem:[#allocation5 + $0x4e8] sm:$0xf]  ;;  %v7467_v54 = vld [vmem:[#allocation5 + $0x4f4] sm:$0xf0]  ;;  %v6291_v21 = vor.u32 %v7372_v56, %v6288_v17 }
0x194d   :  { %v6663_v31 = vor.u32 %v7467_v54, %v6662_v28  ;;  %4997 = vmatpush.bf16.msrb.mxu3 %v6467_v24  ;;  %4986 = vmatpush.bf16.msrb.mxu1 %v6307_v37  ;;  %v7455_v28 = vld [vmem:[#allocation5 + $0x494] sm:$0xf0]  ;;  %v6742_v54 = vld [vmem:[#allocation5 + $0x588] sm:$0xf] }
0x194e   :  { %v3114_v51 = vmax.f32 %v3110_v7, 0.0  ;;  %v6726_v56 = vld [vmem:[#allocation5 + $0x568] sm:$0xf] }
0x194f   :  { %v3086_v43 = vpop.f32.mrf.mxu2 }
0x1950   :  { %5062 = vmatpush.bf16.msrb.mxu0 %v6087_v3  ;;  %5075 = vmatpush.bf16.msrb.mxu2 %v6215_v46  ;;  %v3100_v27 = vmul.f32 %v3096_v63, %v3086_v43  ;;  %v6448_v3 = vld [vmem:[#allocation5 + $0x350] sm:$0xf0]  ;;  %v3136_v0 = vadd.f32 %v8716_v62, %v3114_v51  ;;  %v3221_v4 = vadd.f32 %v8718_v26, %v3114_v51  ;;  %v6614_v43 = vld [vmem:[#allocation5 + $0x488] sm:$0xf] }
0x1951   :  { %v3066_v44 = vpop.f32.mrf.mxu0  ;;  %4987 = vmatpush.bf16.msrb.mxu1 %v6291_v21  ;;  %v7479_v21 = vld [vmem:[#allocation5 + $0x554] sm:$0xf0] }
0x1952   :  { %v3101_v46 = vmul.f32 %v3095_v32, %v3066_v44  ;;  %v3111_v13 = vadd.f32 %v3107_v59, %v3100_v27  ;;  %v6432_v32 = vld [vmem:[#allocation5 + $0x330] sm:$0xf0] }
0x1954   :  { %5063 = vmatpush.bf16.msrb.mxu0 %v6071_v53  ;;  %5076 = vmatpush.bf16.msrb.mxu2 %v6199_v55  ;;  %v3112_v35 = vadd.f32 %v3106_v29, %v3101_v46  ;;  %v7495_v53 = vld [vmem:[#allocation5 + $0x5d4] sm:$0xf0]  ;;  %v6451_v55 = vor.u32 %v7412_v36, %v6448_v3  ;;  %v6615_v46 = vor.u32 %v7455_v28, %v6614_v43  ;;  %v6896_v43 = vld [vmem:[#allocation5 + $0x6d0] sm:$0xf0]  ;;  %v7560_v28 = vld [vmem:[#allocation5 + $0x7e4] sm:$0xf] }
0x1955   :  { %v6775_v29 = vor.u32 %v7495_v53, %v6774_v5  ;;  %v6582_v53 = vld [vmem:[#allocation5 + $0x448] sm:$0xf] }
0x1956   :  { %v3116_v9 = vmax.f32 %v3112_v35, 0.0  ;;  %4998 = vmatpush.bf16.msrb.mxu3 %v6451_v55  ;;  %v7447_v55 = vld [vmem:[#allocation5 + $0x454] sm:$0xf0] }
0x1957   :  { %v3089_v34 = vpop.f32.mrf.mxu2 }
0x1958   :  { %5064 = vmatpush.bf16.msrb.mxu0 %v6055_v22  ;;  %5077 = vmatpush.bf16.msrb.mxu2 %v6183_v1  ;;  %v3144_v11 = vadd.f32 %v8689_v52, %v3116_v9  ;;  %v3229_v14 = vadd.f32 %v8750_v10, %v3116_v9  ;;  %v3102_v60 = vmul.f32 %v3096_v63, %v3089_v34  ;;  %v3115_v1 = vmax.f32 %v3111_v13, 0.0 }
0x1959   :  { %v6435_v22 = vor.u32 %v7408_v25, %v6432_v32  ;;  %v6759_v63 = vor.u32 %v7491_v16, %v6758_v15 }
0x195a   :  { %v3188_v8 = vmax.f32 %v3136_v0, %v3144_v11  ;;  %v3273_v33 = vmax.f32 %v3221_v4, %v3229_v14  ;;  %v3113_v7 = vadd.f32 %v3107_v59, %v3102_v60  ;;  %v3137_v27 = vadd.f32 %v8716_v62, %v3115_v1  ;;  %v7483_v62 = vld [vmem:[#allocation5 + $0x574] sm:$0xf0]  ;;  %v6912_v11 = vld [vmem:[#allocation5 + $0x6f0] sm:$0xf0] }
0x195b   :  { %4999 = vmatpush.bf16.msrb.mxu3 %v6435_v22  ;;  %v3222_v44 = vadd.f32 %v8718_v26, %v3115_v1  ;;  %v6583_v14 = vor.u32 %v7447_v55, %v6582_v53  ;;  %v7443_v1 = vld [vmem:[#allocation5 + $0x434] sm:$0xf0]  ;;  %v7365_v53 = vld [vmem:[#allocation5 + $0x1cc] sm:$0xf]  ;;  %v6264_v55 = vld [vmem:[#allocation5 + $0x1d8] sm:$0xf0] }
0x195c   :  { %5065 = vmatpush.bf16.msrb.mxu0 %v6039_v41  ;;  %5078 = vmatpush.bf16.msrb.mxu2 %v6167_v42  ;;  %v3189_v40 = vrot.slane %v3188_v8, 4  ;;  %v3274_v24 = vrot.slane %v3273_v33, 4  ;;  %v3117_v49 = vmax.f32 %v3113_v7, 0.0  ;;  %v6743_v41 = vor.u32 %v7487_v20, %v6742_v54  ;;  %v6598_v42 = vld [vmem:[#allocation5 + $0x468] sm:$0xf] }
0x195d   :  { %v7524_v7 = vld [vmem:[#allocation5 + $0x6c4] sm:$0xf]  ;;  %v6567_v54 = vor.u32 %v7443_v1, %v6566_v12  ;;  %v7439_v20 = vld [vmem:[#allocation5 + $0x414] sm:$0xf0] }
0x195e   :  { %v3190_v37 = vmax.f32 %v3188_v8, %v3189_v40  ;;  %v3275_v59 = vmax.f32 %v3273_v33, %v3274_v24  ;;  %v3145_v36 = vadd.f32 %v8689_v52, %v3117_v49  ;;  %v3230_v3 = vadd.f32 %v8750_v10, %v3117_v49  ;;  %v7040_v24 = vld [vmem:[#allocation5 + $0x7f0] sm:$0xf0]  ;;  %v6550_v49 = vld [vmem:[#allocation5 + $0x408] sm:$0xf]  ;;  %v7512_v12 = vld [vmem:[#allocation5 + $0x664] sm:$0xf] }
0x195f   :  { %5066 = vmatmul.bf16.vlgmr.msrb.gmra.mxu0 %v8779_v58  ;;  %5079 = vmatmul.bf16.vlgmr.msrb.gmra.mxu2 %v8781_v45  ;;  %v6599_v52 = vor.u32 %v7451_v47, %v6598_v42  ;;  %v6727_v10 = vor.u32 %v7483_v62, %v6726_v56  ;;  %v6915_v33 = vor.u32 %v7528_v6, %v6912_v11  ;;  %v7361_v6 = vld [vmem:[#allocation5 + $0x1ac] sm:$0xf]  ;;  %v6248_v11 = vld [vmem:[#allocation5 + $0x1b8] sm:$0xf0]  ;;  %v7548_v1 = vld [vmem:[#allocation5 + $0x784] sm:$0xf] }
0x1960   :  { %5110 = vmatpush.bf16.msra.mxu0 %v6663_v31  ;;  %5123 = vmatpush.bf16.msra.mxu2 %v6791_v50  ;;  %v3191_v48 = vrot.slane %v3190_v37, 2  ;;  %v3276_v51 = vrot.slane %v3275_v59, 2  ;;  %v3195_v31 = vmax.f32 %v3137_v27, %v3145_v36  ;;  %v3280_v50 = vmax.f32 %v3222_v44, %v3230_v3  ;;  %v6678_v44 = vld [vmem:[#allocation5 + $0x508] sm:$0xf]  ;;  %v6152_v3 = vld [vmem:[#allocation5 + $0xf8] sm:$0xf0] }
0x1961   :  { %5000 = vmatpush.bf16.msrb.mxu3 %v6419_v30  ;;  %v6695_v40 = vor.u32 %v7475_v23, %v6694_v19  ;;  %v6899_v36 = vor.u32 %v7524_v7, %v6896_v43  ;;  %v7043_v47 = vor.u32 %v7560_v28, %v7040_v24  ;;  %v6992_v19 = vld [vmem:[#allocation5 + $0x790] sm:$0xf0]  ;;  %v7325_v23 = vld [vmem:[#allocation5 + $0x8c] sm:$0xf] }
0x1962   :  { %v3192_v26 = vmax.f32 %v3190_v37, %v3191_v48  ;;  %v3277_v17 = vmax.f32 %v3275_v59, %v3276_v51  ;;  %v3196_v35 = vrot.slane %v3195_v31, 4  ;;  %v3281_v5 = vrot.slane %v3280_v50, 4  ;;  %v7471_v37 = vld [vmem:[#allocation5 + $0x514] sm:$0xf0]  ;;  %v7337_v59 = vld [vmem:[#allocation5 + $0xec] sm:$0xf] }
0x1963   :  { %v7520_v48 = vld [vmem:[#allocation5 + $0x6a4] sm:$0xf]  ;;  %v6880_v51 = vld [vmem:[#allocation5 + $0x6b0] sm:$0xf0]  ;;  %v6679_v56 = vor.u32 %v7471_v37, %v6678_v44  ;;  %v6155_v62 = vor.u32 %v7337_v59, %v6152_v3  ;;  %v7357_v7 = vld [vmem:[#allocation5 + $0x18c] sm:$0xf] }
0x1964   :  { %5111 = vmatpush.bf16.msra.mxu0 %v6647_v18  ;;  %5124 = vmatpush.bf16.msra.mxu2 %v6775_v29  ;;  %v3193_v13 = vrot.slane %v3192_v26, 1  ;;  %v3278_v25 = vrot.slane %v3277_v17, 1  ;;  %v3197_v32 = vmax.f32 %v3195_v31, %v3196_v35  ;;  %v3282_v9 = vmax.f32 %v3280_v50, %v3281_v5  ;;  %v6710_v18 = vld [vmem:[#allocation5 + $0x548] sm:$0xf]  ;;  %v7024_v35 = vld [vmem:[#allocation5 + $0x7d0] sm:$0xf0] }
0x1965   :  { %v6711_v60 = vor.u32 %v7479_v21, %v6710_v18  ;;  %v6551_v50 = vor.u32 %v7439_v20, %v6550_v49  ;;  %v7333_v5 = vld [vmem:[#allocation5 + $0xcc] sm:$0xf]  ;;  %v6267_v18 = vor.u32 %v7365_v53, %v6264_v55  ;;  %v7552_v21 = vld [vmem:[#allocation5 + $0x7a4] sm:$0xf]  ;;  %v6832_v24 = vld [vmem:[#allocation5 + $0x650] sm:$0xf0] }
0x1966   :  { %v3194_v0 = vmax.f32 %v3192_v26, %v3193_v13  ;;  %v3279_v4 = vmax.f32 %v3277_v17, %v3278_v25  ;;  %v3198_v34 = vrot.slane %v3197_v32, 2  ;;  %v3283_v29 = vrot.slane %v3282_v9, 2  ;;  %v7556_v17 = vld [vmem:[#allocation5 + $0x7c4] sm:$0xf]  ;;  %v6864_v25 = vld [vmem:[#allocation5 + $0x690] sm:$0xf0] }
0x1967   :  { %v7516_v13 = vld [vmem:[#allocation5 + $0x684] sm:$0xf]  ;;  %v6976_v44 = vld [vmem:[#allocation5 + $0x770] sm:$0xf0]  ;;  %v7321_v37 = vld [vmem:[#allocation5 + $0x6c] sm:$0xf] }
0x1968   :  { %5112 = vmatpush.bf16.msra.mxu0 %v6631_v2  ;;  %5125 = vmatpush.bf16.msra.mxu2 %v6759_v63  ;;  %v3199_v15 = vmax.f32 %v3197_v32, %v3198_v34  ;;  %v3284_v16 = vmax.f32 %v3282_v9, %v3283_v29  ;;  %v3294_v22 = vsel %vm3287_vm3, %v3194_v0, %v3279_v4  ;;  %v7008_v0 = vld [vmem:[#allocation5 + $0x7b0] sm:$0xf0]  ;;  %v7329_v4 = vld [vmem:[#allocation5 + $0xac] sm:$0xf]  ;;  %v6120_v29 = vld [vmem:[#allocation5 + $0xb8] sm:$0xf0] }
0x1969   :  { %v8843_v8 = vpack.c.bf16 %v3294_v22, %v3294_v22  ;;  %v7027_v32 = vor.u32 %v7556_v17, %v7024_v35  ;;  %v6867_v34 = vor.u32 %v7516_v13, %v6864_v25  ;;  %v6251_v22 = vor.u32 %v7361_v6, %v6248_v11  ;;  %v6088_v59 = vld [vmem:[#allocation5 + $0x78] sm:$0xf0]  ;;  %v7500_v13 = vld [vmem:[#allocation5 + $0x604] sm:$0xf]  ;;  %v6944_v11 = vld [vmem:[#allocation5 + $0x730] sm:$0xf0] }
0x196a   :  { %v3200_v2 = vrot.slane %v3199_v15, 1  ;;  %v3285_v63 = vrot.slane %v3284_v16, 1  ;;  %v6216_v3 = vld [vmem:[#allocation5 + $0x178] sm:$0xf0]  ;;  %v7536_v6 = vld [vmem:[#allocation5 + $0x724] sm:$0xf] }
0x196b   :  { %4936 = vmatmul.bf16.vlgmr.msra.gmra.mxu1 %v8843_v8  ;;  %v6072_v35 = vld [vmem:[#allocation5 + $0x58] sm:$0xf0] }
0x196c   :  { %5113 = vmatpush.bf16.msra.mxu0 %v6615_v46  ;;  %5126 = vmatpush.bf16.msra.mxu2 %v6743_v41  ;;  %v3201_v30 = vmax.f32 %v3199_v15, %v3200_v2  ;;  %v3286_v27 = vmax.f32 %v3284_v16, %v3285_v63  ;;  %v7369_v46 = vld [vmem:[#allocation5 + $0x1ec] sm:$0xf]  ;;  %v6280_v41 = vld [vmem:[#allocation5 + $0x1f8] sm:$0xf0]  ;;  %v6848_v15 = vld [vmem:[#allocation5 + $0x670] sm:$0xf0]  ;;  %v6123_v16 = vor.u32 %v7329_v4, %v6120_v29 }
0x196d   :  { %5032 = vmatpush.bf16.msra.mxu1 %v6915_v33  ;;  %v6283_v26 = vor.u32 %v7369_v46, %v6280_v41  ;;  %v6104_v33 = vld [vmem:[#allocation5 + $0x98] sm:$0xf0]  ;;  %v6851_v63 = vor.u32 %v7512_v12, %v6848_v15  ;;  %v7345_v15 = vld [vmem:[#allocation5 + $0x12c] sm:$0xf] }
0x196e   :  { %v3295_v42 = vsel %vm3287_vm3, %v3201_v30, %v3286_v27  ;;  %v6232_v2 = vld [vmem:[#allocation5 + $0x198] sm:$0xf0]  ;;  %v6107_v20 = vor.u32 %v7325_v23, %v6104_v33  ;;  %v7544_v27 = vld [vmem:[#allocation5 + $0x764] sm:$0xf]  ;;  %v6947_v23 = vor.u32 %v7536_v6, %v6944_v11  ;;  %v6390_v33 = vld [vmem:[#allocation5 + $0x2c8] sm:$0xf] }
0x196f   :  { %v8847_v31 = vpack.c.bf16 %v3295_v42, %v3295_v42  ;;  %v6235_v30 = vor.u32 %v7357_v7, %v6232_v2  ;;  %v6979_v41 = vor.u32 %v7544_v27, %v6976_v44  ;;  %v7504_v42 = vld [vmem:[#allocation5 + $0x624] sm:$0xf]  ;;  %v6056_v12 = vld [vmem:[#allocation5 + $0x38] sm:$0xf0]  ;;  %v7399_v7 = vld [vmem:[#allocation5 + $0x2d4] sm:$0xf0] }
0x1970   :  { %5114 = vmatpush.bf16.msra.mxu0 %v6599_v52  ;;  %5127 = vmatpush.bf16.msra.mxu2 %v6727_v10  ;;  %v6883_v52 = vor.u32 %v7520_v48, %v6880_v51  ;;  %v6136_v10 = vld [vmem:[#allocation5 + $0xd8] sm:$0xf0]  ;;  %v6091_v51 = vor.u32 %v7321_v37, %v6088_v59  ;;  %v7532_v2 = vld [vmem:[#allocation5 + $0x704] sm:$0xf]  ;;  %v7465_v37 = vld [vmem:[#allocation5 + $0x4ec] sm:$0xf] }
0x1971   :  { %5033 = vmatpush.bf16.msra.mxu1 %v6899_v36  ;;  %4949 = vmatmul.bf16.vlgmr.msra.gmra.mxu3 %v8847_v31  ;;  %v6139_v9 = vor.u32 %v7333_v5, %v6136_v10  ;;  %v7353_v36 = vld [vmem:[#allocation5 + $0x16c] sm:$0xf]  ;;  %v6168_v44 = vld [vmem:[#allocation5 + $0x118] sm:$0xf0] }
0x1972   :  { %5045 = vmatpush.bf16.msra.mxu3 %v7043_v47  ;;  %v6816_v47 = vld [vmem:[#allocation5 + $0x630] sm:$0xf0]  ;;  %v7349_v5 = vld [vmem:[#allocation5 + $0x14c] sm:$0xf]  ;;  %v6664_v59 = vld [vmem:[#allocation5 + $0x4f8] sm:$0xf0] }
0x1973   :  { %v6819_v55 = vor.u32 %v7504_v42, %v6816_v47  ;;  %v6792_v42 = vld [vmem:[#allocation5 + $0x5f8] sm:$0xf0]  ;;  %v7457_v6 = vld [vmem:[#allocation5 + $0x4ac] sm:$0xf] }
0x1974   :  { %5115 = vmatpush.bf16.msra.mxu0 %v6583_v14  ;;  %5128 = vmatpush.bf16.msra.mxu2 %v6711_v60  ;;  %v7011_v14 = vor.u32 %v7552_v21, %v7008_v0  ;;  %v8853_v60 = vld [vmem:[%s9113_s15] sm:$0xf]  ;;  %v7403_v21 = vld [vmem:[#allocation5 + $0x2f4] sm:$0xf0]  ;;  %v6632_v11 = vld [vmem:[#allocation5 + $0x4b8] sm:$0xf0] }
0x1975   :  { %5034 = vmatpush.bf16.msra.mxu1 %v6883_v52  ;;  %v3562_v43 = vperm.slane %v8853_v60, 0  ;;  %v6200_v52 = vld [vmem:[#allocation5 + $0x158] sm:$0xf0] }
0x1976   :  { %5046 = vmatpush.bf16.msra.mxu3 %v7027_v32  ;;  %v6203_v29 = vor.u32 %v7349_v5, %v6200_v52  ;;  %v7461_v52 = vld [vmem:[#allocation5 + $0x4cc] sm:$0xf] }
0x1978   :  { %5116 = vmatpush.bf16.msra.mxu0 %v6567_v54  ;;  %5129 = vmatpush.bf16.msra.mxu2 %v6695_v40  ;;  %v6995_v54 = vor.u32 %v7548_v1, %v6992_v19  ;;  %v7508_v40 = vld [vmem:[#allocation5 + $0x644] sm:$0xf] }
0x1979   :  { %5035 = vmatpush.bf16.msra.mxu1 %v6867_v34  ;;  %v6835_v46 = vor.u32 %v7508_v40, %v6832_v24  ;;  %v7435_v40 = vld [vmem:[#allocation5 + $0x3f4] sm:$0xf0] }
0x197a   :  { %5047 = vmatpush.bf16.msra.mxu3 %v7011_v14  ;;  %v7313_v14 = vld [vmem:[#allocation5 + $0x2c] sm:$0xf] }
0x197b   :  { %v4859_v28 = vpop.f32.mrf.mxu0  ;;  %4988 = vmatmul.bf16.vlgmr.msrb.gmra.mxu1 %v8783_v57 }
0x197c   :  { %5117 = vmatpush.bf16.msra.mxu0 %v6551_v50  ;;  %5130 = vmatpush.bf16.msra.mxu2 %v6679_v56  ;;  %v4885_v49 = vpop.f32.mrf.mxu1  ;;  %v4860_v48 = vadd.f32 %v4859_v28, %v3562_v43  ;;  %v6219_v50 = vor.u32 %v7353_v36, %v6216_v3  ;;  %v7540_v56 = vld [vmem:[#allocation5 + $0x744] sm:$0xf]  ;;  %v6928_v28 = vld [vmem:[#allocation5 + $0x710] sm:$0xf0]  ;;  %v6391_v3 = vor.u32 %v7399_v7, %v6390_v33  ;;  %v6486_v33 = vld [vmem:[#allocation5 + $0x388] sm:$0xf] }
0x197d   :  { %5036 = vmatpush.bf16.msra.mxu1 %v6851_v63  ;;  %v6059_v63 = vor.u32 %v7313_v14, %v6056_v12  ;;  %v7423_v7 = vld [vmem:[#allocation5 + $0x394] sm:$0xf0] }
0x197e   :  { %5048 = vmatpush.bf16.msra.mxu3 %v6995_v54  ;;  %v6534_v54 = vld [vmem:[#allocation5 + $0x3e8] sm:$0xf] }
0x197f   :  { %5118 = vmatmul.bf16.vlgmr.msra.gmra.mxu0 %v8800_v38  ;;  %5131 = vmatmul.bf16.vlgmr.msra.gmra.mxu2 %v8802_v39 }
0x1980   :  { %5162 = vmatpush.bf16.msrb.mxu0 %v6155_v62  ;;  %5175 = vmatpush.bf16.msrb.mxu2 %v6283_v26  ;;  %v6960_v62 = vld [vmem:[#allocation5 + $0x750] sm:$0xf0]  ;;  %v7317_v26 = vld [vmem:[#allocation5 + $0x4c] sm:$0xf] }
0x1981   :  { %v4872_v17 = vpop.f32.mrf.mxu2  ;;  %5001 = vmatmul.bf16.vlgmr.msrb.gmra.mxu3 %v8786_v61  ;;  %5037 = vmatpush.bf16.msra.mxu1 %v6835_v46  ;;  %v6963_v32 = vor.u32 %v7540_v56, %v6960_v62  ;;  %v6075_v34 = vor.u32 %v7317_v26, %v6072_v35  ;;  %v6931_v46 = vor.u32 %v7532_v2, %v6928_v28  ;;  %v7395_v56 = vld [vmem:[#allocation5 + $0x2b4] sm:$0xf0]  ;;  %v7485_v28 = vld [vmem:[#allocation5 + $0x58c] sm:$0xf] }
0x1982   :  { %v4873_v10 = vadd.f32 %v4872_v17, %v4860_v48  ;;  %v4898_v53 = vpop.f32.mrf.mxu3  ;;  %5049 = vmatpush.bf16.msra.mxu3 %v6979_v41  ;;  %v7497_v41 = vld [vmem:[#allocation5 + $0x5ec] sm:$0xf]  ;;  %v6535_v48 = vor.u32 %v7435_v40, %v6534_v54  ;;  %v6667_v26 = vor.u32 %v7465_v37, %v6664_v59  ;;  %v6518_v17 = vld [vmem:[#allocation5 + $0x3c8] sm:$0xf]  ;;  %v7431_v35 = vld [vmem:[#allocation5 + $0x3d4] sm:$0xf0]  ;;  %v6487_v40 = vor.u32 %v7423_v7, %v6486_v33 }
0x1983   :  { %v4861_v25 = vpop.f32.mrf.mxu0  ;;  %v6795_v5 = vor.u32 %v7497_v41, %v6792_v42  ;;  %v6744_v54 = vld [vmem:[#allocation5 + $0x598] sm:$0xf0]  ;;  %v7449_v37 = vld [vmem:[#allocation5 + $0x46c] sm:$0xf]  ;;  %v7527_v33 = vld [vmem:[#allocation5 + $0x6d4] sm:$0xf0] }
0x1984   :  { %5163 = vmatpush.bf16.msrb.mxu0 %v6139_v9  ;;  %5176 = vmatpush.bf16.msrb.mxu2 %v6267_v18  ;;  %v6800_v9 = vld [vmem:[#allocation5 + $0x610] sm:$0xf0]  ;;  %v6406_v18 = vld [vmem:[#allocation5 + $0x2e8] sm:$0xf]  ;;  %v4886_v0 = vadd.f32 %v4885_v49, %v4873_v10  ;;  %v4887_v4 = vpop.f32.mrf.mxu1  ;;  %v7309_v49 = vld [vmem:[#allocation5 + $0xc] sm:$0xf]  ;;  %v6519_v25 = vor.u32 %v7431_v35, %v6518_v17 }
0x1985   :  { %5038 = vmatpush.bf16.msra.mxu1 %v6819_v55  ;;  %v6803_v1 = vor.u32 %v7500_v13, %v6800_v9  ;;  %v6407_v19 = vor.u32 %v7403_v21, %v6406_v18  ;;  %v6648_v10 = vld [vmem:[#allocation5 + $0x4d8] sm:$0xf0]  ;;  %v7493_v55 = vld [vmem:[#allocation5 + $0x5cc] sm:$0xf]  ;;  %v7391_v9 = vld [vmem:[#allocation5 + $0x294] sm:$0xf0] }
0x1986   :  { %5050 = vmatpush.bf16.msra.mxu3 %v6963_v32  ;;  %v6776_v13 = vld [vmem:[#allocation5 + $0x5d8] sm:$0xf0]  ;;  %v6358_v32 = vld [vmem:[#allocation5 + $0x288] sm:$0xf]  ;;  %v6651_v21 = vor.u32 %v7461_v52, %v6648_v10  ;;  %v7427_v4 = vld [vmem:[#allocation5 + $0x3b4] sm:$0xf0] }
0x1987   :  { %v6359_v12 = vor.u32 %v7391_v9, %v6358_v32  ;;  %v6600_v59 = vld [vmem:[#allocation5 + $0x478] sm:$0xf0]  ;;  %v7445_v17 = vld [vmem:[#allocation5 + $0x44c] sm:$0xf] }
0x1988   :  { %5164 = vmatpush.bf16.msrb.mxu0 %v6123_v16  ;;  %5177 = vmatpush.bf16.msrb.mxu2 %v6251_v22  ;;  %v6184_v16 = vld [vmem:[#allocation5 + $0x138] sm:$0xf0]  ;;  %v4899_v22 = vadd.f32 %v4898_v53, %v4886_v0  ;;  %v6502_v0 = vld [vmem:[#allocation5 + $0x3a8] sm:$0xf]  ;;  %v7477_v52 = vld [vmem:[#allocation5 + $0x54c] sm:$0xf] }
0x1989   :  { %v6187_v43 = vor.u32 %v7345_v15, %v6184_v16  ;;  %v4874_v24 = vpop.f32.mrf.mxu2  ;;  %5039 = vmatpush.bf16.msra.mxu1 %v6803_v1  ;;  %v7489_v15 = vld [vmem:[#allocation5 + $0x5ac] sm:$0xf]  ;;  %v6760_v16 = vld [vmem:[#allocation5 + $0x5b8] sm:$0xf0]  ;;  %v6342_v1 = vld [vmem:[#allocation5 + $0x268] sm:$0xf] }
0x198a   :  { %v4900_v27 = vpop.f32.mrf.mxu3  ;;  %5051 = vmatpush.bf16.msra.mxu3 %v6947_v23  ;;  %v6635_v23 = vor.u32 %v7457_v6, %v6632_v11  ;;  %v6763_v2 = vor.u32 %v7489_v15, %v6760_v16  ;;  %v6326_v24 = vld [vmem:[#allocation5 + $0x248] sm:$0xf]  ;;  %v6584_v35 = vld [vmem:[#allocation5 + $0x458] sm:$0xf0]  ;;  %v7441_v6 = vld [vmem:[#allocation5 + $0x42c] sm:$0xf] }
0x198b   :  { %v4911_v36 = vpop.f32.mrf.mxu0  ;;  %v7419_v27 = vld [vmem:[#allocation5 + $0x374] sm:$0xf0]  ;;  %v6712_v10 = vld [vmem:[#allocation5 + $0x558] sm:$0xf0]  ;;  %v6587_v9 = vor.u32 %v7445_v17, %v6584_v35  ;;  %v7473_v15 = vld [vmem:[#allocation5 + $0x52c] sm:$0xf] }
0x198c   :  { %5165 = vmatpush.bf16.msrb.mxu0 %v6107_v20  ;;  %5178 = vmatpush.bf16.msrb.mxu2 %v6235_v30  ;;  %v6040_v20 = vld [vmem:[#allocation5 + $0x18] sm:$0xf0]  ;;  %v7341_v30 = vld [vmem:[#allocation5 + $0x10c] sm:$0xf]  ;;  %v4912_v47 = vadd.f32 %v4911_v36, %v4899_v22  ;;  %v6503_v22 = vor.u32 %v7427_v4, %v6502_v0  ;;  %v7411_v0 = vld [vmem:[#allocation5 + $0x334] sm:$0xf0] }
0x198d   :  { %5084 = vmatpush.bf16.msrb.mxu1 %v6407_v19  ;;  %v6171_v62 = vor.u32 %v7341_v30, %v6168_v44  ;;  %v7387_v19 = vld [vmem:[#allocation5 + $0x274] sm:$0xf0]  ;;  %v6470_v30 = vld [vmem:[#allocation5 + $0x368] sm:$0xf]  ;;  %v6747_v44 = vor.u32 %v7485_v28, %v6744_v54  ;;  %v6568_v11 = vld [vmem:[#allocation5 + $0x438] sm:$0xf0] }
0x198e   :  { %5040 = vmatmul.bf16.vlgmr.msra.gmra.mxu1 %v8843_v8  ;;  %5052 = vmatpush.bf16.msra.mxu3 %v6931_v46  ;;  %v6728_v46 = vld [vmem:[#allocation5 + $0x578] sm:$0xf0]  ;;  %v6471_v42 = vor.u32 %v7419_v27, %v6470_v30  ;;  %v6571_v7 = vor.u32 %v7441_v6, %v6568_v11  ;;  %v7563_v28 = vld [vmem:[#allocation5 + $0x7f4] sm:$0xf0]  ;;  %v7437_v54 = vld [vmem:[#allocation5 + $0x40c] sm:$0xf] }
0x198f   :  { %v6696_v16 = vld [vmem:[#allocation5 + $0x538] sm:$0xf0]  ;;  %v7515_v17 = vld [vmem:[#allocation5 + $0x674] sm:$0xf0]  ;;  %v7110_v35 = vld [vmem:[%s9114_s16 + $0x70] sm:$0xf] }
0x1990   :  { %5166 = vmatpush.bf16.msrb.mxu0 %v6091_v51  ;;  %5179 = vmatpush.bf16.msrb.mxu2 %v6219_v50  ;;  %v6043_v51 = vor.u32 %v7309_v49, %v6040_v20  ;;  %v6374_v50 = vld [vmem:[#allocation5 + $0x2a8] sm:$0xf]  ;;  %v7507_v11 = vld [vmem:[#allocation5 + $0x634] sm:$0xf0] }
0x1991   :  { %5085 = vmatpush.bf16.msrb.mxu1 %v6391_v3  ;;  %v6375_v53 = vor.u32 %v7395_v56, %v6374_v50  ;;  %v4924_v18 = vpop.f32.mrf.mxu2  ;;  %5053 = vmatmul.bf16.vlgmr.msra.gmra.mxu3 %v8847_v31  ;;  %v7481_v3 = vld [vmem:[#allocation5 + $0x56c] sm:$0xf]  ;;  %v6603_v50 = vor.u32 %v7449_v37, %v6600_v59  ;;  %v6454_v56 = vld [vmem:[#allocation5 + $0x348] sm:$0xf]  ;;  %v7523_v37 = vld [vmem:[#allocation5 + $0x6b4] sm:$0xf0] }
0x1992   :  { %5097 = vmatpush.bf16.msrb.mxu3 %v6535_v48  ;;  %v7379_v48 = vld [vmem:[#allocation5 + $0x234] sm:$0xf0] }
0x1993   :  { %v4913_v14 = vpop.f32.mrf.mxu0 }
0x1994   :  { %5167 = vmatpush.bf16.msrb.mxu0 %v6075_v34  ;;  %5180 = vmatpush.bf16.msrb.mxu2 %v6203_v29  ;;  %v8859_v34 = vadd.f32 %v4924_v18, %v4912_v47  ;;  %v6779_v29 = vor.u32 %v7493_v55, %v6776_v13  ;;  %v6310_v47 = vld [vmem:[#allocation5 + $0x228] sm:$0xf]  ;;  %v7375_v13 = vld [vmem:[#allocation5 + $0x214] sm:$0xf0] }
0x1995   :  { %5086 = vmatpush.bf16.msrb.mxu1 %v6375_v53  ;;  %v6294_v55 = vld [vmem:[#allocation5 + $0x208] sm:$0xf]  ;;  %v7531_v18 = vld [vmem:[#allocation5 + $0x6f4] sm:$0xf0] }
0x1996   :  { %5098 = vmatpush.bf16.msrb.mxu3 %v6519_v25  ;;  %v6918_v25 = vld [vmem:[#allocation5 + $0x6e8] sm:$0xf] }
0x1998   :  { %5168 = vmatpush.bf16.msrb.mxu0 %v6059_v63  ;;  %5181 = vmatpush.bf16.msrb.mxu2 %v6187_v43  ;;  %v7453_v63 = vld [vmem:[#allocation5 + $0x48c] sm:$0xf]  ;;  %v6616_v43 = vld [vmem:[#allocation5 + $0x498] sm:$0xf0] }
0x1999   :  { %5087 = vmatpush.bf16.msrb.mxu1 %v6359_v12  ;;  %v4926_v49 = vpop.f32.mrf.mxu2  ;;  %v6619_v20 = vor.u32 %v7453_v63, %v6616_v43  ;;  %v6295_v12 = vor.u32 %v7375_v13, %v6294_v55  ;;  %v7407_v63 = vld [vmem:[#allocation5 + $0x314] sm:$0xf0]  ;;  %v7046_v43 = vld [vmem:[#allocation5 + $0x7e8] sm:$0xf] }
0x199a   :  { %5099 = vmatpush.bf16.msrb.mxu3 %v6503_v22  ;;  %v7047_v30 = vor.u32 %v7563_v28, %v7046_v43  ;;  %v6838_v13 = vld [vmem:[#allocation5 + $0x648] sm:$0xf]  ;;  %v7086_v43 = vld [vmem:[%s9114_s16 + $0x40] sm:$0xf]  ;;  %v7539_v28 = vld [vmem:[#allocation5 + $0x734] sm:$0xf0] }
0x199c   :  { %5169 = vmatpush.bf16.msrb.mxu0 %v6043_v51  ;;  %5182 = vmatpush.bf16.msrb.mxu2 %v6171_v62  ;;  %v4963_v41 = vpop.f32.mrf.mxu0  ;;  %v3563_v51 = vperm.slane %v8853_v60, 1  ;;  %v7415_v62 = vld [vmem:[#allocation5 + $0x354] sm:$0xf0] }
0x199d   :  { %v6455_v53 = vor.u32 %v7415_v62, %v6454_v56  ;;  %v6854_v62 = vld [vmem:[#allocation5 + $0x668] sm:$0xf] }
0x199e   :  { %5100 = vmatpush.bf16.msrb.mxu3 %v6487_v40  ;;  %v4964_v32 = vadd.f32 %v4963_v41, %v3563_v51  ;;  %v6552_v40 = vld [vmem:[#allocation5 + $0x418] sm:$0xf0]  ;;  %v7014_v51 = vld [vmem:[#allocation5 + $0x7a8] sm:$0xf]  ;;  %v6855_v55 = vor.u32 %v7515_v17, %v6854_v62  ;;  %v7070_v62 = vld [vmem:[%s9114_s16 + $0x20] sm:$0xf] }
0x199f   :  { %5170 = vmatmul.bf16.vlgmr.msrb.gmra.mxu0 %v8779_v58  ;;  %5183 = vmatmul.bf16.vlgmr.msrb.gmra.mxu2 %v8781_v45  ;;  %v6343_v58 = vor.u32 %v7387_v19, %v6342_v1  ;;  %v7383_v45 = vld [vmem:[#allocation5 + $0x254] sm:$0xf0]  ;;  %v6919_v1 = vor.u32 %v7531_v18, %v6918_v25  ;;  %v6555_v27 = vor.u32 %v7437_v54, %v6552_v40  ;;  %v7573_v54 = vld [vmem:[%s9114_s16 + $0x44] sm:$0xf0] }
0x19a0   :  { %5214 = vmatpush.bf16.msra.mxu0 %v6667_v26  ;;  %5227 = vmatpush.bf16.msra.mxu2 %v6795_v5  ;;  %v6327_v36 = vor.u32 %v7383_v45, %v6326_v24  ;;  %v6731_v26 = vor.u32 %v7481_v3, %v6728_v46  ;;  %v6311_v5 = vor.u32 %v7379_v48, %v6310_v47  ;;  %v7469_v24 = vld [vmem:[#allocation5 + $0x50c] sm:$0xf]  ;;  %v6680_v45 = vld [vmem:[#allocation5 + $0x518] sm:$0xf0]  ;;  %v7030_v3 = vld [vmem:[#allocation5 + $0x7c8] sm:$0xf] }
0x19a1   :  { %5088 = vmatpush.bf16.msrb.mxu1 %v6343_v58  ;;  %v6699_v58 = vor.u32 %v7473_v15, %v6696_v16  ;;  %v7559_v46 = vld [vmem:[#allocation5 + $0x7d4] sm:$0xf0]  ;;  %v6870_v47 = vld [vmem:[#allocation5 + $0x688] sm:$0xf] }
0x19a2   :  { %5101 = vmatpush.bf16.msrb.mxu3 %v6471_v42  ;;  %v4976_v4 = vpop.f32.mrf.mxu2  ;;  %v7031_v42 = vor.u32 %v7559_v46, %v7030_v3  ;;  %v7519_v48 = vld [vmem:[#allocation5 + $0x694] sm:$0xf0]  ;;  %v6966_v16 = vld [vmem:[#allocation5 + $0x748] sm:$0xf]  ;;  %v7433_v46 = vld [vmem:[#allocation5 + $0x3ec] sm:$0xf] }
0x19a3   :  { %v8865_v14 = vadd.f32 %v4976_v4, %v4964_v32  ;;  %v6871_v56 = vor.u32 %v7519_v48, %v6870_v47  ;;  %v7511_v25 = vld [vmem:[#allocation5 + $0x654] sm:$0xf0]  ;;  %v7577_v32 = vld [vmem:[%s9114_s16 + $0x64] sm:$0xf0] }
0x19a4   :  { %5215 = vmatpush.bf16.msra.mxu0 %v6651_v21  ;;  %5228 = vmatpush.bf16.msra.mxu2 %v6779_v29  ;;  %v6438_v21 = vld [vmem:[#allocation5 + $0x328] sm:$0xf]  ;;  %v6715_v29 = vor.u32 %v7477_v52, %v6712_v10  ;;  %v4965_v22 = vpop.f32.mrf.mxu0  ;;  %v7551_v10 = vld [vmem:[#allocation5 + $0x794] sm:$0xf0] }
0x19a5   :  { %5089 = vmatpush.bf16.msrb.mxu1 %v6327_v36  ;;  %v6439_v19 = vor.u32 %v7411_v0, %v6438_v21  ;;  %v6683_v36 = vor.u32 %v7469_v24, %v6680_v45  ;;  %v6998_v52 = vld [vmem:[#allocation5 + $0x788] sm:$0xf]  ;;  %v7547_v18 = vld [vmem:[#allocation5 + $0x774] sm:$0xf0]  ;;  %v6839_v0 = vor.u32 %v7511_v25, %v6838_v13  ;;  %v7087_v24 = vor.u32 %v7573_v54, %v7086_v43  ;;  %v6360_v13 = vld [vmem:[#allocation5 + $0x298] sm:$0xf0] }
0x19a6   :  { %5102 = vmatpush.bf16.msrb.mxu3 %v6455_v53  ;;  %v6822_v4 = vld [vmem:[#allocation5 + $0x628] sm:$0xf]  ;;  %v7575_v15 = vld [vmem:[%s9114_s16 + $0x54] sm:$0xf0]  ;;  %v6472_v54 = vld [vmem:[#allocation5 + $0x378] sm:$0xf0] }
0x19a7   :  { %v7543_v22 = vld [vmem:[#allocation5 + $0x754] sm:$0xf0] }
0x19a8   :  { %5216 = vmatpush.bf16.msra.mxu0 %v6635_v23  ;;  %5229 = vmatpush.bf16.msra.mxu2 %v6763_v2  ;;  %v6902_v23 = vld [vmem:[#allocation5 + $0x6c8] sm:$0xf]  ;;  %v7571_v3 = vld [vmem:[%s9114_s16 + $0x34] sm:$0xf0] }
0x19a9   :  { %5090 = vmatpush.bf16.msrb.mxu1 %v6311_v5  ;;  %v6422_v2 = vld [vmem:[#allocation5 + $0x308] sm:$0xf]  ;;  %v6903_v49 = vor.u32 %v7527_v33, %v6902_v23  ;;  %v7579_v5 = vld [vmem:[%s9114_s16 + $0x74] sm:$0xf0] }
0x19aa   :  { %5103 = vmatpush.bf16.msrb.mxu3 %v6439_v19  ;;  %v4978_v59 = vpop.f32.mrf.mxu2  ;;  %v7111_v53 = vor.u32 %v7579_v5, %v7110_v35  ;;  %v6823_v19 = vor.u32 %v7507_v11, %v6822_v4  ;;  %v6806_v23 = vld [vmem:[#allocation5 + $0x608] sm:$0xf]  ;;  %v7503_v33 = vld [vmem:[#allocation5 + $0x614] sm:$0xf0]  ;;  %v7429_v35 = vld [vmem:[#allocation5 + $0x3cc] sm:$0xf] }
0x19ab   :  { %v6807_v45 = vor.u32 %v7503_v33, %v6806_v23  ;;  %v7535_v59 = vld [vmem:[#allocation5 + $0x714] sm:$0xf0]  ;;  %v6520_v5 = vld [vmem:[#allocation5 + $0x3d8] sm:$0xf0]  ;;  %v7565_v11 = vld [vmem:[%s9114_s16 + $0x4] sm:$0xf0] }
0x19ac   :  { %5217 = vmatpush.bf16.msra.mxu0 %v6619_v20  ;;  %5230 = vmatpush.bf16.msra.mxu2 %v6747_v44  ;;  %v6423_v20 = vor.u32 %v7407_v63, %v6422_v2  ;;  %v6886_v44 = vld [vmem:[#allocation5 + $0x6a8] sm:$0xf]  ;;  %v7401_v2 = vld [vmem:[#allocation5 + $0x2ec] sm:$0xf]  ;;  %v6408_v63 = vld [vmem:[#allocation5 + $0x2f8] sm:$0xf0] }
0x19ad   :  { %5091 = vmatpush.bf16.msrb.mxu1 %v6295_v12  ;;  %v6887_v41 = vor.u32 %v7523_v37, %v6886_v44  ;;  %v7094_v12 = vld [vmem:[%s9114_s16 + $0x50] sm:$0xf]  ;;  %v6392_v44 = vld [vmem:[#allocation5 + $0x2d8] sm:$0xf0]  ;;  %v6934_v37 = vld [vmem:[#allocation5 + $0x708] sm:$0xf] }
0x19ae   :  { %5104 = vmatpush.bf16.msrb.mxu3 %v6423_v20  ;;  %v6411_v20 = vor.u32 %v7401_v2, %v6408_v63  ;;  %v6935_v48 = vor.u32 %v7535_v59, %v6934_v37  ;;  %v7567_v25 = vld [vmem:[%s9114_s16 + $0x14] sm:$0xf0]  ;;  %v7381_v33 = vld [vmem:[#allocation5 + $0x24c] sm:$0xf]  ;;  %v7174_v63 = vld [vmem:[%s9114_s16 + $0xf0] sm:$0xf] }
0x19af   :  { %v7595_v43 = vld [vmem:[%s9114_s16 + $0xf4] sm:$0xf0]  ;;  %v6312_v37 = vld [vmem:[#allocation5 + $0x238] sm:$0xf0]  ;;  %v7166_v59 = vld [vmem:[%s9114_s16 + $0xe0] sm:$0xf] }
0x19b0   :  { %5218 = vmatpush.bf16.msra.mxu0 %v6603_v50  ;;  %5231 = vmatpush.bf16.msra.mxu2 %v6731_v26  ;;  %v7555_v50 = vld [vmem:[#allocation5 + $0x7b4] sm:$0xf0] }
0x19b1   :  { %5136 = vmatpush.bf16.msra.mxu1 %v6919_v1  ;;  %5105 = vmatmul.bf16.vlgmr.msrb.gmra.mxu3 %v8786_v61  ;;  %v7015_v26 = vor.u32 %v7555_v50, %v7014_v51  ;;  %v7095_v1 = vor.u32 %v7575_v15, %v7094_v12  ;;  %v7393_v51 = vld [vmem:[#allocation5 + $0x2ac] sm:$0xf]  ;;  %v7578_v12 = vld [vmem:[%s9114_s16 + $0x74] sm:$0xf] }
0x19b2   :  { %5092 = vmatmul.bf16.vlgmr.msrb.gmra.mxu1 %v8783_v57  ;;  %5149 = vmatpush.bf16.msra.mxu3 %v7047_v30  ;;  %v7421_v15 = vld [vmem:[#allocation5 + $0x38c] sm:$0xf] }
0x19b4   :  { %5219 = vmatpush.bf16.msra.mxu0 %v6587_v9  ;;  %5232 = vmatpush.bf16.msra.mxu2 %v6715_v29  ;;  %v6982_v9 = vld [vmem:[#allocation5 + $0x768] sm:$0xf] }
0x19b5   :  { %5137 = vmatpush.bf16.msra.mxu1 %v6903_v49  ;;  %v6983_v6 = vor.u32 %v7547_v18, %v6982_v9 }
0x19b6   :  { %5150 = vmatpush.bf16.msra.mxu3 %v7031_v42 }
0x19b8   :  { %5220 = vmatpush.bf16.msra.mxu0 %v6571_v7  ;;  %5233 = vmatpush.bf16.msra.mxu2 %v6699_v58  ;;  %v6967_v7 = vor.u32 %v7543_v22, %v6966_v16  ;;  %v6950_v58 = vld [vmem:[#allocation5 + $0x728] sm:$0xf]  ;;  %v6488_v16 = vld [vmem:[#allocation5 + $0x398] sm:$0xf0] }
0x19b9   :  { %5138 = vmatpush.bf16.msra.mxu1 %v6887_v41  ;;  %v6951_v30 = vor.u32 %v7539_v28, %v6950_v58  ;;  %v6536_v41 = vld [vmem:[#allocation5 + $0x3f8] sm:$0xf0]  ;;  %v6491_v2 = vor.u32 %v7421_v15, %v6488_v16  ;;  %v7576_v58 = vld [vmem:[%s9114_s16 + $0x64] sm:$0xf]  ;;  %v7417_v28 = vld [vmem:[#allocation5 + $0x36c] sm:$0xf] }
0x19ba   :  { %5151 = vmatpush.bf16.msra.mxu3 %v7015_v26  ;;  %v6539_v50 = vor.u32 %v7433_v46, %v6536_v41  ;;  %v7569_v26 = vld [vmem:[%s9114_s16 + $0x24] sm:$0xf0]  ;;  %v7413_v46 = vld [vmem:[#allocation5 + $0x34c] sm:$0xf]  ;;  %v6456_v41 = vld [vmem:[#allocation5 + $0x358] sm:$0xf0] }
0x19bb   :  { %v7570_v15 = vld [vmem:[%s9114_s16 + $0x34] sm:$0xf]  ;;  %v7405_v16 = vld [vmem:[#allocation5 + $0x30c] sm:$0xf] }
0x19bc   :  { %5221 = vmatpush.bf16.msra.mxu0 %v6555_v27  ;;  %5234 = vmatpush.bf16.msra.mxu2 %v6683_v36  ;;  %v8875_v29 = vpop.f32.mrf.mxu0  ;;  %v7397_v27 = vld [vmem:[#allocation5 + $0x2cc] sm:$0xf]  ;;  %v7078_v36 = vld [vmem:[%s9114_s16 + $0x30] sm:$0xf] }
0x19bd   :  { %5139 = vmatpush.bf16.msra.mxu1 %v6871_v56  ;;  %v7079_v42 = vor.u32 %v7571_v3, %v7078_v36  ;;  %v6395_v47 = vor.u32 %v7397_v27, %v6392_v44  ;;  %v6376_v56 = vld [vmem:[#allocation5 + $0x2b8] sm:$0xf0]  ;;  %v6475_v44 = vor.u32 %v7417_v28, %v6472_v54  ;;  %v7593_v36 = vld [vmem:[%s9114_s16 + $0xe4] sm:$0xf0]  ;;  %v3564_v3 = vperm.slane %v8853_v60, 2 }
0x19be   :  { %v7409_v60 = vld [vmem:[#allocation5 + $0x32c] sm:$0xf]  ;;  %v7568_v28 = vld [vmem:[%s9114_s16 + $0x24] sm:$0xf] }
0x19bf   :  { %5222 = vmatmul.bf16.vlgmr.msra.gmra.mxu0 %v8800_v38  ;;  %5235 = vmatmul.bf16.vlgmr.msra.gmra.mxu2 %v8802_v39  ;;  %v6999_v38 = vor.u32 %v7551_v10, %v6998_v52  ;;  %v7102_v39 = vld [vmem:[%s9114_s16 + $0x60] sm:$0xf]  ;;  %v7071_v52 = vor.u32 %v7569_v26, %v7070_v62  ;;  %v6379_v10 = vor.u32 %v7393_v51, %v6376_v56  ;;  %v7574_v56 = vld [vmem:[%s9114_s16 + $0x54] sm:$0xf]  ;;  %v7096_v62 = vld [vmem:[%s9114_s16 + $0x58] sm:$0xf0] }
0x19c0   :  { %5664 = vmatpush.bf16.msrb.mxu0 %v7111_v53  ;;  %v7103_v21 = vor.u32 %v7577_v32, %v7102_v39  ;;  %v7389_v53 = vld [vmem:[#allocation5 + $0x28c] sm:$0xf]  ;;  %v6504_v32 = vld [vmem:[#allocation5 + $0x3b8] sm:$0xf0]  ;;  %v6459_v26 = vor.u32 %v7413_v46, %v6456_v41 }
0x19c1   :  { %5140 = vmatpush.bf16.msra.mxu1 %v6855_v55  ;;  %5152 = vmatpush.bf16.msra.mxu3 %v6999_v38  ;;  %v6523_v55 = vor.u32 %v7429_v35, %v6520_v5  ;;  %v7062_v38 = vld [vmem:[%s9114_s16 + $0x10] sm:$0xf]  ;;  %v7425_v39 = vld [vmem:[#allocation5 + $0x3ac] sm:$0xf]  ;;  %v6363_v18 = vor.u32 %v7389_v53, %v6360_v13  ;;  %v6440_v35 = vld [vmem:[#allocation5 + $0x338] sm:$0xf0]  ;;  %v7099_v5 = vor.u32 %v7574_v56, %v7096_v62 }
0x19c2   :  { %v8881_v40 = vpop.f32.mrf.mxu2  ;;  %v7063_v9 = vor.u32 %v7567_v25, %v7062_v38  ;;  %v6507_v4 = vor.u32 %v7425_v39, %v6504_v32  ;;  %v7591_v53 = vld [vmem:[%s9114_s16 + $0xd4] sm:$0xf0]  ;;  %v7088_v25 = vld [vmem:[%s9114_s16 + $0x48] sm:$0xf0]  ;;  %v6872_v41 = vld [vmem:[#allocation5 + $0x698] sm:$0xf0] }
0x19c3   :  { %v7072_v54 = vld [vmem:[%s9114_s16 + $0x28] sm:$0xf0]  ;;  %v7126_v62 = vld [vmem:[%s9114_s16 + $0x90] sm:$0xf] }
0x19c4   :  { %5665 = vmatpush.bf16.msrb.mxu0 %v7103_v21  ;;  %v5017_v49 = vpop.f32.mrf.mxu0  ;;  %v7385_v21 = vld [vmem:[#allocation5 + $0x26c] sm:$0xf] }
0x19c5   :  { %5141 = vmatpush.bf16.msra.mxu1 %v6839_v0  ;;  %5153 = vmatpush.bf16.msra.mxu3 %v6983_v6  ;;  %v6344_v0 = vld [vmem:[#allocation5 + $0x278] sm:$0xf0]  ;;  %v7054_v6 = vld [vmem:[%s9114_s16] sm:$0xf]  ;;  %v7517_v46 = vld [vmem:[#allocation5 + $0x68c] sm:$0xf] }
0x19c6   :  { %v7055_v22 = vor.u32 %v7565_v11, %v7054_v6  ;;  %v6347_v23 = vor.u32 %v7385_v21, %v6344_v0  ;;  %v6443_v6 = vor.u32 %v7409_v60, %v6440_v35  ;;  %v7150_v11 = vld [vmem:[%s9114_s16 + $0xc0] sm:$0xf]  ;;  %v6875_v60 = vor.u32 %v7517_v46, %v6872_v41  ;;  %v7513_v35 = vld [vmem:[#allocation5 + $0x66c] sm:$0xf]  ;;  %v7590_v41 = vld [vmem:[%s9114_s16 + $0xd4] sm:$0xf] }
0x19c8   :  { %5666 = vmatpush.bf16.msrb.mxu0 %v7095_v1  ;;  %v7112_v1 = vld [vmem:[%s9114_s16 + $0x78] sm:$0xf0] }
0x19c9   :  { %5142 = vmatpush.bf16.msra.mxu1 %v6823_v19  ;;  %5154 = vmatpush.bf16.msra.mxu3 %v6967_v7  ;;  %v7115_v19 = vor.u32 %v7578_v12, %v7112_v1  ;;  %v6328_v7 = vld [vmem:[#allocation5 + $0x258] sm:$0xf0]  ;;  %v7589_v12 = vld [vmem:[%s9114_s16 + $0xc4] sm:$0xf0] }
0x19ca   :  { %v5030_v17 = vpop.f32.mrf.mxu2  ;;  %v7151_v1 = vor.u32 %v7589_v12, %v7150_v11  ;;  %v7545_v12 = vld [vmem:[#allocation5 + $0x76c] sm:$0xf] }
0x19cb   :  { %v6920_v17 = vld [vmem:[#allocation5 + $0x6f8] sm:$0xf0] }
0x19cc   :  { %5667 = vmatpush.bf16.msrb.mxu0 %v7087_v24  ;;  %v7175_v24 = vor.u32 %v7595_v43, %v7174_v63  ;;  %v7587_v63 = vld [vmem:[%s9114_s16 + $0xb4] sm:$0xf0] }
0x19cd   :  { %5143 = vmatpush.bf16.msra.mxu1 %v6807_v45  ;;  %5155 = vmatpush.bf16.msra.mxu3 %v6951_v30  ;;  %v7104_v45 = vld [vmem:[%s9114_s16 + $0x68] sm:$0xf0] }
0x19ce   :  { %v7107_v49 = vor.u32 %v7576_v58, %v7104_v45  ;;  %v7377_v30 = vld [vmem:[#allocation5 + $0x22c] sm:$0xf]  ;;  %5677 = vmatpush.bf16.msrb.mxu2 %v7175_v24 }
0x19cf   :  { %v6315_v51 = vor.u32 %v7377_v30, %v6312_v37  ;;  %v7521_v45 = vld [vmem:[#allocation5 + $0x6ac] sm:$0xf]  ;;  %v7075_v37 = vor.u32 %v7568_v28, %v7072_v54  ;;  %v6968_v54 = vld [vmem:[#allocation5 + $0x758] sm:$0xf0] }
0x19d0   :  { %5668 = vmatpush.bf16.msrb.mxu0 %v7079_v42  ;;  %5144 = vmatmul.bf16.vlgmr.msra.gmra.mxu1 %v8843_v8  ;;  %v7167_v42 = vor.u32 %v7593_v36, %v7166_v59  ;;  %v7134_v59 = vld [vmem:[%s9114_s16 + $0xa0] sm:$0xf]  ;;  %v7585_v36 = vld [vmem:[%s9114_s16 + $0xa4] sm:$0xf0]  ;;  %v7541_v28 = vld [vmem:[#allocation5 + $0x74c] sm:$0xf] }
0x19d1   :  { %5188 = vmatpush.bf16.msrb.mxu1 %v6411_v20  ;;  %5156 = vmatpush.bf16.msra.mxu3 %v6935_v48  ;;  %v6331_v20 = vor.u32 %v7381_v33, %v6328_v7  ;;  %v6296_v48 = vld [vmem:[#allocation5 + $0x218] sm:$0xf0] }
0x19d2   :  { %5678 = vmatpush.bf16.msrb.mxu2 %v7167_v42  ;;  %v7048_v33 = vld [vmem:[#allocation5 + $0x7f8] sm:$0xf0] }
0x19d4   :  { %5669 = vmatpush.bf16.msrb.mxu0 %v7071_v52  ;;  %5157 = vmatmul.bf16.vlgmr.msra.gmra.mxu3 %v8847_v31 }
0x19d5   :  { %5189 = vmatpush.bf16.msrb.mxu1 %v6395_v47  ;;  %5201 = vmatpush.bf16.msrb.mxu3 %v6539_v50  ;;  %v7373_v47 = vld [vmem:[#allocation5 + $0x20c] sm:$0xf] }
0x19d6   :  { %v7529_v50 = vld [vmem:[#allocation5 + $0x6ec] sm:$0xf]  ;;  %v6299_v32 = vor.u32 %v7373_v47, %v6296_v48  ;;  %v7566_v48 = vld [vmem:[%s9114_s16 + $0x14] sm:$0xf] }
0x19d7   :  { %v7553_v47 = vld [vmem:[#allocation5 + $0x7ac] sm:$0xf] }
0x19d8   :  { %5670 = vmatpush.bf16.msrb.mxu0 %v7063_v9  ;;  %v7525_v9 = vld [vmem:[#allocation5 + $0x6cc] sm:$0xf] }
0x19d9   :  { %5190 = vmatpush.bf16.msrb.mxu1 %v6379_v10  ;;  %5202 = vmatpush.bf16.msrb.mxu3 %v6523_v55  ;;  %v7158_v10 = vld [vmem:[%s9114_s16 + $0xd0] sm:$0xf]  ;;  %v7572_v55 = vld [vmem:[%s9114_s16 + $0x44] sm:$0xf] }
0x19da   :  { %v7159_v38 = vor.u32 %v7591_v53, %v7158_v10  ;;  %v7091_v21 = vor.u32 %v7572_v55, %v7088_v25  ;;  %v7549_v10 = vld [vmem:[#allocation5 + $0x78c] sm:$0xf]  ;;  %v7564_v55 = vld [vmem:[%s9114_s16 + $0x4] sm:$0xf] }
0x19dc   :  { %5671 = vmatpush.bf16.msrb.mxu0 %v7055_v22  ;;  %v5067_v27 = vpop.f32.mrf.mxu0  ;;  %5679 = vmatpush.bf16.msrb.mxu2 %v7159_v38  ;;  %v6424_v22 = vld [vmem:[#allocation5 + $0x318] sm:$0xf0] }
0x19dd   :  { %5191 = vmatpush.bf16.msrb.mxu1 %v6363_v18  ;;  %5203 = vmatpush.bf16.msrb.mxu3 %v6507_v4  ;;  %v5068_v52 = vadd.f32 %v5067_v27, %v3564_v3  ;;  %v6904_v18 = vld [vmem:[#allocation5 + $0x6d8] sm:$0xf0]  ;;  %v6923_v4 = vor.u32 %v7529_v50, %v6920_v17  ;;  %v6427_v58 = vor.u32 %v7405_v16, %v6424_v22 }
0x19de   :  { %v6907_v43 = vor.u32 %v7525_v9, %v6904_v18  ;;  %v7016_v50 = vld [vmem:[#allocation5 + $0x7b8] sm:$0xf0]  ;;  %v7594_v9 = vld [vmem:[%s9114_s16 + $0xf4] sm:$0xf] }
0x19df   :  { %v7000_v38 = vld [vmem:[#allocation5 + $0x798] sm:$0xf0] }
0x19e0   :  { %5716 = vmatpush.bf16.msra.mxu0 %v7115_v19  ;;  %v7080_v19 = vld [vmem:[%s9114_s16 + $0x38] sm:$0xf0]  ;;  %5680 = vmatpush.bf16.msrb.mxu2 %v7151_v1 }
0x19e1   :  { %5192 = vmatpush.bf16.msrb.mxu1 %v6347_v23  ;;  %5204 = vmatpush.bf16.msrb.mxu3 %v6491_v2  ;;  %v7561_v23 = vld [vmem:[#allocation5 + $0x7ec] sm:$0xf]  ;;  %v7083_v7 = vor.u32 %v7570_v15, %v7080_v19  ;;  %v7142_v2 = vld [vmem:[%s9114_s16 + $0xb0] sm:$0xf]  ;;  %v7176_v18 = vld [vmem:[%s9114_s16 + $0xf8] sm:$0xf0] }
0x19e2   :  { %v5080_v13 = vpop.f32.mrf.mxu2  ;;  %v7051_v24 = vor.u32 %v7561_v23, %v7048_v33  ;;  %v7143_v30 = vor.u32 %v7587_v63, %v7142_v2  ;;  %v6984_v15 = vld [vmem:[#allocation5 + $0x778] sm:$0xf0]  ;;  %v7179_v16 = vor.u32 %v7594_v9, %v7176_v18  ;;  %v7592_v19 = vld [vmem:[%s9114_s16 + $0xe4] sm:$0xf]  ;;  %v7168_v23 = vld [vmem:[%s9114_s16 + $0xe8] sm:$0xf0] }
0x19e3   :  { %v8908_v39 = vadd.f32 %v5080_v13, %v5068_v52  ;;  %v7019_v52 = vor.u32 %v7553_v47, %v7016_v50  ;;  %v7056_v13 = vld [vmem:[%s9114_s16 + $0x8] sm:$0xf0]  ;;  %v6987_v2 = vor.u32 %v7545_v12, %v6984_v15  ;;  %v7588_v47 = vld [vmem:[%s9114_s16 + $0xc4] sm:$0xf]  ;;  %v7128_v9 = vld [vmem:[%s9114_s16 + $0x98] sm:$0xf0] }
0x19e4   :  { %5717 = vmatpush.bf16.msra.mxu0 %v7107_v49  ;;  %v5069_v0 = vpop.f32.mrf.mxu0  ;;  %v6888_v49 = vld [vmem:[#allocation5 + $0x6b8] sm:$0xf0]  ;;  %5681 = vmatpush.bf16.msrb.mxu2 %v7143_v30  ;;  %v7059_v25 = vor.u32 %v7564_v55, %v7056_v13  ;;  %v7505_v63 = vld [vmem:[#allocation5 + $0x62c] sm:$0xf]  ;;  %v7584_v55 = vld [vmem:[%s9114_s16 + $0xa4] sm:$0xf] }
0x19e5   :  { %5193 = vmatpush.bf16.msrb.mxu1 %v6331_v20  ;;  %5205 = vmatpush.bf16.msrb.mxu3 %v6475_v44  ;;  %v7557_v20 = vld [vmem:[#allocation5 + $0x7cc] sm:$0xf]  ;;  %v7032_v44 = vld [vmem:[#allocation5 + $0x7d8] sm:$0xf0]  ;;  %v6891_v3 = vor.u32 %v7521_v45, %v6888_v49  ;;  %v7003_v0 = vor.u32 %v7549_v10, %v7000_v38  ;;  %v7238_v18 = vld [vmem:[%s9114_s16 + $0x170] sm:$0xf] }
0x19e6   :  { %v7035_v42 = vor.u32 %v7557_v20, %v7032_v44  ;;  %v7501_v30 = vld [vmem:[#allocation5 + $0x60c] sm:$0xf] }
0x19e7   :  { %v7537_v44 = vld [vmem:[#allocation5 + $0x72c] sm:$0xf] }
0x19e8   :  { %5718 = vmatpush.bf16.msra.mxu0 %v7099_v5  ;;  %v4937_v17 = vpop.f32.mrf.mxu1  ;;  %v6856_v5 = vld [vmem:[#allocation5 + $0x678] sm:$0xf0]  ;;  %v7152_v50 = vld [vmem:[%s9114_s16 + $0xc8] sm:$0xf0] }
0x19e9   :  { %5194 = vmatpush.bf16.msrb.mxu1 %v6315_v51  ;;  %5206 = vmatpush.bf16.msrb.mxu3 %v6459_v26  ;;  %v7064_v51 = vld [vmem:[%s9114_s16 + $0x18] sm:$0xf0]  ;;  %v7583_v26 = vld [vmem:[%s9114_s16 + $0x94] sm:$0xf0]  ;;  %v4938_v33 = vadd.f32 %v4937_v17, %v8859_v34  ;;  %v6971_v34 = vor.u32 %v7541_v28, %v6968_v54  ;;  %v7155_v17 = vor.u32 %v7588_v47, %v7152_v50  ;;  %v7136_v13 = vld [vmem:[%s9114_s16 + $0xa8] sm:$0xf0] }
0x19ea   :  { %v5082_v27 = vpop.f32.mrf.mxu2  ;;  %v7067_v56 = vor.u32 %v7566_v48, %v7064_v51  ;;  %v7127_v53 = vor.u32 %v7583_v26, %v7126_v62  ;;  %v7533_v62 = vld [vmem:[#allocation5 + $0x70c] sm:$0xf]  ;;  %v6936_v26 = vld [vmem:[#allocation5 + $0x718] sm:$0xf0]  ;;  %v7607_v28 = vld [vmem:[%s9114_s16 + $0x154] sm:$0xf0] }
0x19eb   :  { %v6808_v27 = vld [vmem:[#allocation5 + $0x618] sm:$0xf0]  ;;  %v7120_v12 = vld [vmem:[%s9114_s16 + $0x88] sm:$0xf0]  ;;  %v7214_v54 = vld [vmem:[%s9114_s16 + $0x140] sm:$0xf] }
0x19ec   :  { %5719 = vmatpush.bf16.msra.mxu0 %v7091_v21  ;;  %v6859_v21 = vor.u32 %v7513_v35, %v6856_v5  ;;  %v6811_v46 = vor.u32 %v7501_v30, %v6808_v27  ;;  %v7586_v35 = vld [vmem:[%s9114_s16 + $0xb4] sm:$0xf]  ;;  %v7144_v5 = vld [vmem:[%s9114_s16 + $0xb8] sm:$0xf0]  ;;  %v7601_v47 = vld [vmem:[%s9114_s16 + $0x124] sm:$0xf0] }
0x19ed   :  { %5195 = vmatpush.bf16.msrb.mxu1 %v6299_v32  ;;  %5207 = vmatpush.bf16.msrb.mxu3 %v6443_v6  ;;  %v7581_v32 = vld [vmem:[%s9114_s16 + $0x84] sm:$0xf0]  ;;  %v6840_v6 = vld [vmem:[#allocation5 + $0x658] sm:$0xf0]  ;;  %v7147_v10 = vor.u32 %v7586_v35, %v7144_v5  ;;  %v7599_v50 = vld [vmem:[%s9114_s16 + $0x114] sm:$0xf0] }
0x19f0   :  { %5196 = vmatmul.bf16.vlgmr.msrb.gmra.mxu1 %v8783_v57  ;;  %5720 = vmatpush.bf16.msra.mxu0 %v7083_v7  ;;  %v7135_v57 = vor.u32 %v7585_v36, %v7134_v59  ;;  %v4939_v22 = vpop.f32.mrf.mxu1 }
0x19f1   :  { %5240 = vmatpush.bf16.msra.mxu1 %v6923_v4  ;;  %5208 = vmatpush.bf16.msrb.mxu3 %v6427_v58  ;;  %v7509_v4 = vld [vmem:[#allocation5 + $0x64c] sm:$0xf]  ;;  %v7609_v22 = vld [vmem:[%s9114_s16 + $0x164] sm:$0xf0] }
0x19f2   :  { %5682 = vmatpush.bf16.msrb.mxu2 %v7135_v57  ;;  %v6843_v1 = vor.u32 %v7509_v4, %v6840_v6 }
0x19f4   :  { %5721 = vmatpush.bf16.msra.mxu0 %v7075_v37  ;;  %5209 = vmatmul.bf16.vlgmr.msrb.gmra.mxu3 %v8786_v61  ;;  %v7118_v61 = vld [vmem:[%s9114_s16 + $0x80] sm:$0xf]  ;;  %v4950_v58 = vpop.f32.mrf.mxu3  ;;  %v6952_v37 = vld [vmem:[#allocation5 + $0x738] sm:$0xf0] }
0x19f5   :  { %5241 = vmatpush.bf16.msra.mxu1 %v6907_v43  ;;  %5253 = vmatpush.bf16.msra.mxu3 %v7051_v24  ;;  %v7119_v11 = vor.u32 %v7581_v32, %v7118_v61  ;;  %v6824_v43 = vld [vmem:[#allocation5 + $0x638] sm:$0xf0]  ;;  %v7171_v24 = vor.u32 %v7592_v19, %v7168_v23  ;;  %v4951_v45 = vadd.f32 %v4950_v58, %v4938_v33  ;;  %v7856_v33 = vld [vmem:[%s9113_s15] sm:$0xf]  ;;  %v7222_v58 = vld [vmem:[%s9114_s16 + $0x150] sm:$0xf] }
0x19f6   :  { %5683 = vmatpush.bf16.msrb.mxu2 %v7127_v53  ;;  %v6827_v49 = vor.u32 %v7505_v63, %v6824_v43  ;;  %v6955_v48 = vor.u32 %v7537_v44, %v6952_v37 }
0x19f7   :  { %v5266_v20 = vmax.f32 %v4951_v45, 0.0 }
0x19f8   :  { %5722 = vmatpush.bf16.msra.mxu0 %v7067_v56 }
0x19f9   :  { %5242 = vmatpush.bf16.msra.mxu1 %v6891_v3  ;;  %5254 = vmatpush.bf16.msra.mxu3 %v7035_v42  ;;  %v5270_v59 = vpack.c.bf16 %v5266_v20, %v5266_v20  ;;  %v4989_v3 = vpop.f32.mrf.mxu1  ;;  %v7160_v42 = vld [vmem:[%s9114_s16 + $0xd8] sm:$0xf0] }
0x19fa   :  { %5684 = vmatpush.bf16.msrb.mxu2 %v7119_v11  ;;  %v7163_v51 = vor.u32 %v7590_v41, %v7160_v42  ;;  %v4990_v61 = vadd.f32 %v4989_v3, %v8865_v14  ;;  %v7580_v11 = vld [vmem:[%s9114_s16 + $0x84] sm:$0xf]  ;;  %v7603_v3 = vld [vmem:[%s9114_s16 + $0x134] sm:$0xf0]  ;;  %v7198_v42 = vld [vmem:[%s9114_s16 + $0x120] sm:$0xf] }
0x19fb   :  { %5672 = vmatmul.bf16.vlgmr.msrb.gmra.mxu0 %v5270_v59 }
0x19fc   :  { %5723 = vmatpush.bf16.msra.mxu0 %v7059_v25  ;;  %v8935_v7 = vpop.f32.mrf.mxu0  ;;  %v4952_v56 = vpop.f32.mrf.mxu3  ;;  %v7139_v25 = vor.u32 %v7584_v55, %v7136_v13 }
0x19fd   :  { %5243 = vmatpush.bf16.msra.mxu1 %v6875_v60  ;;  %5255 = vmatpush.bf16.msra.mxu3 %v7019_v52  ;;  %v6939_v60 = vor.u32 %v7533_v62, %v6936_v26  ;;  %v7182_v62 = vld [vmem:[%s9114_s16 + $0x100] sm:$0xf]  ;;  %v7597_v26 = vld [vmem:[%s9114_s16 + $0x104] sm:$0xf0] }
0x19fe   :  { %5729 = vmatpush.bf16.msra.mxu2 %v7179_v16  ;;  %v7230_v16 = vld [vmem:[%s9114_s16 + $0x160] sm:$0xf]  ;;  %v7183_v5 = vor.u32 %v7597_v26, %v7182_v62  ;;  %v7617_v62 = vld [vmem:[%s9114_s16 + $0x1a4] sm:$0xf0] }
0x19ff   :  { %v7231_v23 = vor.u32 %v7609_v22, %v7230_v16 }
0x1a01   :  { %5244 = vmatpush.bf16.msra.mxu1 %v6859_v21  ;;  %5256 = vmatpush.bf16.msra.mxu3 %v7003_v0  ;;  %v4991_v53 = vpop.f32.mrf.mxu1  ;;  %v7611_v0 = vld [vmem:[%s9114_s16 + $0x174] sm:$0xf0] }
0x1a02   :  { %5730 = vmatpush.bf16.msra.mxu2 %v7171_v24  ;;  %v8937_v36 = vpop.f32.mrf.mxu2  ;;  %v7239_v6 = vor.u32 %v7611_v0, %v7238_v18  ;;  %v7232_v53 = vld [vmem:[%s9114_s16 + $0x168] sm:$0xf0]  ;;  %v7224_v18 = vld [vmem:[%s9114_s16 + $0x158] sm:$0xf0] }
0x1a04   :  { %v5121_v57 = vpop.f32.mrf.mxu0  ;;  %v5002_v38 = vpop.f32.mrf.mxu3 }
0x1a05   :  { %5245 = vmatpush.bf16.msra.mxu1 %v6843_v1  ;;  %5257 = vmatpush.bf16.msra.mxu3 %v6987_v2  ;;  %v5003_v32 = vadd.f32 %v5002_v38, %v4990_v61  ;;  %v3565_v2 = vperm.slane %v7856_v33, 3  ;;  %v7192_v33 = vld [vmem:[%s9114_s16 + $0x118] sm:$0xf0] }
0x1a06   :  { %5731 = vmatpush.bf16.msra.mxu2 %v7163_v51  ;;  %v7190_v51 = vld [vmem:[%s9114_s16 + $0x110] sm:$0xf] }
0x1a07   :  { %v5016_v15 = vadd.f32 %v8875_v29, %v5003_v32  ;;  %v7191_v56 = vor.u32 %v7599_v50, %v7190_v51 }
0x1a09   :  { %5246 = vmatpush.bf16.msra.mxu1 %v6827_v49  ;;  %5258 = vmatpush.bf16.msra.mxu3 %v6971_v34  ;;  %v5029_v1 = vadd.f32 %v8881_v40, %v5016_v15  ;;  %v7223_v49 = vor.u32 %v7607_v28, %v7222_v58  ;;  %v7605_v40 = vld [vmem:[%s9114_s16 + $0x144] sm:$0xf0]  ;;  %v7602_v15 = vld [vmem:[%s9114_s16 + $0x134] sm:$0xf]  ;;  %v7184_v58 = vld [vmem:[%s9114_s16 + $0x108] sm:$0xf0] }
0x1a0a   :  { %v5134_v52 = vpop.f32.mrf.mxu2  ;;  %5732 = vmatpush.bf16.msra.mxu2 %v7155_v17  ;;  %v7215_v44 = vor.u32 %v7605_v40, %v7214_v54  ;;  %v7610_v17 = vld [vmem:[%s9114_s16 + $0x174] sm:$0xf] }
0x1a0b   :  { %v5041_v4 = vpop.f32.mrf.mxu1  ;;  %5724 = vmatmul.bf16.vlgmr.msra.gmra.mxu0 %v5270_v59  ;;  %v7206_v59 = vld [vmem:[%s9114_s16 + $0x130] sm:$0xf] }
0x1a0c   :  { %v5004_v14 = vpop.f32.mrf.mxu3  ;;  %v5042_v29 = vadd.f32 %v5041_v4, %v5029_v1  ;;  %v7200_v1 = vld [vmem:[%s9114_s16 + $0x128] sm:$0xf0] }
0x1a0d   :  { %5247 = vmatpush.bf16.msra.mxu1 %v6811_v46  ;;  %5259 = vmatpush.bf16.msra.mxu3 %v6955_v48  ;;  %v7207_v46 = vor.u32 %v7603_v3, %v7206_v59  ;;  %v7199_v48 = vor.u32 %v7601_v47, %v7198_v42  ;;  %v7208_v14 = vld [vmem:[%s9114_s16 + $0x138] sm:$0xf0] }
0x1a0e   :  { %5733 = vmatpush.bf16.msra.mxu2 %v7147_v10  ;;  %v7608_v10 = vld [vmem:[%s9114_s16 + $0x164] sm:$0xf]  ;;  %v7211_v16 = vor.u32 %v7602_v15, %v7208_v14  ;;  %v7280_v14 = vld [vmem:[%s9114_s16 + $0x1c8] sm:$0xf0] }
0x1a0f   :  { %v7235_v13 = vor.u32 %v7608_v10, %v7232_v53  ;;  %v7626_v10 = vld [vmem:[%s9114_s16 + $0x1f4] sm:$0xf]  ;;  %v7304_v53 = vld [vmem:[%s9114_s16 + $0x1f8] sm:$0xf0]  ;;  %v7620_v15 = vld [vmem:[%s9114_s16 + $0x1c4] sm:$0xf] }
0x1a10   :  { %5248 = vmatmul.bf16.vlgmr.msra.gmra.mxu1 %v8843_v8  ;;  %v7582_v8 = vld [vmem:[%s9114_s16 + $0x94] sm:$0xf] }
0x1a11   :  { %5260 = vmatpush.bf16.msra.mxu3 %v6939_v60  ;;  %v7131_v21 = vor.u32 %v7582_v8, %v7128_v9  ;;  %5690 = vmatpush.bf16.msrb.mxu1 %v7239_v6  ;;  %v7240_v60 = vld [vmem:[%s9114_s16 + $0x178] sm:$0xf0]  ;;  %v7606_v9 = vld [vmem:[%s9114_s16 + $0x154] sm:$0xf] }
0x1a12   :  { %5734 = vmatpush.bf16.msra.mxu2 %v7139_v25  ;;  %v7243_v52 = vor.u32 %v7610_v17, %v7240_v60  ;;  %v7227_v6 = vor.u32 %v7606_v9, %v7224_v18  ;;  %v7254_v17 = vld [vmem:[%s9114_s16 + $0x190] sm:$0xf]  ;;  %v7615_v60 = vld [vmem:[%s9114_s16 + $0x194] sm:$0xf0] }
0x1a13   :  { %v5043_v63 = vpop.f32.mrf.mxu1 }
0x1a14   :  { %5261 = vmatmul.bf16.vlgmr.msra.gmra.mxu3 %v8847_v31  ;;  %v7123_v31 = vor.u32 %v7580_v11, %v7120_v12  ;;  %v5054_v43 = vpop.f32.mrf.mxu3  ;;  %v7216_v11 = vld [vmem:[%s9114_s16 + $0x148] sm:$0xf0]  ;;  %v7627_v63 = vld [vmem:[%s9114_s16 + $0x1f4] sm:$0xf0] }
0x1a15   :  { %5691 = vmatpush.bf16.msrb.mxu1 %v7231_v23  ;;  %v5055_v45 = vadd.f32 %v5054_v43, %v5042_v29  ;;  %v7598_v23 = vld [vmem:[%s9114_s16 + $0x114] sm:$0xf]  ;;  %v7596_v43 = vld [vmem:[%s9114_s16 + $0x104] sm:$0xf] }
0x1a16   :  { %5735 = vmatpush.bf16.msra.mxu2 %v7131_v21  ;;  %v7604_v21 = vld [vmem:[%s9114_s16 + $0x144] sm:$0xf]  ;;  %v7187_v54 = vor.u32 %v7596_v43, %v7184_v58  ;;  %v7248_v43 = vld [vmem:[%s9114_s16 + $0x188] sm:$0xf0] }
0x1a17   :  { %v5267_v34 = vmax.f32 %v5055_v45, 0.0  ;;  %v7219_v12 = vor.u32 %v7604_v21, %v7216_v11  ;;  %v7625_v45 = vld [vmem:[%s9114_s16 + $0x1e4] sm:$0xf0]  ;;  %v7288_v11 = vld [vmem:[%s9114_s16 + $0x1d8] sm:$0xf0] }
0x1a19   :  { %5692 = vmatpush.bf16.msrb.mxu1 %v7223_v49  ;;  %v5271_v37 = vpack.c.bf16 %v5267_v34, %v5267_v34 }
0x1a1a   :  { %5736 = vmatpush.bf16.msra.mxu2 %v7123_v31 }
0x1a1b   :  { %5685 = vmatmul.bf16.vlgmr.msrb.gmra.mxu2 %v5271_v37 }
0x1a1c   :  { %v5171_v19 = vpop.f32.mrf.mxu0  ;;  %v5056_v41 = vpop.f32.mrf.mxu3 }
0x1a1d   :  { %v5172_v24 = vadd.f32 %v5171_v19, %v3565_v2  ;;  %5693 = vmatpush.bf16.msrb.mxu1 %v7215_v44  ;;  %v7195_v2 = vor.u32 %v7598_v23, %v7192_v33  ;;  %v7623_v44 = vld [vmem:[%s9114_s16 + $0x1d4] sm:$0xf0]  ;;  %v7264_v23 = vld [vmem:[%s9114_s16 + $0x1a8] sm:$0xf0] }
0x1a21   :  { %5694 = vmatpush.bf16.msrb.mxu1 %v7207_v46  ;;  %v7621_v46 = vld [vmem:[%s9114_s16 + $0x1c4] sm:$0xf0] }
0x1a22   :  { %v5184_v20 = vpop.f32.mrf.mxu2 }
0x1a23   :  { %v8965_v30 = vadd.f32 %v5184_v20, %v5172_v24  ;;  %v7294_v24 = vld [vmem:[%s9114_s16 + $0x1e0] sm:$0xf] }
0x1a24   :  { %v5173_v27 = vpop.f32.mrf.mxu0  ;;  %v7295_v49 = vor.u32 %v7625_v45, %v7294_v24 }
0x1a25   :  { %5695 = vmatpush.bf16.msrb.mxu1 %v7199_v48  ;;  %v7286_v27 = vld [vmem:[%s9114_s16 + $0x1d0] sm:$0xf]  ;;  %v7619_v48 = vld [vmem:[%s9114_s16 + $0x1b4] sm:$0xf0] }
0x1a26   :  { %v7287_v3 = vor.u32 %v7623_v44, %v7286_v27 }
0x1a29   :  { %5696 = vmatpush.bf16.msrb.mxu1 %v7191_v56  ;;  %v7262_v56 = vld [vmem:[%s9114_s16 + $0x1a0] sm:$0xf] }
0x1a2a   :  { %v5186_v57 = vpop.f32.mrf.mxu2  ;;  %v7263_v26 = vor.u32 %v7617_v62, %v7262_v56  ;;  %v5785_v56 = vld [vmem:[%s8119_s6 + $0x78] sm:$0xff]  ;;  %v5784_v62 = vld [vmem:[%s8119_s6 + $0x70] sm:$0xff] }
0x1a2b   :  { %5737 = vmatmul.bf16.vlgmr.msra.gmra.mxu2 %v5271_v37  ;;  %v7278_v37 = vld [vmem:[%s9114_s16 + $0x1c0] sm:$0xf]  ;;  %v7270_v57 = vld [vmem:[%s9114_s16 + $0x1b0] sm:$0xf]  ;;  %5806 = vmatpush.msrb.mxu0 %v5785_v56 }
0x1a2c   :  { %v7279_v42 = vor.u32 %v7621_v46, %v7278_v37  ;;  %v7271_v51 = vor.u32 %v7619_v48, %v7270_v57  ;;  %v5338_v37 = vld [vmem:[%s8114_s12] sm:$0x3] }
0x1a2d   :  { %5697 = vmatpush.bf16.msrb.mxu1 %v7183_v5  ;;  %v7246_v5 = vld [vmem:[%s9114_s16 + $0x180] sm:$0xf]  ;;  %5807 = vmatpush.msrb.mxu0 %v5784_v62 }
0x1a2f   :  { %v5093_v35 = vpop.f32.mrf.mxu1 }
0x1a30   :  { %v5094_v25 = vadd.f32 %v5093_v35, %v8908_v39  ;;  %v7255_v35 = vor.u32 %v7615_v60, %v7254_v17  ;;  %v5801_v17 = vld [vmem:[%s8119_s6 + $0xf8] sm:$0xff]  ;;  %v5800_v60 = vld [vmem:[%s8119_s6 + $0xf0] sm:$0xff] }
0x1a31   :  { %5742 = vmatpush.bf16.msra.mxu1 %v7243_v52  ;;  %v7613_v52 = vld [vmem:[%s9114_s16 + $0x184] sm:$0xf0]  ;;  %5826 = vmatpush.msrb.mxu2 %v5801_v17 }
0x1a33   :  { %5827 = vmatpush.msrb.mxu2 %v5800_v60 }
0x1a34   :  { %v5106_v61 = vpop.f32.mrf.mxu3 }
0x1a35   :  { %5743 = vmatpush.bf16.msra.mxu1 %v7235_v13  ;;  %v5107_v32 = vadd.f32 %v5106_v61, %v5094_v25  ;;  %v7307_v25 = vor.u32 %v7626_v10, %v7304_v53  ;;  %v7624_v61 = vld [vmem:[%s9114_s16 + $0x1e4] sm:$0xf] }
0x1a36   :  { %v5798_v10 = vld [vmem:[%s8119_s6 + $0xe0] sm:$0xff] }
0x1a37   :  { %v5095_v38 = vpop.f32.mrf.mxu1  ;;  %v5120_v0 = vadd.f32 %v8935_v7, %v5107_v32  ;;  %v7600_v7 = vld [vmem:[%s9114_s16 + $0x124] sm:$0xf]  ;;  %v7296_v32 = vld [vmem:[%s9114_s16 + $0x1e8] sm:$0xf0] }
0x1a38   :  { %v7203_v19 = vor.u32 %v7600_v7, %v7200_v1  ;;  %v7247_v38 = vor.u32 %v7613_v52, %v7246_v5  ;;  %v7299_v9 = vor.u32 %v7624_v61, %v7296_v32  ;;  %v5799_v5 = vld [vmem:[%s8119_s6 + $0xe8] sm:$0xff]  ;;  %v5781_v52 = vld [vmem:[%s8119_s6 + $0x58] sm:$0xff]  ;;  %v5778_v61 = vld [vmem:[%s8119_s6 + $0x40] sm:$0xff] }
0x1a39   :  { %v5133_v39 = vadd.f32 %v8937_v36, %v5120_v0  ;;  %5744 = vmatpush.bf16.msra.mxu1 %v7227_v6  ;;  %v7302_v36 = vld [vmem:[%s9114_s16 + $0x1f0] sm:$0xf]  ;;  %v7622_v6 = vld [vmem:[%s9114_s16 + $0x1d4] sm:$0xf]  ;;  %5828 = vmatpush.msrb.mxu2 %v5799_v5  ;;  %v5777_v32 = vld [vmem:[%s8119_s6 + $0x38] sm:$0xff] }
0x1a3a   :  { %v7303_v28 = vor.u32 %v7627_v63, %v7302_v36  ;;  %v7614_v36 = vld [vmem:[%s9114_s16 + $0x194] sm:$0xf] }
0x1a3b   :  { %5829 = vmatpush.msrb.mxu2 %v5798_v10 }
0x1a3c   :  { %v8979_v55 = vpop.f32.mrf.mxu0  ;;  %v5108_v31 = vpop.f32.mrf.mxu3  ;;  %5703 = vmatpush.bf16.msrb.mxu3 %v7303_v28 }
0x1a3d   :  { %5745 = vmatpush.bf16.msra.mxu1 %v7219_v12  ;;  %v7291_v12 = vor.u32 %v7622_v6, %v7288_v11 }
0x1a40   :  { %5704 = vmatpush.bf16.msrb.mxu3 %v7295_v49 }
0x1a41   :  { %5746 = vmatpush.bf16.msra.mxu1 %v7211_v16  ;;  %v7283_v16 = vor.u32 %v7620_v15, %v7280_v14  ;;  %v5771_v15 = vld [vmem:[%s8119_s6 + $0x8] sm:$0xff] }
0x1a42   :  { %v8982_v8 = vpop.f32.mrf.mxu2  ;;  %v5795_v14 = vld [vmem:[%s8119_s6 + $0xc8] sm:$0xff] }
0x1a44   :  { %v5225_v4 = vpop.f32.mrf.mxu0  ;;  %5705 = vmatpush.bf16.msrb.mxu3 %v7287_v3 }
0x1a45   :  { %5747 = vmatpush.bf16.msra.mxu1 %v7203_v19  ;;  %v7616_v19 = vld [vmem:[%s9114_s16 + $0x1a4] sm:$0xf] }
0x1a48   :  { %5706 = vmatpush.bf16.msrb.mxu3 %v7279_v42 }
0x1a49   :  { %5748 = vmatpush.bf16.msra.mxu1 %v7195_v2  ;;  %v7256_v2 = vld [vmem:[%s9114_s16 + $0x198] sm:$0xf0] }
0x1a4a   :  { %v5238_v22 = vpop.f32.mrf.mxu2  ;;  %v7259_v63 = vor.u32 %v7614_v36, %v7256_v2 }
0x1a4b   :  { %v7272_v22 = vld [vmem:[%s9114_s16 + $0x1b8] sm:$0xf0] }
0x1a4c   :  { %5707 = vmatpush.bf16.msrb.mxu3 %v7271_v51 }
0x1a4d   :  { %v5145_v29 = vpop.f32.mrf.mxu1  ;;  %5749 = vmatpush.bf16.msra.mxu1 %v7187_v54 }
0x1a4e   :  { %v5146_v20 = vadd.f32 %v5145_v29, %v5133_v39 }
0x1a50   :  { %5708 = vmatpush.bf16.msrb.mxu3 %v7263_v26  ;;  %v5783_v26 = vld [vmem:[%s8119_s6 + $0x68] sm:$0xff] }
0x1a51   :  { %5808 = vmatpush.msrb.mxu0 %v5783_v26 }
0x1a54   :  { %5709 = vmatpush.bf16.msrb.mxu3 %v7255_v35  ;;  %v5782_v35 = vld [vmem:[%s8119_s6 + $0x60] sm:$0xff] }
0x1a55   :  { %v5147_v40 = vpop.f32.mrf.mxu1  ;;  %5809 = vmatpush.msrb.mxu0 %v5782_v35 }
0x1a57   :  { %v5158_v34 = vpop.f32.mrf.mxu3  ;;  %5810 = vmatpush.msrb.mxu0 %v5781_v52 }
0x1a58   :  { %v5159_v59 = vadd.f32 %v5158_v34, %v5146_v20  ;;  %5710 = vmatpush.bf16.msrb.mxu3 %v7247_v38  ;;  %v5797_v38 = vld [vmem:[%s8119_s6 + $0xd8] sm:$0xff] }
0x1a59   :  { %5830 = vmatpush.msrb.mxu2 %v5797_v38 }
0x1a5a   :  { %v5268_v41 = vmax.f32 %v5159_v59, 0.0  ;;  %v5340_v59 = vperm.slane %v5338_v37, 0 }
0x1a5c   :  { %v5272_v47 = vpack.c.bf16 %v5268_v41, %v5268_v41  ;;  %5755 = vmatpush.bf16.msra.mxu3 %v7307_v25  ;;  %v5779_v25 = vld [vmem:[%s8119_s6 + $0x48] sm:$0xff] }
0x1a5e   :  { %5698 = vmatmul.bf16.vlgmr.msrb.gmra.mxu1 %v5272_v47 }
0x1a5f   :  { %v5160_v50 = vpop.f32.mrf.mxu3 }
0x1a60   :  { %5756 = vmatpush.bf16.msra.mxu3 %v7299_v9 }
0x1a64   :  { %5757 = vmatpush.bf16.msra.mxu3 %v7291_v12  ;;  %v5796_v12 = vld [vmem:[%s8119_s6 + $0xd0] sm:$0xff] }
0x1a65   :  { %5831 = vmatpush.msrb.mxu2 %v5796_v12 }
0x1a67   :  { %5832 = vmatpush.msrb.mxu2 %v5795_v14 }
0x1a68   :  { %5758 = vmatpush.bf16.msra.mxu3 %v7283_v16  ;;  %v5794_v16 = vld [vmem:[%s8119_s6 + $0xc0] sm:$0xff] }
0x1a69   :  { %5833 = vmatpush.msrb.mxu2 %v5794_v16 }
0x1a6d   :  { %v5197_v13 = vpop.f32.mrf.mxu1 }
0x1a6e   :  { %5750 = vmatmul.bf16.vlgmr.msra.gmra.mxu1 %v5272_v47  ;;  %v5198_v21 = vadd.f32 %v5197_v13, %v8965_v30  ;;  %v7618_v30 = vld [vmem:[%s9114_s16 + $0x1b4] sm:$0xf]  ;;  %v5341_v47 = vperm.slane %v5338_v37, 1 }
0x1a6f   :  { %v7275_v1 = vor.u32 %v7618_v30, %v7272_v22  ;;  %v5780_v13 = vld [vmem:[%s8119_s6 + $0x50] sm:$0xff]  ;;  %v5793_v30 = vld [vmem:[%s8119_s6 + $0xb8] sm:$0xff] }
0x1a70   :  { %5811 = vmatpush.msrb.mxu0 %v5780_v13  ;;  %v5792_v22 = vld [vmem:[%s8119_s6 + $0xb0] sm:$0xff]  ;;  %5834 = vmatpush.msrb.mxu2 %v5793_v30 }
0x1a71   :  { %5759 = vmatpush.bf16.msra.mxu3 %v7275_v1  ;;  %v5790_v1 = vld [vmem:[%s8119_s6 + $0xa0] sm:$0xff] }
0x1a72   :  { %5812 = vmatpush.msrb.mxu0 %v5779_v25  ;;  %5835 = vmatpush.msrb.mxu2 %v5792_v22 }
0x1a74   :  { %5813 = vmatpush.msrb.mxu0 %v5778_v61 }
0x1a75   :  { %v5199_v18 = vpop.f32.mrf.mxu1 }
0x1a76   :  { %v5776_v18 = vld [vmem:[%s8119_s6 + $0x30] sm:$0xff]  ;;  %5814 = vmatpush.msrb.mxu0 %v5777_v32 }
0x1a77   :  { %v5210_v0 = vpop.f32.mrf.mxu3 }
0x1a78   :  { %v5211_v4 = vadd.f32 %v5210_v0, %v5198_v21  ;;  %v5673_v33 = vpop.f32.mrf.mxu0  ;;  %v5775_v21 = vld [vmem:[%s8119_s6 + $0x28] sm:$0xff]  ;;  %5815 = vmatpush.msrb.mxu0 %v5776_v18  ;;  %v5774_v0 = vld [vmem:[%s8119_s6 + $0x20] sm:$0xff] }
0x1a79   :  { %v5674_v3 = vadd.f32 %v5673_v33, %v5340_v59  ;;  %v5787_v33 = vld [vmem:[%s8119_s6 + $0x88] sm:$0xff] }
0x1a7a   :  { %v5224_v39 = vadd.f32 %v8979_v55, %v5211_v4  ;;  %v7267_v55 = vor.u32 %v7616_v19, %v7264_v23  ;;  %5816 = vmatpush.msrb.mxu0 %v5775_v21  ;;  %v5773_v4 = vld [vmem:[%s8119_s6 + $0x18] sm:$0xff]  ;;  %v5788_v23 = vld [vmem:[%s8119_s6 + $0x90] sm:$0xff] }
0x1a7b   :  { %v5789_v19 = vld [vmem:[%s8119_s6 + $0x98] sm:$0xff] }
0x1a7c   :  { %v5237_v31 = vadd.f32 %v8982_v8, %v5224_v39  ;;  %5760 = vmatpush.bf16.msra.mxu3 %v7267_v55  ;;  %v7612_v8 = vld [vmem:[%s9114_s16 + $0x184] sm:$0xf]  ;;  %5817 = vmatpush.msrb.mxu0 %v5774_v0  ;;  %v5772_v39 = vld [vmem:[%s8119_s6 + $0x10] sm:$0xff] }
0x1a7d   :  { %v7251_v28 = vor.u32 %v7612_v8, %v7248_v43  ;;  %v5786_v55 = vld [vmem:[%s8119_s6 + $0x80] sm:$0xff] }
0x1a7e   :  { %5818 = vmatpush.msrb.mxu0 %v5773_v4 }
0x1a7f   :  { %v5212_v7 = vpop.f32.mrf.mxu3 }
0x1a80   :  { %v5675_v58 = vpop.f32.mrf.mxu0  ;;  %5761 = vmatpush.bf16.msra.mxu3 %v7259_v63  ;;  %5819 = vmatpush.msrb.mxu0 %v5772_v39  ;;  %v5791_v7 = vld [vmem:[%s8119_s6 + $0xa8] sm:$0xff] }
0x1a81   :  { %5836 = vmatpush.msrb.mxu2 %v5791_v7 }
0x1a82   :  { %5820 = vmatpush.msrb.mxu0 %v5771_v15 }
0x1a83   :  { %5837 = vmatpush.msrb.mxu2 %v5790_v1 }
0x1a84   :  { %5762 = vmatpush.bf16.msra.mxu3 %v7251_v28 }
0x1a85   :  { %5838 = vmatpush.msrb.mxu2 %v5789_v19 }
0x1a87   :  { %5839 = vmatpush.msrb.mxu2 %v5788_v23 }
0x1a88   :  { %v5725_v45 = vpop.f32.mrf.mxu0 }
0x1a89   :  { %v5726_v57 = vadd.f32 %v5725_v45, %v5341_v47  ;;  %5840 = vmatpush.msrb.mxu2 %v5787_v33  ;;  %v7721_v45 = vld [vmem:[%s8124_s27] ss:$0 sm:$0xff]  ;;  %s5871_s27 = sshll.u32 %s8129_s4, 4  ;;  %s5872_s27 = int_to_ptr.hbm [resolvable:$true] %s5871_s27 }
0x1a8a   :  { %s7917_s18 = sshra.s32 %s5872_s27, 4  ;;  %s7918_s18 = int_to_ptr.hbm [resolvable:$true] %s7917_s18 }
0x1a8b   :  { %5841 = vmatpush.msrb.mxu2 %v5786_v55  ;;  %s7919_s22 = scalar_lea.hbm %s7918_s18, 2  ;;  %p7922_p11 = scmp.lt.s32.totalorder %s7918_s18, %s8129_s4 }
0x1a8c   :  { %p7920_p10 = scmp.ne.s32.totalorder %s7918_s18, %s7919_s22  ;;  %p7923_p12 = scmp.lt.s32.totalorder %s7921_s0, %s7919_s22 }
0x1a8d   :  { %v5249_v29 = vpop.f32.mrf.mxu1 }
0x1a8e   :  { %v5250_v24 = vadd.f32 %v5249_v29, %v5237_v31  ;;  %v5770_v31 = vld [vmem:[%s8119_s6] sm:$0xff]  ;;  %s7975_s6 = smov [#allocation7]   ;;  %p7924_p13 = por %p7923_p12, %p7922_p11 }
0x1a8f   :  { %5821 = vmatpush.msrb.mxu0 %v5770_v31  ;;  %s5869_s12 = sshll.u32 %s7975_s6, 4  ;;  %s5870_s12 = int_to_ptr.vmem [resolvable:$true] %s5869_s12 }
0x1a90   :  { %v5727_v27 = vpop.f32.mrf.mxu0  ;;  %p7925_p0 = pnand %p7924_p13, %p7920_p10 }
0x1a95   :  { %v5251_v54 = vpop.f32.mrf.mxu1 }
0x1a97   :  { %v5262_v49 = vpop.f32.mrf.mxu3 }
0x1a98   :  { %v5263_v40 = vadd.f32 %v5262_v49, %v5250_v24 }
0x1a9a   :  { %v5269_v20 = vmax.f32 %v5263_v40, 0.0 }
0x1a9c   :  { %v5273_v34 = vpack.c.bf16 %v5269_v20, %v5269_v20 }
0x1a9e   :  { %5711 = vmatmul.bf16.vlgmr.msrb.gmra.mxu3 %v5273_v34  ;;  %v5686_v46 = vpop.f32.mrf.mxu2 }
0x1a9f   :  { %v5264_v44 = vpop.f32.mrf.mxu3  ;;  %v9034_v41 = vadd.f32 %v5686_v46, %v5674_v3 }
0x1aa6   :  { %v5688_v42 = vpop.f32.mrf.mxu2 }
0x1aae   :  { %5763 = vmatmul.bf16.vlgmr.msra.gmra.mxu3 %v5273_v34  ;;  %v5738_v48 = vpop.f32.mrf.mxu2 }
0x1aaf   :  { %v9036_v51 = vadd.f32 %v5738_v48, %v5726_v57 }
0x1ab6   :  { %v5740_v50 = vpop.f32.mrf.mxu2 }
0x1adb   :  { %v5699_v53 = vpop.f32.mrf.mxu1 }
0x1adc   :  { %v5700_v36 = vadd.f32 %v5699_v53, %v9034_v41 }
0x1ae3   :  { %v5701_v9 = vpop.f32.mrf.mxu1 }
0x1aeb   :  { %v5751_v6 = vpop.f32.mrf.mxu1 }
0x1aec   :  { %v5752_v43 = vadd.f32 %v5751_v6, %v9036_v51 }
0x1af3   :  { %v5753_v11 = vpop.f32.mrf.mxu1 }
0x1b21   :  { %v5712_v2 = vpop.f32.mrf.mxu3 }
0x1b22   :  { %v5713_v63 = vadd.f32 %v5712_v2, %v5700_v36 }
0x1b24   :  { %v5768_v29 = vmax.f32 %v5713_v63, 0.0 }
0x1b26   :  { %5822 = vmatmul.f32.vlgmr.msrb.gmra.mxu0 %v5768_v29 }
0x1b29   :  { %v5714_v8 = vpop.f32.mrf.mxu3 }
0x1b31   :  { %v5764_v58 = vpop.f32.mrf.mxu3 }
0x1b32   :  { %v5765_v28 = vadd.f32 %v5764_v58, %v5752_v43 }
0x1b34   :  { %v5769_v54 = vmax.f32 %v5765_v28, 0.0 }
0x1b36   :  { %5842 = vmatmul.f32.vlgmr.msrb.gmra.mxu2 %v5769_v54 }
0x1b39   :  { %v5766_v24 = vpop.f32.mrf.mxu3 }
0x1ba3   :  { %v5823_v49 = vpop.f32.mrf.mxu0 }
0x1ba4   :  { %v5824_v40 = vadd.f32 %v7721_v45, %v5823_v49 }
0x1bb9   :  { %v5843_v20 = vpop.f32.mrf.mxu2 }
0x1bba   :  { %v5844_v34 = vadd.f32 %v5843_v20, %v5824_v40 }
0x1bbc   :  { %v5846_v27 = vmul.f32 %v5844_v34, %v5844_v34 }
0x1bbe   :  { %v5848_v44 = vsel %vm5847_vm9, %v5846_v27, 0.0 }
0x1bbf   :  { %5849 = vadd.xlane.f32.xlu1 %v5848_v44 }
0x1c32   :  { %v5850_v37 = vpop.xlane.xlu1 %5849 }
0x1c33   :  { %v5851_v59 = vmax.f32 %v5850_v37, 1e-24 }
0x1c35   :  { %7850 = vrsqrt.f32 %v5851_v59  ;;  %vm5858_vm12 = vweird.f32 %v5851_v59 }
0x1c3b   :  { %v7851_v3 = vpop.eup %7850 }
0x1c3c   :  { %v5853_v46 = vmul.f32 %v7851_v3, %v5851_v59  ;;  %vm5859_vm10 = vweird.f32 %v7851_v3 }
0x1c3d   :  { %vm5860_vm13 = vmor %vm5858_vm12, %vm5859_vm10 }
0x1c3e   :  { %v5854_v41 = vmul.f32 %v7851_v3, %v5853_v46 }
0x1c40   :  { %v5855_v42 = vmul.f32 0.5, %v5854_v41 }
0x1c42   :  { %v5856_v47 = vsub.f32 1.5, %v5855_v42 }
0x1c44   :  { %v5857_v57 = vmul.f32 %v7851_v3, %v5856_v47 }
0x1c46   :  { %v5861_v48 = vsel %vm5860_vm13, %v7851_v3, %v5857_v57 }
0x1c47   :  { %v5862_v51 = vmul.f32 %v5861_v48, %v5844_v34 }
0x1c49   :  { %5863 = vst.msk [vmem:[#allocation7] sm:$0x3] %vm5847_vm9, %v5862_v51 }
0x1c4a   :  { %7928 = shalt.err (!%p7925_p0)
}
0x1c4b   :  { %5874 = dma.vmem_to_hbm [thread:$0]  %s5870_s12, 32, %s5872_s27, [#allocation4]  }
0x1c4c   :  { %7933 = dma.done.wait [#allocation4], 32  }
0x1c4d   :  { %7934 = vsyncadd [#allocation4], 4294967264 }
0x1c4e   :  { %5879 = vsyncpa [#allocation3], 1 }
0x1c4f   :  { %5880 = vsyncpa [#allocation6], 1 }
0x1c50   :  { %5881 = vsyncpa [#allocation4], 1 }

</bundles_post_ra>
